<compile_context>
chip_gen: v7x
topology: tpu7x:2x2x1
jax: 0.10.0
libtpu: 0.0.40
codegen_flags: <defaults>
</compile_context>

<pallas_src>
import functools
import math

import numpy as np

import jax
import jax.numpy as jnp
from jax.experimental import pallas as pl
from jax.experimental.pallas import tpu as pltpu


NEG_INF = -1e30
LN_EPS = 1e-5


# ----------------------------------------------------------------------------
# in-kernel helpers
# ----------------------------------------------------------------------------
def _mm(a, b):
    """bf16 MXU matmul (A @ B) with f32 accumulation."""
    return jax.lax.dot_general(
        a.astype(jnp.bfloat16), b.astype(jnp.bfloat16),
        dimension_numbers=(((1,), (0,)), ((), ())),
        preferred_element_type=jnp.float32)


def _mm_nt(a, b):
    """bf16 MXU matmul (A @ B^T) with f32 accumulation, no explicit transpose."""
    return jax.lax.dot_general(
        a.astype(jnp.bfloat16), b.astype(jnp.bfloat16),
        dimension_numbers=(((1,), (1,)), ((), ())),
        preferred_element_type=jnp.float32)


def _layernorm(z, g, b):
    mu = jnp.mean(z, axis=-1, keepdims=True)
    var = jnp.mean(jnp.square(z - mu), axis=-1, keepdims=True)
    return (z - mu) * jax.lax.rsqrt(var + LN_EPS) * g + b


# ----------------------------------------------------------------------------
# THE fused kernel: stem + 3 encoder layers + S2Fuse, one batch element per grid step
# ----------------------------------------------------------------------------
def _fused_kernel(x_ref, pe_ref, geo_ref, lpshift_ref, s2shift_ref, s2mask_ref,
                  fcw_ref, fcb_ref, lng_ref, lnb_ref,
                  wqkv_ref, bqkv_ref, wo_ref, bo_ref,
                  ln1g_ref, ln1b_ref, lpw_ref, lpb_ref, ln2g_ref, ln2b_ref,
                  w1_ref, b1_ref, w2_ref, b2_ref, ln3g_ref, ln3b_ref,
                  s2w1_ref, s2b1_ref, s2w2_ref, s2b2_ref,
                  o_ref, mask_ref,
                  *, H, DK, DV, N, L, scale):
    # ----------------- stem: PE add -> fc -> relu -> LayerNorm -> masked_fill -----------------
    feat = x_ref[0] + pe_ref[...]                                       # (N, d_in) f32
    stem_mask = jnp.sum(feat, axis=-1, keepdims=True) == 0.0            # (N, 1)  (post-PE sum)
    y = jnp.maximum(_mm(feat, fcw_ref[...]) + fcb_ref[...], 0.0)
    y = _layernorm(y, lng_ref[...], lnb_ref[...])
    out = jnp.where(stem_mask, 0.0, y)                                  # (N, D)

    # ----------------- attention key-mask (sum(input == 0, -1) != 0 on stem output) -----------
    zcount = jnp.sum((out == 0.0).astype(jnp.float32), axis=-1, keepdims=True)  # (N, 1)
    km_col = (zcount > 0.0).astype(jnp.float32)                         # (N, 1) 0/1
    mask_ref[0] = km_col
    # Move the (N,1) sublane-oriented mask to the lane (key) axis without an XLU transpose:
    # ones(N,N) @ diag(km)  ->  row q, col k  =  km[k]   (exact for 0/1 values).
    rid = jax.lax.broadcasted_iota(jnp.int32, (N, N), 0)
    cid = jax.lax.broadcasted_iota(jnp.int32, (N, N), 1)
    km_diag = jnp.where(rid == cid, km_col, 0.0)                        # (N, N)
    key_mask_nn = _mm(jnp.ones((N, N), jnp.float32), km_diag) > 0.5     # (N, N) bool (keys)
    # Shared (all layers / all heads) attention bias: masked log grid-geometry.
    # Fully-masked rows degrade to a uniform softmax (finite with -1e30), never re-zeroed,
    # matching the previous accepted behaviour of this port.
    bias = jnp.where(key_mask_nn[None, :, :], NEG_INF, geo_ref[...])    # (H, N, N)

    koff = H * DK
    voff = 2 * H * DK
    lp_shift = lpshift_ref[...]                                         # (9N, N) bf16

    # ----------------- 3 encoder layers, weights indexed by the static layer id ---------------
    outs = []
    for l in range(L):
        # --- grid-biased multi-head attention (fused QKV, lane-dense output projection) ---
        # TODO(synk): MultiHeadAttention1 is not defined in the provided source; standard MHA
        # with softmax(QK^T/sqrt(dk) + log(clamp(grid2grid,1e-6)), masked_fill) is used.
        qkv = _mm(out, wqkv_ref[l]) + bqkv_ref[l]                       # (N, H*(2DK+DV))
        heads = []
        for hh in range(H):
            q = qkv[:, hh * DK:(hh + 1) * DK]
            k = qkv[:, koff + hh * DK:koff + (hh + 1) * DK]
            v = qkv[:, voff + hh * DV:voff + (hh + 1) * DV]
            s = _mm_nt(q, k) * scale + bias[hh]                         # (N, N) f32
            s = s - jnp.max(s, axis=-1, keepdims=True)
            prob = jnp.exp(s)
            prob = prob * pl.reciprocal(jnp.sum(prob, axis=-1, keepdims=True), approx=True)
            heads.append(_mm(prob, v))                                  # (N, DV)
        heads_cat = jnp.concatenate(heads, axis=-1)                     # (N, H*DV) lane-dense
        att = _mm(heads_cat, wo_ref[l]) + bo_ref[l]                     # single K=128 push
        att1 = _layernorm(out + att, ln1g_ref[l], ln1b_ref[l])

        # --- LocalPerceptron: depthwise 3x3 conv as ONE stacked (9N,N) token-shift matmul ---
        # TODO(synk): LocalPerceptron is not defined in the provided source; implemented as a
        # depthwise 3x3 conv over the token grid ('same' zero padding folded into the shifts).
        taps = _mm(lp_shift, att1)                                      # (9N, D)
        lpw = lpw_ref[l]                                                # (9, D)
        lp_out = taps[0:N, :] * lpw[0:1, :]
        for t in range(1, 9):
            lp_out = lp_out + taps[t * N:(t + 1) * N, :] * lpw[t:t + 1, :]
        att2 = _layernorm(att1 + lp_out + lpb_ref[l], ln2g_ref[l], ln2b_ref[l])

        # --- position-wise feed-forward with residual + LN ---
        # TODO(synk): PositionWiseFeedForward is not defined in source; fc->relu->fc with
        # internal residual + layernorm is used.
        hft = jnp.maximum(_mm(att2, w1_ref[l]) + b1_ref[l], 0.0)
        ff = _mm(hft, w2_ref[l]) + b2_ref[l]
        out = _layernorm(att2 + ff, ln3g_ref[l], ln3b_ref[l])
        outs.append(out)

    # ----------------- S2Fuse: spatial shifts + mlp + 0.2 residual, all in VMEM ---------------
    stack = jnp.concatenate(outs, axis=-1)                              # (N, 3D)
    ytap = _mm(s2shift_ref[...], stack)                                 # (9N, 3D) shifted copies
    s2m = s2mask_ref[...]                                               # (9, 3D) channel groups
    x_all = ytap[0:N, :] * s2m[0:1, :]
    for kk in range(1, 9):
        x_all = x_all + ytap[kk * N:(kk + 1) * N, :] * s2m[kk:kk + 1, :]
    h1 = jnp.maximum(_mm(x_all, s2w1_ref[...]) + s2b1_ref[...], 0.0)    # conv1x1+BN+ReLU (folded)
    y2 = _mm(h1, s2w2_ref[...]) + s2b2_ref[...]                         # conv1x1+BN (folded)
    o_ref[0] = outs[-1] + 0.2 * y2


# ----------------------------------------------------------------------------
# Trace-time constant tables (numpy -> baked-in constants)
# ----------------------------------------------------------------------------
def _pe_table(max_len, d):
    pos = np.arange(max_len, dtype=np.float32)[:, None]
    div = np.exp(np.arange(0, d, 2, dtype=np.float32) * (-math.log(10000.0) / d))
    pe = np.zeros((max_len, d), np.float32)
    pe[:, 0::2] = np.sin(pos * div)
    pe[:, 1::2] = np.cos(pos * div)
    return pe


def _pe_full(g, d, max_len=50):
    """Combined row+col sinusoidal PE, one row per flattened token (i*g+j)."""
    pe = _pe_table(max_len, d)[:g]
    full = pe[None, :, :] + pe[:, None, :]          # [i, j] = pe(j) + pe(i)
    return full.reshape(g * g, d).astype(np.float32)


def _grid_relational_embedding(g, dim_g=64, wave_len=1000.0):
    # TODO(synk): GridRelationalEmbedding is not defined in the provided source; this is the
    # standard sinusoidal grid box relational embedding (dim 64) for a g x g grid.
    ys, xs = np.meshgrid(np.arange(g, dtype=np.float32),
                         np.arange(g, dtype=np.float32), indexing="ij")
    cx = xs.reshape(-1) + 0.5
    cy = ys.reshape(-1) + 0.5
    w = np.ones_like(cx)
    h = np.ones_like(cy)
    dx = np.log(np.maximum(np.abs(cx[:, None] - cx[None, :]) / w[:, None], 1e-3))
    dy = np.log(np.maximum(np.abs(cy[:, None] - cy[None, :]) / h[:, None], 1e-3))
    dw = np.log(w[:, None] / w[None, :])
    dh = np.log(h[:, None] / h[None, :])
    pos = np.stack([dx, dy, dw, dh], axis=-1)                 # (n, n, 4)
    feat_range = np.arange(dim_g // 8, dtype=np.float32)
    dim_mat = wave_len ** (8.0 / dim_g * feat_range)          # (8,)
    mul = (100.0 * pos)[..., None] / dim_mat                  # (n, n, 4, 8)
    emb = np.concatenate([np.sin(mul), np.cos(mul)], axis=-1)
    return emb.reshape(pos.shape[0], pos.shape[1], dim_g).astype(np.float32)


def _conv_shift_stacked(g):
    """Stacked (9N, N) 0/1 matrix: block t @ x == token grid shifted by tap t (zero pad)."""
    n = g * g
    rows = np.arange(n) // g
    cols = np.arange(n) % g
    blocks = []
    for di in (-1, 0, 1):
        for dj in (-1, 0, 1):
            m = np.zeros((n, n), np.float32)
            sr, sc = rows + di, cols + dj
            valid = (sr >= 0) & (sr < g) & (sc >= 0) & (sc < g)
            src = np.clip(sr, 0, g - 1) * g + np.clip(sc, 0, g - 1)
            m[np.arange(n)[valid], src[valid]] = 1.0
            blocks.append(m)
    return np.concatenate(blocks, axis=0)


def _shift_perm(g, dr, dc):
    """(N,N) 0/1 matrix for spatial_shift: dest takes src at (row+dr, col+dc); boundary keeps
    its original value (matching the functional reading of the in-place PyTorch shifts)."""
    n = g * g
    rows = np.arange(n) // g
    cols = np.arange(n) % g
    sr, sc = rows + dr, cols + dc
    valid = (sr >= 0) & (sr < g) & (sc >= 0) & (sc < g)
    src = np.where(valid, np.clip(sr, 0, g - 1) * g + np.clip(sc, 0, g - 1), np.arange(n))
    m = np.zeros((n, n), np.float32)
    m[np.arange(n), src] = 1.0
    return m


def _s2_shift_stacked(g):
    """Stacked (9N, N): 4 quarter-perms of spatial_shift1, 4 of spatial_shift2, identity."""
    n = g * g
    blocks = [
        _shift_perm(g, -1, 0), _shift_perm(g, +1, 0),      # shift1 quarters 0,1 (row axis)
        _shift_perm(g, 0, -1), _shift_perm(g, 0, +1),      # shift1 quarters 2,3 (col axis)
        _shift_perm(g, 0, -1), _shift_perm(g, 0, +1),      # shift2 quarters 0,1 (col axis)
        _shift_perm(g, -1, 0), _shift_perm(g, +1, 0),      # shift2 quarters 2,3 (row axis)
        np.eye(n, dtype=np.float32),                       # out2: untouched third
    ]
    return np.concatenate(blocks, axis=0)


def _s2_group_masks(d_model):
    """(9, 3*d_model) channel masks selecting which channels each shift block feeds."""
    c_big = 3 * d_model
    q = d_model // 4
    m = np.zeros((9, c_big), np.float32)
    for k in range(4):
        m[k, k * q:(k + 1) * q] = 1.0                               # shift1 quarters of out0
    for k in range(4):
        m[4 + k, d_model + k * q:d_model + (k + 1) * q] = 1.0       # shift2 quarters of out1
    m[8, 2 * d_model:] = 1.0                                        # identity third (out2)
    return m


# ----------------------------------------------------------------------------
# Forward pass: one pallas_call for the whole network
# ----------------------------------------------------------------------------
def transformer_encoder_forward(params, x, cfg):
    B, N, D_IN = x.shape
    D, H, DK, DV = cfg["d_model"], cfg["h"], cfg["d_k"], cfg["d_v"]
    DFF, L = cfg["d_ff"], cfg["n_layers"]
    QKV = H * (2 * DK + DV)
    g = int(math.isqrt(N))
    assert g * g == N, "sequence length must be a perfect square (token grid)"

    # Batch-invariant relational-geometry bias (log(clamp(relu(WG(rel)), 1e-6))) computed ONCE.
    rel = jnp.asarray(_grid_relational_embedding(g)).reshape(N * N, 64)
    wg = rel @ params["wg_w"] + params["wg_b"]                         # (N*N, H)
    grid2grid = jnp.maximum(wg, 0.0).reshape(N, N, H).transpose(2, 0, 1)
    log_geo = jnp.log(jnp.maximum(grid2grid, 1e-6)).astype(jnp.float32)  # (H, N, N)

    # Trace-time constant tables (bf16 for MXU-side shift matrices).
    pe = jnp.asarray(_pe_full(g, D_IN))
    lp_shift = jnp.asarray(_conv_shift_stacked(g), dtype=jnp.bfloat16)
    s2_shift = jnp.asarray(_s2_shift_stacked(g), dtype=jnp.bfloat16)
    s2_mask = jnp.asarray(_s2_group_masks(D))

    kernel = functools.partial(_fused_kernel, H=H, DK=DK, DV=DV, N=N, L=L,
                               scale=1.0 / math.sqrt(DK))

    def shared(shape):
        return pl.BlockSpec(shape, lambda b: (0,) * len(shape))

    in_specs = [
        pl.BlockSpec((1, N, D_IN), lambda b: (b, 0, 0)),   # x
        shared((N, D_IN)),                                 # pe
        shared((H, N, N)),                                 # log_geo
        shared((9 * N, N)),                                # lp_shift
        shared((9 * N, N)),                                # s2_shift
        shared((9, 3 * D)),                                # s2_mask
        shared((D_IN, D)),                                 # fc_w
        shared((1, D)), shared((1, D)), shared((1, D)),    # fc_b, ln_g, ln_b
        shared((L, D, QKV)),                               # wqkv
        shared((L, 1, QKV)),                               # bqkv
        shared((L, H * DV, D)),                            # wo
        shared((L, 1, D)),                                 # bo
        shared((L, 1, D)), shared((L, 1, D)),              # ln1 g/b
        shared((L, 9, D)),                                 # lp_w
        shared((L, 1, D)),                                 # lp_b
        shared((L, 1, D)), shared((L, 1, D)),              # ln2 g/b
        shared((L, D, DFF)),                               # w1
        shared((L, 1, DFF)),                               # b1
        shared((L, DFF, D)),                               # w2
        shared((L, 1, D)),                                 # b2
        shared((L, 1, D)), shared((L, 1, D)),              # ln3 g/b
        shared((3 * D, 3 * D)),                            # s2_w1
        shared((1, 3 * D)),                                # s2_b1
        shared((3 * D, D)),                                # s2_w2
        shared((1, D)),                                    # s2_b2
    ]
    out_specs = (pl.BlockSpec((1, N, D), lambda b: (b, 0, 0)),
                 pl.BlockSpec((1, N, 1), lambda b: (b, 0, 0)))
    out_shape = (jax.ShapeDtypeStruct((B, N, D), jnp.float32),
                 jax.ShapeDtypeStruct((B, N, 1), jnp.float32))

    out, mask_col = pl.pallas_call(
        kernel,
        out_shape=out_shape,
        grid=(B,),
        in_specs=in_specs,
        out_specs=out_specs,
        compiler_params=pltpu.CompilerParams(
            dimension_semantics=("parallel",),             # batch -> 2 TCs on v7x
            vmem_limit_bytes=32 * 1024 * 1024),
    )(x, pe, log_geo, lp_shift, s2_shift, s2_mask,
      params["fc_w"], params["fc_b"], params["ln_g"], params["ln_b"],
      params["wqkv"], params["bqkv"], params["wo"], params["bo"],
      params["ln1_g"], params["ln1_b"], params["lp_w"], params["lp_b"],
      params["ln2_g"], params["ln2_b"],
      params["w1"], params["b1"], params["w2"], params["b2"],
      params["ln3_g"], params["ln3_b"],
      params["s2_w1"], params["s2_b1"], params["s2_w2"], params["s2_b2"])

    attention_mask = (mask_col[:, :, 0] > 0.5)[:, None, None, :]       # (B, 1, 1, N) bool
    return out, attention_mask


# ----------------------------------------------------------------------------
# Deterministic parameter init (weights used on the MXU stored in bf16; per-layer weights
# stacked along a leading layer axis so the fused kernel can index them statically)
# ----------------------------------------------------------------------------
def init_params(key, d_in, d_model, d_k, d_v, h, d_ff, n_layers):
    ks = iter(jax.random.split(key, 32))

    def nrm(shape, scale=0.02):
        return scale * jax.random.normal(next(ks), shape, jnp.float32)

    ones = lambda *s: jnp.ones(s, jnp.float32)
    zeros = lambda *s: jnp.zeros(s, jnp.float32)
    L = n_layers
    QKV = h * (2 * d_k + d_v)

    p = {}
    p["fc_w"] = nrm((d_in, d_model)).astype(jnp.bfloat16)
    p["fc_b"] = zeros(1, d_model)
    p["ln_g"], p["ln_b"] = ones(1, d_model), zeros(1, d_model)
    # h parallel Linear(64, 1) geometry heads packed as columns of a single (64, h) matrix
    p["wg_w"] = nrm((64, h))
    p["wg_b"] = zeros(h)

    # Stacked per-layer weights (layer axis first).
    p["wqkv"] = nrm((L, d_model, QKV)).astype(jnp.bfloat16)   # [Wq | Wk | Wv] fused, lane-dense
    p["bqkv"] = zeros(L, 1, QKV)
    p["wo"] = nrm((L, h * d_v, d_model)).astype(jnp.bfloat16)
    p["bo"] = zeros(L, 1, d_model)
    p["ln1_g"], p["ln1_b"] = ones(L, 1, d_model), zeros(L, 1, d_model)
    p["lp_w"] = nrm((L, 9, d_model))                          # depthwise 3x3 taps (row-major)
    p["lp_b"] = zeros(L, 1, d_model)
    p["ln2_g"], p["ln2_b"] = ones(L, 1, d_model), zeros(L, 1, d_model)
    p["w1"] = nrm((L, d_model, d_ff)).astype(jnp.bfloat16)
    p["b1"] = zeros(L, 1, d_ff)
    p["w2"] = nrm((L, d_ff, d_model)).astype(jnp.bfloat16)
    p["b2"] = zeros(L, 1, d_model)
    p["ln3_g"], p["ln3_b"] = ones(L, 1, d_model), zeros(L, 1, d_model)

    # S2Fuse mlp: Conv1x1(kC->kC,no bias)+BN+ReLU+Conv1x1(kC->C,no bias)+BN, BN folded (eval,
    # identity running stats -> scale 1/sqrt(1+eps), zero bias).
    kC = 3 * d_model
    bn_scale = 1.0 / math.sqrt(1.0 + 1e-5)
    p["s2_w1"] = (bn_scale * nrm((kC, kC))).astype(jnp.bfloat16)
    p["s2_b1"] = zeros(1, kC)
    p["s2_w2"] = (bn_scale * nrm((kC, d_model))).astype(jnp.bfloat16)
    p["s2_b2"] = zeros(1, d_model)
    # NOTE: S2Fuse.split_attention / SplitAttention exist in __init__ but are unused in
    # forward(), so no parameters are created for them.
    return p


# ----------------------------------------------------------------------------
# Main
# ----------------------------------------------------------------------------
if __name__ == "__main__":
    # n_layers must be 3 so the stacked layer outputs (3*d_model) match S2Fuse(d_model, 3).
    cfg = dict(d_in=64, d_model=128, d_k=32, d_v=32, h=4, d_ff=128, n_layers=3)
    B, GS = 2, 16  # 4x4 token grid (sequence length must be a perfect square)

    key = jax.random.PRNGKey(0)
    pkey, xkey = jax.random.split(key)
    params = init_params(pkey, **cfg)
    x = jax.random.normal(xkey, (B, GS, cfg["d_in"]), jnp.float32)

    fwd = jax.jit(lambda p, xx: transformer_encoder_forward(p, xx, cfg))
    out, attn_mask = fwd(params, x)
    jax.block_until_ready(out)

    assert out.shape == (B, GS, cfg["d_model"])
    assert attn_mask.shape == (B, 1, 1, GS)
    assert bool(jnp.all(jnp.isfinite(out)))
    print("KERNEL_OK")
</pallas_src>

<mosaic_0001>
module attributes {stable_mosaic.version = 11 : i64} {
  func.func @_fused_kernel(%arg0: i32, %arg1: memref<1x16x64xf32, #tpu.memory_space<vmem>>, %arg2: memref<16x64xf32, #tpu.memory_space<vmem>>, %arg3: memref<4x16x16xf32, #tpu.memory_space<vmem>>, %arg4: memref<144x16xbf16, #tpu.memory_space<vmem>>, %arg5: memref<144x16xbf16, #tpu.memory_space<vmem>>, %arg6: memref<9x384xf32, #tpu.memory_space<vmem>>, %arg7: memref<64x128xbf16, #tpu.memory_space<vmem>>, %arg8: memref<1x128xf32, #tpu.memory_space<vmem>>, %arg9: memref<1x128xf32, #tpu.memory_space<vmem>>, %arg10: memref<1x128xf32, #tpu.memory_space<vmem>>, %arg11: memref<3x128x384xbf16, #tpu.memory_space<vmem>>, %arg12: memref<3x1x384xf32, #tpu.memory_space<vmem>>, %arg13: memref<3x128x128xbf16, #tpu.memory_space<vmem>>, %arg14: memref<3x1x128xf32, #tpu.memory_space<vmem>>, %arg15: memref<3x1x128xf32, #tpu.memory_space<vmem>>, %arg16: memref<3x1x128xf32, #tpu.memory_space<vmem>>, %arg17: memref<3x9x128xf32, #tpu.memory_space<vmem>>, %arg18: memref<3x1x128xf32, #tpu.memory_space<vmem>>, %arg19: memref<3x1x128xf32, #tpu.memory_space<vmem>>, %arg20: memref<3x1x128xf32, #tpu.memory_space<vmem>>, %arg21: memref<3x128x128xbf16, #tpu.memory_space<vmem>>, %arg22: memref<3x1x128xf32, #tpu.memory_space<vmem>>, %arg23: memref<3x128x128xbf16, #tpu.memory_space<vmem>>, %arg24: memref<3x1x128xf32, #tpu.memory_space<vmem>>, %arg25: memref<3x1x128xf32, #tpu.memory_space<vmem>>, %arg26: memref<3x1x128xf32, #tpu.memory_space<vmem>>, %arg27: memref<384x384xbf16, #tpu.memory_space<vmem>>, %arg28: memref<1x384xf32, #tpu.memory_space<vmem>>, %arg29: memref<384x128xbf16, #tpu.memory_space<vmem>>, %arg30: memref<1x128xf32, #tpu.memory_space<vmem>>, %arg31: memref<1x16x128xf32, #tpu.memory_space<vmem>>, %arg32: memref<1x16x1xf32, #tpu.memory_space<vmem>>) attributes {dimension_semantics = [#tpu.dimension_semantics<parallel>], iteration_bounds = array<i64: 2>, scalar_prefetch = 0 : i64, scratch_operands = 0 : i64, tpu.core_type = #tpu.core_type<tc>, window_params = [{transform_indices = @transform_0, window_bounds = array<i64: 1, 16, 64>}, {pipeline_mode = #tpu.pipeline_mode<synchronous>, transform_indices = @transform_1, window_bounds = array<i64: 16, 64>}, {pipeline_mode = #tpu.pipeline_mode<synchronous>, transform_indices = @transform_2, window_bounds = array<i64: 4, 16, 16>}, {pipeline_mode = #tpu.pipeline_mode<synchronous>, transform_indices = @transform_3, window_bounds = array<i64: 144, 16>}, {pipeline_mode = #tpu.pipeline_mode<synchronous>, transform_indices = @transform_4, window_bounds = array<i64: 144, 16>}, {pipeline_mode = #tpu.pipeline_mode<synchronous>, transform_indices = @transform_5, window_bounds = array<i64: 9, 384>}, {pipeline_mode = #tpu.pipeline_mode<synchronous>, transform_indices = @transform_6, window_bounds = array<i64: 64, 128>}, {pipeline_mode = #tpu.pipeline_mode<synchronous>, transform_indices = @transform_7, window_bounds = array<i64: 1, 128>}, {pipeline_mode = #tpu.pipeline_mode<synchronous>, transform_indices = @transform_8, window_bounds = array<i64: 1, 128>}, {pipeline_mode = #tpu.pipeline_mode<synchronous>, transform_indices = @transform_9, window_bounds = array<i64: 1, 128>}, {pipeline_mode = #tpu.pipeline_mode<synchronous>, transform_indices = @transform_10, window_bounds = array<i64: 3, 128, 384>}, {pipeline_mode = #tpu.pipeline_mode<synchronous>, transform_indices = @transform_11, window_bounds = array<i64: 3, 1, 384>}, {pipeline_mode = #tpu.pipeline_mode<synchronous>, transform_indices = @transform_12, window_bounds = array<i64: 3, 128, 128>}, {pipeline_mode = #tpu.pipeline_mode<synchronous>, transform_indices = @transform_13, window_bounds = array<i64: 3, 1, 128>}, {pipeline_mode = #tpu.pipeline_mode<synchronous>, transform_indices = @transform_14, window_bounds = array<i64: 3, 1, 128>}, {pipeline_mode = #tpu.pipeline_mode<synchronous>, transform_indices = @transform_15, window_bounds = array<i64: 3, 1, 128>}, {pipeline_mode = #tpu.pipeline_mode<synchronous>, transform_indices = @transform_16, window_bounds = array<i64: 3, 9, 128>}, {pipeline_mode = #tpu.pipeline_mode<synchronous>, transform_indices = @transform_17, window_bounds = array<i64: 3, 1, 128>}, {pipeline_mode = #tpu.pipeline_mode<synchronous>, transform_indices = @transform_18, window_bounds = array<i64: 3, 1, 128>}, {pipeline_mode = #tpu.pipeline_mode<synchronous>, transform_indices = @transform_19, window_bounds = array<i64: 3, 1, 128>}, {pipeline_mode = #tpu.pipeline_mode<synchronous>, transform_indices = @transform_20, window_bounds = array<i64: 3, 128, 128>}, {pipeline_mode = #tpu.pipeline_mode<synchronous>, transform_indices = @transform_21, window_bounds = array<i64: 3, 1, 128>}, {pipeline_mode = #tpu.pipeline_mode<synchronous>, transform_indices = @transform_22, window_bounds = array<i64: 3, 128, 128>}, {pipeline_mode = #tpu.pipeline_mode<synchronous>, transform_indices = @transform_23, window_bounds = array<i64: 3, 1, 128>}, {pipeline_mode = #tpu.pipeline_mode<synchronous>, transform_indices = @transform_24, window_bounds = array<i64: 3, 1, 128>}, {pipeline_mode = #tpu.pipeline_mode<synchronous>, transform_indices = @transform_25, window_bounds = array<i64: 3, 1, 128>}, {pipeline_mode = #tpu.pipeline_mode<synchronous>, transform_indices = @transform_26, window_bounds = array<i64: 384, 384>}, {pipeline_mode = #tpu.pipeline_mode<synchronous>, transform_indices = @transform_27, window_bounds = array<i64: 1, 384>}, {pipeline_mode = #tpu.pipeline_mode<synchronous>, transform_indices = @transform_28, window_bounds = array<i64: 384, 128>}, {pipeline_mode = #tpu.pipeline_mode<synchronous>, transform_indices = @transform_29, window_bounds = array<i64: 1, 128>}, {transform_indices = @transform_30, window_bounds = array<i64: 1, 16, 128>}, {transform_indices = @transform_31, window_bounds = array<i64: 1, 16, 1>}]} {
    %c0 = arith.constant 0 : index
    %c0_0 = arith.constant 0 : index
    %c0_1 = arith.constant 0 : index
    %0 = vector.load %arg1[%c0, %c0_0, %c0_1] : memref<1x16x64xf32, #tpu.memory_space<vmem>>, vector<1x16x64xf32>
    %1 = vector.shape_cast %0 : vector<1x16x64xf32> to vector<16x64xf32>
    %c0_2 = arith.constant 0 : index
    %c0_3 = arith.constant 0 : index
    %2 = vector.load %arg2[%c0_2, %c0_3] : memref<16x64xf32, #tpu.memory_space<vmem>>, vector<16x64xf32>
    %3 = arith.addf %1, %2 : vector<16x64xf32>
    %cst = arith.constant dense<0.000000e+00> : vector<16xf32>
    %4 = vector.multi_reduction <add>, %3, %cst [1] : vector<16x64xf32> to vector<16xf32>
    %5 = vector.shape_cast %4 : vector<16xf32> to vector<16x1xf32>
    %cst_4 = arith.constant 0.000000e+00 : f32
    %6 = vector.broadcast %cst_4 : f32 to vector<16x1xf32>
    %7 = arith.cmpf oeq, %5, %6 : vector<16x1xf32>
    %c0_5 = arith.constant 0 : index
    %c0_6 = arith.constant 0 : index
    %8 = vector.load %arg7[%c0_5, %c0_6] : memref<64x128xbf16, #tpu.memory_space<vmem>>, vector<64x128xbf16>
    %9 = arith.truncf %3 : vector<16x64xf32> to vector<16x64xbf16>
    %cst_7 = arith.constant dense<0.000000e+00> : vector<16x128xf32>
    %10 = tpu.matmul %9, %8, %cst_7 {dimension_numbers = #tpu.dot_dimension_numbers<[1], [0], [0], [1], [0, 0, 1, 1], [], []>} : vector<16x64xbf16>, vector<64x128xbf16>, vector<16x128xf32> -> vector<16x128xf32>
    %c0_8 = arith.constant 0 : index
    %c0_9 = arith.constant 0 : index
    %11 = vector.load %arg8[%c0_8, %c0_9] : memref<1x128xf32, #tpu.memory_space<vmem>>, vector<1x128xf32>
    %12 = vector.broadcast %11 : vector<1x128xf32> to vector<16x128xf32>
    %13 = arith.addf %10, %12 : vector<16x128xf32>
    %cst_10 = arith.constant 0.000000e+00 : f32
    %14 = vector.broadcast %cst_10 : f32 to vector<16x128xf32>
    %15 = arith.maximumf %13, %14 : vector<16x128xf32>
    %c0_11 = arith.constant 0 : index
    %c0_12 = arith.constant 0 : index
    %16 = vector.load %arg9[%c0_11, %c0_12] : memref<1x128xf32, #tpu.memory_space<vmem>>, vector<1x128xf32>
    %c0_13 = arith.constant 0 : index
    %c0_14 = arith.constant 0 : index
    %17 = vector.load %arg10[%c0_13, %c0_14] : memref<1x128xf32, #tpu.memory_space<vmem>>, vector<1x128xf32>
    %cst_15 = arith.constant dense<0.000000e+00> : vector<16xf32>
    %18 = vector.multi_reduction <add>, %15, %cst_15 [1] : vector<16x128xf32> to vector<16xf32>
    %19 = vector.shape_cast %18 : vector<16xf32> to vector<16x1xf32>
    %cst_16 = arith.constant 1.280000e+02 : f32
    %20 = vector.broadcast %cst_16 : f32 to vector<16x1xf32>
    %21 = arith.divf %19, %20 : vector<16x1xf32>
    %22 = vector.broadcast %21 : vector<16x1xf32> to vector<16x128xf32>
    %23 = arith.subf %15, %22 : vector<16x128xf32>
    %24 = arith.mulf %23, %23 : vector<16x128xf32>
    %cst_17 = arith.constant dense<0.000000e+00> : vector<16xf32>
    %25 = vector.multi_reduction <add>, %24, %cst_17 [1] : vector<16x128xf32> to vector<16xf32>
    %26 = vector.shape_cast %25 : vector<16xf32> to vector<16x1xf32>
    %cst_18 = arith.constant 1.280000e+02 : f32
    %27 = vector.broadcast %cst_18 : f32 to vector<16x1xf32>
    %28 = arith.divf %26, %27 : vector<16x1xf32>
    %29 = vector.broadcast %21 : vector<16x1xf32> to vector<16x128xf32>
    %30 = arith.subf %15, %29 : vector<16x128xf32>
    %cst_19 = arith.constant 9.99999974E-6 : f32
    %31 = vector.broadcast %cst_19 : f32 to vector<16x1xf32>
    %32 = arith.addf %28, %31 : vector<16x1xf32>
    %33 = math.rsqrt %32 : vector<16x1xf32>
    %34 = vector.broadcast %33 : vector<16x1xf32> to vector<16x128xf32>
    %35 = arith.mulf %30, %34 : vector<16x128xf32>
    %36 = vector.broadcast %16 : vector<1x128xf32> to vector<16x128xf32>
    %37 = arith.mulf %35, %36 : vector<16x128xf32>
    %38 = vector.broadcast %17 : vector<1x128xf32> to vector<16x128xf32>
    %39 = arith.addf %37, %38 : vector<16x128xf32>
    %cst_20 = arith.constant 0.000000e+00 : f32
    %40 = vector.shape_cast %7 : vector<16x1xi1> to vector<16x1xi1>
    %41 = vector.broadcast %40 : vector<16x1xi1> to vector<16x128xi1>
    %42 = vector.broadcast %cst_20 : f32 to vector<16x128xf32>
    %43 = arith.select %41, %42, %39 : vector<16x128xi1>, vector<16x128xf32>
    %cst_21 = arith.constant 0.000000e+00 : f32
    %44 = vector.broadcast %cst_21 : f32 to vector<16x128xf32>
    %45 = arith.cmpf oeq, %43, %44 : vector<16x128xf32>
    %46 = arith.extui %45 : vector<16x128xi1> to vector<16x128xi32>
    %47 = arith.sitofp %46 : vector<16x128xi32> to vector<16x128xf32>
    %cst_22 = arith.constant dense<0.000000e+00> : vector<16xf32>
    %48 = vector.multi_reduction <add>, %47, %cst_22 [1] : vector<16x128xf32> to vector<16xf32>
    %49 = vector.shape_cast %48 : vector<16xf32> to vector<16x1xf32>
    %cst_23 = arith.constant 0.000000e+00 : f32
    %50 = vector.broadcast %cst_23 : f32 to vector<16x1xf32>
    %51 = arith.cmpf ogt, %49, %50 : vector<16x1xf32>
    %52 = arith.extui %51 : vector<16x1xi1> to vector<16x1xi32>
    %53 = arith.sitofp %52 : vector<16x1xi32> to vector<16x1xf32>
    %c0_24 = arith.constant 0 : index
    %c0_25 = arith.constant 0 : index
    %c0_26 = arith.constant 0 : index
    %54 = vector.load %arg32[%c0_24, %c0_25, %c0_26] : memref<1x16x1xf32, #tpu.memory_space<vmem>>, vector<1x16x1xf32>
    %55 = vector.shape_cast %54 : vector<1x16x1xf32> to vector<16x1xf32>
    %56 = vector.shape_cast %53 : vector<16x1xf32> to vector<1x16x1xf32>
    tpu.vector_store %arg32[%c0_24, %c0_25, %c0_26], %56 {strides = array<i32>} : memref<1x16x1xf32, #tpu.memory_space<vmem>>, vector<1x16x1xf32>,
    %57 = tpu.iota {dimensions = array<i32: 0>} : vector<16x16xi32>
    %58 = tpu.iota {dimensions = array<i32: 1>} : vector<16x16xi32>
    %59 = arith.cmpi eq, %57, %58 : vector<16x16xi32>
    %cst_27 = arith.constant 0.000000e+00 : f32
    %60 = vector.shape_cast %53 : vector<16x1xf32> to vector<16x1xf32>
    %61 = vector.broadcast %60 : vector<16x1xf32> to vector<16x16xf32>
    %62 = vector.broadcast %cst_27 : f32 to vector<16x16xf32>
    %63 = arith.select %59, %61, %62 : vector<16x16xi1>, vector<16x16xf32>
    %cst_28 = arith.constant 1.000000e+00 : f32
    %64 = vector.broadcast %cst_28 : f32 to vector<16x16xf32>
    %65 = arith.truncf %64 : vector<16x16xf32> to vector<16x16xbf16>
    %66 = arith.truncf %63 : vector<16x16xf32> to vector<16x16xbf16>
    %cst_29 = arith.constant dense<0.000000e+00> : vector<16x16xf32>
    %67 = tpu.matmul %65, %66, %cst_29 {dimension_numbers = #tpu.dot_dimension_numbers<[1], [0], [0], [1], [0, 0, 1, 1], [], []>} : vector<16x16xbf16>, vector<16x16xbf16>, vector<16x16xf32> -> vector<16x16xf32>
    %cst_30 = arith.constant 5.000000e-01 : f32
    %68 = vector.broadcast %cst_30 : f32 to vector<16x16xf32>
    %69 = arith.cmpf ogt, %67, %68 : vector<16x16xf32>
    %70 = vector.shape_cast %69 : vector<16x16xi1> to vector<1x16x16xi1>
    %c0_31 = arith.constant 0 : index
    %c0_32 = arith.constant 0 : index
    %c0_33 = arith.constant 0 : index
    %71 = vector.load %arg3[%c0_31, %c0_32, %c0_33] : memref<4x16x16xf32, #tpu.memory_space<vmem>>, vector<4x16x16xf32>
    %cst_34 = arith.constant -1.000000e+30 : f32
    %72 = vector.shape_cast %70 : vector<1x16x16xi1> to vector<1x16x16xi1>
    %73 = vector.broadcast %72 : vector<1x16x16xi1> to vector<4x16x16xi1>
    %74 = vector.broadcast %cst_34 : f32 to vector<4x16x16xf32>
    %75 = arith.select %73, %74, %71 : vector<4x16x16xi1>, vector<4x16x16xf32>
    %c0_35 = arith.constant 0 : index
    %c0_36 = arith.constant 0 : index
    %76 = vector.load %arg4[%c0_35, %c0_36] : memref<144x16xbf16, #tpu.memory_space<vmem>>, vector<144x16xbf16>
    %c0_37 = arith.constant 0 : index
    %c0_38 = arith.constant 0 : index
    %c0_39 = arith.constant 0 : index
    %77 = vector.load %arg11[%c0_37, %c0_38, %c0_39] : memref<3x128x384xbf16, #tpu.memory_space<vmem>>, vector<1x128x384xbf16>
    %78 = vector.shape_cast %77 : vector<1x128x384xbf16> to vector<128x384xbf16>
    %79 = arith.truncf %43 : vector<16x128xf32> to vector<16x128xbf16>
    %cst_40 = arith.constant dense<0.000000e+00> : vector<16x384xf32>
    %80 = tpu.matmul %79, %78, %cst_40 {dimension_numbers = #tpu.dot_dimension_numbers<[1], [0], [0], [1], [0, 0, 1, 1], [], []>} : vector<16x128xbf16>, vector<128x384xbf16>, vector<16x384xf32> -> vector<16x384xf32>
    %c0_41 = arith.constant 0 : index
    %c0_42 = arith.constant 0 : index
    %c0_43 = arith.constant 0 : index
    %81 = vector.load %arg12[%c0_41, %c0_42, %c0_43] : memref<3x1x384xf32, #tpu.memory_space<vmem>>, vector<1x1x384xf32>
    %82 = vector.shape_cast %81 : vector<1x1x384xf32> to vector<1x384xf32>
    %83 = vector.broadcast %82 : vector<1x384xf32> to vector<16x384xf32>
    %84 = arith.addf %80, %83 : vector<16x384xf32>
    %85 = vector.extract_strided_slice %84 {offsets = [0, 0], sizes = [16, 32], strides = [1, 1]} : vector<16x384xf32> to vector<16x32xf32>
    %86 = vector.extract_strided_slice %84 {offsets = [0, 128], sizes = [16, 32], strides = [1, 1]} : vector<16x384xf32> to vector<16x32xf32>
    %87 = vector.extract_strided_slice %84 {offsets = [0, 256], sizes = [16, 32], strides = [1, 1]} : vector<16x384xf32> to vector<16x32xf32>
    %88 = arith.truncf %85 : vector<16x32xf32> to vector<16x32xbf16>
    %89 = arith.truncf %86 : vector<16x32xf32> to vector<16x32xbf16>
    %cst_44 = arith.constant dense<0.000000e+00> : vector<16x16xf32>
    %90 = tpu.matmul %88, %89, %cst_44 {dimension_numbers = #tpu.dot_dimension_numbers<[1], [1], [0], [0], [0, 0, 1, 0], [], []>} : vector<16x32xbf16>, vector<16x32xbf16>, vector<16x16xf32> -> vector<16x16xf32>
    %cst_45 = arith.constant 0.176776692 : f32
    %91 = vector.broadcast %cst_45 : f32 to vector<16x16xf32>
    %92 = arith.mulf %90, %91 : vector<16x16xf32>
    %93 = vector.extract_strided_slice %75 {offsets = [0, 0, 0], sizes = [1, 16, 16], strides = [1, 1, 1]} : vector<4x16x16xf32> to vector<1x16x16xf32>
    %94 = vector.shape_cast %93 : vector<1x16x16xf32> to vector<16x16xf32>
    %95 = arith.addf %92, %94 : vector<16x16xf32>
    %cst_46 = arith.constant dense<0xFF800000> : vector<16xf32>
    %96 = vector.multi_reduction <maximumf>, %95, %cst_46 [1] : vector<16x16xf32> to vector<16xf32>
    %97 = vector.shape_cast %96 : vector<16xf32> to vector<16x1xf32>
    %98 = vector.broadcast %97 : vector<16x1xf32> to vector<16x16xf32>
    %99 = arith.subf %95, %98 : vector<16x16xf32>
    %100 = math.exp %99 : vector<16x16xf32>
    %cst_47 = arith.constant dense<0.000000e+00> : vector<16xf32>
    %101 = vector.multi_reduction <add>, %100, %cst_47 [1] : vector<16x16xf32> to vector<16xf32>
    %102 = vector.shape_cast %101 : vector<16xf32> to vector<16x1xf32>
    %103 = tpu.reciprocal %102 {approx = true} : vector<16x1xf32> -> vector<16x1xf32>
    %104 = vector.broadcast %103 : vector<16x1xf32> to vector<16x16xf32>
    %105 = arith.mulf %100, %104 : vector<16x16xf32>
    %106 = arith.truncf %105 : vector<16x16xf32> to vector<16x16xbf16>
    %107 = arith.truncf %87 : vector<16x32xf32> to vector<16x32xbf16>
    %cst_48 = arith.constant dense<0.000000e+00> : vector<16x32xf32>
    %108 = tpu.matmul %106, %107, %cst_48 {dimension_numbers = #tpu.dot_dimension_numbers<[1], [0], [0], [1], [0, 0, 1, 1], [], []>} : vector<16x16xbf16>, vector<16x32xbf16>, vector<16x32xf32> -> vector<16x32xf32>
    %109 = vector.extract_strided_slice %84 {offsets = [0, 32], sizes = [16, 32], strides = [1, 1]} : vector<16x384xf32> to vector<16x32xf32>
    %110 = vector.extract_strided_slice %84 {offsets = [0, 160], sizes = [16, 32], strides = [1, 1]} : vector<16x384xf32> to vector<16x32xf32>
    %111 = vector.extract_strided_slice %84 {offsets = [0, 288], sizes = [16, 32], strides = [1, 1]} : vector<16x384xf32> to vector<16x32xf32>
    %112 = arith.truncf %109 : vector<16x32xf32> to vector<16x32xbf16>
    %113 = arith.truncf %110 : vector<16x32xf32> to vector<16x32xbf16>
    %cst_49 = arith.constant dense<0.000000e+00> : vector<16x16xf32>
    %114 = tpu.matmul %112, %113, %cst_49 {dimension_numbers = #tpu.dot_dimension_numbers<[1], [1], [0], [0], [0, 0, 1, 0], [], []>} : vector<16x32xbf16>, vector<16x32xbf16>, vector<16x16xf32> -> vector<16x16xf32>
    %cst_50 = arith.constant 0.176776692 : f32
    %115 = vector.broadcast %cst_50 : f32 to vector<16x16xf32>
    %116 = arith.mulf %114, %115 : vector<16x16xf32>
    %117 = vector.extract_strided_slice %75 {offsets = [1, 0, 0], sizes = [1, 16, 16], strides = [1, 1, 1]} : vector<4x16x16xf32> to vector<1x16x16xf32>
    %118 = vector.shape_cast %117 : vector<1x16x16xf32> to vector<16x16xf32>
    %119 = arith.addf %116, %118 : vector<16x16xf32>
    %cst_51 = arith.constant dense<0xFF800000> : vector<16xf32>
    %120 = vector.multi_reduction <maximumf>, %119, %cst_51 [1] : vector<16x16xf32> to vector<16xf32>
    %121 = vector.shape_cast %120 : vector<16xf32> to vector<16x1xf32>
    %122 = vector.broadcast %121 : vector<16x1xf32> to vector<16x16xf32>
    %123 = arith.subf %119, %122 : vector<16x16xf32>
    %124 = math.exp %123 : vector<16x16xf32>
    %cst_52 = arith.constant dense<0.000000e+00> : vector<16xf32>
    %125 = vector.multi_reduction <add>, %124, %cst_52 [1] : vector<16x16xf32> to vector<16xf32>
    %126 = vector.shape_cast %125 : vector<16xf32> to vector<16x1xf32>
    %127 = tpu.reciprocal %126 {approx = true} : vector<16x1xf32> -> vector<16x1xf32>
    %128 = vector.broadcast %127 : vector<16x1xf32> to vector<16x16xf32>
    %129 = arith.mulf %124, %128 : vector<16x16xf32>
    %130 = arith.truncf %129 : vector<16x16xf32> to vector<16x16xbf16>
    %131 = arith.truncf %111 : vector<16x32xf32> to vector<16x32xbf16>
    %cst_53 = arith.constant dense<0.000000e+00> : vector<16x32xf32>
    %132 = tpu.matmul %130, %131, %cst_53 {dimension_numbers = #tpu.dot_dimension_numbers<[1], [0], [0], [1], [0, 0, 1, 1], [], []>} : vector<16x16xbf16>, vector<16x32xbf16>, vector<16x32xf32> -> vector<16x32xf32>
    %133 = vector.extract_strided_slice %84 {offsets = [0, 64], sizes = [16, 32], strides = [1, 1]} : vector<16x384xf32> to vector<16x32xf32>
    %134 = vector.extract_strided_slice %84 {offsets = [0, 192], sizes = [16, 32], strides = [1, 1]} : vector<16x384xf32> to vector<16x32xf32>
    %135 = vector.extract_strided_slice %84 {offsets = [0, 320], sizes = [16, 32], strides = [1, 1]} : vector<16x384xf32> to vector<16x32xf32>
    %136 = arith.truncf %133 : vector<16x32xf32> to vector<16x32xbf16>
    %137 = arith.truncf %134 : vector<16x32xf32> to vector<16x32xbf16>
    %cst_54 = arith.constant dense<0.000000e+00> : vector<16x16xf32>
    %138 = tpu.matmul %136, %137, %cst_54 {dimension_numbers = #tpu.dot_dimension_numbers<[1], [1], [0], [0], [0, 0, 1, 0], [], []>} : vector<16x32xbf16>, vector<16x32xbf16>, vector<16x16xf32> -> vector<16x16xf32>
    %cst_55 = arith.constant 0.176776692 : f32
    %139 = vector.broadcast %cst_55 : f32 to vector<16x16xf32>
    %140 = arith.mulf %138, %139 : vector<16x16xf32>
    %141 = vector.extract_strided_slice %75 {offsets = [2, 0, 0], sizes = [1, 16, 16], strides = [1, 1, 1]} : vector<4x16x16xf32> to vector<1x16x16xf32>
    %142 = vector.shape_cast %141 : vector<1x16x16xf32> to vector<16x16xf32>
    %143 = arith.addf %140, %142 : vector<16x16xf32>
    %cst_56 = arith.constant dense<0xFF800000> : vector<16xf32>
    %144 = vector.multi_reduction <maximumf>, %143, %cst_56 [1] : vector<16x16xf32> to vector<16xf32>
    %145 = vector.shape_cast %144 : vector<16xf32> to vector<16x1xf32>
    %146 = vector.broadcast %145 : vector<16x1xf32> to vector<16x16xf32>
    %147 = arith.subf %143, %146 : vector<16x16xf32>
    %148 = math.exp %147 : vector<16x16xf32>
    %cst_57 = arith.constant dense<0.000000e+00> : vector<16xf32>
    %149 = vector.multi_reduction <add>, %148, %cst_57 [1] : vector<16x16xf32> to vector<16xf32>
    %150 = vector.shape_cast %149 : vector<16xf32> to vector<16x1xf32>
    %151 = tpu.reciprocal %150 {approx = true} : vector<16x1xf32> -> vector<16x1xf32>
    %152 = vector.broadcast %151 : vector<16x1xf32> to vector<16x16xf32>
    %153 = arith.mulf %148, %152 : vector<16x16xf32>
    %154 = arith.truncf %153 : vector<16x16xf32> to vector<16x16xbf16>
    %155 = arith.truncf %135 : vector<16x32xf32> to vector<16x32xbf16>
    %cst_58 = arith.constant dense<0.000000e+00> : vector<16x32xf32>
    %156 = tpu.matmul %154, %155, %cst_58 {dimension_numbers = #tpu.dot_dimension_numbers<[1], [0], [0], [1], [0, 0, 1, 1], [], []>} : vector<16x16xbf16>, vector<16x32xbf16>, vector<16x32xf32> -> vector<16x32xf32>
    %157 = vector.extract_strided_slice %84 {offsets = [0, 96], sizes = [16, 32], strides = [1, 1]} : vector<16x384xf32> to vector<16x32xf32>
    %158 = vector.extract_strided_slice %84 {offsets = [0, 224], sizes = [16, 32], strides = [1, 1]} : vector<16x384xf32> to vector<16x32xf32>
    %159 = vector.extract_strided_slice %84 {offsets = [0, 352], sizes = [16, 32], strides = [1, 1]} : vector<16x384xf32> to vector<16x32xf32>
    %160 = arith.truncf %157 : vector<16x32xf32> to vector<16x32xbf16>
    %161 = arith.truncf %158 : vector<16x32xf32> to vector<16x32xbf16>
    %cst_59 = arith.constant dense<0.000000e+00> : vector<16x16xf32>
    %162 = tpu.matmul %160, %161, %cst_59 {dimension_numbers = #tpu.dot_dimension_numbers<[1], [1], [0], [0], [0, 0, 1, 0], [], []>} : vector<16x32xbf16>, vector<16x32xbf16>, vector<16x16xf32> -> vector<16x16xf32>
    %cst_60 = arith.constant 0.176776692 : f32
    %163 = vector.broadcast %cst_60 : f32 to vector<16x16xf32>
    %164 = arith.mulf %162, %163 : vector<16x16xf32>
    %165 = vector.extract_strided_slice %75 {offsets = [3, 0, 0], sizes = [1, 16, 16], strides = [1, 1, 1]} : vector<4x16x16xf32> to vector<1x16x16xf32>
    %166 = vector.shape_cast %165 : vector<1x16x16xf32> to vector<16x16xf32>
    %167 = arith.addf %164, %166 : vector<16x16xf32>
    %cst_61 = arith.constant dense<0xFF800000> : vector<16xf32>
    %168 = vector.multi_reduction <maximumf>, %167, %cst_61 [1] : vector<16x16xf32> to vector<16xf32>
    %169 = vector.shape_cast %168 : vector<16xf32> to vector<16x1xf32>
    %170 = vector.broadcast %169 : vector<16x1xf32> to vector<16x16xf32>
    %171 = arith.subf %167, %170 : vector<16x16xf32>
    %172 = math.exp %171 : vector<16x16xf32>
    %cst_62 = arith.constant dense<0.000000e+00> : vector<16xf32>
    %173 = vector.multi_reduction <add>, %172, %cst_62 [1] : vector<16x16xf32> to vector<16xf32>
    %174 = vector.shape_cast %173 : vector<16xf32> to vector<16x1xf32>
    %175 = tpu.reciprocal %174 {approx = true} : vector<16x1xf32> -> vector<16x1xf32>
    %176 = vector.broadcast %175 : vector<16x1xf32> to vector<16x16xf32>
    %177 = arith.mulf %172, %176 : vector<16x16xf32>
    %178 = arith.truncf %177 : vector<16x16xf32> to vector<16x16xbf16>
    %179 = arith.truncf %159 : vector<16x32xf32> to vector<16x32xbf16>
    %cst_63 = arith.constant dense<0.000000e+00> : vector<16x32xf32>
    %180 = tpu.matmul %178, %179, %cst_63 {dimension_numbers = #tpu.dot_dimension_numbers<[1], [0], [0], [1], [0, 0, 1, 1], [], []>} : vector<16x16xbf16>, vector<16x32xbf16>, vector<16x32xf32> -> vector<16x32xf32>
    %181 = tpu.concatenate %108, %132, %156, %180 in 1 : vector<16x32xf32>, vector<16x32xf32>, vector<16x32xf32>, vector<16x32xf32> -> vector<16x128xf32>
    %c0_64 = arith.constant 0 : index
    %c0_65 = arith.constant 0 : index
    %c0_66 = arith.constant 0 : index
    %182 = vector.load %arg13[%c0_64, %c0_65, %c0_66] : memref<3x128x128xbf16, #tpu.memory_space<vmem>>, vector<1x128x128xbf16>
    %183 = vector.shape_cast %182 : vector<1x128x128xbf16> to vector<128x128xbf16>
    %184 = arith.truncf %181 : vector<16x128xf32> to vector<16x128xbf16>
    %cst_67 = arith.constant dense<0.000000e+00> : vector<16x128xf32>
    %185 = tpu.matmul %184, %183, %cst_67 {dimension_numbers = #tpu.dot_dimension_numbers<[1], [0], [0], [1], [0, 0, 1, 1], [], []>} : vector<16x128xbf16>, vector<128x128xbf16>, vector<16x128xf32> -> vector<16x128xf32>
    %c0_68 = arith.constant 0 : index
    %c0_69 = arith.constant 0 : index
    %c0_70 = arith.constant 0 : index
    %186 = vector.load %arg14[%c0_68, %c0_69, %c0_70] : memref<3x1x128xf32, #tpu.memory_space<vmem>>, vector<1x1x128xf32>
    %187 = vector.shape_cast %186 : vector<1x1x128xf32> to vector<1x128xf32>
    %188 = vector.broadcast %187 : vector<1x128xf32> to vector<16x128xf32>
    %189 = arith.addf %185, %188 : vector<16x128xf32>
    %190 = arith.addf %43, %189 : vector<16x128xf32>
    %c0_71 = arith.constant 0 : index
    %c0_72 = arith.constant 0 : index
    %c0_73 = arith.constant 0 : index
    %191 = vector.load %arg15[%c0_71, %c0_72, %c0_73] : memref<3x1x128xf32, #tpu.memory_space<vmem>>, vector<1x1x128xf32>
    %192 = vector.shape_cast %191 : vector<1x1x128xf32> to vector<1x128xf32>
    %c0_74 = arith.constant 0 : index
    %c0_75 = arith.constant 0 : index
    %c0_76 = arith.constant 0 : index
    %193 = vector.load %arg16[%c0_74, %c0_75, %c0_76] : memref<3x1x128xf32, #tpu.memory_space<vmem>>, vector<1x1x128xf32>
    %194 = vector.shape_cast %193 : vector<1x1x128xf32> to vector<1x128xf32>
    %cst_77 = arith.constant dense<0.000000e+00> : vector<16xf32>
    %195 = vector.multi_reduction <add>, %190, %cst_77 [1] : vector<16x128xf32> to vector<16xf32>
    %196 = vector.shape_cast %195 : vector<16xf32> to vector<16x1xf32>
    %cst_78 = arith.constant 1.280000e+02 : f32
    %197 = vector.broadcast %cst_78 : f32 to vector<16x1xf32>
    %198 = arith.divf %196, %197 : vector<16x1xf32>
    %199 = vector.broadcast %198 : vector<16x1xf32> to vector<16x128xf32>
    %200 = arith.subf %190, %199 : vector<16x128xf32>
    %201 = arith.mulf %200, %200 : vector<16x128xf32>
    %cst_79 = arith.constant dense<0.000000e+00> : vector<16xf32>
    %202 = vector.multi_reduction <add>, %201, %cst_79 [1] : vector<16x128xf32> to vector<16xf32>
    %203 = vector.shape_cast %202 : vector<16xf32> to vector<16x1xf32>
    %cst_80 = arith.constant 1.280000e+02 : f32
    %204 = vector.broadcast %cst_80 : f32 to vector<16x1xf32>
    %205 = arith.divf %203, %204 : vector<16x1xf32>
    %206 = vector.broadcast %198 : vector<16x1xf32> to vector<16x128xf32>
    %207 = arith.subf %190, %206 : vector<16x128xf32>
    %cst_81 = arith.constant 9.99999974E-6 : f32
    %208 = vector.broadcast %cst_81 : f32 to vector<16x1xf32>
    %209 = arith.addf %205, %208 : vector<16x1xf32>
    %210 = math.rsqrt %209 : vector<16x1xf32>
    %211 = vector.broadcast %210 : vector<16x1xf32> to vector<16x128xf32>
    %212 = arith.mulf %207, %211 : vector<16x128xf32>
    %213 = vector.broadcast %192 : vector<1x128xf32> to vector<16x128xf32>
    %214 = arith.mulf %212, %213 : vector<16x128xf32>
    %215 = vector.broadcast %194 : vector<1x128xf32> to vector<16x128xf32>
    %216 = arith.addf %214, %215 : vector<16x128xf32>
    %217 = arith.truncf %216 : vector<16x128xf32> to vector<16x128xbf16>
    %cst_82 = arith.constant dense<0.000000e+00> : vector<144x128xf32>
    %218 = tpu.matmul %76, %217, %cst_82 {dimension_numbers = #tpu.dot_dimension_numbers<[1], [0], [0], [1], [0, 0, 1, 1], [], []>} : vector<144x16xbf16>, vector<16x128xbf16>, vector<144x128xf32> -> vector<144x128xf32>
    %c0_83 = arith.constant 0 : index
    %c0_84 = arith.constant 0 : index
    %c0_85 = arith.constant 0 : index
    %219 = vector.load %arg17[%c0_83, %c0_84, %c0_85] : memref<3x9x128xf32, #tpu.memory_space<vmem>>, vector<1x9x128xf32>
    %220 = vector.shape_cast %219 : vector<1x9x128xf32> to vector<9x128xf32>
    %221 = vector.extract_strided_slice %218 {offsets = [0, 0], sizes = [16, 128], strides = [1, 1]} : vector<144x128xf32> to vector<16x128xf32>
    %222 = vector.extract_strided_slice %220 {offsets = [0, 0], sizes = [1, 128], strides = [1, 1]} : vector<9x128xf32> to vector<1x128xf32>
    %223 = vector.broadcast %222 : vector<1x128xf32> to vector<16x128xf32>
    %224 = arith.mulf %221, %223 : vector<16x128xf32>
    %225 = vector.extract_strided_slice %218 {offsets = [16, 0], sizes = [16, 128], strides = [1, 1]} : vector<144x128xf32> to vector<16x128xf32>
    %226 = vector.extract_strided_slice %220 {offsets = [1, 0], sizes = [1, 128], strides = [1, 1]} : vector<9x128xf32> to vector<1x128xf32>
    %227 = vector.broadcast %226 : vector<1x128xf32> to vector<16x128xf32>
    %228 = arith.mulf %225, %227 : vector<16x128xf32>
    %229 = arith.addf %224, %228 : vector<16x128xf32>
    %230 = vector.extract_strided_slice %218 {offsets = [32, 0], sizes = [16, 128], strides = [1, 1]} : vector<144x128xf32> to vector<16x128xf32>
    %231 = vector.extract_strided_slice %220 {offsets = [2, 0], sizes = [1, 128], strides = [1, 1]} : vector<9x128xf32> to vector<1x128xf32>
    %232 = vector.broadcast %231 : vector<1x128xf32> to vector<16x128xf32>
    %233 = arith.mulf %230, %232 : vector<16x128xf32>
    %234 = arith.addf %229, %233 : vector<16x128xf32>
    %235 = vector.extract_strided_slice %218 {offsets = [48, 0], sizes = [16, 128], strides = [1, 1]} : vector<144x128xf32> to vector<16x128xf32>
    %236 = vector.extract_strided_slice %220 {offsets = [3, 0], sizes = [1, 128], strides = [1, 1]} : vector<9x128xf32> to vector<1x128xf32>
    %237 = vector.broadcast %236 : vector<1x128xf32> to vector<16x128xf32>
    %238 = arith.mulf %235, %237 : vector<16x128xf32>
    %239 = arith.addf %234, %238 : vector<16x128xf32>
    %240 = vector.extract_strided_slice %218 {offsets = [64, 0], sizes = [16, 128], strides = [1, 1]} : vector<144x128xf32> to vector<16x128xf32>
    %241 = vector.extract_strided_slice %220 {offsets = [4, 0], sizes = [1, 128], strides = [1, 1]} : vector<9x128xf32> to vector<1x128xf32>
    %242 = vector.broadcast %241 : vector<1x128xf32> to vector<16x128xf32>
    %243 = arith.mulf %240, %242 : vector<16x128xf32>
    %244 = arith.addf %239, %243 : vector<16x128xf32>
    %245 = vector.extract_strided_slice %218 {offsets = [80, 0], sizes = [16, 128], strides = [1, 1]} : vector<144x128xf32> to vector<16x128xf32>
    %246 = vector.extract_strided_slice %220 {offsets = [5, 0], sizes = [1, 128], strides = [1, 1]} : vector<9x128xf32> to vector<1x128xf32>
    %247 = vector.broadcast %246 : vector<1x128xf32> to vector<16x128xf32>
    %248 = arith.mulf %245, %247 : vector<16x128xf32>
    %249 = arith.addf %244, %248 : vector<16x128xf32>
    %250 = vector.extract_strided_slice %218 {offsets = [96, 0], sizes = [16, 128], strides = [1, 1]} : vector<144x128xf32> to vector<16x128xf32>
    %251 = vector.extract_strided_slice %220 {offsets = [6, 0], sizes = [1, 128], strides = [1, 1]} : vector<9x128xf32> to vector<1x128xf32>
    %252 = vector.broadcast %251 : vector<1x128xf32> to vector<16x128xf32>
    %253 = arith.mulf %250, %252 : vector<16x128xf32>
    %254 = arith.addf %249, %253 : vector<16x128xf32>
    %255 = vector.extract_strided_slice %218 {offsets = [112, 0], sizes = [16, 128], strides = [1, 1]} : vector<144x128xf32> to vector<16x128xf32>
    %256 = vector.extract_strided_slice %220 {offsets = [7, 0], sizes = [1, 128], strides = [1, 1]} : vector<9x128xf32> to vector<1x128xf32>
    %257 = vector.broadcast %256 : vector<1x128xf32> to vector<16x128xf32>
    %258 = arith.mulf %255, %257 : vector<16x128xf32>
    %259 = arith.addf %254, %258 : vector<16x128xf32>
    %260 = vector.extract_strided_slice %218 {offsets = [128, 0], sizes = [16, 128], strides = [1, 1]} : vector<144x128xf32> to vector<16x128xf32>
    %261 = vector.extract_strided_slice %220 {offsets = [8, 0], sizes = [1, 128], strides = [1, 1]} : vector<9x128xf32> to vector<1x128xf32>
    %262 = vector.broadcast %261 : vector<1x128xf32> to vector<16x128xf32>
    %263 = arith.mulf %260, %262 : vector<16x128xf32>
    %264 = arith.addf %259, %263 : vector<16x128xf32>
    %265 = arith.addf %216, %264 : vector<16x128xf32>
    %c0_86 = arith.constant 0 : index
    %c0_87 = arith.constant 0 : index
    %c0_88 = arith.constant 0 : index
    %266 = vector.load %arg18[%c0_86, %c0_87, %c0_88] : memref<3x1x128xf32, #tpu.memory_space<vmem>>, vector<1x1x128xf32>
    %267 = vector.shape_cast %266 : vector<1x1x128xf32> to vector<1x128xf32>
    %268 = vector.broadcast %267 : vector<1x128xf32> to vector<16x128xf32>
    %269 = arith.addf %265, %268 : vector<16x128xf32>
    %c0_89 = arith.constant 0 : index
    %c0_90 = arith.constant 0 : index
    %c0_91 = arith.constant 0 : index
    %270 = vector.load %arg19[%c0_89, %c0_90, %c0_91] : memref<3x1x128xf32, #tpu.memory_space<vmem>>, vector<1x1x128xf32>
    %271 = vector.shape_cast %270 : vector<1x1x128xf32> to vector<1x128xf32>
    %c0_92 = arith.constant 0 : index
    %c0_93 = arith.constant 0 : index
    %c0_94 = arith.constant 0 : index
    %272 = vector.load %arg20[%c0_92, %c0_93, %c0_94] : memref<3x1x128xf32, #tpu.memory_space<vmem>>, vector<1x1x128xf32>
    %273 = vector.shape_cast %272 : vector<1x1x128xf32> to vector<1x128xf32>
    %cst_95 = arith.constant dense<0.000000e+00> : vector<16xf32>
    %274 = vector.multi_reduction <add>, %269, %cst_95 [1] : vector<16x128xf32> to vector<16xf32>
    %275 = vector.shape_cast %274 : vector<16xf32> to vector<16x1xf32>
    %cst_96 = arith.constant 1.280000e+02 : f32
    %276 = vector.broadcast %cst_96 : f32 to vector<16x1xf32>
    %277 = arith.divf %275, %276 : vector<16x1xf32>
    %278 = vector.broadcast %277 : vector<16x1xf32> to vector<16x128xf32>
    %279 = arith.subf %269, %278 : vector<16x128xf32>
    %280 = arith.mulf %279, %279 : vector<16x128xf32>
    %cst_97 = arith.constant dense<0.000000e+00> : vector<16xf32>
    %281 = vector.multi_reduction <add>, %280, %cst_97 [1] : vector<16x128xf32> to vector<16xf32>
    %282 = vector.shape_cast %281 : vector<16xf32> to vector<16x1xf32>
    %cst_98 = arith.constant 1.280000e+02 : f32
    %283 = vector.broadcast %cst_98 : f32 to vector<16x1xf32>
    %284 = arith.divf %282, %283 : vector<16x1xf32>
    %285 = vector.broadcast %277 : vector<16x1xf32> to vector<16x128xf32>
    %286 = arith.subf %269, %285 : vector<16x128xf32>
    %cst_99 = arith.constant 9.99999974E-6 : f32
    %287 = vector.broadcast %cst_99 : f32 to vector<16x1xf32>
    %288 = arith.addf %284, %287 : vector<16x1xf32>
    %289 = math.rsqrt %288 : vector<16x1xf32>
    %290 = vector.broadcast %289 : vector<16x1xf32> to vector<16x128xf32>
    %291 = arith.mulf %286, %290 : vector<16x128xf32>
    %292 = vector.broadcast %271 : vector<1x128xf32> to vector<16x128xf32>
    %293 = arith.mulf %291, %292 : vector<16x128xf32>
    %294 = vector.broadcast %273 : vector<1x128xf32> to vector<16x128xf32>
    %295 = arith.addf %293, %294 : vector<16x128xf32>
    %c0_100 = arith.constant 0 : index
    %c0_101 = arith.constant 0 : index
    %c0_102 = arith.constant 0 : index
    %296 = vector.load %arg21[%c0_100, %c0_101, %c0_102] : memref<3x128x128xbf16, #tpu.memory_space<vmem>>, vector<1x128x128xbf16>
    %297 = vector.shape_cast %296 : vector<1x128x128xbf16> to vector<128x128xbf16>
    %298 = arith.truncf %295 : vector<16x128xf32> to vector<16x128xbf16>
    %cst_103 = arith.constant dense<0.000000e+00> : vector<16x128xf32>
    %299 = tpu.matmul %298, %297, %cst_103 {dimension_numbers = #tpu.dot_dimension_numbers<[1], [0], [0], [1], [0, 0, 1, 1], [], []>} : vector<16x128xbf16>, vector<128x128xbf16>, vector<16x128xf32> -> vector<16x128xf32>
    %c0_104 = arith.constant 0 : index
    %c0_105 = arith.constant 0 : index
    %c0_106 = arith.constant 0 : index
    %300 = vector.load %arg22[%c0_104, %c0_105, %c0_106] : memref<3x1x128xf32, #tpu.memory_space<vmem>>, vector<1x1x128xf32>
    %301 = vector.shape_cast %300 : vector<1x1x128xf32> to vector<1x128xf32>
    %302 = vector.broadcast %301 : vector<1x128xf32> to vector<16x128xf32>
    %303 = arith.addf %299, %302 : vector<16x128xf32>
    %cst_107 = arith.constant 0.000000e+00 : f32
    %304 = vector.broadcast %cst_107 : f32 to vector<16x128xf32>
    %305 = arith.maximumf %303, %304 : vector<16x128xf32>
    %c0_108 = arith.constant 0 : index
    %c0_109 = arith.constant 0 : index
    %c0_110 = arith.constant 0 : index
    %306 = vector.load %arg23[%c0_108, %c0_109, %c0_110] : memref<3x128x128xbf16, #tpu.memory_space<vmem>>, vector<1x128x128xbf16>
    %307 = vector.shape_cast %306 : vector<1x128x128xbf16> to vector<128x128xbf16>
    %308 = arith.truncf %305 : vector<16x128xf32> to vector<16x128xbf16>
    %cst_111 = arith.constant dense<0.000000e+00> : vector<16x128xf32>
    %309 = tpu.matmul %308, %307, %cst_111 {dimension_numbers = #tpu.dot_dimension_numbers<[1], [0], [0], [1], [0, 0, 1, 1], [], []>} : vector<16x128xbf16>, vector<128x128xbf16>, vector<16x128xf32> -> vector<16x128xf32>
    %c0_112 = arith.constant 0 : index
    %c0_113 = arith.constant 0 : index
    %c0_114 = arith.constant 0 : index
    %310 = vector.load %arg24[%c0_112, %c0_113, %c0_114] : memref<3x1x128xf32, #tpu.memory_space<vmem>>, vector<1x1x128xf32>
    %311 = vector.shape_cast %310 : vector<1x1x128xf32> to vector<1x128xf32>
    %312 = vector.broadcast %311 : vector<1x128xf32> to vector<16x128xf32>
    %313 = arith.addf %309, %312 : vector<16x128xf32>
    %314 = arith.addf %295, %313 : vector<16x128xf32>
    %c0_115 = arith.constant 0 : index
    %c0_116 = arith.constant 0 : index
    %c0_117 = arith.constant 0 : index
    %315 = vector.load %arg25[%c0_115, %c0_116, %c0_117] : memref<3x1x128xf32, #tpu.memory_space<vmem>>, vector<1x1x128xf32>
    %316 = vector.shape_cast %315 : vector<1x1x128xf32> to vector<1x128xf32>
    %c0_118 = arith.constant 0 : index
    %c0_119 = arith.constant 0 : index
    %c0_120 = arith.constant 0 : index
    %317 = vector.load %arg26[%c0_118, %c0_119, %c0_120] : memref<3x1x128xf32, #tpu.memory_space<vmem>>, vector<1x1x128xf32>
    %318 = vector.shape_cast %317 : vector<1x1x128xf32> to vector<1x128xf32>
    %cst_121 = arith.constant dense<0.000000e+00> : vector<16xf32>
    %319 = vector.multi_reduction <add>, %314, %cst_121 [1] : vector<16x128xf32> to vector<16xf32>
    %320 = vector.shape_cast %319 : vector<16xf32> to vector<16x1xf32>
    %cst_122 = arith.constant 1.280000e+02 : f32
    %321 = vector.broadcast %cst_122 : f32 to vector<16x1xf32>
    %322 = arith.divf %320, %321 : vector<16x1xf32>
    %323 = vector.broadcast %322 : vector<16x1xf32> to vector<16x128xf32>
    %324 = arith.subf %314, %323 : vector<16x128xf32>
    %325 = arith.mulf %324, %324 : vector<16x128xf32>
    %cst_123 = arith.constant dense<0.000000e+00> : vector<16xf32>
    %326 = vector.multi_reduction <add>, %325, %cst_123 [1] : vector<16x128xf32> to vector<16xf32>
    %327 = vector.shape_cast %326 : vector<16xf32> to vector<16x1xf32>
    %cst_124 = arith.constant 1.280000e+02 : f32
    %328 = vector.broadcast %cst_124 : f32 to vector<16x1xf32>
    %329 = arith.divf %327, %328 : vector<16x1xf32>
    %330 = vector.broadcast %322 : vector<16x1xf32> to vector<16x128xf32>
    %331 = arith.subf %314, %330 : vector<16x128xf32>
    %cst_125 = arith.constant 9.99999974E-6 : f32
    %332 = vector.broadcast %cst_125 : f32 to vector<16x1xf32>
    %333 = arith.addf %329, %332 : vector<16x1xf32>
    %334 = math.rsqrt %333 : vector<16x1xf32>
    %335 = vector.broadcast %334 : vector<16x1xf32> to vector<16x128xf32>
    %336 = arith.mulf %331, %335 : vector<16x128xf32>
    %337 = vector.broadcast %316 : vector<1x128xf32> to vector<16x128xf32>
    %338 = arith.mulf %336, %337 : vector<16x128xf32>
    %339 = vector.broadcast %318 : vector<1x128xf32> to vector<16x128xf32>
    %340 = arith.addf %338, %339 : vector<16x128xf32>
    %c1 = arith.constant 1 : index
    %c0_126 = arith.constant 0 : index
    %c0_127 = arith.constant 0 : index
    %341 = vector.load %arg11[%c1, %c0_126, %c0_127] : memref<3x128x384xbf16, #tpu.memory_space<vmem>>, vector<1x128x384xbf16>
    %342 = vector.shape_cast %341 : vector<1x128x384xbf16> to vector<128x384xbf16>
    %343 = arith.truncf %340 : vector<16x128xf32> to vector<16x128xbf16>
    %cst_128 = arith.constant dense<0.000000e+00> : vector<16x384xf32>
    %344 = tpu.matmul %343, %342, %cst_128 {dimension_numbers = #tpu.dot_dimension_numbers<[1], [0], [0], [1], [0, 0, 1, 1], [], []>} : vector<16x128xbf16>, vector<128x384xbf16>, vector<16x384xf32> -> vector<16x384xf32>
    %c1_129 = arith.constant 1 : index
    %c0_130 = arith.constant 0 : index
    %c0_131 = arith.constant 0 : index
    %345 = vector.load %arg12[%c1_129, %c0_130, %c0_131] : memref<3x1x384xf32, #tpu.memory_space<vmem>>, vector<1x1x384xf32>
    %346 = vector.shape_cast %345 : vector<1x1x384xf32> to vector<1x384xf32>
    %347 = vector.broadcast %346 : vector<1x384xf32> to vector<16x384xf32>
    %348 = arith.addf %344, %347 : vector<16x384xf32>
    %349 = vector.extract_strided_slice %348 {offsets = [0, 0], sizes = [16, 32], strides = [1, 1]} : vector<16x384xf32> to vector<16x32xf32>
    %350 = vector.extract_strided_slice %348 {offsets = [0, 128], sizes = [16, 32], strides = [1, 1]} : vector<16x384xf32> to vector<16x32xf32>
    %351 = vector.extract_strided_slice %348 {offsets = [0, 256], sizes = [16, 32], strides = [1, 1]} : vector<16x384xf32> to vector<16x32xf32>
    %352 = arith.truncf %349 : vector<16x32xf32> to vector<16x32xbf16>
    %353 = arith.truncf %350 : vector<16x32xf32> to vector<16x32xbf16>
    %cst_132 = arith.constant dense<0.000000e+00> : vector<16x16xf32>
    %354 = tpu.matmul %352, %353, %cst_132 {dimension_numbers = #tpu.dot_dimension_numbers<[1], [1], [0], [0], [0, 0, 1, 0], [], []>} : vector<16x32xbf16>, vector<16x32xbf16>, vector<16x16xf32> -> vector<16x16xf32>
    %cst_133 = arith.constant 0.176776692 : f32
    %355 = vector.broadcast %cst_133 : f32 to vector<16x16xf32>
    %356 = arith.mulf %354, %355 : vector<16x16xf32>
    %357 = vector.extract_strided_slice %75 {offsets = [0, 0, 0], sizes = [1, 16, 16], strides = [1, 1, 1]} : vector<4x16x16xf32> to vector<1x16x16xf32>
    %358 = vector.shape_cast %357 : vector<1x16x16xf32> to vector<16x16xf32>
    %359 = arith.addf %356, %358 : vector<16x16xf32>
    %cst_134 = arith.constant dense<0xFF800000> : vector<16xf32>
    %360 = vector.multi_reduction <maximumf>, %359, %cst_134 [1] : vector<16x16xf32> to vector<16xf32>
    %361 = vector.shape_cast %360 : vector<16xf32> to vector<16x1xf32>
    %362 = vector.broadcast %361 : vector<16x1xf32> to vector<16x16xf32>
    %363 = arith.subf %359, %362 : vector<16x16xf32>
    %364 = math.exp %363 : vector<16x16xf32>
    %cst_135 = arith.constant dense<0.000000e+00> : vector<16xf32>
    %365 = vector.multi_reduction <add>, %364, %cst_135 [1] : vector<16x16xf32> to vector<16xf32>
    %366 = vector.shape_cast %365 : vector<16xf32> to vector<16x1xf32>
    %367 = tpu.reciprocal %366 {approx = true} : vector<16x1xf32> -> vector<16x1xf32>
    %368 = vector.broadcast %367 : vector<16x1xf32> to vector<16x16xf32>
    %369 = arith.mulf %364, %368 : vector<16x16xf32>
    %370 = arith.truncf %369 : vector<16x16xf32> to vector<16x16xbf16>
    %371 = arith.truncf %351 : vector<16x32xf32> to vector<16x32xbf16>
    %cst_136 = arith.constant dense<0.000000e+00> : vector<16x32xf32>
    %372 = tpu.matmul %370, %371, %cst_136 {dimension_numbers = #tpu.dot_dimension_numbers<[1], [0], [0], [1], [0, 0, 1, 1], [], []>} : vector<16x16xbf16>, vector<16x32xbf16>, vector<16x32xf32> -> vector<16x32xf32>
    %373 = vector.extract_strided_slice %348 {offsets = [0, 32], sizes = [16, 32], strides = [1, 1]} : vector<16x384xf32> to vector<16x32xf32>
    %374 = vector.extract_strided_slice %348 {offsets = [0, 160], sizes = [16, 32], strides = [1, 1]} : vector<16x384xf32> to vector<16x32xf32>
    %375 = vector.extract_strided_slice %348 {offsets = [0, 288], sizes = [16, 32], strides = [1, 1]} : vector<16x384xf32> to vector<16x32xf32>
    %376 = arith.truncf %373 : vector<16x32xf32> to vector<16x32xbf16>
    %377 = arith.truncf %374 : vector<16x32xf32> to vector<16x32xbf16>
    %cst_137 = arith.constant dense<0.000000e+00> : vector<16x16xf32>
    %378 = tpu.matmul %376, %377, %cst_137 {dimension_numbers = #tpu.dot_dimension_numbers<[1], [1], [0], [0], [0, 0, 1, 0], [], []>} : vector<16x32xbf16>, vector<16x32xbf16>, vector<16x16xf32> -> vector<16x16xf32>
    %cst_138 = arith.constant 0.176776692 : f32
    %379 = vector.broadcast %cst_138 : f32 to vector<16x16xf32>
    %380 = arith.mulf %378, %379 : vector<16x16xf32>
    %381 = vector.extract_strided_slice %75 {offsets = [1, 0, 0], sizes = [1, 16, 16], strides = [1, 1, 1]} : vector<4x16x16xf32> to vector<1x16x16xf32>
    %382 = vector.shape_cast %381 : vector<1x16x16xf32> to vector<16x16xf32>
    %383 = arith.addf %380, %382 : vector<16x16xf32>
    %cst_139 = arith.constant dense<0xFF800000> : vector<16xf32>
    %384 = vector.multi_reduction <maximumf>, %383, %cst_139 [1] : vector<16x16xf32> to vector<16xf32>
    %385 = vector.shape_cast %384 : vector<16xf32> to vector<16x1xf32>
    %386 = vector.broadcast %385 : vector<16x1xf32> to vector<16x16xf32>
    %387 = arith.subf %383, %386 : vector<16x16xf32>
    %388 = math.exp %387 : vector<16x16xf32>
    %cst_140 = arith.constant dense<0.000000e+00> : vector<16xf32>
    %389 = vector.multi_reduction <add>, %388, %cst_140 [1] : vector<16x16xf32> to vector<16xf32>
    %390 = vector.shape_cast %389 : vector<16xf32> to vector<16x1xf32>
    %391 = tpu.reciprocal %390 {approx = true} : vector<16x1xf32> -> vector<16x1xf32>
    %392 = vector.broadcast %391 : vector<16x1xf32> to vector<16x16xf32>
    %393 = arith.mulf %388, %392 : vector<16x16xf32>
    %394 = arith.truncf %393 : vector<16x16xf32> to vector<16x16xbf16>
    %395 = arith.truncf %375 : vector<16x32xf32> to vector<16x32xbf16>
    %cst_141 = arith.constant dense<0.000000e+00> : vector<16x32xf32>
    %396 = tpu.matmul %394, %395, %cst_141 {dimension_numbers = #tpu.dot_dimension_numbers<[1], [0], [0], [1], [0, 0, 1, 1], [], []>} : vector<16x16xbf16>, vector<16x32xbf16>, vector<16x32xf32> -> vector<16x32xf32>
    %397 = vector.extract_strided_slice %348 {offsets = [0, 64], sizes = [16, 32], strides = [1, 1]} : vector<16x384xf32> to vector<16x32xf32>
    %398 = vector.extract_strided_slice %348 {offsets = [0, 192], sizes = [16, 32], strides = [1, 1]} : vector<16x384xf32> to vector<16x32xf32>
    %399 = vector.extract_strided_slice %348 {offsets = [0, 320], sizes = [16, 32], strides = [1, 1]} : vector<16x384xf32> to vector<16x32xf32>
    %400 = arith.truncf %397 : vector<16x32xf32> to vector<16x32xbf16>
    %401 = arith.truncf %398 : vector<16x32xf32> to vector<16x32xbf16>
    %cst_142 = arith.constant dense<0.000000e+00> : vector<16x16xf32>
    %402 = tpu.matmul %400, %401, %cst_142 {dimension_numbers = #tpu.dot_dimension_numbers<[1], [1], [0], [0], [0, 0, 1, 0], [], []>} : vector<16x32xbf16>, vector<16x32xbf16>, vector<16x16xf32> -> vector<16x16xf32>
    %cst_143 = arith.constant 0.176776692 : f32
    %403 = vector.broadcast %cst_143 : f32 to vector<16x16xf32>
    %404 = arith.mulf %402, %403 : vector<16x16xf32>
    %405 = vector.extract_strided_slice %75 {offsets = [2, 0, 0], sizes = [1, 16, 16], strides = [1, 1, 1]} : vector<4x16x16xf32> to vector<1x16x16xf32>
    %406 = vector.shape_cast %405 : vector<1x16x16xf32> to vector<16x16xf32>
    %407 = arith.addf %404, %406 : vector<16x16xf32>
    %cst_144 = arith.constant dense<0xFF800000> : vector<16xf32>
    %408 = vector.multi_reduction <maximumf>, %407, %cst_144 [1] : vector<16x16xf32> to vector<16xf32>
    %409 = vector.shape_cast %408 : vector<16xf32> to vector<16x1xf32>
    %410 = vector.broadcast %409 : vector<16x1xf32> to vector<16x16xf32>
    %411 = arith.subf %407, %410 : vector<16x16xf32>
    %412 = math.exp %411 : vector<16x16xf32>
    %cst_145 = arith.constant dense<0.000000e+00> : vector<16xf32>
    %413 = vector.multi_reduction <add>, %412, %cst_145 [1] : vector<16x16xf32> to vector<16xf32>
    %414 = vector.shape_cast %413 : vector<16xf32> to vector<16x1xf32>
    %415 = tpu.reciprocal %414 {approx = true} : vector<16x1xf32> -> vector<16x1xf32>
    %416 = vector.broadcast %415 : vector<16x1xf32> to vector<16x16xf32>
    %417 = arith.mulf %412, %416 : vector<16x16xf32>
    %418 = arith.truncf %417 : vector<16x16xf32> to vector<16x16xbf16>
    %419 = arith.truncf %399 : vector<16x32xf32> to vector<16x32xbf16>
    %cst_146 = arith.constant dense<0.000000e+00> : vector<16x32xf32>
    %420 = tpu.matmul %418, %419, %cst_146 {dimension_numbers = #tpu.dot_dimension_numbers<[1], [0], [0], [1], [0, 0, 1, 1], [], []>} : vector<16x16xbf16>, vector<16x32xbf16>, vector<16x32xf32> -> vector<16x32xf32>
    %421 = vector.extract_strided_slice %348 {offsets = [0, 96], sizes = [16, 32], strides = [1, 1]} : vector<16x384xf32> to vector<16x32xf32>
    %422 = vector.extract_strided_slice %348 {offsets = [0, 224], sizes = [16, 32], strides = [1, 1]} : vector<16x384xf32> to vector<16x32xf32>
    %423 = vector.extract_strided_slice %348 {offsets = [0, 352], sizes = [16, 32], strides = [1, 1]} : vector<16x384xf32> to vector<16x32xf32>
    %424 = arith.truncf %421 : vector<16x32xf32> to vector<16x32xbf16>
    %425 = arith.truncf %422 : vector<16x32xf32> to vector<16x32xbf16>
    %cst_147 = arith.constant dense<0.000000e+00> : vector<16x16xf32>
    %426 = tpu.matmul %424, %425, %cst_147 {dimension_numbers = #tpu.dot_dimension_numbers<[1], [1], [0], [0], [0, 0, 1, 0], [], []>} : vector<16x32xbf16>, vector<16x32xbf16>, vector<16x16xf32> -> vector<16x16xf32>
    %cst_148 = arith.constant 0.176776692 : f32
    %427 = vector.broadcast %cst_148 : f32 to vector<16x16xf32>
    %428 = arith.mulf %426, %427 : vector<16x16xf32>
    %429 = vector.extract_strided_slice %75 {offsets = [3, 0, 0], sizes = [1, 16, 16], strides = [1, 1, 1]} : vector<4x16x16xf32> to vector<1x16x16xf32>
    %430 = vector.shape_cast %429 : vector<1x16x16xf32> to vector<16x16xf32>
    %431 = arith.addf %428, %430 : vector<16x16xf32>
    %cst_149 = arith.constant dense<0xFF800000> : vector<16xf32>
    %432 = vector.multi_reduction <maximumf>, %431, %cst_149 [1] : vector<16x16xf32> to vector<16xf32>
    %433 = vector.shape_cast %432 : vector<16xf32> to vector<16x1xf32>
    %434 = vector.broadcast %433 : vector<16x1xf32> to vector<16x16xf32>
    %435 = arith.subf %431, %434 : vector<16x16xf32>
    %436 = math.exp %435 : vector<16x16xf32>
    %cst_150 = arith.constant dense<0.000000e+00> : vector<16xf32>
    %437 = vector.multi_reduction <add>, %436, %cst_150 [1] : vector<16x16xf32> to vector<16xf32>
    %438 = vector.shape_cast %437 : vector<16xf32> to vector<16x1xf32>
    %439 = tpu.reciprocal %438 {approx = true} : vector<16x1xf32> -> vector<16x1xf32>
    %440 = vector.broadcast %439 : vector<16x1xf32> to vector<16x16xf32>
    %441 = arith.mulf %436, %440 : vector<16x16xf32>
    %442 = arith.truncf %441 : vector<16x16xf32> to vector<16x16xbf16>
    %443 = arith.truncf %423 : vector<16x32xf32> to vector<16x32xbf16>
    %cst_151 = arith.constant dense<0.000000e+00> : vector<16x32xf32>
    %444 = tpu.matmul %442, %443, %cst_151 {dimension_numbers = #tpu.dot_dimension_numbers<[1], [0], [0], [1], [0, 0, 1, 1], [], []>} : vector<16x16xbf16>, vector<16x32xbf16>, vector<16x32xf32> -> vector<16x32xf32>
    %445 = tpu.concatenate %372, %396, %420, %444 in 1 : vector<16x32xf32>, vector<16x32xf32>, vector<16x32xf32>, vector<16x32xf32> -> vector<16x128xf32>
    %c1_152 = arith.constant 1 : index
    %c0_153 = arith.constant 0 : index
    %c0_154 = arith.constant 0 : index
    %446 = vector.load %arg13[%c1_152, %c0_153, %c0_154] : memref<3x128x128xbf16, #tpu.memory_space<vmem>>, vector<1x128x128xbf16>
    %447 = vector.shape_cast %446 : vector<1x128x128xbf16> to vector<128x128xbf16>
    %448 = arith.truncf %445 : vector<16x128xf32> to vector<16x128xbf16>
    %cst_155 = arith.constant dense<0.000000e+00> : vector<16x128xf32>
    %449 = tpu.matmul %448, %447, %cst_155 {dimension_numbers = #tpu.dot_dimension_numbers<[1], [0], [0], [1], [0, 0, 1, 1], [], []>} : vector<16x128xbf16>, vector<128x128xbf16>, vector<16x128xf32> -> vector<16x128xf32>
    %c1_156 = arith.constant 1 : index
    %c0_157 = arith.constant 0 : index
    %c0_158 = arith.constant 0 : index
    %450 = vector.load %arg14[%c1_156, %c0_157, %c0_158] : memref<3x1x128xf32, #tpu.memory_space<vmem>>, vector<1x1x128xf32>
    %451 = vector.shape_cast %450 : vector<1x1x128xf32> to vector<1x128xf32>
    %452 = vector.broadcast %451 : vector<1x128xf32> to vector<16x128xf32>
    %453 = arith.addf %449, %452 : vector<16x128xf32>
    %454 = arith.addf %340, %453 : vector<16x128xf32>
    %c1_159 = arith.constant 1 : index
    %c0_160 = arith.constant 0 : index
    %c0_161 = arith.constant 0 : index
    %455 = vector.load %arg15[%c1_159, %c0_160, %c0_161] : memref<3x1x128xf32, #tpu.memory_space<vmem>>, vector<1x1x128xf32>
    %456 = vector.shape_cast %455 : vector<1x1x128xf32> to vector<1x128xf32>
    %c1_162 = arith.constant 1 : index
    %c0_163 = arith.constant 0 : index
    %c0_164 = arith.constant 0 : index
    %457 = vector.load %arg16[%c1_162, %c0_163, %c0_164] : memref<3x1x128xf32, #tpu.memory_space<vmem>>, vector<1x1x128xf32>
    %458 = vector.shape_cast %457 : vector<1x1x128xf32> to vector<1x128xf32>
    %cst_165 = arith.constant dense<0.000000e+00> : vector<16xf32>
    %459 = vector.multi_reduction <add>, %454, %cst_165 [1] : vector<16x128xf32> to vector<16xf32>
    %460 = vector.shape_cast %459 : vector<16xf32> to vector<16x1xf32>
    %cst_166 = arith.constant 1.280000e+02 : f32
    %461 = vector.broadcast %cst_166 : f32 to vector<16x1xf32>
    %462 = arith.divf %460, %461 : vector<16x1xf32>
    %463 = vector.broadcast %462 : vector<16x1xf32> to vector<16x128xf32>
    %464 = arith.subf %454, %463 : vector<16x128xf32>
    %465 = arith.mulf %464, %464 : vector<16x128xf32>
    %cst_167 = arith.constant dense<0.000000e+00> : vector<16xf32>
    %466 = vector.multi_reduction <add>, %465, %cst_167 [1] : vector<16x128xf32> to vector<16xf32>
    %467 = vector.shape_cast %466 : vector<16xf32> to vector<16x1xf32>
    %cst_168 = arith.constant 1.280000e+02 : f32
    %468 = vector.broadcast %cst_168 : f32 to vector<16x1xf32>
    %469 = arith.divf %467, %468 : vector<16x1xf32>
    %470 = vector.broadcast %462 : vector<16x1xf32> to vector<16x128xf32>
    %471 = arith.subf %454, %470 : vector<16x128xf32>
    %cst_169 = arith.constant 9.99999974E-6 : f32
    %472 = vector.broadcast %cst_169 : f32 to vector<16x1xf32>
    %473 = arith.addf %469, %472 : vector<16x1xf32>
    %474 = math.rsqrt %473 : vector<16x1xf32>
    %475 = vector.broadcast %474 : vector<16x1xf32> to vector<16x128xf32>
    %476 = arith.mulf %471, %475 : vector<16x128xf32>
    %477 = vector.broadcast %456 : vector<1x128xf32> to vector<16x128xf32>
    %478 = arith.mulf %476, %477 : vector<16x128xf32>
    %479 = vector.broadcast %458 : vector<1x128xf32> to vector<16x128xf32>
    %480 = arith.addf %478, %479 : vector<16x128xf32>
    %481 = arith.truncf %480 : vector<16x128xf32> to vector<16x128xbf16>
    %cst_170 = arith.constant dense<0.000000e+00> : vector<144x128xf32>
    %482 = tpu.matmul %76, %481, %cst_170 {dimension_numbers = #tpu.dot_dimension_numbers<[1], [0], [0], [1], [0, 0, 1, 1], [], []>} : vector<144x16xbf16>, vector<16x128xbf16>, vector<144x128xf32> -> vector<144x128xf32>
    %c1_171 = arith.constant 1 : index
    %c0_172 = arith.constant 0 : index
    %c0_173 = arith.constant 0 : index
    %483 = vector.load %arg17[%c1_171, %c0_172, %c0_173] : memref<3x9x128xf32, #tpu.memory_space<vmem>>, vector<1x9x128xf32>
    %484 = vector.shape_cast %483 : vector<1x9x128xf32> to vector<9x128xf32>
    %485 = vector.extract_strided_slice %482 {offsets = [0, 0], sizes = [16, 128], strides = [1, 1]} : vector<144x128xf32> to vector<16x128xf32>
    %486 = vector.extract_strided_slice %484 {offsets = [0, 0], sizes = [1, 128], strides = [1, 1]} : vector<9x128xf32> to vector<1x128xf32>
    %487 = vector.broadcast %486 : vector<1x128xf32> to vector<16x128xf32>
    %488 = arith.mulf %485, %487 : vector<16x128xf32>
    %489 = vector.extract_strided_slice %482 {offsets = [16, 0], sizes = [16, 128], strides = [1, 1]} : vector<144x128xf32> to vector<16x128xf32>
    %490 = vector.extract_strided_slice %484 {offsets = [1, 0], sizes = [1, 128], strides = [1, 1]} : vector<9x128xf32> to vector<1x128xf32>
    %491 = vector.broadcast %490 : vector<1x128xf32> to vector<16x128xf32>
    %492 = arith.mulf %489, %491 : vector<16x128xf32>
    %493 = arith.addf %488, %492 : vector<16x128xf32>
    %494 = vector.extract_strided_slice %482 {offsets = [32, 0], sizes = [16, 128], strides = [1, 1]} : vector<144x128xf32> to vector<16x128xf32>
    %495 = vector.extract_strided_slice %484 {offsets = [2, 0], sizes = [1, 128], strides = [1, 1]} : vector<9x128xf32> to vector<1x128xf32>
    %496 = vector.broadcast %495 : vector<1x128xf32> to vector<16x128xf32>
    %497 = arith.mulf %494, %496 : vector<16x128xf32>
    %498 = arith.addf %493, %497 : vector<16x128xf32>
    %499 = vector.extract_strided_slice %482 {offsets = [48, 0], sizes = [16, 128], strides = [1, 1]} : vector<144x128xf32> to vector<16x128xf32>
    %500 = vector.extract_strided_slice %484 {offsets = [3, 0], sizes = [1, 128], strides = [1, 1]} : vector<9x128xf32> to vector<1x128xf32>
    %501 = vector.broadcast %500 : vector<1x128xf32> to vector<16x128xf32>
    %502 = arith.mulf %499, %501 : vector<16x128xf32>
    %503 = arith.addf %498, %502 : vector<16x128xf32>
    %504 = vector.extract_strided_slice %482 {offsets = [64, 0], sizes = [16, 128], strides = [1, 1]} : vector<144x128xf32> to vector<16x128xf32>
    %505 = vector.extract_strided_slice %484 {offsets = [4, 0], sizes = [1, 128], strides = [1, 1]} : vector<9x128xf32> to vector<1x128xf32>
    %506 = vector.broadcast %505 : vector<1x128xf32> to vector<16x128xf32>
    %507 = arith.mulf %504, %506 : vector<16x128xf32>
    %508 = arith.addf %503, %507 : vector<16x128xf32>
    %509 = vector.extract_strided_slice %482 {offsets = [80, 0], sizes = [16, 128], strides = [1, 1]} : vector<144x128xf32> to vector<16x128xf32>
    %510 = vector.extract_strided_slice %484 {offsets = [5, 0], sizes = [1, 128], strides = [1, 1]} : vector<9x128xf32> to vector<1x128xf32>
    %511 = vector.broadcast %510 : vector<1x128xf32> to vector<16x128xf32>
    %512 = arith.mulf %509, %511 : vector<16x128xf32>
    %513 = arith.addf %508, %512 : vector<16x128xf32>
    %514 = vector.extract_strided_slice %482 {offsets = [96, 0], sizes = [16, 128], strides = [1, 1]} : vector<144x128xf32> to vector<16x128xf32>
    %515 = vector.extract_strided_slice %484 {offsets = [6, 0], sizes = [1, 128], strides = [1, 1]} : vector<9x128xf32> to vector<1x128xf32>
    %516 = vector.broadcast %515 : vector<1x128xf32> to vector<16x128xf32>
    %517 = arith.mulf %514, %516 : vector<16x128xf32>
    %518 = arith.addf %513, %517 : vector<16x128xf32>
    %519 = vector.extract_strided_slice %482 {offsets = [112, 0], sizes = [16, 128], strides = [1, 1]} : vector<144x128xf32> to vector<16x128xf32>
    %520 = vector.extract_strided_slice %484 {offsets = [7, 0], sizes = [1, 128], strides = [1, 1]} : vector<9x128xf32> to vector<1x128xf32>
    %521 = vector.broadcast %520 : vector<1x128xf32> to vector<16x128xf32>
    %522 = arith.mulf %519, %521 : vector<16x128xf32>
    %523 = arith.addf %518, %522 : vector<16x128xf32>
    %524 = vector.extract_strided_slice %482 {offsets = [128, 0], sizes = [16, 128], strides = [1, 1]} : vector<144x128xf32> to vector<16x128xf32>
    %525 = vector.extract_strided_slice %484 {offsets = [8, 0], sizes = [1, 128], strides = [1, 1]} : vector<9x128xf32> to vector<1x128xf32>
    %526 = vector.broadcast %525 : vector<1x128xf32> to vector<16x128xf32>
    %527 = arith.mulf %524, %526 : vector<16x128xf32>
    %528 = arith.addf %523, %527 : vector<16x128xf32>
    %529 = arith.addf %480, %528 : vector<16x128xf32>
    %c1_174 = arith.constant 1 : index
    %c0_175 = arith.constant 0 : index
    %c0_176 = arith.constant 0 : index
    %530 = vector.load %arg18[%c1_174, %c0_175, %c0_176] : memref<3x1x128xf32, #tpu.memory_space<vmem>>, vector<1x1x128xf32>
    %531 = vector.shape_cast %530 : vector<1x1x128xf32> to vector<1x128xf32>
    %532 = vector.broadcast %531 : vector<1x128xf32> to vector<16x128xf32>
    %533 = arith.addf %529, %532 : vector<16x128xf32>
    %c1_177 = arith.constant 1 : index
    %c0_178 = arith.constant 0 : index
    %c0_179 = arith.constant 0 : index
    %534 = vector.load %arg19[%c1_177, %c0_178, %c0_179] : memref<3x1x128xf32, #tpu.memory_space<vmem>>, vector<1x1x128xf32>
    %535 = vector.shape_cast %534 : vector<1x1x128xf32> to vector<1x128xf32>
    %c1_180 = arith.constant 1 : index
    %c0_181 = arith.constant 0 : index
    %c0_182 = arith.constant 0 : index
    %536 = vector.load %arg20[%c1_180, %c0_181, %c0_182] : memref<3x1x128xf32, #tpu.memory_space<vmem>>, vector<1x1x128xf32>
    %537 = vector.shape_cast %536 : vector<1x1x128xf32> to vector<1x128xf32>
    %cst_183 = arith.constant dense<0.000000e+00> : vector<16xf32>
    %538 = vector.multi_reduction <add>, %533, %cst_183 [1] : vector<16x128xf32> to vector<16xf32>
    %539 = vector.shape_cast %538 : vector<16xf32> to vector<16x1xf32>
    %cst_184 = arith.constant 1.280000e+02 : f32
    %540 = vector.broadcast %cst_184 : f32 to vector<16x1xf32>
    %541 = arith.divf %539, %540 : vector<16x1xf32>
    %542 = vector.broadcast %541 : vector<16x1xf32> to vector<16x128xf32>
    %543 = arith.subf %533, %542 : vector<16x128xf32>
    %544 = arith.mulf %543, %543 : vector<16x128xf32>
    %cst_185 = arith.constant dense<0.000000e+00> : vector<16xf32>
    %545 = vector.multi_reduction <add>, %544, %cst_185 [1] : vector<16x128xf32> to vector<16xf32>
    %546 = vector.shape_cast %545 : vector<16xf32> to vector<16x1xf32>
    %cst_186 = arith.constant 1.280000e+02 : f32
    %547 = vector.broadcast %cst_186 : f32 to vector<16x1xf32>
    %548 = arith.divf %546, %547 : vector<16x1xf32>
    %549 = vector.broadcast %541 : vector<16x1xf32> to vector<16x128xf32>
    %550 = arith.subf %533, %549 : vector<16x128xf32>
    %cst_187 = arith.constant 9.99999974E-6 : f32
    %551 = vector.broadcast %cst_187 : f32 to vector<16x1xf32>
    %552 = arith.addf %548, %551 : vector<16x1xf32>
    %553 = math.rsqrt %552 : vector<16x1xf32>
    %554 = vector.broadcast %553 : vector<16x1xf32> to vector<16x128xf32>
    %555 = arith.mulf %550, %554 : vector<16x128xf32>
    %556 = vector.broadcast %535 : vector<1x128xf32> to vector<16x128xf32>
    %557 = arith.mulf %555, %556 : vector<16x128xf32>
    %558 = vector.broadcast %537 : vector<1x128xf32> to vector<16x128xf32>
    %559 = arith.addf %557, %558 : vector<16x128xf32>
    %c1_188 = arith.constant 1 : index
    %c0_189 = arith.constant 0 : index
    %c0_190 = arith.constant 0 : index
    %560 = vector.load %arg21[%c1_188, %c0_189, %c0_190] : memref<3x128x128xbf16, #tpu.memory_space<vmem>>, vector<1x128x128xbf16>
    %561 = vector.shape_cast %560 : vector<1x128x128xbf16> to vector<128x128xbf16>
    %562 = arith.truncf %559 : vector<16x128xf32> to vector<16x128xbf16>
    %cst_191 = arith.constant dense<0.000000e+00> : vector<16x128xf32>
    %563 = tpu.matmul %562, %561, %cst_191 {dimension_numbers = #tpu.dot_dimension_numbers<[1], [0], [0], [1], [0, 0, 1, 1], [], []>} : vector<16x128xbf16>, vector<128x128xbf16>, vector<16x128xf32> -> vector<16x128xf32>
    %c1_192 = arith.constant 1 : index
    %c0_193 = arith.constant 0 : index
    %c0_194 = arith.constant 0 : index
    %564 = vector.load %arg22[%c1_192, %c0_193, %c0_194] : memref<3x1x128xf32, #tpu.memory_space<vmem>>, vector<1x1x128xf32>
    %565 = vector.shape_cast %564 : vector<1x1x128xf32> to vector<1x128xf32>
    %566 = vector.broadcast %565 : vector<1x128xf32> to vector<16x128xf32>
    %567 = arith.addf %563, %566 : vector<16x128xf32>
    %cst_195 = arith.constant 0.000000e+00 : f32
    %568 = vector.broadcast %cst_195 : f32 to vector<16x128xf32>
    %569 = arith.maximumf %567, %568 : vector<16x128xf32>
    %c1_196 = arith.constant 1 : index
    %c0_197 = arith.constant 0 : index
    %c0_198 = arith.constant 0 : index
    %570 = vector.load %arg23[%c1_196, %c0_197, %c0_198] : memref<3x128x128xbf16, #tpu.memory_space<vmem>>, vector<1x128x128xbf16>
    %571 = vector.shape_cast %570 : vector<1x128x128xbf16> to vector<128x128xbf16>
    %572 = arith.truncf %569 : vector<16x128xf32> to vector<16x128xbf16>
    %cst_199 = arith.constant dense<0.000000e+00> : vector<16x128xf32>
    %573 = tpu.matmul %572, %571, %cst_199 {dimension_numbers = #tpu.dot_dimension_numbers<[1], [0], [0], [1], [0, 0, 1, 1], [], []>} : vector<16x128xbf16>, vector<128x128xbf16>, vector<16x128xf32> -> vector<16x128xf32>
    %c1_200 = arith.constant 1 : index
    %c0_201 = arith.constant 0 : index
    %c0_202 = arith.constant 0 : index
    %574 = vector.load %arg24[%c1_200, %c0_201, %c0_202] : memref<3x1x128xf32, #tpu.memory_space<vmem>>, vector<1x1x128xf32>
    %575 = vector.shape_cast %574 : vector<1x1x128xf32> to vector<1x128xf32>
    %576 = vector.broadcast %575 : vector<1x128xf32> to vector<16x128xf32>
    %577 = arith.addf %573, %576 : vector<16x128xf32>
    %578 = arith.addf %559, %577 : vector<16x128xf32>
    %c1_203 = arith.constant 1 : index
    %c0_204 = arith.constant 0 : index
    %c0_205 = arith.constant 0 : index
    %579 = vector.load %arg25[%c1_203, %c0_204, %c0_205] : memref<3x1x128xf32, #tpu.memory_space<vmem>>, vector<1x1x128xf32>
    %580 = vector.shape_cast %579 : vector<1x1x128xf32> to vector<1x128xf32>
    %c1_206 = arith.constant 1 : index
    %c0_207 = arith.constant 0 : index
    %c0_208 = arith.constant 0 : index
    %581 = vector.load %arg26[%c1_206, %c0_207, %c0_208] : memref<3x1x128xf32, #tpu.memory_space<vmem>>, vector<1x1x128xf32>
    %582 = vector.shape_cast %581 : vector<1x1x128xf32> to vector<1x128xf32>
    %cst_209 = arith.constant dense<0.000000e+00> : vector<16xf32>
    %583 = vector.multi_reduction <add>, %578, %cst_209 [1] : vector<16x128xf32> to vector<16xf32>
    %584 = vector.shape_cast %583 : vector<16xf32> to vector<16x1xf32>
    %cst_210 = arith.constant 1.280000e+02 : f32
    %585 = vector.broadcast %cst_210 : f32 to vector<16x1xf32>
    %586 = arith.divf %584, %585 : vector<16x1xf32>
    %587 = vector.broadcast %586 : vector<16x1xf32> to vector<16x128xf32>
    %588 = arith.subf %578, %587 : vector<16x128xf32>
    %589 = arith.mulf %588, %588 : vector<16x128xf32>
    %cst_211 = arith.constant dense<0.000000e+00> : vector<16xf32>
    %590 = vector.multi_reduction <add>, %589, %cst_211 [1] : vector<16x128xf32> to vector<16xf32>
    %591 = vector.shape_cast %590 : vector<16xf32> to vector<16x1xf32>
    %cst_212 = arith.constant 1.280000e+02 : f32
    %592 = vector.broadcast %cst_212 : f32 to vector<16x1xf32>
    %593 = arith.divf %591, %592 : vector<16x1xf32>
    %594 = vector.broadcast %586 : vector<16x1xf32> to vector<16x128xf32>
    %595 = arith.subf %578, %594 : vector<16x128xf32>
    %cst_213 = arith.constant 9.99999974E-6 : f32
    %596 = vector.broadcast %cst_213 : f32 to vector<16x1xf32>
    %597 = arith.addf %593, %596 : vector<16x1xf32>
    %598 = math.rsqrt %597 : vector<16x1xf32>
    %599 = vector.broadcast %598 : vector<16x1xf32> to vector<16x128xf32>
    %600 = arith.mulf %595, %599 : vector<16x128xf32>
    %601 = vector.broadcast %580 : vector<1x128xf32> to vector<16x128xf32>
    %602 = arith.mulf %600, %601 : vector<16x128xf32>
    %603 = vector.broadcast %582 : vector<1x128xf32> to vector<16x128xf32>
    %604 = arith.addf %602, %603 : vector<16x128xf32>
    %c2 = arith.constant 2 : index
    %c0_214 = arith.constant 0 : index
    %c0_215 = arith.constant 0 : index
    %605 = vector.load %arg11[%c2, %c0_214, %c0_215] : memref<3x128x384xbf16, #tpu.memory_space<vmem>>, vector<1x128x384xbf16>
    %606 = vector.shape_cast %605 : vector<1x128x384xbf16> to vector<128x384xbf16>
    %607 = arith.truncf %604 : vector<16x128xf32> to vector<16x128xbf16>
    %cst_216 = arith.constant dense<0.000000e+00> : vector<16x384xf32>
    %608 = tpu.matmul %607, %606, %cst_216 {dimension_numbers = #tpu.dot_dimension_numbers<[1], [0], [0], [1], [0, 0, 1, 1], [], []>} : vector<16x128xbf16>, vector<128x384xbf16>, vector<16x384xf32> -> vector<16x384xf32>
    %c2_217 = arith.constant 2 : index
    %c0_218 = arith.constant 0 : index
    %c0_219 = arith.constant 0 : index
    %609 = vector.load %arg12[%c2_217, %c0_218, %c0_219] : memref<3x1x384xf32, #tpu.memory_space<vmem>>, vector<1x1x384xf32>
    %610 = vector.shape_cast %609 : vector<1x1x384xf32> to vector<1x384xf32>
    %611 = vector.broadcast %610 : vector<1x384xf32> to vector<16x384xf32>
    %612 = arith.addf %608, %611 : vector<16x384xf32>
    %613 = vector.extract_strided_slice %612 {offsets = [0, 0], sizes = [16, 32], strides = [1, 1]} : vector<16x384xf32> to vector<16x32xf32>
    %614 = vector.extract_strided_slice %612 {offsets = [0, 128], sizes = [16, 32], strides = [1, 1]} : vector<16x384xf32> to vector<16x32xf32>
    %615 = vector.extract_strided_slice %612 {offsets = [0, 256], sizes = [16, 32], strides = [1, 1]} : vector<16x384xf32> to vector<16x32xf32>
    %616 = arith.truncf %613 : vector<16x32xf32> to vector<16x32xbf16>
    %617 = arith.truncf %614 : vector<16x32xf32> to vector<16x32xbf16>
    %cst_220 = arith.constant dense<0.000000e+00> : vector<16x16xf32>
    %618 = tpu.matmul %616, %617, %cst_220 {dimension_numbers = #tpu.dot_dimension_numbers<[1], [1], [0], [0], [0, 0, 1, 0], [], []>} : vector<16x32xbf16>, vector<16x32xbf16>, vector<16x16xf32> -> vector<16x16xf32>
    %cst_221 = arith.constant 0.176776692 : f32
    %619 = vector.broadcast %cst_221 : f32 to vector<16x16xf32>
    %620 = arith.mulf %618, %619 : vector<16x16xf32>
    %621 = vector.extract_strided_slice %75 {offsets = [0, 0, 0], sizes = [1, 16, 16], strides = [1, 1, 1]} : vector<4x16x16xf32> to vector<1x16x16xf32>
    %622 = vector.shape_cast %621 : vector<1x16x16xf32> to vector<16x16xf32>
    %623 = arith.addf %620, %622 : vector<16x16xf32>
    %cst_222 = arith.constant dense<0xFF800000> : vector<16xf32>
    %624 = vector.multi_reduction <maximumf>, %623, %cst_222 [1] : vector<16x16xf32> to vector<16xf32>
    %625 = vector.shape_cast %624 : vector<16xf32> to vector<16x1xf32>
    %626 = vector.broadcast %625 : vector<16x1xf32> to vector<16x16xf32>
    %627 = arith.subf %623, %626 : vector<16x16xf32>
    %628 = math.exp %627 : vector<16x16xf32>
    %cst_223 = arith.constant dense<0.000000e+00> : vector<16xf32>
    %629 = vector.multi_reduction <add>, %628, %cst_223 [1] : vector<16x16xf32> to vector<16xf32>
    %630 = vector.shape_cast %629 : vector<16xf32> to vector<16x1xf32>
    %631 = tpu.reciprocal %630 {approx = true} : vector<16x1xf32> -> vector<16x1xf32>
    %632 = vector.broadcast %631 : vector<16x1xf32> to vector<16x16xf32>
    %633 = arith.mulf %628, %632 : vector<16x16xf32>
    %634 = arith.truncf %633 : vector<16x16xf32> to vector<16x16xbf16>
    %635 = arith.truncf %615 : vector<16x32xf32> to vector<16x32xbf16>
    %cst_224 = arith.constant dense<0.000000e+00> : vector<16x32xf32>
    %636 = tpu.matmul %634, %635, %cst_224 {dimension_numbers = #tpu.dot_dimension_numbers<[1], [0], [0], [1], [0, 0, 1, 1], [], []>} : vector<16x16xbf16>, vector<16x32xbf16>, vector<16x32xf32> -> vector<16x32xf32>
    %637 = vector.extract_strided_slice %612 {offsets = [0, 32], sizes = [16, 32], strides = [1, 1]} : vector<16x384xf32> to vector<16x32xf32>
    %638 = vector.extract_strided_slice %612 {offsets = [0, 160], sizes = [16, 32], strides = [1, 1]} : vector<16x384xf32> to vector<16x32xf32>
    %639 = vector.extract_strided_slice %612 {offsets = [0, 288], sizes = [16, 32], strides = [1, 1]} : vector<16x384xf32> to vector<16x32xf32>
    %640 = arith.truncf %637 : vector<16x32xf32> to vector<16x32xbf16>
    %641 = arith.truncf %638 : vector<16x32xf32> to vector<16x32xbf16>
    %cst_225 = arith.constant dense<0.000000e+00> : vector<16x16xf32>
    %642 = tpu.matmul %640, %641, %cst_225 {dimension_numbers = #tpu.dot_dimension_numbers<[1], [1], [0], [0], [0, 0, 1, 0], [], []>} : vector<16x32xbf16>, vector<16x32xbf16>, vector<16x16xf32> -> vector<16x16xf32>
    %cst_226 = arith.constant 0.176776692 : f32
    %643 = vector.broadcast %cst_226 : f32 to vector<16x16xf32>
    %644 = arith.mulf %642, %643 : vector<16x16xf32>
    %645 = vector.extract_strided_slice %75 {offsets = [1, 0, 0], sizes = [1, 16, 16], strides = [1, 1, 1]} : vector<4x16x16xf32> to vector<1x16x16xf32>
    %646 = vector.shape_cast %645 : vector<1x16x16xf32> to vector<16x16xf32>
    %647 = arith.addf %644, %646 : vector<16x16xf32>
    %cst_227 = arith.constant dense<0xFF800000> : vector<16xf32>
    %648 = vector.multi_reduction <maximumf>, %647, %cst_227 [1] : vector<16x16xf32> to vector<16xf32>
    %649 = vector.shape_cast %648 : vector<16xf32> to vector<16x1xf32>
    %650 = vector.broadcast %649 : vector<16x1xf32> to vector<16x16xf32>
    %651 = arith.subf %647, %650 : vector<16x16xf32>
    %652 = math.exp %651 : vector<16x16xf32>
    %cst_228 = arith.constant dense<0.000000e+00> : vector<16xf32>
    %653 = vector.multi_reduction <add>, %652, %cst_228 [1] : vector<16x16xf32> to vector<16xf32>
    %654 = vector.shape_cast %653 : vector<16xf32> to vector<16x1xf32>
    %655 = tpu.reciprocal %654 {approx = true} : vector<16x1xf32> -> vector<16x1xf32>
    %656 = vector.broadcast %655 : vector<16x1xf32> to vector<16x16xf32>
    %657 = arith.mulf %652, %656 : vector<16x16xf32>
    %658 = arith.truncf %657 : vector<16x16xf32> to vector<16x16xbf16>
    %659 = arith.truncf %639 : vector<16x32xf32> to vector<16x32xbf16>
    %cst_229 = arith.constant dense<0.000000e+00> : vector<16x32xf32>
    %660 = tpu.matmul %658, %659, %cst_229 {dimension_numbers = #tpu.dot_dimension_numbers<[1], [0], [0], [1], [0, 0, 1, 1], [], []>} : vector<16x16xbf16>, vector<16x32xbf16>, vector<16x32xf32> -> vector<16x32xf32>
    %661 = vector.extract_strided_slice %612 {offsets = [0, 64], sizes = [16, 32], strides = [1, 1]} : vector<16x384xf32> to vector<16x32xf32>
    %662 = vector.extract_strided_slice %612 {offsets = [0, 192], sizes = [16, 32], strides = [1, 1]} : vector<16x384xf32> to vector<16x32xf32>
    %663 = vector.extract_strided_slice %612 {offsets = [0, 320], sizes = [16, 32], strides = [1, 1]} : vector<16x384xf32> to vector<16x32xf32>
    %664 = arith.truncf %661 : vector<16x32xf32> to vector<16x32xbf16>
    %665 = arith.truncf %662 : vector<16x32xf32> to vector<16x32xbf16>
    %cst_230 = arith.constant dense<0.000000e+00> : vector<16x16xf32>
    %666 = tpu.matmul %664, %665, %cst_230 {dimension_numbers = #tpu.dot_dimension_numbers<[1], [1], [0], [0], [0, 0, 1, 0], [], []>} : vector<16x32xbf16>, vector<16x32xbf16>, vector<16x16xf32> -> vector<16x16xf32>
    %cst_231 = arith.constant 0.176776692 : f32
    %667 = vector.broadcast %cst_231 : f32 to vector<16x16xf32>
    %668 = arith.mulf %666, %667 : vector<16x16xf32>
    %669 = vector.extract_strided_slice %75 {offsets = [2, 0, 0], sizes = [1, 16, 16], strides = [1, 1, 1]} : vector<4x16x16xf32> to vector<1x16x16xf32>
    %670 = vector.shape_cast %669 : vector<1x16x16xf32> to vector<16x16xf32>
    %671 = arith.addf %668, %670 : vector<16x16xf32>
    %cst_232 = arith.constant dense<0xFF800000> : vector<16xf32>
    %672 = vector.multi_reduction <maximumf>, %671, %cst_232 [1] : vector<16x16xf32> to vector<16xf32>
    %673 = vector.shape_cast %672 : vector<16xf32> to vector<16x1xf32>
    %674 = vector.broadcast %673 : vector<16x1xf32> to vector<16x16xf32>
    %675 = arith.subf %671, %674 : vector<16x16xf32>
    %676 = math.exp %675 : vector<16x16xf32>
    %cst_233 = arith.constant dense<0.000000e+00> : vector<16xf32>
    %677 = vector.multi_reduction <add>, %676, %cst_233 [1] : vector<16x16xf32> to vector<16xf32>
    %678 = vector.shape_cast %677 : vector<16xf32> to vector<16x1xf32>
    %679 = tpu.reciprocal %678 {approx = true} : vector<16x1xf32> -> vector<16x1xf32>
    %680 = vector.broadcast %679 : vector<16x1xf32> to vector<16x16xf32>
    %681 = arith.mulf %676, %680 : vector<16x16xf32>
    %682 = arith.truncf %681 : vector<16x16xf32> to vector<16x16xbf16>
    %683 = arith.truncf %663 : vector<16x32xf32> to vector<16x32xbf16>
    %cst_234 = arith.constant dense<0.000000e+00> : vector<16x32xf32>
    %684 = tpu.matmul %682, %683, %cst_234 {dimension_numbers = #tpu.dot_dimension_numbers<[1], [0], [0], [1], [0, 0, 1, 1], [], []>} : vector<16x16xbf16>, vector<16x32xbf16>, vector<16x32xf32> -> vector<16x32xf32>
    %685 = vector.extract_strided_slice %612 {offsets = [0, 96], sizes = [16, 32], strides = [1, 1]} : vector<16x384xf32> to vector<16x32xf32>
    %686 = vector.extract_strided_slice %612 {offsets = [0, 224], sizes = [16, 32], strides = [1, 1]} : vector<16x384xf32> to vector<16x32xf32>
    %687 = vector.extract_strided_slice %612 {offsets = [0, 352], sizes = [16, 32], strides = [1, 1]} : vector<16x384xf32> to vector<16x32xf32>
    %688 = arith.truncf %685 : vector<16x32xf32> to vector<16x32xbf16>
    %689 = arith.truncf %686 : vector<16x32xf32> to vector<16x32xbf16>
    %cst_235 = arith.constant dense<0.000000e+00> : vector<16x16xf32>
    %690 = tpu.matmul %688, %689, %cst_235 {dimension_numbers = #tpu.dot_dimension_numbers<[1], [1], [0], [0], [0, 0, 1, 0], [], []>} : vector<16x32xbf16>, vector<16x32xbf16>, vector<16x16xf32> -> vector<16x16xf32>
    %cst_236 = arith.constant 0.176776692 : f32
    %691 = vector.broadcast %cst_236 : f32 to vector<16x16xf32>
    %692 = arith.mulf %690, %691 : vector<16x16xf32>
    %693 = vector.extract_strided_slice %75 {offsets = [3, 0, 0], sizes = [1, 16, 16], strides = [1, 1, 1]} : vector<4x16x16xf32> to vector<1x16x16xf32>
    %694 = vector.shape_cast %693 : vector<1x16x16xf32> to vector<16x16xf32>
    %695 = arith.addf %692, %694 : vector<16x16xf32>
    %cst_237 = arith.constant dense<0xFF800000> : vector<16xf32>
    %696 = vector.multi_reduction <maximumf>, %695, %cst_237 [1] : vector<16x16xf32> to vector<16xf32>
    %697 = vector.shape_cast %696 : vector<16xf32> to vector<16x1xf32>
    %698 = vector.broadcast %697 : vector<16x1xf32> to vector<16x16xf32>
    %699 = arith.subf %695, %698 : vector<16x16xf32>
    %700 = math.exp %699 : vector<16x16xf32>
    %cst_238 = arith.constant dense<0.000000e+00> : vector<16xf32>
    %701 = vector.multi_reduction <add>, %700, %cst_238 [1] : vector<16x16xf32> to vector<16xf32>
    %702 = vector.shape_cast %701 : vector<16xf32> to vector<16x1xf32>
    %703 = tpu.reciprocal %702 {approx = true} : vector<16x1xf32> -> vector<16x1xf32>
    %704 = vector.broadcast %703 : vector<16x1xf32> to vector<16x16xf32>
    %705 = arith.mulf %700, %704 : vector<16x16xf32>
    %706 = arith.truncf %705 : vector<16x16xf32> to vector<16x16xbf16>
    %707 = arith.truncf %687 : vector<16x32xf32> to vector<16x32xbf16>
    %cst_239 = arith.constant dense<0.000000e+00> : vector<16x32xf32>
    %708 = tpu.matmul %706, %707, %cst_239 {dimension_numbers = #tpu.dot_dimension_numbers<[1], [0], [0], [1], [0, 0, 1, 1], [], []>} : vector<16x16xbf16>, vector<16x32xbf16>, vector<16x32xf32> -> vector<16x32xf32>
    %709 = tpu.concatenate %636, %660, %684, %708 in 1 : vector<16x32xf32>, vector<16x32xf32>, vector<16x32xf32>, vector<16x32xf32> -> vector<16x128xf32>
    %c2_240 = arith.constant 2 : index
    %c0_241 = arith.constant 0 : index
    %c0_242 = arith.constant 0 : index
    %710 = vector.load %arg13[%c2_240, %c0_241, %c0_242] : memref<3x128x128xbf16, #tpu.memory_space<vmem>>, vector<1x128x128xbf16>
    %711 = vector.shape_cast %710 : vector<1x128x128xbf16> to vector<128x128xbf16>
    %712 = arith.truncf %709 : vector<16x128xf32> to vector<16x128xbf16>
    %cst_243 = arith.constant dense<0.000000e+00> : vector<16x128xf32>
    %713 = tpu.matmul %712, %711, %cst_243 {dimension_numbers = #tpu.dot_dimension_numbers<[1], [0], [0], [1], [0, 0, 1, 1], [], []>} : vector<16x128xbf16>, vector<128x128xbf16>, vector<16x128xf32> -> vector<16x128xf32>
    %c2_244 = arith.constant 2 : index
    %c0_245 = arith.constant 0 : index
    %c0_246 = arith.constant 0 : index
    %714 = vector.load %arg14[%c2_244, %c0_245, %c0_246] : memref<3x1x128xf32, #tpu.memory_space<vmem>>, vector<1x1x128xf32>
    %715 = vector.shape_cast %714 : vector<1x1x128xf32> to vector<1x128xf32>
    %716 = vector.broadcast %715 : vector<1x128xf32> to vector<16x128xf32>
    %717 = arith.addf %713, %716 : vector<16x128xf32>
    %718 = arith.addf %604, %717 : vector<16x128xf32>
    %c2_247 = arith.constant 2 : index
    %c0_248 = arith.constant 0 : index
    %c0_249 = arith.constant 0 : index
    %719 = vector.load %arg15[%c2_247, %c0_248, %c0_249] : memref<3x1x128xf32, #tpu.memory_space<vmem>>, vector<1x1x128xf32>
    %720 = vector.shape_cast %719 : vector<1x1x128xf32> to vector<1x128xf32>
    %c2_250 = arith.constant 2 : index
    %c0_251 = arith.constant 0 : index
    %c0_252 = arith.constant 0 : index
    %721 = vector.load %arg16[%c2_250, %c0_251, %c0_252] : memref<3x1x128xf32, #tpu.memory_space<vmem>>, vector<1x1x128xf32>
    %722 = vector.shape_cast %721 : vector<1x1x128xf32> to vector<1x128xf32>
    %cst_253 = arith.constant dense<0.000000e+00> : vector<16xf32>
    %723 = vector.multi_reduction <add>, %718, %cst_253 [1] : vector<16x128xf32> to vector<16xf32>
    %724 = vector.shape_cast %723 : vector<16xf32> to vector<16x1xf32>
    %cst_254 = arith.constant 1.280000e+02 : f32
    %725 = vector.broadcast %cst_254 : f32 to vector<16x1xf32>
    %726 = arith.divf %724, %725 : vector<16x1xf32>
    %727 = vector.broadcast %726 : vector<16x1xf32> to vector<16x128xf32>
    %728 = arith.subf %718, %727 : vector<16x128xf32>
    %729 = arith.mulf %728, %728 : vector<16x128xf32>
    %cst_255 = arith.constant dense<0.000000e+00> : vector<16xf32>
    %730 = vector.multi_reduction <add>, %729, %cst_255 [1] : vector<16x128xf32> to vector<16xf32>
    %731 = vector.shape_cast %730 : vector<16xf32> to vector<16x1xf32>
    %cst_256 = arith.constant 1.280000e+02 : f32
    %732 = vector.broadcast %cst_256 : f32 to vector<16x1xf32>
    %733 = arith.divf %731, %732 : vector<16x1xf32>
    %734 = vector.broadcast %726 : vector<16x1xf32> to vector<16x128xf32>
    %735 = arith.subf %718, %734 : vector<16x128xf32>
    %cst_257 = arith.constant 9.99999974E-6 : f32
    %736 = vector.broadcast %cst_257 : f32 to vector<16x1xf32>
    %737 = arith.addf %733, %736 : vector<16x1xf32>
    %738 = math.rsqrt %737 : vector<16x1xf32>
    %739 = vector.broadcast %738 : vector<16x1xf32> to vector<16x128xf32>
    %740 = arith.mulf %735, %739 : vector<16x128xf32>
    %741 = vector.broadcast %720 : vector<1x128xf32> to vector<16x128xf32>
    %742 = arith.mulf %740, %741 : vector<16x128xf32>
    %743 = vector.broadcast %722 : vector<1x128xf32> to vector<16x128xf32>
    %744 = arith.addf %742, %743 : vector<16x128xf32>
    %745 = arith.truncf %744 : vector<16x128xf32> to vector<16x128xbf16>
    %cst_258 = arith.constant dense<0.000000e+00> : vector<144x128xf32>
    %746 = tpu.matmul %76, %745, %cst_258 {dimension_numbers = #tpu.dot_dimension_numbers<[1], [0], [0], [1], [0, 0, 1, 1], [], []>} : vector<144x16xbf16>, vector<16x128xbf16>, vector<144x128xf32> -> vector<144x128xf32>
    %c2_259 = arith.constant 2 : index
    %c0_260 = arith.constant 0 : index
    %c0_261 = arith.constant 0 : index
    %747 = vector.load %arg17[%c2_259, %c0_260, %c0_261] : memref<3x9x128xf32, #tpu.memory_space<vmem>>, vector<1x9x128xf32>
    %748 = vector.shape_cast %747 : vector<1x9x128xf32> to vector<9x128xf32>
    %749 = vector.extract_strided_slice %746 {offsets = [0, 0], sizes = [16, 128], strides = [1, 1]} : vector<144x128xf32> to vector<16x128xf32>
    %750 = vector.extract_strided_slice %748 {offsets = [0, 0], sizes = [1, 128], strides = [1, 1]} : vector<9x128xf32> to vector<1x128xf32>
    %751 = vector.broadcast %750 : vector<1x128xf32> to vector<16x128xf32>
    %752 = arith.mulf %749, %751 : vector<16x128xf32>
    %753 = vector.extract_strided_slice %746 {offsets = [16, 0], sizes = [16, 128], strides = [1, 1]} : vector<144x128xf32> to vector<16x128xf32>
    %754 = vector.extract_strided_slice %748 {offsets = [1, 0], sizes = [1, 128], strides = [1, 1]} : vector<9x128xf32> to vector<1x128xf32>
    %755 = vector.broadcast %754 : vector<1x128xf32> to vector<16x128xf32>
    %756 = arith.mulf %753, %755 : vector<16x128xf32>
    %757 = arith.addf %752, %756 : vector<16x128xf32>
    %758 = vector.extract_strided_slice %746 {offsets = [32, 0], sizes = [16, 128], strides = [1, 1]} : vector<144x128xf32> to vector<16x128xf32>
    %759 = vector.extract_strided_slice %748 {offsets = [2, 0], sizes = [1, 128], strides = [1, 1]} : vector<9x128xf32> to vector<1x128xf32>
    %760 = vector.broadcast %759 : vector<1x128xf32> to vector<16x128xf32>
    %761 = arith.mulf %758, %760 : vector<16x128xf32>
    %762 = arith.addf %757, %761 : vector<16x128xf32>
    %763 = vector.extract_strided_slice %746 {offsets = [48, 0], sizes = [16, 128], strides = [1, 1]} : vector<144x128xf32> to vector<16x128xf32>
    %764 = vector.extract_strided_slice %748 {offsets = [3, 0], sizes = [1, 128], strides = [1, 1]} : vector<9x128xf32> to vector<1x128xf32>
    %765 = vector.broadcast %764 : vector<1x128xf32> to vector<16x128xf32>
    %766 = arith.mulf %763, %765 : vector<16x128xf32>
    %767 = arith.addf %762, %766 : vector<16x128xf32>
    %768 = vector.extract_strided_slice %746 {offsets = [64, 0], sizes = [16, 128], strides = [1, 1]} : vector<144x128xf32> to vector<16x128xf32>
    %769 = vector.extract_strided_slice %748 {offsets = [4, 0], sizes = [1, 128], strides = [1, 1]} : vector<9x128xf32> to vector<1x128xf32>
    %770 = vector.broadcast %769 : vector<1x128xf32> to vector<16x128xf32>
    %771 = arith.mulf %768, %770 : vector<16x128xf32>
    %772 = arith.addf %767, %771 : vector<16x128xf32>
    %773 = vector.extract_strided_slice %746 {offsets = [80, 0], sizes = [16, 128], strides = [1, 1]} : vector<144x128xf32> to vector<16x128xf32>
    %774 = vector.extract_strided_slice %748 {offsets = [5, 0], sizes = [1, 128], strides = [1, 1]} : vector<9x128xf32> to vector<1x128xf32>
    %775 = vector.broadcast %774 : vector<1x128xf32> to vector<16x128xf32>
    %776 = arith.mulf %773, %775 : vector<16x128xf32>
    %777 = arith.addf %772, %776 : vector<16x128xf32>
    %778 = vector.extract_strided_slice %746 {offsets = [96, 0], sizes = [16, 128], strides = [1, 1]} : vector<144x128xf32> to vector<16x128xf32>
    %779 = vector.extract_strided_slice %748 {offsets = [6, 0], sizes = [1, 128], strides = [1, 1]} : vector<9x128xf32> to vector<1x128xf32>
    %780 = vector.broadcast %779 : vector<1x128xf32> to vector<16x128xf32>
    %781 = arith.mulf %778, %780 : vector<16x128xf32>
    %782 = arith.addf %777, %781 : vector<16x128xf32>
    %783 = vector.extract_strided_slice %746 {offsets = [112, 0], sizes = [16, 128], strides = [1, 1]} : vector<144x128xf32> to vector<16x128xf32>
    %784 = vector.extract_strided_slice %748 {offsets = [7, 0], sizes = [1, 128], strides = [1, 1]} : vector<9x128xf32> to vector<1x128xf32>
    %785 = vector.broadcast %784 : vector<1x128xf32> to vector<16x128xf32>
    %786 = arith.mulf %783, %785 : vector<16x128xf32>
    %787 = arith.addf %782, %786 : vector<16x128xf32>
    %788 = vector.extract_strided_slice %746 {offsets = [128, 0], sizes = [16, 128], strides = [1, 1]} : vector<144x128xf32> to vector<16x128xf32>
    %789 = vector.extract_strided_slice %748 {offsets = [8, 0], sizes = [1, 128], strides = [1, 1]} : vector<9x128xf32> to vector<1x128xf32>
    %790 = vector.broadcast %789 : vector<1x128xf32> to vector<16x128xf32>
    %791 = arith.mulf %788, %790 : vector<16x128xf32>
    %792 = arith.addf %787, %791 : vector<16x128xf32>
    %793 = arith.addf %744, %792 : vector<16x128xf32>
    %c2_262 = arith.constant 2 : index
    %c0_263 = arith.constant 0 : index
    %c0_264 = arith.constant 0 : index
    %794 = vector.load %arg18[%c2_262, %c0_263, %c0_264] : memref<3x1x128xf32, #tpu.memory_space<vmem>>, vector<1x1x128xf32>
    %795 = vector.shape_cast %794 : vector<1x1x128xf32> to vector<1x128xf32>
    %796 = vector.broadcast %795 : vector<1x128xf32> to vector<16x128xf32>
    %797 = arith.addf %793, %796 : vector<16x128xf32>
    %c2_265 = arith.constant 2 : index
    %c0_266 = arith.constant 0 : index
    %c0_267 = arith.constant 0 : index
    %798 = vector.load %arg19[%c2_265, %c0_266, %c0_267] : memref<3x1x128xf32, #tpu.memory_space<vmem>>, vector<1x1x128xf32>
    %799 = vector.shape_cast %798 : vector<1x1x128xf32> to vector<1x128xf32>
    %c2_268 = arith.constant 2 : index
    %c0_269 = arith.constant 0 : index
    %c0_270 = arith.constant 0 : index
    %800 = vector.load %arg20[%c2_268, %c0_269, %c0_270] : memref<3x1x128xf32, #tpu.memory_space<vmem>>, vector<1x1x128xf32>
    %801 = vector.shape_cast %800 : vector<1x1x128xf32> to vector<1x128xf32>
    %cst_271 = arith.constant dense<0.000000e+00> : vector<16xf32>
    %802 = vector.multi_reduction <add>, %797, %cst_271 [1] : vector<16x128xf32> to vector<16xf32>
    %803 = vector.shape_cast %802 : vector<16xf32> to vector<16x1xf32>
    %cst_272 = arith.constant 1.280000e+02 : f32
    %804 = vector.broadcast %cst_272 : f32 to vector<16x1xf32>
    %805 = arith.divf %803, %804 : vector<16x1xf32>
    %806 = vector.broadcast %805 : vector<16x1xf32> to vector<16x128xf32>
    %807 = arith.subf %797, %806 : vector<16x128xf32>
    %808 = arith.mulf %807, %807 : vector<16x128xf32>
    %cst_273 = arith.constant dense<0.000000e+00> : vector<16xf32>
    %809 = vector.multi_reduction <add>, %808, %cst_273 [1] : vector<16x128xf32> to vector<16xf32>
    %810 = vector.shape_cast %809 : vector<16xf32> to vector<16x1xf32>
    %cst_274 = arith.constant 1.280000e+02 : f32
    %811 = vector.broadcast %cst_274 : f32 to vector<16x1xf32>
    %812 = arith.divf %810, %811 : vector<16x1xf32>
    %813 = vector.broadcast %805 : vector<16x1xf32> to vector<16x128xf32>
    %814 = arith.subf %797, %813 : vector<16x128xf32>
    %cst_275 = arith.constant 9.99999974E-6 : f32
    %815 = vector.broadcast %cst_275 : f32 to vector<16x1xf32>
    %816 = arith.addf %812, %815 : vector<16x1xf32>
    %817 = math.rsqrt %816 : vector<16x1xf32>
    %818 = vector.broadcast %817 : vector<16x1xf32> to vector<16x128xf32>
    %819 = arith.mulf %814, %818 : vector<16x128xf32>
    %820 = vector.broadcast %799 : vector<1x128xf32> to vector<16x128xf32>
    %821 = arith.mulf %819, %820 : vector<16x128xf32>
    %822 = vector.broadcast %801 : vector<1x128xf32> to vector<16x128xf32>
    %823 = arith.addf %821, %822 : vector<16x128xf32>
    %c2_276 = arith.constant 2 : index
    %c0_277 = arith.constant 0 : index
    %c0_278 = arith.constant 0 : index
    %824 = vector.load %arg21[%c2_276, %c0_277, %c0_278] : memref<3x128x128xbf16, #tpu.memory_space<vmem>>, vector<1x128x128xbf16>
    %825 = vector.shape_cast %824 : vector<1x128x128xbf16> to vector<128x128xbf16>
    %826 = arith.truncf %823 : vector<16x128xf32> to vector<16x128xbf16>
    %cst_279 = arith.constant dense<0.000000e+00> : vector<16x128xf32>
    %827 = tpu.matmul %826, %825, %cst_279 {dimension_numbers = #tpu.dot_dimension_numbers<[1], [0], [0], [1], [0, 0, 1, 1], [], []>} : vector<16x128xbf16>, vector<128x128xbf16>, vector<16x128xf32> -> vector<16x128xf32>
    %c2_280 = arith.constant 2 : index
    %c0_281 = arith.constant 0 : index
    %c0_282 = arith.constant 0 : index
    %828 = vector.load %arg22[%c2_280, %c0_281, %c0_282] : memref<3x1x128xf32, #tpu.memory_space<vmem>>, vector<1x1x128xf32>
    %829 = vector.shape_cast %828 : vector<1x1x128xf32> to vector<1x128xf32>
    %830 = vector.broadcast %829 : vector<1x128xf32> to vector<16x128xf32>
    %831 = arith.addf %827, %830 : vector<16x128xf32>
    %cst_283 = arith.constant 0.000000e+00 : f32
    %832 = vector.broadcast %cst_283 : f32 to vector<16x128xf32>
    %833 = arith.maximumf %831, %832 : vector<16x128xf32>
    %c2_284 = arith.constant 2 : index
    %c0_285 = arith.constant 0 : index
    %c0_286 = arith.constant 0 : index
    %834 = vector.load %arg23[%c2_284, %c0_285, %c0_286] : memref<3x128x128xbf16, #tpu.memory_space<vmem>>, vector<1x128x128xbf16>
    %835 = vector.shape_cast %834 : vector<1x128x128xbf16> to vector<128x128xbf16>
    %836 = arith.truncf %833 : vector<16x128xf32> to vector<16x128xbf16>
    %cst_287 = arith.constant dense<0.000000e+00> : vector<16x128xf32>
    %837 = tpu.matmul %836, %835, %cst_287 {dimension_numbers = #tpu.dot_dimension_numbers<[1], [0], [0], [1], [0, 0, 1, 1], [], []>} : vector<16x128xbf16>, vector<128x128xbf16>, vector<16x128xf32> -> vector<16x128xf32>
    %c2_288 = arith.constant 2 : index
    %c0_289 = arith.constant 0 : index
    %c0_290 = arith.constant 0 : index
    %838 = vector.load %arg24[%c2_288, %c0_289, %c0_290] : memref<3x1x128xf32, #tpu.memory_space<vmem>>, vector<1x1x128xf32>
    %839 = vector.shape_cast %838 : vector<1x1x128xf32> to vector<1x128xf32>
    %840 = vector.broadcast %839 : vector<1x128xf32> to vector<16x128xf32>
    %841 = arith.addf %837, %840 : vector<16x128xf32>
    %842 = arith.addf %823, %841 : vector<16x128xf32>
    %c2_291 = arith.constant 2 : index
    %c0_292 = arith.constant 0 : index
    %c0_293 = arith.constant 0 : index
    %843 = vector.load %arg25[%c2_291, %c0_292, %c0_293] : memref<3x1x128xf32, #tpu.memory_space<vmem>>, vector<1x1x128xf32>
    %844 = vector.shape_cast %843 : vector<1x1x128xf32> to vector<1x128xf32>
    %c2_294 = arith.constant 2 : index
    %c0_295 = arith.constant 0 : index
    %c0_296 = arith.constant 0 : index
    %845 = vector.load %arg26[%c2_294, %c0_295, %c0_296] : memref<3x1x128xf32, #tpu.memory_space<vmem>>, vector<1x1x128xf32>
    %846 = vector.shape_cast %845 : vector<1x1x128xf32> to vector<1x128xf32>
    %cst_297 = arith.constant dense<0.000000e+00> : vector<16xf32>
    %847 = vector.multi_reduction <add>, %842, %cst_297 [1] : vector<16x128xf32> to vector<16xf32>
    %848 = vector.shape_cast %847 : vector<16xf32> to vector<16x1xf32>
    %cst_298 = arith.constant 1.280000e+02 : f32
    %849 = vector.broadcast %cst_298 : f32 to vector<16x1xf32>
    %850 = arith.divf %848, %849 : vector<16x1xf32>
    %851 = vector.broadcast %850 : vector<16x1xf32> to vector<16x128xf32>
    %852 = arith.subf %842, %851 : vector<16x128xf32>
    %853 = arith.mulf %852, %852 : vector<16x128xf32>
    %cst_299 = arith.constant dense<0.000000e+00> : vector<16xf32>
    %854 = vector.multi_reduction <add>, %853, %cst_299 [1] : vector<16x128xf32> to vector<16xf32>
    %855 = vector.shape_cast %854 : vector<16xf32> to vector<16x1xf32>
    %cst_300 = arith.constant 1.280000e+02 : f32
    %856 = vector.broadcast %cst_300 : f32 to vector<16x1xf32>
    %857 = arith.divf %855, %856 : vector<16x1xf32>
    %858 = vector.broadcast %850 : vector<16x1xf32> to vector<16x128xf32>
    %859 = arith.subf %842, %858 : vector<16x128xf32>
    %cst_301 = arith.constant 9.99999974E-6 : f32
    %860 = vector.broadcast %cst_301 : f32 to vector<16x1xf32>
    %861 = arith.addf %857, %860 : vector<16x1xf32>
    %862 = math.rsqrt %861 : vector<16x1xf32>
    %863 = vector.broadcast %862 : vector<16x1xf32> to vector<16x128xf32>
    %864 = arith.mulf %859, %863 : vector<16x128xf32>
    %865 = vector.broadcast %844 : vector<1x128xf32> to vector<16x128xf32>
    %866 = arith.mulf %864, %865 : vector<16x128xf32>
    %867 = vector.broadcast %846 : vector<1x128xf32> to vector<16x128xf32>
    %868 = arith.addf %866, %867 : vector<16x128xf32>
    %869 = tpu.concatenate %340, %604, %868 in 1 : vector<16x128xf32>, vector<16x128xf32>, vector<16x128xf32> -> vector<16x384xf32>
    %c0_302 = arith.constant 0 : index
    %c0_303 = arith.constant 0 : index
    %870 = vector.load %arg5[%c0_302, %c0_303] : memref<144x16xbf16, #tpu.memory_space<vmem>>, vector<144x16xbf16>
    %871 = arith.truncf %869 : vector<16x384xf32> to vector<16x384xbf16>
    %cst_304 = arith.constant dense<0.000000e+00> : vector<144x384xf32>
    %872 = tpu.matmul %870, %871, %cst_304 {dimension_numbers = #tpu.dot_dimension_numbers<[1], [0], [0], [1], [0, 0, 1, 1], [], []>} : vector<144x16xbf16>, vector<16x384xbf16>, vector<144x384xf32> -> vector<144x384xf32>
    %c0_305 = arith.constant 0 : index
    %c0_306 = arith.constant 0 : index
    %873 = vector.load %arg6[%c0_305, %c0_306] : memref<9x384xf32, #tpu.memory_space<vmem>>, vector<9x384xf32>
    %874 = vector.extract_strided_slice %872 {offsets = [0, 0], sizes = [16, 384], strides = [1, 1]} : vector<144x384xf32> to vector<16x384xf32>
    %875 = vector.extract_strided_slice %873 {offsets = [0, 0], sizes = [1, 384], strides = [1, 1]} : vector<9x384xf32> to vector<1x384xf32>
    %876 = vector.broadcast %875 : vector<1x384xf32> to vector<16x384xf32>
    %877 = arith.mulf %874, %876 : vector<16x384xf32>
    %878 = vector.extract_strided_slice %872 {offsets = [16, 0], sizes = [16, 384], strides = [1, 1]} : vector<144x384xf32> to vector<16x384xf32>
    %879 = vector.extract_strided_slice %873 {offsets = [1, 0], sizes = [1, 384], strides = [1, 1]} : vector<9x384xf32> to vector<1x384xf32>
    %880 = vector.broadcast %879 : vector<1x384xf32> to vector<16x384xf32>
    %881 = arith.mulf %878, %880 : vector<16x384xf32>
    %882 = arith.addf %877, %881 : vector<16x384xf32>
    %883 = vector.extract_strided_slice %872 {offsets = [32, 0], sizes = [16, 384], strides = [1, 1]} : vector<144x384xf32> to vector<16x384xf32>
    %884 = vector.extract_strided_slice %873 {offsets = [2, 0], sizes = [1, 384], strides = [1, 1]} : vector<9x384xf32> to vector<1x384xf32>
    %885 = vector.broadcast %884 : vector<1x384xf32> to vector<16x384xf32>
    %886 = arith.mulf %883, %885 : vector<16x384xf32>
    %887 = arith.addf %882, %886 : vector<16x384xf32>
    %888 = vector.extract_strided_slice %872 {offsets = [48, 0], sizes = [16, 384], strides = [1, 1]} : vector<144x384xf32> to vector<16x384xf32>
    %889 = vector.extract_strided_slice %873 {offsets = [3, 0], sizes = [1, 384], strides = [1, 1]} : vector<9x384xf32> to vector<1x384xf32>
    %890 = vector.broadcast %889 : vector<1x384xf32> to vector<16x384xf32>
    %891 = arith.mulf %888, %890 : vector<16x384xf32>
    %892 = arith.addf %887, %891 : vector<16x384xf32>
    %893 = vector.extract_strided_slice %872 {offsets = [64, 0], sizes = [16, 384], strides = [1, 1]} : vector<144x384xf32> to vector<16x384xf32>
    %894 = vector.extract_strided_slice %873 {offsets = [4, 0], sizes = [1, 384], strides = [1, 1]} : vector<9x384xf32> to vector<1x384xf32>
    %895 = vector.broadcast %894 : vector<1x384xf32> to vector<16x384xf32>
    %896 = arith.mulf %893, %895 : vector<16x384xf32>
    %897 = arith.addf %892, %896 : vector<16x384xf32>
    %898 = vector.extract_strided_slice %872 {offsets = [80, 0], sizes = [16, 384], strides = [1, 1]} : vector<144x384xf32> to vector<16x384xf32>
    %899 = vector.extract_strided_slice %873 {offsets = [5, 0], sizes = [1, 384], strides = [1, 1]} : vector<9x384xf32> to vector<1x384xf32>
    %900 = vector.broadcast %899 : vector<1x384xf32> to vector<16x384xf32>
    %901 = arith.mulf %898, %900 : vector<16x384xf32>
    %902 = arith.addf %897, %901 : vector<16x384xf32>
    %903 = vector.extract_strided_slice %872 {offsets = [96, 0], sizes = [16, 384], strides = [1, 1]} : vector<144x384xf32> to vector<16x384xf32>
    %904 = vector.extract_strided_slice %873 {offsets = [6, 0], sizes = [1, 384], strides = [1, 1]} : vector<9x384xf32> to vector<1x384xf32>
    %905 = vector.broadcast %904 : vector<1x384xf32> to vector<16x384xf32>
    %906 = arith.mulf %903, %905 : vector<16x384xf32>
    %907 = arith.addf %902, %906 : vector<16x384xf32>
    %908 = vector.extract_strided_slice %872 {offsets = [112, 0], sizes = [16, 384], strides = [1, 1]} : vector<144x384xf32> to vector<16x384xf32>
    %909 = vector.extract_strided_slice %873 {offsets = [7, 0], sizes = [1, 384], strides = [1, 1]} : vector<9x384xf32> to vector<1x384xf32>
    %910 = vector.broadcast %909 : vector<1x384xf32> to vector<16x384xf32>
    %911 = arith.mulf %908, %910 : vector<16x384xf32>
    %912 = arith.addf %907, %911 : vector<16x384xf32>
    %913 = vector.extract_strided_slice %872 {offsets = [128, 0], sizes = [16, 384], strides = [1, 1]} : vector<144x384xf32> to vector<16x384xf32>
    %914 = vector.extract_strided_slice %873 {offsets = [8, 0], sizes = [1, 384], strides = [1, 1]} : vector<9x384xf32> to vector<1x384xf32>
    %915 = vector.broadcast %914 : vector<1x384xf32> to vector<16x384xf32>
    %916 = arith.mulf %913, %915 : vector<16x384xf32>
    %917 = arith.addf %912, %916 : vector<16x384xf32>
    %c0_307 = arith.constant 0 : index
    %c0_308 = arith.constant 0 : index
    %918 = vector.load %arg27[%c0_307, %c0_308] : memref<384x384xbf16, #tpu.memory_space<vmem>>, vector<384x384xbf16>
    %919 = arith.truncf %917 : vector<16x384xf32> to vector<16x384xbf16>
    %cst_309 = arith.constant dense<0.000000e+00> : vector<16x384xf32>
    %920 = tpu.matmul %919, %918, %cst_309 {dimension_numbers = #tpu.dot_dimension_numbers<[1], [0], [0], [1], [0, 0, 1, 1], [], []>} : vector<16x384xbf16>, vector<384x384xbf16>, vector<16x384xf32> -> vector<16x384xf32>
    %c0_310 = arith.constant 0 : index
    %c0_311 = arith.constant 0 : index
    %921 = vector.load %arg28[%c0_310, %c0_311] : memref<1x384xf32, #tpu.memory_space<vmem>>, vector<1x384xf32>
    %922 = vector.broadcast %921 : vector<1x384xf32> to vector<16x384xf32>
    %923 = arith.addf %920, %922 : vector<16x384xf32>
    %cst_312 = arith.constant 0.000000e+00 : f32
    %924 = vector.broadcast %cst_312 : f32 to vector<16x384xf32>
    %925 = arith.maximumf %923, %924 : vector<16x384xf32>
    %c0_313 = arith.constant 0 : index
    %c0_314 = arith.constant 0 : index
    %926 = vector.load %arg29[%c0_313, %c0_314] : memref<384x128xbf16, #tpu.memory_space<vmem>>, vector<384x128xbf16>
    %927 = arith.truncf %925 : vector<16x384xf32> to vector<16x384xbf16>
    %cst_315 = arith.constant dense<0.000000e+00> : vector<16x128xf32>
    %928 = tpu.matmul %927, %926, %cst_315 {dimension_numbers = #tpu.dot_dimension_numbers<[1], [0], [0], [1], [0, 0, 1, 1], [], []>} : vector<16x384xbf16>, vector<384x128xbf16>, vector<16x128xf32> -> vector<16x128xf32>
    %c0_316 = arith.constant 0 : index
    %c0_317 = arith.constant 0 : index
    %929 = vector.load %arg30[%c0_316, %c0_317] : memref<1x128xf32, #tpu.memory_space<vmem>>, vector<1x128xf32>
    %930 = vector.broadcast %929 : vector<1x128xf32> to vector<16x128xf32>
    %931 = arith.addf %928, %930 : vector<16x128xf32>
    %cst_318 = arith.constant 2.000000e-01 : f32
    %932 = vector.broadcast %cst_318 : f32 to vector<16x128xf32>
    %933 = arith.mulf %932, %931 : vector<16x128xf32>
    %934 = arith.addf %868, %933 : vector<16x128xf32>
    %c0_319 = arith.constant 0 : index
    %c0_320 = arith.constant 0 : index
    %c0_321 = arith.constant 0 : index
    %935 = vector.load %arg31[%c0_319, %c0_320, %c0_321] : memref<1x16x128xf32, #tpu.memory_space<vmem>>, vector<1x16x128xf32>
    %936 = vector.shape_cast %935 : vector<1x16x128xf32> to vector<16x128xf32>
    %937 = vector.shape_cast %934 : vector<16x128xf32> to vector<1x16x128xf32>
    tpu.vector_store %arg31[%c0_319, %c0_320, %c0_321], %937 {strides = array<i32>} : memref<1x16x128xf32, #tpu.memory_space<vmem>>, vector<1x16x128xf32>,
    return
  }
  func.func @transform_0(%arg0: i32) -> (i32, i32, i32) {
    %c0_i32 = arith.constant 0 : i32
    %c0_i32_0 = arith.constant 0 : i32
    %c0_i32_1 = arith.constant 0 : i32
    return %arg0, %c0_i32, %c0_i32_0 : i32, i32, i32
  }
  func.func @transform_1(%arg0: i32) -> (i32, i32) {
    %c0_i32 = arith.constant 0 : i32
    %c0_i32_0 = arith.constant 0 : i32
    %c0_i32_1 = arith.constant 0 : i32
    return %c0_i32, %c0_i32_0 : i32, i32
  }
  func.func @transform_2(%arg0: i32) -> (i32, i32, i32) {
    %c0_i32 = arith.constant 0 : i32
    %c0_i32_0 = arith.constant 0 : i32
    %c0_i32_1 = arith.constant 0 : i32
    %c0_i32_2 = arith.constant 0 : i32
    return %c0_i32, %c0_i32_0, %c0_i32_1 : i32, i32, i32
  }
  func.func @transform_3(%arg0: i32) -> (i32, i32) {
    %c0_i32 = arith.constant 0 : i32
    %c0_i32_0 = arith.constant 0 : i32
    %c0_i32_1 = arith.constant 0 : i32
    return %c0_i32, %c0_i32_0 : i32, i32
  }
  func.func @transform_4(%arg0: i32) -> (i32, i32) {
    %c0_i32 = arith.constant 0 : i32
    %c0_i32_0 = arith.constant 0 : i32
    %c0_i32_1 = arith.constant 0 : i32
    return %c0_i32, %c0_i32_0 : i32, i32
  }
  func.func @transform_5(%arg0: i32) -> (i32, i32) {
    %c0_i32 = arith.constant 0 : i32
    %c0_i32_0 = arith.constant 0 : i32
    %c0_i32_1 = arith.constant 0 : i32
    return %c0_i32, %c0_i32_0 : i32, i32
  }
  func.func @transform_6(%arg0: i32) -> (i32, i32) {
    %c0_i32 = arith.constant 0 : i32
    %c0_i32_0 = arith.constant 0 : i32
    %c0_i32_1 = arith.constant 0 : i32
    return %c0_i32, %c0_i32_0 : i32, i32
  }
  func.func @transform_7(%arg0: i32) -> (i32, i32) {
    %c0_i32 = arith.constant 0 : i32
    %c0_i32_0 = arith.constant 0 : i32
    %c0_i32_1 = arith.constant 0 : i32
    return %c0_i32, %c0_i32_0 : i32, i32
  }
  func.func @transform_8(%arg0: i32) -> (i32, i32) {
    %c0_i32 = arith.constant 0 : i32
    %c0_i32_0 = arith.constant 0 : i32
    %c0_i32_1 = arith.constant 0 : i32
    return %c0_i32, %c0_i32_0 : i32, i32
  }
  func.func @transform_9(%arg0: i32) -> (i32, i32) {
    %c0_i32 = arith.constant 0 : i32
    %c0_i32_0 = arith.constant 0 : i32
    %c0_i32_1 = arith.constant 0 : i32
    return %c0_i32, %c0_i32_0 : i32, i32
  }
  func.func @transform_10(%arg0: i32) -> (i32, i32, i32) {
    %c0_i32 = arith.constant 0 : i32
    %c0_i32_0 = arith.constant 0 : i32
    %c0_i32_1 = arith.constant 0 : i32
    %c0_i32_2 = arith.constant 0 : i32
    return %c0_i32, %c0_i32_0, %c0_i32_1 : i32, i32, i32
  }
  func.func @transform_11(%arg0: i32) -> (i32, i32, i32) {
    %c0_i32 = arith.constant 0 : i32
    %c0_i32_0 = arith.constant 0 : i32
    %c0_i32_1 = arith.constant 0 : i32
    %c0_i32_2 = arith.constant 0 : i32
    return %c0_i32, %c0_i32_0, %c0_i32_1 : i32, i32, i32
  }
  func.func @transform_12(%arg0: i32) -> (i32, i32, i32) {
    %c0_i32 = arith.constant 0 : i32
    %c0_i32_0 = arith.constant 0 : i32
    %c0_i32_1 = arith.constant 0 : i32
    %c0_i32_2 = arith.constant 0 : i32
    return %c0_i32, %c0_i32_0, %c0_i32_1 : i32, i32, i32
  }
  func.func @transform_13(%arg0: i32) -> (i32, i32, i32) {
    %c0_i32 = arith.constant 0 : i32
    %c0_i32_0 = arith.constant 0 : i32
    %c0_i32_1 = arith.constant 0 : i32
    %c0_i32_2 = arith.constant 0 : i32
    return %c0_i32, %c0_i32_0, %c0_i32_1 : i32, i32, i32
  }
  func.func @transform_14(%arg0: i32) -> (i32, i32, i32) {
    %c0_i32 = arith.constant 0 : i32
    %c0_i32_0 = arith.constant 0 : i32
    %c0_i32_1 = arith.constant 0 : i32
    %c0_i32_2 = arith.constant 0 : i32
    return %c0_i32, %c0_i32_0, %c0_i32_1 : i32, i32, i32
  }
  func.func @transform_15(%arg0: i32) -> (i32, i32, i32) {
    %c0_i32 = arith.constant 0 : i32
    %c0_i32_0 = arith.constant 0 : i32
    %c0_i32_1 = arith.constant 0 : i32
    %c0_i32_2 = arith.constant 0 : i32
    return %c0_i32, %c0_i32_0, %c0_i32_1 : i32, i32, i32
  }
  func.func @transform_16(%arg0: i32) -> (i32, i32, i32) {
    %c0_i32 = arith.constant 0 : i32
    %c0_i32_0 = arith.constant 0 : i32
    %c0_i32_1 = arith.constant 0 : i32
    %c0_i32_2 = arith.constant 0 : i32
    return %c0_i32, %c0_i32_0, %c0_i32_1 : i32, i32, i32
  }
  func.func @transform_17(%arg0: i32) -> (i32, i32, i32) {
    %c0_i32 = arith.constant 0 : i32
    %c0_i32_0 = arith.constant 0 : i32
    %c0_i32_1 = arith.constant 0 : i32
    %c0_i32_2 = arith.constant 0 : i32
    return %c0_i32, %c0_i32_0, %c0_i32_1 : i32, i32, i32
  }
  func.func @transform_18(%arg0: i32) -> (i32, i32, i32) {
    %c0_i32 = arith.constant 0 : i32
    %c0_i32_0 = arith.constant 0 : i32
    %c0_i32_1 = arith.constant 0 : i32
    %c0_i32_2 = arith.constant 0 : i32
    return %c0_i32, %c0_i32_0, %c0_i32_1 : i32, i32, i32
  }
  func.func @transform_19(%arg0: i32) -> (i32, i32, i32) {
    %c0_i32 = arith.constant 0 : i32
    %c0_i32_0 = arith.constant 0 : i32
    %c0_i32_1 = arith.constant 0 : i32
    %c0_i32_2 = arith.constant 0 : i32
    return %c0_i32, %c0_i32_0, %c0_i32_1 : i32, i32, i32
  }
  func.func @transform_20(%arg0: i32) -> (i32, i32, i32) {
    %c0_i32 = arith.constant 0 : i32
    %c0_i32_0 = arith.constant 0 : i32
    %c0_i32_1 = arith.constant 0 : i32
    %c0_i32_2 = arith.constant 0 : i32
    return %c0_i32, %c0_i32_0, %c0_i32_1 : i32, i32, i32
  }
  func.func @transform_21(%arg0: i32) -> (i32, i32, i32) {
    %c0_i32 = arith.constant 0 : i32
    %c0_i32_0 = arith.constant 0 : i32
    %c0_i32_1 = arith.constant 0 : i32
    %c0_i32_2 = arith.constant 0 : i32
    return %c0_i32, %c0_i32_0, %c0_i32_1 : i32, i32, i32
  }
  func.func @transform_22(%arg0: i32) -> (i32, i32, i32) {
    %c0_i32 = arith.constant 0 : i32
    %c0_i32_0 = arith.constant 0 : i32
    %c0_i32_1 = arith.constant 0 : i32
    %c0_i32_2 = arith.constant 0 : i32
    return %c0_i32, %c0_i32_0, %c0_i32_1 : i32, i32, i32
  }
  func.func @transform_23(%arg0: i32) -> (i32, i32, i32) {
    %c0_i32 = arith.constant 0 : i32
    %c0_i32_0 = arith.constant 0 : i32
    %c0_i32_1 = arith.constant 0 : i32
    %c0_i32_2 = arith.constant 0 : i32
    return %c0_i32, %c0_i32_0, %c0_i32_1 : i32, i32, i32
  }
  func.func @transform_24(%arg0: i32) -> (i32, i32, i32) {
    %c0_i32 = arith.constant 0 : i32
    %c0_i32_0 = arith.constant 0 : i32
    %c0_i32_1 = arith.constant 0 : i32
    %c0_i32_2 = arith.constant 0 : i32
    return %c0_i32, %c0_i32_0, %c0_i32_1 : i32, i32, i32
  }
  func.func @transform_25(%arg0: i32) -> (i32, i32, i32) {
    %c0_i32 = arith.constant 0 : i32
    %c0_i32_0 = arith.constant 0 : i32
    %c0_i32_1 = arith.constant 0 : i32
    %c0_i32_2 = arith.constant 0 : i32
    return %c0_i32, %c0_i32_0, %c0_i32_1 : i32, i32, i32
  }
  func.func @transform_26(%arg0: i32) -> (i32, i32) {
    %c0_i32 = arith.constant 0 : i32
    %c0_i32_0 = arith.constant 0 : i32
    %c0_i32_1 = arith.constant 0 : i32
    return %c0_i32, %c0_i32_0 : i32, i32
  }
  func.func @transform_27(%arg0: i32) -> (i32, i32) {
    %c0_i32 = arith.constant 0 : i32
    %c0_i32_0 = arith.constant 0 : i32
    %c0_i32_1 = arith.constant 0 : i32
    return %c0_i32, %c0_i32_0 : i32, i32
  }
  func.func @transform_28(%arg0: i32) -> (i32, i32) {
    %c0_i32 = arith.constant 0 : i32
    %c0_i32_0 = arith.constant 0 : i32
    %c0_i32_1 = arith.constant 0 : i32
    return %c0_i32, %c0_i32_0 : i32, i32
  }
  func.func @transform_29(%arg0: i32) -> (i32, i32) {
    %c0_i32 = arith.constant 0 : i32
    %c0_i32_0 = arith.constant 0 : i32
    %c0_i32_1 = arith.constant 0 : i32
    return %c0_i32, %c0_i32_0 : i32, i32
  }
  func.func @transform_30(%arg0: i32) -> (i32, i32, i32) {
    %c0_i32 = arith.constant 0 : i32
    %c0_i32_0 = arith.constant 0 : i32
    %c0_i32_1 = arith.constant 0 : i32
    return %arg0, %c0_i32, %c0_i32_0 : i32, i32, i32
  }
  func.func @transform_31(%arg0: i32) -> (i32, i32, i32) {
    %c0_i32 = arith.constant 0 : i32
    %c0_i32_0 = arith.constant 0 : i32
    %c0_i32_1 = arith.constant 0 : i32
    return %arg0, %c0_i32, %c0_i32_0 : i32, i32, i32
  }
}

</mosaic_0001>

<bundles_post_ra>
// kernel: _lambda_.1
= control target key start
LH: loop header
LB: loop body
LE: loop exit
PB: predicated region body
PF: predicated region fallthrough
CT: control target
= control target key end

     0   :  { %s10969_s6 = smov 1   ;;  %s10970_s10 = smov 2   ;;  %s12733_s0 = inlined_call_operand.smem [shape: u32[32], index: -1, kind: input, shape index: {}] }
   0x1   :  { %s11055_s5 = sld [smem:[%s12733_s0]]   ;;  %s10971_s14 = smov 3  }
   0x2   :  { %s11060_s9 = sld [smem:[%s12733_s0 + %s10969_s6]]   ;;  %s10972_s18 = smov 4  }
   0x3   :  { %s11065_s13 = sld [smem:[%s12733_s0 + %s10970_s10]]   ;;  %s10973_s22 = smov 5  }
   0x4   :  { %s11070_s17 = sld [smem:[%s12733_s0 + %s10971_s14]]   ;;  %s10974_s26 = smov 6  }
   0x5   :  { %s11075_s21 = sld [smem:[%s12733_s0 + %s10972_s18]]   ;;  %s10975_s30 = smov 7  }
   0x6   :  { %s11080_s25 = sld [smem:[%s12733_s0 + %s10973_s22]]   ;;  %s10976_s4 = smov 8  }
   0x7   :  { %12778 = sst [smem:[#allocation56_spill]] %s11055_s5  ;;  %s10977_s10 = smov 9  }
   0x8   :  { %12779 = sst [smem:[#allocation57_spill]] %s11060_s9  ;;  %s10978_s15 = smov 10  }
   0x9   :  { %12780 = sst [smem:[#allocation58_spill]] %s11065_s13  ;;  %s10979_s20 = smov 11  }
   0xa   :  { %12781 = sst [smem:[#allocation59_spill]] %s11070_s17  ;;  %s10981_s1 = smov 13  }
   0xb   :  { %s11085_s29 = sld [smem:[%s12733_s0 + %s10974_s26]]   ;;  %s10980_s26 = smov 12  }
   0xc   :  { %s11090_s3 = sld [smem:[%s12733_s0 + %s10975_s30]]   ;;  %s10982_s7 = smov 14  }
   0xd   :  { %s11095_s8 = sld [smem:[%s12733_s0 + %s10976_s4]]   ;;  %s10984_s22 = smov 16  }
   0xe   :  { %s11100_s14 = sld [smem:[%s12733_s0 + %s10977_s10]]   ;;  %s10985_s28 = smov 17  }
   0xf   :  { %s11105_s19 = sld [smem:[%s12733_s0 + %s10978_s15]]   ;;  %s10983_s15 = smov 15  }
  0x10   :  { %s11110_s24 = sld [smem:[%s12733_s0 + %s10979_s20]]  }
  0x11   :  { %s11115_s30 = sld [smem:[%s12733_s0 + %s10980_s26]]  }
  0x12   :  { %12782 = sst [smem:[#allocation60_spill]] %s11090_s3 }
  0x13   :  { %12783 = sst [smem:[#allocation61_spill]] %s11095_s8 }
  0x14   :  { %12784 = sst [smem:[#allocation62_spill]] %s11100_s14 }
  0x15   :  { %12785 = sst [smem:[#allocation63_spill]] %s11105_s19 }
  0x16   :  { %s11120_s6 = sld [smem:[%s12733_s0 + %s10981_s1]]  }
  0x17   :  { %12786 = sst [smem:[#allocation64_spill]] %s11115_s30 }
  0x18   :  { %s11125_s12 = sld [smem:[%s12733_s0 + %s10982_s7]]   ;;  %s10986_s7 = smov 18  }
  0x19   :  { %s11130_s20 = sld [smem:[%s12733_s0 + %s10983_s15]]   ;;  %s10987_s15 = smov 19  }
  0x1a   :  { %s11135_s27 = sld [smem:[%s12733_s0 + %s10984_s22]]   ;;  %s10988_s22 = smov 20  }
  0x1b   :  { %s11140_s4 = sld [smem:[%s12733_s0 + %s10985_s28]]   ;;  %s10989_s28 = smov 21  }
  0x1c   :  { %12787 = sst [smem:[#allocation65_spill]] %s11120_s6 }
  0x1d   :  { %s11145_s30 = sld [smem:[%s12733_s0 + %s10986_s7]]   ;;  %s10990_s7 = smov 22  }
  0x1e   :  { %12788 = sst [smem:[#allocation66_spill]] %s11125_s12 }
  0x1f   :  { %12789 = sst [smem:[#allocation67_spill]] %s11130_s20 }
  0x20   :  { %12790 = sst [smem:[#allocation68_spill]] %s11135_s27 }
  0x21   :  { %12791 = sst [smem:[#allocation69_spill]] %s11140_s4 }
  0x22   :  { %s11150_s13 = sld [smem:[%s12733_s0 + %s10987_s15]]   ;;  %s10991_s15 = smov 23  }
  0x23   :  { %12792 = sst [smem:[#allocation70_spill]] %s11145_s30 }
  0x24   :  { %s11155_s27 = sld [smem:[%s12733_s0 + %s10988_s22]]   ;;  %s10992_s22 = smov 24  }
  0x25   :  { %s11160_s9 = sld [smem:[%s12733_s0 + %s10989_s28]]   ;;  %s10993_s28 = smov 25  }
  0x26   :  { %s11165_s5 = sld [smem:[%s12733_s0 + %s10990_s7]]   ;;  %s10994_s7 = smov 26  }
  0x27   :  { %s11170_s30 = sld [smem:[%s12733_s0 + %s10991_s15]]   ;;  %s10995_s15 = smov 27  }
  0x28   :  { %12793 = sst [smem:[#allocation71_spill]] %s11150_s13 }
  0x29   :  { %s11185_s20 = sld [smem:[%s12733_s0 + %s10994_s7]]   ;;  %s10998_s7 = smov 30  }
  0x2a   :  { %12794 = sst [smem:[#allocation72_spill]] %s11155_s27 }
  0x2b   :  { %12795 = sst [smem:[#allocation73_spill]] %s11160_s9 }
  0x2c   :  { %12796 = sst [smem:[#allocation74_spill]] %s11165_s5 }
  0x2d   :  { %12797 = sst [smem:[#allocation75_spill]] %s11170_s30 }
  0x2e   :  { %s11175_s27 = sld [smem:[%s12733_s0 + %s10992_s22]]   ;;  %s10996_s22 = smov 28  }
  0x2f   :  { %s11180_s9 = sld [smem:[%s12733_s0 + %s10993_s28]]   ;;  %s10997_s28 = smov 29  }
  0x30   :  { %s11190_s30 = sld [smem:[%s12733_s0 + %s10995_s15]]   ;;  %s10999_s15 = smov 31  }
  0x31   :  { %s11195_s6 = sld [smem:[%s12733_s0 + %s10996_s22]]  }
  0x32   :  { %s11205_s19 = sld [smem:[%s12733_s0 + %s10998_s7]]  }
  0x35   :  { %12798 = sst [smem:[#allocation76_spill]] %s11180_s9 }
  0x36   :  { %12799 = sst [smem:[#allocation77_spill]] %s11190_s30 }
  0x37   :  { %12800 = sst [smem:[#allocation78_spill]] %s11195_s6 }
  0x38   :  { %s11200_s9 = sld [smem:[%s12733_s0 + %s10997_s28]]  }
  0x39   :  { %12802 = sst [smem:[#allocation80_spill]] %s11205_s19 }
  0x3a   :  { %s11210_s30 = sld [smem:[%s12733_s0 + %s10999_s15]]  }
  0x3e   :  { %12801 = sst [smem:[#allocation79_spill]] %s11200_s9 }
  0x40   :  { %12803 = sst [smem:[#allocation81_spill]] %s11210_s30 }
  0x41   :  { %69 = vsyncpa [#allocation3], 0 }
  0x42   :  { %71 = vsyncpa [#allocation3 + $0x1], 0 }
  0x43   :  { %72 = vsyncpa [#allocation6], 0 }
  0x44   :  { %73 = vsyncpa [#allocation9], 0 }
  0x45   :  { %74 = vsyncpa [#allocation12], 0 }
  0x46   :  { %75 = vsyncpa [#allocation15], 0 }
  0x47   :  { %76 = vsyncpa [#allocation18], 0 }
  0x48   :  { %77 = vsyncpa [#allocation21], 0 }
  0x49   :  { %78 = vsyncpa [#allocation24], 0 }
  0x4a   :  { %79 = vsyncpa [#allocation27], 0 }
  0x4b   :  { %80 = vsyncpa [#allocation30], 0 }
  0x4c   :  { %81 = vsyncpa [#allocation33], 0 }
  0x4d   :  { %82 = vsyncpa [#allocation36], 0 }
  0x4e   :  { %83 = vsyncpa [#allocation39], 0 }
  0x4f   :  { %84 = vsyncpa [#allocation4], 0 }
  0x50   :  { %86 = vsyncpa [#allocation4 + $0x1], 0  ;;  %s11212_s22 = smov 0   ;;  %s11214_s0 = smov 0  }
  0x51   :  { %s11216_s23 = smov 0   ;;  %s11218_s26 = smov 0  }
  0x52 LB: > { %s12804_s13 = sld [smem:[#allocation71_spill]]  ;;  %s12805_s12 = sld [smem:[#allocation66_spill]]  ;;  %s10959_s0 = sphi %s11214_s0, %s12877_s0   ;;  %s10955_s22 = sphi %s11212_s22, %s12876_s22   ;;  %s10967_s26 = sphi %s11218_s26, %s12879_s26   ;;  %s10963_s23 = sphi %s11216_s23, %s12878_s23  }
  0x53   : > { %s12806_s9 = sld [smem:[#allocation79_spill]]  ;;  %s12807_s8 = sld [smem:[#allocation61_spill]] }
  0x54   : > { %s12808_s6 = sld [smem:[#allocation78_spill]]  ;;  %s12809_s5 = sld [smem:[#allocation74_spill]] }
  0x55   : > { %s12810_s4 = sld [smem:[#allocation69_spill]]  ;;  %s12811_s14 = sld [smem:[#allocation62_spill]] }
  0x56   : > { %s12812_s3 = sld [smem:[#allocation60_spill]]  ;;  %s12813_s17 = sld [smem:[#allocation59_spill]] }
  0x57   : > { %s11000_s28 = smov [#allocation5]   ;;  %s11233_s2 = sadd.s32 4294967295, %s10967_s26  }
  0x58   : > { %s802_s1 = sshll.u32 %s11000_s28, 4  ;;  %p7912_p0 = scmp.ge.s32.totalorder %s10967_s26, 1  ;;  %s11238_s1 = int_to_ptr.vmem [resolvable:$true] %s802_s1 }
  0x59   : > { %p12749_p1 = scmp.eq.s32.totalorder %s11233_s2, 0  ;;  %p784_p2 = scmp.lt.s32.totalorder %s10967_s26, 3 }
  0x5a   : > { %s11001_s10 = smov [#allocation8]   ;;  %s11002_s16 = smov [#allocation11]  }
  0x5b   : > { %p11240_p3 = pnand %p7912_p0, %p784_p2  ;;  %s828_s11 = sshll.u32 %s11001_s10, 4  ;;  %s11253_s11 = int_to_ptr.vmem [resolvable:$true] %s828_s11 }
  0x5c   : > { %s11255_s18 = sshll.u32 %s11002_s16, 4  ;;  %s10151_s28 = scalar_lea.hbm %s12813_s17, 1152  ;;  %s856_s18 = int_to_ptr.vmem [resolvable:$true] %s11255_s18 }
  0x5d   : > { %s12814_s7 = scalar_select %p11240_p3, 1, 0 }
  0x5e   : > { %p9403_p5 = pneg %p11240_p3  ;;  %p10152_p7 = scmp.ne.s32.totalorder %s12813_s17, %s10151_s28 }
  0x5f   : > { %p10158_p11 = scmp.lt.u32.totalorder %s10151_s28, %s12813_s17 }
  0x60   : > { %p11249_p6 = pnand %p9403_p5, %p12749_p1 }
  0x62   : > { %p11261_p8 = pneg %p11249_p6 }
  0x64   : > { %p10154_p9 = pnand %p11261_p8, %p10152_p7 }
  0x66   : > { %p10155_p10 = pneg %p10154_p9 }
  0x68   : > { %p10160_p12 = pnand %p10158_p11, %p10155_p10 }
  0x6a   : > { %10163 = shalt.err (!%p10160_p12)
}
  0x6b   : > { %s10164_s10 = scalar_lea.vmem %s11238_s1, 1152  ;;  %p10172_p5 = scmp.lt.s32.totalorder %s11238_s1, %s11238_s1 }
  0x6c   : > { %p10165_p13 = scmp.ne.s32.totalorder %s11238_s1, %s10164_s10  ;;  %p10173_p4 = scmp.lt.s32.totalorder %s10164_s10, %s10164_s10 }
  0x6e   : > { %p10167_p0 = pnand %p10165_p13, %p11261_p8  ;;  %p10174_p1 = por %p10173_p4, %p10172_p5 }
  0x70   : > { %p10168_p2 = pneg %p10167_p0 }
  0x72   : > { %p10175_p3 = pnand %p10174_p1, %p10168_p2 }
  0x74   : > { %10178 = shalt.err (!%p10175_p3)
}
  0x75   : > { %s12751_s16 = smov 64   ;;  %s12753_s28 = smov 4  }
  0x76   : > { %9406 = dma.hbm_to_vmem [thread:$0]  (!%p11249_p6), %s12813_s17, 1152, %s11238_s1, [#allocation6], %s12751_s16, %s12751_s16, %s12753_s28  }
  0x77   : > { %s10179_s30 = scalar_lea.hbm %s11080_s25, 768 }
  0x78   : > { %p10180_p7 = scmp.ne.s32.totalorder %s11080_s25, %s10179_s30  ;;  %p10186_p3 = scmp.lt.u32.totalorder %s10179_s30, %s11080_s25 }
  0x7a   : > { %p10182_p4 = pnand %p10180_p7, %p11261_p8 }
  0x7c   : > { %p10183_p1 = pneg %p10182_p4 }
  0x7e   : > { %p10188_p9 = pnand %p10186_p3, %p10183_p1 }
  0x80   : > { %10191 = shalt.err (!%p10188_p9)
}
  0x81   : > { %s10192_s10 = scalar_lea.vmem %s11253_s11, 768  ;;  %p10200_p13 = scmp.lt.s32.totalorder %s11253_s11, %s11253_s11 }
  0x82   : > { %p10193_p10 = scmp.ne.s32.totalorder %s11253_s11, %s10192_s10  ;;  %p10201_p0 = scmp.lt.s32.totalorder %s10192_s10, %s10192_s10 }
  0x84   : > { %p10195_p11 = pnand %p10193_p10, %p11261_p8  ;;  %p10202_p2 = por %p10201_p0, %p10200_p13 }
  0x86   : > { %p10196_p12 = pneg %p10195_p11 }
  0x88   : > { %p10203_p5 = pnand %p10202_p2, %p10196_p12 }
  0x8a   : > { %10206 = shalt.err (!%p10203_p5)
}
  0x8b   : > { %s11005_s1 = smov 384   ;;  %s11006_s30 = smov 24  }
  0x8c   : > { %9412 = dma.hbm_to_vmem [thread:$0]  (!%p11249_p6), %s11080_s25, 768, %s11253_s11, [#allocation9], %s11005_s1, %s11005_s1, %s11006_s30  }
  0x8d   : > { %s10207_s16 = scalar_lea.hbm %s12812_s3, 16 }
  0x8e   : > { %p10208_p7 = scmp.ne.s32.totalorder %s12812_s3, %s10207_s16  ;;  %p10214_p3 = scmp.lt.u32.totalorder %s10207_s16, %s12812_s3 }
  0x90   : > { %p10210_p4 = pnand %p10208_p7, %p11261_p8 }
  0x92   : > { %p10211_p1 = pneg %p10210_p4 }
  0x94   : > { %p10216_p9 = pnand %p10214_p3, %p10211_p1 }
  0x96   : > { %10219 = shalt.err (!%p10216_p9)
}
  0x97   : > { %s10220_s10 = scalar_lea.vmem %s856_s18, 16  ;;  %s10227_s28 = scalar_lea.vmem %s856_s18, 32 }
  0x98   : > { %p10221_p10 = scmp.ne.s32.totalorder %s856_s18, %s10220_s10  ;;  %p10228_p13 = scmp.lt.s32.totalorder %s856_s18, %s856_s18 }
  0x99   : > { %p10229_p0 = scmp.lt.s32.totalorder %s10227_s28, %s10220_s10 }
  0x9a   : > { %p10223_p11 = pnand %p10221_p10, %p11261_p8 }
  0x9b   : > { %p10230_p2 = por %p10229_p0, %p10228_p13 }
  0x9c   : > { %p10224_p12 = pneg %p10223_p11 }
  0x9e   : > { %p10231_p5 = pnand %p10230_p2, %p10224_p12 }
  0xa0   : > { %10234 = shalt.err (!%p10231_p5)
}
  0xa1   : > { %9418 = dma.hbm_to_vmem [thread:$0]  (!%p11249_p6), %s12812_s3, 16, %s856_s18, [#allocation12]  }
  0xa2   : > { %s11007_s11 = smov [#allocation14]   ;;  %s11008_s1 = smov [#allocation17]  }
  0xa3   : > { %s877_s16 = sshll.u32 %s11007_s11, 4  ;;  %s900_s30 = sshll.u32 %s11008_s1, 4  ;;  %s878_s16 = int_to_ptr.vmem [resolvable:$true] %s877_s16  ;;  %s901_s30 = int_to_ptr.vmem [resolvable:$true] %s900_s30 }
  0xa4   : > { %s10235_s17 = scalar_lea.hbm %s12811_s14, 16 }
  0xa5   : > { %p10236_p7 = scmp.ne.s32.totalorder %s12811_s14, %s10235_s17  ;;  %p10242_p3 = scmp.lt.u32.totalorder %s10235_s17, %s12811_s14 }
  0xa7   : > { %p10238_p4 = pnand %p10236_p7, %p11261_p8 }
  0xa9   : > { %p10239_p1 = pneg %p10238_p4 }
  0xab   : > { %p10244_p9 = pnand %p10242_p3, %p10239_p1 }
  0xad   : > { %10247 = shalt.err (!%p10244_p9)
}
  0xae   : > { %s10248_s28 = scalar_lea.vmem %s878_s16, 16  ;;  %s10255_s18 = scalar_lea.vmem %s878_s16, 32 }
  0xaf   : > { %p10249_p10 = scmp.ne.s32.totalorder %s878_s16, %s10248_s28  ;;  %p10256_p13 = scmp.lt.s32.totalorder %s878_s16, %s878_s16 }
  0xb0   : > { %p10257_p0 = scmp.lt.s32.totalorder %s10255_s18, %s10248_s28 }
  0xb1   : > { %p10251_p11 = pnand %p10249_p10, %p11261_p8 }
  0xb2   : > { %p10258_p2 = por %p10257_p0, %p10256_p13 }
  0xb3   : > { %p10252_p12 = pneg %p10251_p11 }
  0xb5   : > { %p10259_p5 = pnand %p10258_p2, %p10252_p12 }
  0xb7   : > { %10262 = shalt.err (!%p10259_p5)
}
  0xb8   : > { %9424 = dma.hbm_to_vmem [thread:$0]  (!%p11249_p6), %s12811_s14, 16, %s878_s16, [#allocation15]  }
  0xb9   : > { %s10263_s17 = scalar_lea.hbm %s11110_s24, 144 }
  0xba   : > { %p10264_p7 = scmp.ne.s32.totalorder %s11110_s24, %s10263_s17  ;;  %p10270_p3 = scmp.lt.u32.totalorder %s10263_s17, %s11110_s24 }
  0xbc   : > { %p10266_p4 = pnand %p10264_p7, %p11261_p8 }
  0xbe   : > { %p10267_p1 = pneg %p10266_p4 }
  0xc0   : > { %p10272_p9 = pnand %p10270_p3, %p10267_p1 }
  0xc2   : > { %10275 = shalt.err (!%p10272_p9)
}
  0xc3   : > { %s10276_s10 = scalar_lea.vmem %s901_s30, 144  ;;  %s10283_s11 = scalar_lea.vmem %s901_s30, 160 }
  0xc4   : > { %p10277_p10 = scmp.ne.s32.totalorder %s901_s30, %s10276_s10  ;;  %p10284_p13 = scmp.lt.s32.totalorder %s901_s30, %s901_s30 }
  0xc5   : > { %p10285_p0 = scmp.lt.s32.totalorder %s10283_s11, %s10276_s10 }
  0xc6   : > { %p10279_p11 = pnand %p10277_p10, %p11261_p8 }
  0xc7   : > { %p10286_p2 = por %p10285_p0, %p10284_p13 }
  0xc8   : > { %p10280_p12 = pneg %p10279_p11 }
  0xca   : > { %p10287_p5 = pnand %p10286_p2, %p10280_p12 }
  0xcc   : > { %10290 = shalt.err (!%p10287_p5)
}
  0xcd   : > { %s11009_s16 = smov 48   ;;  %s11010_s1 = smov 3  }
  0xce   : > { %9430 = dma.hbm_to_vmem [thread:$0]  (!%p11249_p6), %s11110_s24, 144, %s901_s30, [#allocation18], %s11009_s16, %s11009_s16, %s11010_s1  }
  0xcf   : > { %s11011_s28 = smov [#allocation20]   ;;  %s11012_s17 = smov [#allocation23]  }
  0xd0   : > { %s929_s18 = sshll.u32 %s11011_s28, 4  ;;  %s958_s3 = sshll.u32 %s11012_s17, 4  ;;  %s930_s18 = int_to_ptr.vmem [resolvable:$true] %s929_s18  ;;  %s959_s3 = int_to_ptr.vmem [resolvable:$true] %s958_s3 }
  0xd1   : > { %s10291_s14 = scalar_lea.hbm %s12805_s12, 48 }
  0xd2   : > { %p10292_p7 = scmp.ne.s32.totalorder %s12805_s12, %s10291_s14  ;;  %p10298_p3 = scmp.lt.u32.totalorder %s10291_s14, %s12805_s12 }
  0xd4   : > { %p10294_p4 = pnand %p10292_p7, %p11261_p8 }
  0xd6   : > { %p10295_p1 = pneg %p10294_p4 }
  0xd8   : > { %p10300_p9 = pnand %p10298_p3, %p10295_p1 }
  0xda   : > { %10303 = shalt.err (!%p10300_p9)
}
  0xdb   : > { %s10304_s10 = scalar_lea.vmem %s930_s18, 48  ;;  %s10311_s30 = scalar_lea.vmem %s930_s18, 64 }
  0xdc   : > { %p10305_p10 = scmp.ne.s32.totalorder %s930_s18, %s10304_s10  ;;  %p10312_p13 = scmp.lt.s32.totalorder %s930_s18, %s930_s18 }
  0xdd   : > { %p10313_p0 = scmp.lt.s32.totalorder %s10311_s30, %s10304_s10 }
  0xde   : > { %p10307_p11 = pnand %p10305_p10, %p11261_p8 }
  0xdf   : > { %p10314_p2 = por %p10313_p0, %p10312_p13 }
  0xe0   : > { %p10308_p12 = pneg %p10307_p11 }
  0xe2   : > { %p10315_p5 = pnand %p10314_p2, %p10308_p12 }
  0xe4   : > { %10318 = shalt.err (!%p10315_p5)
}
  0xe5   : > { %s12759_s11 = smov 16   ;;  %s12761_s14 = smov 1  }
  0xe6   : > { %9436 = dma.hbm_to_vmem [thread:$0]  (!%p11249_p6), %s12805_s12, 48, %s930_s18, [#allocation21], %s12759_s11, %s12759_s11, %s12761_s14  }
  0xe7   : > { %s10319_s16 = scalar_lea.hbm %s12810_s4, 48 }
  0xe8   : > { %p10320_p7 = scmp.ne.s32.totalorder %s12810_s4, %s10319_s16  ;;  %p10326_p3 = scmp.lt.u32.totalorder %s10319_s16, %s12810_s4 }
  0xea   : > { %p10322_p4 = pnand %p10320_p7, %p11261_p8 }
  0xec   : > { %p10323_p1 = pneg %p10322_p4 }
  0xee   : > { %p10328_p9 = pnand %p10326_p3, %p10323_p1 }
  0xf0   : > { %10331 = shalt.err (!%p10328_p9)
}
  0xf1   : > { %s10332_s1 = scalar_lea.vmem %s959_s3, 48  ;;  %s10339_s28 = scalar_lea.vmem %s959_s3, 64 }
  0xf2   : > { %p10333_p10 = scmp.ne.s32.totalorder %s959_s3, %s10332_s1  ;;  %p10340_p13 = scmp.lt.s32.totalorder %s959_s3, %s959_s3 }
  0xf3   : > { %p10341_p0 = scmp.lt.s32.totalorder %s10339_s28, %s10332_s1 }
  0xf4   : > { %p10335_p11 = pnand %p10333_p10, %p11261_p8 }
  0xf5   : > { %p10342_p2 = por %p10341_p0, %p10340_p13 }
  0xf6   : > { %p10336_p12 = pneg %p10335_p11 }
  0xf8   : > { %p10343_p5 = pnand %p10342_p2, %p10336_p12 }
  0xfa   : > { %10346 = shalt.err (!%p10343_p5)
}
  0xfb   : > { %9442 = dma.hbm_to_vmem [thread:$0]  (!%p11249_p6), %s12810_s4, 48, %s959_s3, [#allocation24], %s12759_s11, %s12759_s11, %s12761_s14  }
  0xfc   : > { %s11015_s18 = smov [#allocation26]   ;;  %s11016_s10 = smov [#allocation29]  }
  0xfd   : > { %s984_s17 = sshll.u32 %s11015_s18, 4  ;;  %s1013_s30 = sshll.u32 %s11016_s10, 4  ;;  %s985_s17 = int_to_ptr.vmem [resolvable:$true] %s984_s17  ;;  %s1014_s30 = int_to_ptr.vmem [resolvable:$true] %s1013_s30 }
  0xfe   : > { %s10347_s16 = scalar_lea.hbm %s12804_s13, 48 }
  0xff   : > { %p10348_p7 = scmp.ne.s32.totalorder %s12804_s13, %s10347_s16  ;;  %p10354_p3 = scmp.lt.u32.totalorder %s10347_s16, %s12804_s13 }
 0x101   : > { %p10350_p4 = pnand %p10348_p7, %p11261_p8 }
 0x103   : > { %p10351_p1 = pneg %p10350_p4 }
 0x105   : > { %p10356_p9 = pnand %p10354_p3, %p10351_p1 }
 0x107   : > { %10359 = shalt.err (!%p10356_p9)
}
 0x108   : > { %s10360_s1 = scalar_lea.vmem %s985_s17, 48  ;;  %s10367_s3 = scalar_lea.vmem %s985_s17, 64 }
 0x109   : > { %p10361_p10 = scmp.ne.s32.totalorder %s985_s17, %s10360_s1  ;;  %p10368_p13 = scmp.lt.s32.totalorder %s985_s17, %s985_s17 }
 0x10a   : > { %p10369_p0 = scmp.lt.s32.totalorder %s10367_s3, %s10360_s1 }
 0x10b   : > { %p10363_p11 = pnand %p10361_p10, %p11261_p8 }
 0x10c   : > { %p10370_p2 = por %p10369_p0, %p10368_p13 }
 0x10d   : > { %p10364_p12 = pneg %p10363_p11 }
 0x10f   : > { %p10371_p5 = pnand %p10370_p2, %p10364_p12 }
 0x111   : > { %10374 = shalt.err (!%p10371_p5)
}
 0x112   : > { %9448 = dma.hbm_to_vmem [thread:$0]  (!%p11249_p6), %s12804_s13, 48, %s985_s17, [#allocation27], %s12759_s11, %s12759_s11, %s12761_s14  }
 0x113   : > { %s10375_s28 = scalar_lea.hbm %s12809_s5, 3072 }
 0x114   : > { %p10376_p7 = scmp.ne.s32.totalorder %s12809_s5, %s10375_s28  ;;  %p10382_p3 = scmp.lt.u32.totalorder %s10375_s28, %s12809_s5 }
 0x116   : > { %p10378_p4 = pnand %p10376_p7, %p11261_p8 }
 0x118   : > { %p10379_p1 = pneg %p10378_p4 }
 0x11a   : > { %p10384_p9 = pnand %p10382_p3, %p10379_p1 }
 0x11c   : > { %10387 = shalt.err (!%p10384_p9)
}
 0x11d   : > { %s10388_s18 = scalar_lea.vmem %s1014_s30, 3072  ;;  %p10396_p13 = scmp.lt.s32.totalorder %s1014_s30, %s1014_s30 }
 0x11e   : > { %p10389_p10 = scmp.ne.s32.totalorder %s1014_s30, %s10388_s18  ;;  %p10397_p0 = scmp.lt.s32.totalorder %s10388_s18, %s10388_s18 }
 0x120   : > { %p10391_p11 = pnand %p10389_p10, %p11261_p8  ;;  %p10398_p2 = por %p10397_p0, %p10396_p13 }
 0x122   : > { %p10392_p12 = pneg %p10391_p11 }
 0x124   : > { %p10399_p5 = pnand %p10398_p2, %p10392_p12 }
 0x126   : > { %10402 = shalt.err (!%p10399_p5)
}
 0x127   : > { %s12817_s17 = smov 4   ;;  %s12818_s10 = smov 64  }
 0x128   : > { %9454 = dma.hbm_to_vmem [thread:$0]  (!%p11249_p6), %s12809_s5, 3072, %s1014_s30, [#allocation30], %s12818_s10, %s12818_s10, %s12817_s17  }
 0x129   : > { %s11017_s16 = smov [#allocation32]   ;;  %s10403_s3 = scalar_lea.hbm %s11175_s27, 48 }
 0x12a   : > { %s1039_s1 = sshll.u32 %s11017_s16, 4  ;;  %p10404_p7 = scmp.ne.s32.totalorder %s11175_s27, %s10403_s3  ;;  %s1040_s1 = int_to_ptr.vmem [resolvable:$true] %s1039_s1 }
 0x12b   : > { %p10410_p3 = scmp.lt.u32.totalorder %s10403_s3, %s11175_s27 }
 0x12c   : > { %p10406_p4 = pnand %p10404_p7, %p11261_p8 }
 0x12e   : > { %p10407_p1 = pneg %p10406_p4 }
 0x130   : > { %p10412_p9 = pnand %p10410_p3, %p10407_p1 }
 0x132   : > { %10415 = shalt.err (!%p10412_p9)
}
 0x133   : > { %s10416_s28 = scalar_lea.vmem %s1040_s1, 48  ;;  %s10423_s18 = scalar_lea.vmem %s1040_s1, 64 }
 0x134   : > { %p10417_p10 = scmp.ne.s32.totalorder %s1040_s1, %s10416_s28  ;;  %p10424_p13 = scmp.lt.s32.totalorder %s1040_s1, %s1040_s1 }
 0x135   : > { %p10425_p0 = scmp.lt.s32.totalorder %s10423_s18, %s10416_s28 }
 0x136   : > { %p10419_p11 = pnand %p10417_p10, %p11261_p8 }
 0x137   : > { %p10426_p2 = por %p10425_p0, %p10424_p13 }
 0x138   : > { %p10420_p12 = pneg %p10419_p11 }
 0x13a   : > { %p10427_p5 = pnand %p10426_p2, %p10420_p12 }
 0x13c   : > { %10430 = shalt.err (!%p10427_p5)
}
 0x13d   : > { %9460 = dma.hbm_to_vmem [thread:$0]  (!%p11249_p6), %s11175_s27, 48, %s1040_s1, [#allocation33], %s12759_s11, %s12759_s11, %s12761_s14  }
 0x13e   : > { %s11018_s30 = smov [#allocation35]   ;;  %s11019_s3 = smov [#allocation38]  }
 0x13f   : > { %s1065_s16 = sshll.u32 %s11018_s30, 4  ;;  %s1089_s4 = sshll.u32 %s11019_s3, 4  ;;  %s1066_s16 = int_to_ptr.vmem [resolvable:$true] %s1065_s16  ;;  %s11392_s4 = int_to_ptr.vmem [resolvable:$true] %s1089_s4 }
 0x140   : > { %s10431_s28 = scalar_lea.hbm %s11185_s20, 9216 }
 0x141   : > { %p10432_p7 = scmp.ne.s32.totalorder %s11185_s20, %s10431_s28  ;;  %p10438_p3 = scmp.lt.u32.totalorder %s10431_s28, %s11185_s20 }
 0x143   : > { %p10434_p4 = pnand %p10432_p7, %p11261_p8 }
 0x145   : > { %p10435_p1 = pneg %p10434_p4 }
 0x147   : > { %p10440_p9 = pnand %p10438_p3, %p10435_p1 }
 0x149   : > { %10443 = shalt.err (!%p10440_p9)
}
 0x14a   : > { %s10444_s18 = scalar_lea.vmem %s1066_s16, 9216  ;;  %p10452_p13 = scmp.lt.s32.totalorder %s1066_s16, %s1066_s16 }
 0x14b   : > { %p10445_p10 = scmp.ne.s32.totalorder %s1066_s16, %s10444_s18  ;;  %p10453_p0 = scmp.lt.s32.totalorder %s10444_s18, %s10444_s18 }
 0x14d   : > { %p10447_p11 = pnand %p10445_p10, %p11261_p8  ;;  %p10454_p2 = por %p10453_p0, %p10452_p13 }
 0x14f   : > { %p10448_p12 = pneg %p10447_p11 }
 0x151   : > { %p10455_p5 = pnand %p10454_p2, %p10448_p12 }
 0x153   : > { %10458 = shalt.err (!%p10455_p5)
}
 0x154   : > { %s11020_s1 = smov 192   ;;  %s11021_s30 = smov 12  }
 0x155   : > { %9466 = dma.hbm_to_vmem [thread:$0]  (!%p11249_p6), %s11185_s20, 9216, %s1066_s16, [#allocation36], %s11020_s1, %s11020_s1, %s11021_s30  }
 0x156   : > { %s10459_s3 = scalar_lea.hbm %s12808_s6, 3072 }
 0x157   : > { %p10460_p7 = scmp.ne.s32.totalorder %s12808_s6, %s10459_s3  ;;  %p10466_p3 = scmp.lt.u32.totalorder %s10459_s3, %s12808_s6 }
 0x159   : > { %p10462_p4 = pnand %p10460_p7, %p11261_p8 }
 0x15b   : > { %p10463_p1 = pneg %p10462_p4 }
 0x15d   : > { %p10468_p9 = pnand %p10466_p3, %p10463_p1 }
 0x15f   : > { %10471 = shalt.err (!%p10468_p9)
}
 0x160   : > { %s10472_s28 = scalar_lea.vmem %s11392_s4, 3072  ;;  %p10480_p13 = scmp.lt.s32.totalorder %s11392_s4, %s11392_s4 }
 0x161   : > { %p10473_p10 = scmp.ne.s32.totalorder %s11392_s4, %s10472_s28  ;;  %p10481_p0 = scmp.lt.s32.totalorder %s10472_s28, %s10472_s28 }
 0x163   : > { %p10475_p11 = pnand %p10473_p10, %p11261_p8  ;;  %p10482_p2 = por %p10481_p0, %p10480_p13 }
 0x165   : > { %p10476_p12 = pneg %p10475_p11 }
 0x167   : > { %p10483_p5 = pnand %p10482_p2, %p10476_p12 }
 0x169   : > { %10486 = shalt.err (!%p10483_p5)
}
 0x16a   : > { %9472 = dma.hbm_to_vmem [thread:$0]  (!%p11249_p6), %s12808_s6, 3072, %s11392_s4, [#allocation39], %s12818_s10, %s12818_s10, %s12817_s17  }
 0x16b   : > { %s11022_s16 = smov [#allocation7]   ;;  %s11023_s3 = smov [#allocation10]  }
 0x16c   : > { %s815_s18 = sshll.u32 %s11022_s16, 4  ;;  %s841_s11 = sshll.u32 %s11023_s3, 4  ;;  %s816_s18 = int_to_ptr.vmem [resolvable:$true] %s815_s18  ;;  %s11425_s11 = int_to_ptr.vmem [resolvable:$true] %s841_s11 }
 0x16d   : > { %s10487_s28 = scalar_lea.hbm %s11075_s21, 1152 }
 0x16e   : > { %p10488_p7 = scmp.ne.s32.totalorder %s11075_s21, %s10487_s28  ;;  %p10494_p3 = scmp.lt.u32.totalorder %s10487_s28, %s11075_s21 }
 0x170   : > { %p10490_p4 = pnand %p10488_p7, %p11261_p8 }
 0x172   : > { %p10491_p1 = pneg %p10490_p4 }
 0x174   : > { %p10496_p9 = pnand %p10494_p3, %p10491_p1 }
 0x176   : > { %10499 = shalt.err (!%p10496_p9)
}
 0x177   : > { %s10500_s14 = scalar_lea.vmem %s816_s18, 1152  ;;  %p10508_p13 = scmp.lt.s32.totalorder %s816_s18, %s816_s18 }
 0x178   : > { %p10501_p10 = scmp.ne.s32.totalorder %s816_s18, %s10500_s14  ;;  %p10509_p0 = scmp.lt.s32.totalorder %s10500_s14, %s10500_s14 }
 0x17a   : > { %p10503_p11 = pnand %p10501_p10, %p11261_p8  ;;  %p10510_p2 = por %p10509_p0, %p10508_p13 }
 0x17c   : > { %p10504_p12 = pneg %p10503_p11 }
 0x17e   : > { %p10511_p5 = pnand %p10510_p2, %p10504_p12 }
 0x180   : > { %10514 = shalt.err (!%p10511_p5)
}
 0x181   : > { %9409 = dma.hbm_to_vmem [thread:$0]  (!%p11249_p6), %s11075_s21, 1152, %s816_s18, [#allocation6], %s12818_s10, %s12818_s10, %s12817_s17  }
 0x182   : > { %s10515_s4 = scalar_lea.hbm %s11085_s29, 512 }
 0x183   : > { %p10516_p7 = scmp.ne.s32.totalorder %s11085_s29, %s10515_s4  ;;  %p10522_p3 = scmp.lt.u32.totalorder %s10515_s4, %s11085_s29 }
 0x185   : > { %p10518_p4 = pnand %p10516_p7, %p11261_p8 }
 0x187   : > { %p10519_p1 = pneg %p10518_p4 }
 0x189   : > { %p10524_p9 = pnand %p10522_p3, %p10519_p1 }
 0x18b   : > { %10527 = shalt.err (!%p10524_p9)
}
 0x18c   : > { %s10528_s14 = scalar_lea.vmem %s11425_s11, 512  ;;  %p10536_p13 = scmp.lt.s32.totalorder %s11425_s11, %s11425_s11 }
 0x18d   : > { %p10529_p10 = scmp.ne.s32.totalorder %s11425_s11, %s10528_s14  ;;  %p10537_p0 = scmp.lt.s32.totalorder %s10528_s14, %s10528_s14 }
 0x18f   : > { %p10531_p11 = pnand %p10529_p10, %p11261_p8  ;;  %p10538_p2 = por %p10537_p0, %p10536_p13 }
 0x191   : > { %p10532_p12 = pneg %p10531_p11 }
 0x193   : > { %p10539_p5 = pnand %p10538_p2, %p10532_p12 }
 0x195   : > { %10542 = shalt.err (!%p10539_p5)
}
 0x196   : > { %9415 = dma.hbm_to_vmem [thread:$0]  (!%p11249_p6), %s11085_s29, 512, %s11425_s11, [#allocation9], %s12818_s10, %s12818_s10, %s12817_s17  }
 0x197   : > { %s11024_s16 = smov [#allocation13]   ;;  %s11025_s3 = smov [#allocation16]  }
 0x198   : > { %s866_s18 = sshll.u32 %s11024_s16, 4  ;;  %s887_s28 = sshll.u32 %s11025_s3, 4  ;;  %s867_s18 = int_to_ptr.vmem [resolvable:$true] %s866_s18  ;;  %s11458_s28 = int_to_ptr.vmem [resolvable:$true] %s887_s28 }
 0x199   : > { %s10543_s4 = scalar_lea.hbm %s12807_s8, 16 }
 0x19a   : > { %p10544_p7 = scmp.ne.s32.totalorder %s12807_s8, %s10543_s4  ;;  %p10550_p3 = scmp.lt.u32.totalorder %s10543_s4, %s12807_s8 }
 0x19c   : > { %p10546_p4 = pnand %p10544_p7, %p11261_p8 }
 0x19e   : > { %p10547_p1 = pneg %p10546_p4 }
 0x1a0   : > { %p10552_p9 = pnand %p10550_p3, %p10547_p1 }
 0x1a2   : > { %10555 = shalt.err (!%p10552_p9)
}
 0x1a3   : > { %s10556_s14 = scalar_lea.vmem %s867_s18, 16  ;;  %s10563_s11 = scalar_lea.vmem %s867_s18, 32 }
 0x1a4   : > { %p10557_p10 = scmp.ne.s32.totalorder %s867_s18, %s10556_s14  ;;  %p10564_p13 = scmp.lt.s32.totalorder %s867_s18, %s867_s18 }
 0x1a5   : > { %p10565_p0 = scmp.lt.s32.totalorder %s10563_s11, %s10556_s14 }
 0x1a6   : > { %p10559_p11 = pnand %p10557_p10, %p11261_p8 }
 0x1a7   : > { %p10566_p2 = por %p10565_p0, %p10564_p13 }
 0x1a8   : > { %p10560_p12 = pneg %p10559_p11 }
 0x1aa   : > { %p10567_p5 = pnand %p10566_p2, %p10560_p12 }
 0x1ac   : > { %10570 = shalt.err (!%p10567_p5)
}
 0x1ad   : > { %s12819_s17 = sld [smem:[#allocation63_spill]] }
 0x1ae   : > { %9421 = dma.hbm_to_vmem [thread:$0]  (!%p11249_p6), %s12807_s8, 16, %s867_s18, [#allocation12]  }
 0x1b3   : > { %s10571_s10 = scalar_lea.hbm %s12819_s17, 9216 }
 0x1b4   : > { %p10572_p7 = scmp.ne.s32.totalorder %s12819_s17, %s10571_s10  ;;  %p10578_p3 = scmp.lt.u32.totalorder %s10571_s10, %s12819_s17 }
 0x1b6   : > { %p10574_p4 = pnand %p10572_p7, %p11261_p8 }
 0x1b8   : > { %p10575_p1 = pneg %p10574_p4 }
 0x1ba   : > { %p10580_p9 = pnand %p10578_p3, %p10575_p1 }
 0x1bc   : > { %10583 = shalt.err (!%p10580_p9)
}
 0x1bd   : > { %s10584_s16 = scalar_lea.vmem %s11458_s28, 9216  ;;  %p10592_p13 = scmp.lt.s32.totalorder %s11458_s28, %s11458_s28 }
 0x1be   : > { %p10585_p10 = scmp.ne.s32.totalorder %s11458_s28, %s10584_s16  ;;  %p10593_p0 = scmp.lt.s32.totalorder %s10584_s16, %s10584_s16 }
 0x1c0   : > { %p10587_p11 = pnand %p10585_p10, %p11261_p8  ;;  %p10594_p2 = por %p10593_p0, %p10592_p13 }
 0x1c2   : > { %p10588_p12 = pneg %p10587_p11 }
 0x1c4   : > { %p10595_p5 = pnand %p10594_p2, %p10588_p12 }
 0x1c6   : > { %10598 = shalt.err (!%p10595_p5)
}
 0x1c7   : > { %s12820_s18 = sld [smem:[#allocation65_spill]]  ;;  %s11026_s3 = smov [#allocation19]  }
 0x1c8   : > { %9427 = dma.hbm_to_vmem [thread:$0]  (!%p11249_p6), %s12819_s17, 9216, %s11458_s28, [#allocation15], %s11020_s1, %s11020_s1, %s11021_s30  }
 0x1c9   : > { %s916_s4 = sshll.u32 %s11026_s3, 4  ;;  %s11027_s14 = smov [#allocation22]   ;;  %s917_s4 = int_to_ptr.vmem [resolvable:$true] %s916_s4 }
 0x1ca   : > { %s942_s11 = sshll.u32 %s11027_s14, 4  ;;  %s11488_s11 = int_to_ptr.vmem [resolvable:$true] %s942_s11 }
 0x1cd   : > { %s10599_s10 = scalar_lea.hbm %s12820_s18, 48 }
 0x1ce   : > { %p10600_p7 = scmp.ne.s32.totalorder %s12820_s18, %s10599_s10  ;;  %p10606_p3 = scmp.lt.u32.totalorder %s10599_s10, %s12820_s18 }
 0x1d0   : > { %p10602_p4 = pnand %p10600_p7, %p11261_p8 }
 0x1d2   : > { %p10603_p1 = pneg %p10602_p4 }
 0x1d4   : > { %p10608_p9 = pnand %p10606_p3, %p10603_p1 }
 0x1d6   : > { %10611 = shalt.err (!%p10608_p9)
}
 0x1d7   : > { %s10612_s16 = scalar_lea.vmem %s917_s4, 48  ;;  %s10619_s1 = scalar_lea.vmem %s917_s4, 64 }
 0x1d8   : > { %p10613_p10 = scmp.ne.s32.totalorder %s917_s4, %s10612_s16  ;;  %p10620_p13 = scmp.lt.s32.totalorder %s917_s4, %s917_s4 }
 0x1d9   : > { %p10621_p0 = scmp.lt.s32.totalorder %s10619_s1, %s10612_s16 }
 0x1da   : > { %p10615_p11 = pnand %p10613_p10, %p11261_p8 }
 0x1db   : > { %p10622_p2 = por %p10621_p0, %p10620_p13 }
 0x1dc   : > { %p10616_p12 = pneg %p10615_p11 }
 0x1de   : > { %p10623_p5 = pnand %p10622_p2, %p10616_p12 }
 0x1e0   : > { %10626 = shalt.err (!%p10623_p5)
}
 0x1e1   : > { %s12821_s30 = smov 1   ;;  %s12822_s28 = smov 16  }
 0x1e2   : > { %s12823_s3 = sld [smem:[#allocation67_spill]] }
 0x1e3   : > { %9433 = dma.hbm_to_vmem [thread:$0]  (!%p11249_p6), %s12820_s18, 48, %s917_s4, [#allocation18], %s12822_s28, %s12822_s28, %s12821_s30  }
 0x1e8   : > { %s10627_s14 = scalar_lea.hbm %s12823_s3, 48 }
 0x1e9   : > { %p10628_p7 = scmp.ne.s32.totalorder %s12823_s3, %s10627_s14  ;;  %p10634_p3 = scmp.lt.u32.totalorder %s10627_s14, %s12823_s3 }
 0x1eb   : > { %p10630_p4 = pnand %p10628_p7, %p11261_p8 }
 0x1ed   : > { %p10631_p1 = pneg %p10630_p4 }
 0x1ef   : > { %p10636_p9 = pnand %p10634_p3, %p10631_p1 }
 0x1f1   : > { %10639 = shalt.err (!%p10636_p9)
}
 0x1f2   : > { %s10640_s10 = scalar_lea.vmem %s11488_s11, 48  ;;  %s10647_s16 = scalar_lea.vmem %s11488_s11, 64 }
 0x1f3   : > { %p10641_p10 = scmp.ne.s32.totalorder %s11488_s11, %s10640_s10  ;;  %p10648_p13 = scmp.lt.s32.totalorder %s11488_s11, %s11488_s11 }
 0x1f4   : > { %p10649_p0 = scmp.lt.s32.totalorder %s10647_s16, %s10640_s10 }
 0x1f5   : > { %p10643_p11 = pnand %p10641_p10, %p11261_p8 }
 0x1f6   : > { %p10650_p2 = por %p10649_p0, %p10648_p13 }
 0x1f7   : > { %p10644_p12 = pneg %p10643_p11 }
 0x1f9   : > { %p10651_p5 = pnand %p10650_p2, %p10644_p12 }
 0x1fb   : > { %10654 = shalt.err (!%p10651_p5)
}
 0x1fc   : > { %s12824_s4 = sld [smem:[#allocation70_spill]]  ;;  %s11028_s1 = smov [#allocation25]  }
 0x1fd   : > { %9439 = dma.hbm_to_vmem [thread:$0]  (!%p11249_p6), %s12823_s3, 48, %s11488_s11, [#allocation21], %s12822_s28, %s12822_s28, %s12821_s30  }
 0x1fe   : > { %s971_s14 = sshll.u32 %s11028_s1, 4  ;;  %s11029_s5 = smov [#allocation28]   ;;  %s972_s14 = int_to_ptr.vmem [resolvable:$true] %s971_s14 }
 0x1ff   : > { %s1000_s6 = sshll.u32 %s11029_s5, 4  ;;  %s11522_s6 = int_to_ptr.vmem [resolvable:$true] %s1000_s6 }
 0x202   : > { %s10655_s10 = scalar_lea.hbm %s12824_s4, 48 }
 0x203   : > { %p10656_p7 = scmp.ne.s32.totalorder %s12824_s4, %s10655_s10  ;;  %p10662_p3 = scmp.lt.u32.totalorder %s10655_s10, %s12824_s4 }
 0x205   : > { %p10658_p4 = pnand %p10656_p7, %p11261_p8 }
 0x207   : > { %p10659_p1 = pneg %p10658_p4 }
 0x209   : > { %p10664_p9 = pnand %p10662_p3, %p10659_p1 }
 0x20b   : > { %10667 = shalt.err (!%p10664_p9)
}
 0x20c   : > { %s10668_s16 = scalar_lea.vmem %s972_s14, 48  ;;  %s10675_s11 = scalar_lea.vmem %s972_s14, 64 }
 0x20d   : > { %p10669_p10 = scmp.ne.s32.totalorder %s972_s14, %s10668_s16  ;;  %p10676_p13 = scmp.lt.s32.totalorder %s972_s14, %s972_s14 }
 0x20e   : > { %p10677_p0 = scmp.lt.s32.totalorder %s10675_s11, %s10668_s16 }
 0x20f   : > { %p10671_p11 = pnand %p10669_p10, %p11261_p8 }
 0x210   : > { %p10678_p2 = por %p10677_p0, %p10676_p13 }
 0x211   : > { %p10672_p12 = pneg %p10671_p11 }
 0x213   : > { %p10679_p5 = pnand %p10678_p2, %p10672_p12 }
 0x215   : > { %10682 = shalt.err (!%p10679_p5)
}
 0x216   : > { %s12825_s5 = sld [smem:[#allocation73_spill]] }
 0x217   : > { %9445 = dma.hbm_to_vmem [thread:$0]  (!%p11249_p6), %s12824_s4, 48, %s972_s14, [#allocation24], %s12822_s28, %s12822_s28, %s12821_s30  }
 0x21c   : > { %s10683_s1 = scalar_lea.hbm %s12825_s5, 48 }
 0x21d   : > { %p10684_p7 = scmp.ne.s32.totalorder %s12825_s5, %s10683_s1  ;;  %p10690_p3 = scmp.lt.u32.totalorder %s10683_s1, %s12825_s5 }
 0x21f   : > { %p10686_p4 = pnand %p10684_p7, %p11261_p8 }
 0x221   : > { %p10687_p1 = pneg %p10686_p4 }
 0x223   : > { %p10692_p9 = pnand %p10690_p3, %p10687_p1 }
 0x225   : > { %10695 = shalt.err (!%p10692_p9)
}
 0x226   : > { %s10696_s10 = scalar_lea.vmem %s11522_s6, 48  ;;  %s10703_s16 = scalar_lea.vmem %s11522_s6, 64 }
 0x227   : > { %p10697_p10 = scmp.ne.s32.totalorder %s11522_s6, %s10696_s10  ;;  %p10704_p13 = scmp.lt.s32.totalorder %s11522_s6, %s11522_s6 }
 0x228   : > { %p10705_p0 = scmp.lt.s32.totalorder %s10703_s16, %s10696_s10 }
 0x229   : > { %p10699_p11 = pnand %p10697_p10, %p11261_p8 }
 0x22a   : > { %p10706_p2 = por %p10705_p0, %p10704_p13 }
 0x22b   : > { %p10700_p12 = pneg %p10699_p11 }
 0x22d   : > { %p10707_p5 = pnand %p10706_p2, %p10700_p12 }
 0x22f   : > { %10710 = shalt.err (!%p10707_p5)
}
 0x230   : > { %s12826_s14 = sld [smem:[#allocation75_spill]]  ;;  %s11030_s11 = smov [#allocation31]  }
 0x231   : > { %9451 = dma.hbm_to_vmem [thread:$0]  (!%p11249_p6), %s12825_s5, 48, %s11522_s6, [#allocation27], %s12822_s28, %s12822_s28, %s12821_s30  }
 0x232   : > { %s1026_s1 = sshll.u32 %s11030_s11, 4  ;;  %s11031_s3 = smov [#allocation34]   ;;  %s1027_s1 = int_to_ptr.vmem [resolvable:$true] %s1026_s1 }
 0x233   : > { %s1052_s4 = sshll.u32 %s11031_s3, 4  ;;  %s11556_s4 = int_to_ptr.vmem [resolvable:$true] %s1052_s4 }
 0x236   : > { %s10711_s10 = scalar_lea.hbm %s12826_s14, 48 }
 0x237   : > { %p10712_p7 = scmp.ne.s32.totalorder %s12826_s14, %s10711_s10  ;;  %p10718_p3 = scmp.lt.u32.totalorder %s10711_s10, %s12826_s14 }
 0x239   : > { %p10714_p4 = pnand %p10712_p7, %p11261_p8 }
 0x23b   : > { %p10715_p1 = pneg %p10714_p4 }
 0x23d   : > { %p10720_p9 = pnand %p10718_p3, %p10715_p1 }
 0x23f   : > { %10723 = shalt.err (!%p10720_p9)
}
 0x240   : > { %s10724_s16 = scalar_lea.vmem %s1027_s1, 48  ;;  %s10731_s6 = scalar_lea.vmem %s1027_s1, 64 }
 0x241   : > { %p10725_p10 = scmp.ne.s32.totalorder %s1027_s1, %s10724_s16  ;;  %p10732_p13 = scmp.lt.s32.totalorder %s1027_s1, %s1027_s1 }
 0x242   : > { %p10733_p0 = scmp.lt.s32.totalorder %s10731_s6, %s10724_s16 }
 0x243   : > { %p10727_p11 = pnand %p10725_p10, %p11261_p8 }
 0x244   : > { %p10734_p2 = por %p10733_p0, %p10732_p13 }
 0x245   : > { %p10728_p12 = pneg %p10727_p11 }
 0x247   : > { %p10735_p5 = pnand %p10734_p2, %p10728_p12 }
 0x249   : > { %10738 = shalt.err (!%p10735_p5)
}
 0x24a   : > { %s12827_s3 = sld [smem:[#allocation76_spill]] }
 0x24b   : > { %9457 = dma.hbm_to_vmem [thread:$0]  (!%p11249_p6), %s12826_s14, 48, %s1027_s1, [#allocation30], %s12822_s28, %s12822_s28, %s12821_s30  }
 0x250   : > { %s10739_s11 = scalar_lea.hbm %s12827_s3, 48 }
 0x251   : > { %p10740_p7 = scmp.ne.s32.totalorder %s12827_s3, %s10739_s11  ;;  %p10746_p3 = scmp.lt.u32.totalorder %s10739_s11, %s12827_s3 }
 0x253   : > { %p10742_p4 = pnand %p10740_p7, %p11261_p8 }
 0x255   : > { %p10743_p1 = pneg %p10742_p4 }
 0x257   : > { %p10748_p9 = pnand %p10746_p3, %p10743_p1 }
 0x259   : > { %10751 = shalt.err (!%p10748_p9)
}
 0x25a   : > { %s10752_s10 = scalar_lea.vmem %s11556_s4, 48  ;;  %s10759_s16 = scalar_lea.vmem %s11556_s4, 64 }
 0x25b   : > { %p10753_p10 = scmp.ne.s32.totalorder %s11556_s4, %s10752_s10  ;;  %p10760_p13 = scmp.lt.s32.totalorder %s11556_s4, %s11556_s4 }
 0x25c   : > { %p10761_p0 = scmp.lt.s32.totalorder %s10759_s16, %s10752_s10 }
 0x25d   : > { %p10755_p11 = pnand %p10753_p10, %p11261_p8 }
 0x25e   : > { %p10762_p2 = por %p10761_p0, %p10760_p13 }
 0x25f   : > { %p10756_p12 = pneg %p10755_p11 }
 0x261   : > { %p10763_p5 = pnand %p10762_p2, %p10756_p12 }
 0x263   : > { %10766 = shalt.err (!%p10763_p5)
}
 0x264   : > { %s12828_s1 = sld [smem:[#allocation77_spill]]  ;;  %s11032_s6 = smov [#allocation37]  }
 0x265   : > { %9463 = dma.hbm_to_vmem [thread:$0]  (!%p11249_p6), %s12827_s3, 48, %s11556_s4, [#allocation33], %s12822_s28, %s12822_s28, %s12821_s30  }
 0x266   : > { %s1079_s11 = sshll.u32 %s11032_s6, 4  ;;  %s11033_s5 = smov [#allocation40]   ;;  %s1080_s11 = int_to_ptr.vmem [resolvable:$true] %s1079_s11 }
 0x267   : > { %s1103_s8 = sshll.u32 %s11033_s5, 4  ;;  %s11590_s8 = int_to_ptr.vmem [resolvable:$true] %s1103_s8 }
 0x26a   : > { %s10767_s10 = scalar_lea.hbm %s12828_s1, 48 }
 0x26b   : > { %p10768_p7 = scmp.ne.s32.totalorder %s12828_s1, %s10767_s10  ;;  %p10774_p3 = scmp.lt.u32.totalorder %s10767_s10, %s12828_s1 }
 0x26d   : > { %p10770_p4 = pnand %p10768_p7, %p11261_p8 }
 0x26f   : > { %p10771_p1 = pneg %p10770_p4 }
 0x271   : > { %p10776_p9 = pnand %p10774_p3, %p10771_p1 }
 0x273   : > { %10779 = shalt.err (!%p10776_p9)
}
 0x274   : > { %s10780_s16 = scalar_lea.vmem %s1080_s11, 48  ;;  %s10787_s30 = scalar_lea.vmem %s1080_s11, 64 }
 0x275   : > { %p10781_p10 = scmp.ne.s32.totalorder %s1080_s11, %s10780_s16  ;;  %p10788_p13 = scmp.lt.s32.totalorder %s1080_s11, %s1080_s11 }
 0x276   : > { %p10789_p0 = scmp.lt.s32.totalorder %s10787_s30, %s10780_s16 }
 0x277   : > { %p10783_p11 = pnand %p10781_p10, %p11261_p8 }
 0x278   : > { %p10790_p2 = por %p10789_p0, %p10788_p13 }
 0x279   : > { %p10784_p12 = pneg %p10783_p11 }
 0x27b   : > { %p10791_p5 = pnand %p10790_p2, %p10784_p12 }
 0x27d   : > { %10794 = shalt.err (!%p10791_p5)
}
 0x27e   : > { %9469 = dma.hbm_to_vmem [thread:$0]  (!%p11249_p6), %s12828_s1, 48, %s1080_s11, [#allocation36]  }
 0x27f   : > { %s10795_s28 = scalar_lea.hbm %s12806_s9, 16 }
 0x280   : > { %p10796_p7 = scmp.ne.s32.totalorder %s12806_s9, %s10795_s28  ;;  %p10802_p3 = scmp.lt.u32.totalorder %s10795_s28, %s12806_s9 }
 0x282   : > { %p10798_p4 = pnand %p10796_p7, %p11261_p8 }
 0x284   : > { %p10799_p1 = pneg %p10798_p4 }
 0x286   : > { %p10804_p9 = pnand %p10802_p3, %p10799_p1 }
 0x288   : > { %10807 = shalt.err (!%p10804_p9)
}
 0x289   : > { %s10808_s4 = scalar_lea.vmem %s11590_s8, 16  ;;  %s10815_s5 = scalar_lea.vmem %s11590_s8, 32 }
 0x28a   : > { %p10809_p10 = scmp.ne.s32.totalorder %s11590_s8, %s10808_s4  ;;  %p10816_p13 = scmp.lt.s32.totalorder %s11590_s8, %s11590_s8 }
 0x28b   : > { %p10817_p0 = scmp.lt.s32.totalorder %s10815_s5, %s10808_s4 }
 0x28c   : > { %p10811_p11 = pnand %p10809_p10, %p11261_p8 }
 0x28d   : > { %p10818_p2 = por %p10817_p0, %p10816_p13 }
 0x28e   : > { %p10812_p12 = pneg %p10811_p11 }
 0x290   : > { %p10819_p5 = pnand %p10818_p2, %p10812_p12 }
 0x292   : > { %10822 = shalt.err (!%p10819_p5)
}
 0x293   : > { %9475 = dma.hbm_to_vmem [thread:$0]  (!%p11249_p6), %s12806_s9, 16, %s11590_s8, [#allocation39]  }
 0x294   : > { %s7911_s19 = sadd.s32 4294967294, %s10967_s26   ;;  %s11620_s6 = sadd.s32 1, %s10967_s26  }
 0x295   : > { %s96_s15 = ssub.s32 %s10967_s26, %s11620_s6  ;;  %s99_s11 = sadd.s32 1, %s10963_s23 }
 0x296   : > { %s12829_s10 = sld [smem:[#allocation56_spill]]  ;;  %p97_p8 = scmp.eq.s32.totalorder %s96_s15, 0 }
 0x297   : > { %p106_p7 = scmp.ne.s32.totalorder %s10963_s23, %s10959_s0  ;;  %p107_p4 = scmp.eq.s32.totalorder %s10967_s26, 0 }
 0x298   : > { %p112_p1 = scmp.ne.s32.totalorder %s10959_s0, %s10955_s22  ;;  %p12831_p9 = scmp.eq.s32.totalorder %s11233_s2, 0 }
 0x299   : > { %s11631_s16 = scalar_select %p97_p8, %s10963_s23, %s99_s11  }
 0x29a   : > { %p11633_p3 = por %p107_p4, %p106_p7  ;;  %p11639_p6 = por %p12831_p9, %p112_p1 }
 0x29b   : > { %p745_p10 = scmp.eq.s32.totalorder %s11233_s2, 1  ;;  %p751_p11 = scmp.eq.s32.totalorder %s7911_s19, 1 }
 0x29c   : > { %s12832_s8 = scalar_select %p11639_p6, 1, 0 }
 0x29d   : > { %p9508_p12 = scmp.lt.s32.totalorder %s10967_s26, 2  ;;  %s1114_s28 = sand.u32 1, %s10963_s23  }
 0x29e   : > { %p11646_p13 = por %p745_p10, %p106_p7  ;;  %p11650_p0 = por %p751_p11, %p112_p1 }
 0x29f   : > { %s7938_s15 = sshll.u32 %s1114_s28, 4  ;;  %s8433_s11 = sshll.u32 %s10967_s26, 8 }
 0x2a0   : > { %s12833_s4 = scalar_select %p11646_p13, 1, 0 }
 0x2a1   : > { %s12834_s5 = scalar_select %p11650_p0, 1, 0 }
 0x2a2   : > { %s11656_s1 = scalar_lea.hbm %s12829_s10, %s8433_s11  ;;  %s1118_s19 = scalar_lea.vmem [#allocation2], %s7938_s15 }
 0x2a3   : > { %s1125_s3 = sshll.u32 %s1118_s19, 4  ;;  %p11662_p2 = pnand %p9508_p12, %p11633_p3  ;;  %s11658_s3 = int_to_ptr.vmem [resolvable:$true] %s1125_s3 }
 0x2a4   : > { %s11666_s12 = scalar_lea.sflag [#allocation3], %s1114_s28  ;;  %s10823_s13 = scalar_lea.hbm %s11656_s1, 256 }
 0x2a5   : > { %p10824_p5 = scmp.ne.s32.totalorder %s11656_s1, %s10823_s13  ;;  %p10825_p8 = pneg %p11662_p2 }
 0x2a6   : > { %s10828_s15 = scalar_lea.hbm %s12829_s10, 512  ;;  %p10829_p1 = scmp.lt.u32.totalorder %s11656_s1, %s12829_s10 }
 0x2a7   : > { %p10826_p7 = pnand %p10825_p8, %p10824_p5  ;;  %p10830_p9 = scmp.lt.u32.totalorder %s10828_s15, %s10823_s13 }
 0x2a8   : > { %p10832_p3 = scmp.lt.u32.totalorder %s10823_s13, %s11656_s1 }
 0x2a9   : > { %p10827_p4 = pneg %p10826_p7  ;;  %p10831_p10 = por %p10830_p9, %p10829_p1 }
 0x2ab   : > { %p10833_p11 = por %p10832_p3, %p10831_p10 }
 0x2ad   : > { %p10834_p12 = pnand %p10833_p11, %p10827_p4 }
 0x2af   : > { %10837 = shalt.err (!%p10834_p12)
}
 0x2b0   : > { %s10838_s30 = scalar_lea.vmem %s11658_s3, 256  ;;  %s11034_s28 = smov [#allocation2]  }
 0x2b1   : > { %p10839_p0 = scmp.ne.s32.totalorder %s11658_s3, %s10838_s30  ;;  %s10843_s11 = sshll.u32 %s11034_s28, 4  ;;  %s10844_s11 = int_to_ptr.vmem [resolvable:$false] %s10843_s11 }
 0x2b2   : > { %s10845_s19 = scalar_lea.vmem %s10844_s11, 512  ;;  %p10846_p5 = scmp.lt.s32.totalorder %s11658_s3, %s10844_s11 }
 0x2b3   : > { %p10841_p13 = pnand %p10839_p0, %p10825_p8  ;;  %p10847_p7 = scmp.lt.s32.totalorder %s10845_s19, %s10838_s30 }
 0x2b5   : > { %p10842_p6 = pneg %p10841_p13  ;;  %p10848_p1 = por %p10847_p7, %p10846_p5 }
 0x2b7   : > { %p10849_p9 = pnand %p10848_p1, %p10842_p6 }
 0x2b9   : > { %10852 = shalt.err (!%p10849_p9)
}
 0x2ba   : > { %s11035_s13 = smov 128   ;;  %s11036_s15 = smov 8  }
 0x2bb   : > { %9479 = dma.hbm_to_vmem [thread:$0]  (!%p11662_p2), %s11656_s1, 256, %s11658_s3, %s11666_s12, %s11035_s13, %s11035_s13, %s11036_s15  }
 0x2bc   : > { %p12836_p0 = scmp.ne.s32.totalorder %s12814_s7, 0 }
 0x2bd   : > { %s11693_s28 = sand.u32 (!%p12836_p0), 1, %s10959_s0   ;;  %p12837_p6 = scmp.ne.s32.totalorder (!%p12836_p0), %s12832_s8, 0 }
 0x2be   : > { %1137 = sbr.rel (%p12836_p0) target bundleno = 12564 (0x3114), region = 140  ;;  %s7942_s30 = sshll.u32 (!%p12836_p0), %s11693_s28, 4 }
 0x2bf   : > { %s1140_s11 = scalar_lea.sflag (!%p12836_p0), [#allocation3], %s11693_s28  ;;  %s11699_s19 = scalar_lea.vmem (!%p12836_p0), [#allocation2], %s7942_s30 }
 0x2c5   : > { %10898 = dma.done.wait (%p12837_p6), %s1140_s11, 256  }
 0x2c6   : > { %10900 = vsyncadd (%p12837_p6), %s1140_s11, 4294967040  ;;  %p12838_p13 = scmp.eq.s32.totalorder %s11233_s2, 0 }
 0x2c8   : > { %10902 = dma.done.wait (%p12838_p13), [#allocation6], 2304   ;;  %p12839_p2 = pmov %p12838_p13 }
 0x2ca   : > { %10904 = vsyncadd (%p12839_p2), [#allocation6], 4294964992  ;;  %p12840_p8 = pmov %p12839_p2 }
 0x2cb   : > { %p12841_p4 = pmov %p12839_p2 }
 0x2cc   : > { %10906 = dma.done.wait (%p12840_p8), [#allocation9], 1280  }
 0x2cd   : > { %10908 = vsyncadd (%p12841_p4), [#allocation9], 4294966016  ;;  %p12842_p10 = pmov %p12839_p2 }
 0x2ce   : > { %p12843_p3 = pmov %p12839_p2 }
 0x2cf   : > { %10910 = dma.done.wait (%p12842_p10), [#allocation12], 32  }
 0x2d0   : > { %10912 = vsyncadd (%p12843_p3), [#allocation12], 4294967264  ;;  %p12844_p11 = pmov %p12839_p2 }
 0x2d1   : > { %p12845_p12 = pmov %p12839_p2 }
 0x2d2   : > { %10914 = dma.done.wait (%p12844_p11), [#allocation15], 9232  }
 0x2d3   : > { %10916 = vsyncadd (%p12845_p12), [#allocation15], 4294958064  ;;  %p12846_p5 = pmov %p12839_p2 }
 0x2d4   : > { %p12847_p7 = pmov %p12839_p2 }
 0x2d5   : > { %10918 = dma.done.wait (%p12846_p5), [#allocation18], 192  }
 0x2d6   : > { %10920 = vsyncadd (%p12847_p7), [#allocation18], 4294967104  ;;  %p12848_p1 = pmov %p12839_p2 }
 0x2d8   : > { %10922 = dma.done.wait (%p12848_p1), [#allocation21], 96   ;;  %p12849_p9 = pmov %p12848_p1 }
 0x2d9   : > { %p12850_p0 = pmov %p12848_p1 }
 0x2da   : > { %10924 = vsyncadd (%p12849_p9), [#allocation21], 4294967200 }
 0x2db   : > { %10926 = dma.done.wait (%p12850_p0), [#allocation24], 96   ;;  %p12851_p6 = pmov %p12850_p0 }
 0x2dc   : > { %p12852_p13 = pmov %p12850_p0 }
 0x2dd   : > { %10928 = vsyncadd (%p12851_p6), [#allocation24], 4294967200 }
 0x2de   : > { %10930 = dma.done.wait (%p12852_p13), [#allocation27], 96   ;;  %p12853_p2 = pmov %p12850_p0 }
 0x2df   : > { %p12854_p8 = pmov %p12850_p0 }
 0x2e0   : > { %10932 = vsyncadd (%p12853_p2), [#allocation27], 4294967200 }
 0x2e1   : > { %10934 = dma.done.wait (%p12854_p8), [#allocation30], 3120   ;;  %p12855_p4 = pmov %p12850_p0 }
 0x2e2   : > { %p12856_p10 = pmov %p12850_p0 }
 0x2e3   : > { %10936 = vsyncadd (%p12855_p4), [#allocation30], 4294964176 }
 0x2e4   : > { %10938 = dma.done.wait (%p12856_p10), [#allocation33], 96   ;;  %p12857_p3 = pmov %p12850_p0 }
 0x2e5   : > { %p12858_p11 = pmov %p12850_p0 }
 0x2e6   : > { %10940 = vsyncadd (%p12857_p3), [#allocation33], 4294967200 }
 0x2e7   : > { %10942 = dma.done.wait (%p12858_p11), [#allocation36], 9264   ;;  %p12859_p12 = pmov %p12850_p0 }
 0x2e8   : > { %p12860_p5 = pmov %p12850_p0 }
 0x2e9   : > { %10944 = vsyncadd (%p12859_p12), [#allocation36], 4294958032 }
 0x2ea   : > { %10946 = dma.done.wait (%p12860_p5), [#allocation39], 3088   ;;  %p12861_p7 = pmov %p12850_p0 }
 0x2eb   : > { %s12862_s9 = sld [smem:[#allocation57_spill]]  ;;  %v11037_v0 = vmov 0.0   ;;  %vm11038_vm0 = vmmov 0   ;;  %v9687_v1 = vld [vmem:[#allocation10] sm:$0xff]   ;;  %v9688_v2 = vld [vmem:[#allocation10 + $0x8] sm:$0xff]   ;;  %v9689_v3 = vld [vmem:[#allocation10 + $0x10] sm:$0xff]  }
 0x2ec   : > { %10948 = vsyncadd (%p12861_p7), [#allocation39], 4294964208  ;;  %8701 = vmatprep.subr.bf16.mxu0 %v11037_v0  ;;  %8709 = vmatprep.mubr.msk.bf16.mxu0 %vm11038_vm0, %v11037_v0  ;;  %v1330_v4 = vld [vmem:[%s11699_s19] sm:$0xff]  ;;  %v1331_v5 = vld [vmem:[%s11699_s19 + $0x8] sm:$0xff]  ;;  %vm1336_vm1 = vcmask 523264   ;;  %s12867_s12 = sld [smem:[#allocation81_spill]] }
 0x2ed   : > { %8713 = vmatprep.subr.bf16.mxu1 %v11037_v0  ;;  %8715 = vmatprep.mubr.msk.bf16.mxu1 %vm11038_vm0, %v11037_v0  ;;  %v9690_v8 = vld [vmem:[#allocation10 + $0x18] sm:$0xff]   ;;  %v7970_v12 = vld [vmem:[#allocation11] ss:$0 sm:$0xff]  ;;  %v9692_v32 = vld [vmem:[#allocation16 + $0x20] ss:$12 sps:$4 sm:$0xff]   ;;  %p1323_p1 = scmp.lt.s32.totalorder %s11233_s2, 1 }
 0x2ee   : > { %8702 = vmatpush3.bf16.msra.mxu0 %v9687_v1  ;;  %v9691_v22 = vld [vmem:[#allocation16 + $0x8] ss:$12 sps:$4 sm:$0xff]   ;;  %v9693_v33 = vld [vmem:[#allocation16 + $0x38] ss:$12 sps:$4 sm:$0xff]   ;;  %v9694_v34 = vld [vmem:[#allocation16 + $0x50] ss:$12 sps:$4 sm:$0xff]   ;;  %v1497_v1 = vlaneseq }
 0x2ef   : > { %8703 = vmatprep.subr.bf16.mxu0 %v11037_v0  ;;  %v9695_v35 = vld [vmem:[#allocation16 + $0x68] ss:$12 sps:$4 sm:$0xff]   ;;  %v9696_v36 = vld [vmem:[#allocation16 + $0x80] ss:$12 sps:$4 sm:$0xff]   ;;  %v9697_v37 = vld [vmem:[#allocation16 + $0x98] ss:$12 sps:$4 sm:$0xff]  }
 0x2f0   : > { %v9698_v38 = vld [vmem:[#allocation16 + $0xb0] ss:$12 sps:$4 sm:$0xff]   ;;  %s1324_s7 = scalar_select %p1323_p1, %s11233_s2, 1  ;;  %vm1494_vm9 = vcmask 7168   ;;  %vm1507_vm15 = vcmask 130048  }
 0x2f1   : > { %v1332_v6 = vld [vmem:[%s12862_s9] sm:$0xff]  ;;  %v1333_v7 = vld [vmem:[%s12862_s9 + $0x8] sm:$0xff]  ;;  %s11041_s8 = smov 96   ;;  %s11042_s13 = smov 64  }
 0x2f2   : > { %8704 = vmatpush3.bf16.msra.mxu0 %v9688_v2  ;;  %v1334_v9 = vadd.f32 %v1332_v6, %v1330_v4  ;;  %v1335_v10 = vadd.f32 %v1333_v7, %v1331_v5  ;;  %v7976_v46 = vld [vmem:[#allocation13] ss:$0 sm:$0xff]  ;;  %v7977_v50 = vld [vmem:[#allocation14] ss:$0 sm:$0xff]  ;;  %v11812_v2 = vshrl.u32 %v1497_v1, 7  ;;  %s8434_s3 = sshll.u32 %s1324_s7, 4 }
 0x2f3   : > { %8705 = vmatprep.subr.bf16.mxu0 %v11037_v0  ;;  %v1501_v4 = vand.u32 127, %v1497_v1  ;;  %s1327_s1 = scalar_lea.vmem %s12867_s12, %s8434_s3  ;;  %s11043_s15 = smov 32  }
 0x2f4   : > { %v1353_v11 = vpack.c.bf16 %v1335_v10, %v1334_v9  ;;  %v1337_v21 = vsel %vm1336_vm1, %v1334_v9, 0.0  ;;  %v1340_v31 = vsel %vm1336_vm1, %v1335_v10, 0.0  ;;  %v9701_v9 = vld [vmem:[#allocation16 + $0x4] ss:$12 sps:$4 sm:$0xff]   ;;  %s12868_s11 = sld [smem:[#allocation58_spill]]  ;;  %s12869_s19 = sld [smem:[#allocation64_spill]] }
 0x2f5   : > { %vm1502_vm11 = vcmp.eq.s32.totalorder %v11812_v2, %v1501_v4  ;;  %s12870_s12 = sld [smem:[#allocation68_spill]]  ;;  %s12871_s7 = sld [smem:[#allocation72_spill]] }
 0x2f6   : > { %8706 = vmatpush3.bf16.msra.mxu0 %v9689_v3  ;;  %v1499_v3 = vadd.s32 8, %v11812_v2  ;;  %s12872_s3 = sld [smem:[#allocation80_spill]]  ;;  %p12873_p0 = scmp.ne.s32.totalorder %s12833_s4, 0 }
 0x2f7   : > { %8707 = vmatprep.subr.bf16.mxu0 %v11037_v0 }
 0x2f8   : > { %vm1503_vm12 = vcmp.eq.s32.totalorder %v1499_v3, %v1501_v4 }
 0x2f9   : > { %vm7982_vm14 = vmpackc.low %vm1503_vm12, %vm1502_vm11 }
 0x2fa   : > { %8708 = vmatpush3.bf16.msra.mxu0 %v9690_v8 }
 0x2fb   : > { %8719 = vmatprep.subr.bf16.mxu0 %v11037_v0 }
 0x2fd   : > { %8710 = vmatmul.mubr.msk.bf16.vlgmr.msra.gmra.mrb[0].mxu0 %vm1336_vm1, %v1353_v11  ;;  %v9699_v11 = vld [vmem:[#allocation16] ss:$12 sps:$4 sm:$0xff]  }
 0x2fe   : > { %8735 = vmatprep.mubr.msk.bf16.mxu0 %vm11038_vm0, %v11037_v0  ;;  %8720 = vmatpush3.bf16.msra.mxu0 %v9691_v22  ;;  %v9716_v22 = vld [vmem:[#allocation16 + $0x7c] ss:$12 sps:$4 sm:$0xff]  }
 0x2ff   : > { %8721 = vmatprep.subr.bf16.mxu0 %v11037_v0 }
 0x302   : > { %8722 = vmatpush3.bf16.msra.mxu0 %v9692_v32 }
 0x303   : > { %8723 = vmatprep.subr.bf16.mxu0 %v11037_v0 }
 0x306   : > { %8724 = vmatpush3.bf16.msra.mxu0 %v9693_v33 }
 0x307   : > { %8725 = vmatprep.subr.bf16.mxu0 %v11037_v0 }
 0x30a   : > { %8726 = vmatpush3.bf16.msra.mxu0 %v9694_v34 }
 0x30b   : > { %8727 = vmatprep.subr.bf16.mxu0 %v11037_v0 }
 0x30e   : > { %8728 = vmatpush3.bf16.msra.mxu0 %v9695_v35 }
 0x30f   : > { %8729 = vmatprep.subr.bf16.mxu0 %v11037_v0 }
 0x312   : > { %8730 = vmatpush3.bf16.msra.mxu0 %v9696_v36 }
 0x313   : > { %8731 = vmatprep.subr.bf16.mxu0 %v11037_v0 }
 0x316   : > { %8732 = vmatpush3.bf16.msra.mxu0 %v9697_v37 }
 0x317   : > { %8733 = vmatprep.subr.bf16.mxu0 %v11037_v0 }
 0x31a   : > { %8734 = vmatpush3.bf16.msra.mxu0 %v9698_v38 }
 0x31b   : > { %8739 = vmatprep.subr.bf16.mxu0 %v11037_v0 }
 0x3d0   : > { %v1422_v13 = vpop.f32.mrb[0].mxu0 }
 0x3d1   : > { %v1423_v14 = vadd.f32 %v7970_v12, %v1422_v13  ;;  %v8711_v15 = vpop.f32.mrb[1].mxu0  ;;  %v11039_v13 = vmov 1065369472  }
 0x3d2   : > { %v1425_v16 = vpop.f32.mrb[2].mxu0  ;;  %v11040_v15 = vmov 0  }
 0x3d3   : > { %v1429_v17 = vmax.f32 %v1423_v14, 0.0  ;;  %v1426_v18 = vadd.f32 %v7970_v12, %v1425_v16  ;;  %v8712_v19 = vpop.f32.mrb[3].mxu0  ;;  %v9704_v12 = vld [vmem:[#allocation16 + $0x1c] ss:$12 sps:$4 sm:$0xff]   ;;  %v9702_v14 = vld [vmem:[#allocation16 + $0x18] ss:$12 sps:$4 sm:$0xff]  }
 0x3d4   : > { %v9707_v16 = vld [vmem:[#allocation16 + $0x34] ss:$12 sps:$4 sm:$0xff]  }
 0x3d5   : > { %1433 = vadd.xlane.f32.xlu0 %v1429_v17  ;;  %v1430_v20 = vmax.f32 %v1426_v18, 0.0  ;;  %v9710_v18 = vld [vmem:[#allocation16 + $0x4c] ss:$12 sps:$4 sm:$0xff]   ;;  %v9708_v19 = vld [vmem:[#allocation16 + $0x48] ss:$12 sps:$4 sm:$0xff]  }
 0x3d9   : > { %1435 = vadd.xlane.f32.xlu0 %v1430_v20 }
 0x3dd   : > { %1338 = vadd.xlane.f32.xlu0 %v1337_v21  ;;  %v9711_v21 = vld [vmem:[#allocation16 + $0x60] ss:$12 sps:$4 sm:$0xff]  }
 0x462   : > { %v1434_v23 = vpop.xlane.xlu0 %1433 }
 0x463   : > { %v1438_v24 = vmul.f32 0.0078125, %v1434_v23  ;;  %v9714_v23 = vld [vmem:[#allocation16 + $0x78] ss:$12 sps:$4 sm:$0xff]  }
 0x465   : > { %v1440_v25 = vsub.f32 %v1429_v17, %v1438_v24  ;;  %v9705_v17 = vld [vmem:[#allocation16 + $0x30] ss:$12 sps:$4 sm:$0xff]   ;;  %v9719_v24 = vld [vmem:[#allocation16 + $0x94] ss:$12 sps:$4 sm:$0xff]  }
 0x466   : > { %v1436_v26 = vpop.xlane.xlu0 %1435 }
 0x467   : > { %v1439_v27 = vmul.f32 0.0078125, %v1436_v26  ;;  %v1442_v28 = vmul.f32 %v1440_v25, %v1440_v25  ;;  %v9722_v26 = vld [vmem:[#allocation16 + $0xac] ss:$12 sps:$4 sm:$0xff]  }
 0x469   : > { %1444 = vadd.xlane.f32.xlu1 %v1442_v28  ;;  %v1441_v29 = vsub.f32 %v1430_v20, %v1439_v27  ;;  %v9713_v20 = vld [vmem:[#allocation16 + $0x64] ss:$12 sps:$4 sm:$0xff]   ;;  %v9720_v27 = vld [vmem:[#allocation16 + $0xa8] ss:$12 sps:$4 sm:$0xff]   ;;  %v11831_v28 = vsub.s32 2, %v11812_v2 }
 0x46a   : > { %v1339_v47 = vpop.xlane.xlu0 %1338 }
 0x46b   : > { %v1443_v30 = vmul.f32 %v1441_v29, %v1441_v29  ;;  %vm1343_vm2 = vcmp.eq.f32.partialorder %v1339_v47, 0.0 }
 0x46c   : > { %vm11780_vm4 = vmneg %vm1343_vm2 }
 0x46d   : > { %1446 = vadd.xlane.f32.xlu1 %v1443_v30 }
 0x471   : > { %1341 = vadd.xlane.f32.xlu1 %v1340_v31 }
 0x4f6   : > { %v1445_v39 = vpop.xlane.xlu1 %1444 }
 0x4f7   : > { %v1448_v40 = vmul.f32 0.0078125, %v1445_v39 }
 0x4f9   : > { %v1450_v41 = vadd.f32 1e-05, %v1448_v40 }
 0x4fa   : > { %v1447_v42 = vpop.xlane.xlu1 %1446 }
 0x4fb   : > { %9997 = vrsqrt.f32 %v1450_v41  ;;  %v1449_v43 = vmul.f32 0.0078125, %v1447_v42  ;;  %v11843_v42 = vsub.s32 0, %v11812_v2 }
 0x4fd   : > { %v1451_v44 = vadd.f32 1e-05, %v1449_v43  ;;  %v11846_v43 = vsub.s32 1, %v11812_v2 }
 0x4fe   : > { %v1342_v48 = vpop.xlane.xlu1 %1341 }
 0x4ff   : > { %9999 = vrsqrt.f32 %v1451_v44  ;;  %vm1344_vm3 = vcmp.eq.f32.partialorder %v1342_v48, 0.0 }
 0x500   : > { %vm11784_vm5 = vmneg %vm1344_vm3 }
 0x501   : > { %vm8012_vm7 = vmpackc.low %vm11784_vm5, %vm11780_vm4  ;;  %vm2382_vm5 = vcmask 785408  }
 0x505   : > { %v9998_v45 = vpop.eup %9997 }
 0x506   : > { %v1454_v49 = vmul.f32 %v9998_v45, %v1440_v25  ;;  %v9717_v25 = vld [vmem:[#allocation16 + $0x90] ss:$12 sps:$4 sm:$0xff]  }
 0x508   : > { %v1462_v51 = vmul.f32 %v7976_v46, %v1454_v49 }
 0x509   : > { %v10000_v52 = vpop.eup %9999 }
 0x50a   : > { %v1455_v53 = vmul.f32 %v10000_v52, %v1441_v29  ;;  %v1470_v54 = vadd.f32 %v7977_v50, %v1462_v51  ;;  %v1625_v29 = vld [vmem:[#allocation17] sm:$0x7] }
 0x50b   : > { %v1638_v30 = vrot.slane %v1625_v29, %v11831_v28  ;;  %v1630_v44 = vrot.slane %v1625_v29, %v11843_v42 }
 0x50c   : > { %v1463_v57 = vmul.f32 %v7976_v46, %v1455_v53  ;;  %v11788_v58 = vsel %vm1343_vm2, 0.0, %v1470_v54  ;;  %v1634_v46 = vrot.slane %v1625_v29, %v11846_v43  ;;  %vm1856_vm2 = vcmask 261120  }
 0x50d   : > { %vm1478_vm6 = vcmp.eq.f32.partialorder %v11788_v58, 0.0 }
 0x50e   : > { %v1471_v59 = vadd.f32 %v7977_v50, %v1463_v57  ;;  %v7978_v60 = vsel %vm1478_vm6, 1.0, %v11037_v0 }
 0x50f   : > { %1484 = vadd.xlane.f32.xlu0 %v7978_v60 }
 0x510   : > { %v11796_v61 = vpack.c.bf16 %v1471_v59, %v1470_v54  ;;  %v11798_v62 = vsel %vm1344_vm3, 0.0, %v1471_v59 }
 0x511   : > { %vm1479_vm8 = vcmp.eq.f32.partialorder %v11798_v62, 0.0 }
 0x512   : > { %8736 = vmatmul.mubr.msk.bf16.vlgmr.msra.gmra.mrb[4].mxu0 %vm8012_vm7, %v11796_v61  ;;  %v7979_v63 = vsel %vm1479_vm8, 1.0, %v11037_v0 }
 0x513   : > { %1486 = vadd.xlane.f32.xlu1 %v7979_v63  ;;  %8741 = vmatprep.mubr.msk.bf16.mxu0 %vm11038_vm0, %v11037_v0 }
 0x59c   : > { %v1485_v5 = vpop.xlane.xlu0 %1484 }
 0x59d   : > { %vm1488_vm10 = vcmp.gt.f32.partialorder %v1485_v5, 0.0 }
 0x59e   : > { %v7980_v6 = vsel %vm1488_vm10, 1.0, %v11037_v0 }
 0x59f   : > { %1495 = vst.msk [vmem:[%s1327_s1] sm:$0xff] %vm1494_vm9, %v7980_v6 }
 0x5a0   : > { %v1487_v7 = vpop.xlane.xlu1 %1486 }
 0x5a1   : > { %vm1489_vm13 = vcmp.gt.f32.partialorder %v1487_v7, 0.0 }
 0x5a2   : > { %v7981_v8 = vsel %vm1489_vm13, 1.0, %v11037_v0 }
 0x5a3   : > { %1496 = vst.msk [vmem:[%s1327_s1 + $0x8] sm:$0xff] %vm1494_vm9, %v7981_v8  ;;  %v7983_v10 = vpack.c.bf16 %v7981_v8, %v7980_v6  ;;  %v1554_v6 = vld [vmem:[%s12868_s11] sm:$0xff]  ;;  %v1555_v8 = vld [vmem:[%s12868_s11 + $0x8] sm:$0xff]  ;;  %s8435_s1 = sshll.u32 %s11233_s2, 8  ;;  %s11044_s2 = smov [#allocation41]  }
 0x5a5   : > { %8714 = vmatpush3.bf16.msk.msra.mxu1 %vm7982_vm14, %v7983_v10 }
 0x5a6   : > { %1770 = vmatprep.subr.bf16.mxu1 %v9701_v9 }
 0x5a8   : > { %8716 = vmatmul.mubr.msk.bf16.vlgmr.msra.gmra.mrb[0].mxu1 %vm1507_vm15, %v11039_v13 }
 0x5a9   : > { %1771 = vmatpush1.bf16.msra.mxu1 %v9699_v11  ;;  %1802 = vmatprep.mubr.bf16.mxu1 %v11040_v15 }
 0x5aa   : > { %1772 = vmatprep.subr.bf16.mxu1 %v9704_v12 }
 0x5ad   : > { %1773 = vmatpush1.bf16.msra.mxu1 %v9702_v14 }
 0x5ae   : > { %1774 = vmatprep.subr.bf16.mxu1 %v9707_v16 }
 0x5b1   : > { %1775 = vmatpush1.bf16.msra.mxu1 %v9705_v17 }
 0x5b2   : > { %1776 = vmatprep.subr.bf16.mxu1 %v9710_v18 }
 0x5b5   : > { %1777 = vmatpush1.bf16.msra.mxu1 %v9708_v19 }
 0x5b6   : > { %1778 = vmatprep.subr.bf16.mxu1 %v9713_v20 }
 0x5b9   : > { %1779 = vmatpush1.bf16.msra.mxu1 %v9711_v21  ;;  %v1556_v21 = vld [vmem:[%s12868_s11 + $0x10] sm:$0xff] }
 0x5ba   : > { %1780 = vmatprep.subr.bf16.mxu1 %v9716_v22 }
 0x5bd   : > { %1781 = vmatpush1.bf16.msra.mxu1 %v9714_v23  ;;  %v1557_v23 = vld [vmem:[%s12868_s11 + $0x18] sm:$0xff] }
 0x5be   : > { %1782 = vmatprep.subr.bf16.mxu1 %v9719_v24 }
 0x5c1   : > { %1783 = vmatpush1.bf16.msra.mxu1 %v9717_v25 }
 0x5c2   : > { %1784 = vmatprep.subr.bf16.mxu1 %v9722_v26 }
 0x5c5   : > { %1785 = vmatpush1.bf16.msra.mxu1 %v9720_v27 }
 0x5c6   : > { %8745 = vmatprep.subr.bf16.mxu1 %v11037_v0 }
 0x5c8   : > { %8014 = vmatmul.mubr.msk.bf16.vlgmr.msra.gmra.mrb[4].mxu1 %vm8012_vm7, %v11796_v61 }
 0x5c9   : > { %8747 = vmatprep.mubr.msk.bf16.mxu1 %vm11038_vm0, %v11037_v0 }
 0x5e5   : > { %v1847_v31 = vpop.f32.mrb[4].mxu0 }
 0x5e6   : > { %v8737_v32 = vpop.f32.mrb[5].mxu0  ;;  %v1848_v34 = vadd.f32 %v1847_v31, %v1638_v30 }
 0x5e7   : > { %v1850_v33 = vpop.f32.mrb[6].mxu0 }
 0x5e8   : > { %v1851_v35 = vadd.f32 %v1850_v33, %v1638_v30  ;;  %v8738_v36 = vpop.f32.mrb[7].mxu0 }
 0x5ea   : > { %v11834_v37 = vpack.c.bf16 %v1851_v35, %v1848_v34  ;;  %v1558_v35 = vld [vmem:[%s12868_s11 + $0x20] sm:$0xff] }
 0x5ec   : > { %8746 = vmatpush3.bf16.msra.mxu1 %v11834_v37 }
 0x5ed   : > { %8757 = vmatprep.subr.bf16.mxu1 %v11037_v0 }
 0x67b   : > { %v11838_v38 = vpop.f32.mrb[0].mxu1 }
 0x67c   : > { %v8717_v39 = vpop.f32.mrb[1].mxu1  ;;  %vm1552_vm3 = vcmp.gt.f32.partialorder %v11838_v38, 0.5 }
 0x67d   : > { %v11840_v40 = vpop.f32.mrb[2].mxu1  ;;  %v11882_v11 = vsel %vm1552_vm3, -1e+30, %v1554_v6  ;;  %v11896_v26 = vsel %vm1552_vm3, -1e+30, %v1556_v21  ;;  %v1559_v39 = vld [vmem:[%s12868_s11 + $0x28] sm:$0xff] }
 0x67e   : > { %v8718_v41 = vpop.f32.mrb[3].mxu1  ;;  %vm1553_vm4 = vcmp.gt.f32.partialorder %v11840_v40, 0.5 }
 0x67f   : > { %v11887_v17 = vsel %vm1553_vm4, -1e+30, %v1555_v8  ;;  %v11901_v32 = vsel %vm1553_vm4, -1e+30, %v1557_v23 }
 0x69b   : > { %v1804_v45 = vpop.f32.mrb[4].mxu1 }
 0x69c   : > { %v1806_v47 = vpop.f32.mrb[5].mxu1  ;;  %v1805_v49 = vadd.f32 %v1804_v45, %v1630_v44 }
 0x69d   : > { %v1808_v48 = vpop.f32.mrb[6].mxu1  ;;  %v1807_v52 = vadd.f32 %v1806_v47, %v1634_v46 }
 0x69e   : > { %v1809_v50 = vadd.f32 %v1808_v48, %v1630_v44  ;;  %v1810_v51 = vpop.f32.mrb[7].mxu1 }
 0x69f   : > { %v1811_v53 = vadd.f32 %v1810_v51, %v1634_v46  ;;  %v11910_v46 = vsel %vm1552_vm3, -1e+30, %v1558_v35  ;;  %v11915_v51 = vsel %vm1553_vm4, -1e+30, %v1559_v39 }
 0x6a0   : > { %v1854_v54 = vpack.c.bf16 %v1809_v50, %v1805_v49 }
 0x6a1   : > { %v1855_v55 = vpack.c.bf16 %v1811_v53, %v1807_v52 }
 0x6a2   : > { %1977 = vrot.lane.b32.xlu1 %v1854_v54, %s11041_s8 }
 0x6a3   : > { %1980 = vrot.lane.b32.xlu0 %v1855_v55, %s11041_s8  ;;  %v1861_v56 = vsel %vm1856_vm2, %v1855_v55, 0 }
 0x6a4   : > { %8740 = vmatpush3.bf16.xpose.msra.mxu0 %v1861_v56 }
 0x6a5   : > { %8751 = vmatprep.subr.bf16.mxu0 %v11037_v0 }
 0x6a6   : > { %2106 = vrot.lane.b32.xlu1 %v1855_v55, %s11042_s13 }
 0x6a7   : > { %2231 = vrot.lane.b32.xlu0 %v1855_v55, %s11043_s15 }
 0x6aa   : > { %2104 = vrot.lane.b32.xlu1 %v1854_v54, %s11042_s13 }
 0x6ab   : > { %8742 = vmatmul.mubr.msk.bf16.vlgmr.msra.gmra.mrb[8].mxu0 %vm1856_vm2, %v1854_v54 }
 0x6ac   : > { %8753 = vmatprep.mubr.msk.bf16.mxu0 %vm11038_vm0, %v11037_v0 }
 0x6ae   : > { %2229 = vrot.lane.b32.xlu1 %v1854_v54, %s11043_s15  ;;  %v1560_v54 = vld [vmem:[%s12868_s11 + $0x30] sm:$0xff] }
 0x714   : > { %v1978_v57 = vpop.permute.xlu1 %1977 }
 0x715   : > { %v1981_v59 = vpop.permute.xlu0 %1980 }
 0x716   : > { %v1986_v60 = vsel %vm1856_vm2, %v1981_v59, 0 }
 0x717   : > { %8752 = vmatpush3.bf16.xpose.msra.mxu0 %v1986_v60 }
 0x718   : > { %8763 = vmatprep.subr.bf16.mxu0 %v11037_v0  ;;  %v2107_v61 = vpop.permute.xlu1 %2106 }
 0x719   : > { %v2112_v63 = vsel %vm1856_vm2, %v2107_v61, 0  ;;  %v2232_v1 = vpop.permute.xlu0 %2231  ;;  %v11924_v61 = vsel %vm1552_vm3, -1e+30, %v1560_v54 }
 0x71a   : > { %v2237_v4 = vsel %vm1856_vm2, %v2232_v1, 0 }
 0x71c   : > { %v2105_v3 = vpop.permute.xlu1 %2104 }
 0x71e   : > { %8754 = vmatmul.mubr.msk.bf16.vlgmr.msra.gmra.mrb[12].mxu0 %vm1856_vm2, %v1978_v57  ;;  %v1561_v57 = vld [vmem:[%s12868_s11 + $0x38] sm:$0xff] }
 0x71f   : > { %8764 = vmatpush3.bf16.xpose.msra.mxu0 %v2112_v63  ;;  %8765 = vmatprep.mubr.msk.bf16.mxu0 %vm11038_vm0, %v11037_v0 }
 0x720   : > { %8775 = vmatprep.subr.bf16.mxu0 %v11037_v0  ;;  %v2230_v5 = vpop.permute.xlu1 %2229 }
 0x726   : > { %8766 = vmatmul.mubr.msk.bf16.vlgmr.msra.gmra.mrb[16].mxu0 %vm1856_vm2, %v2105_v3 }
 0x727   : > { %8776 = vmatpush3.bf16.xpose.msra.mxu0 %v2237_v4  ;;  %8777 = vmatprep.mubr.msk.bf16.mxu0 %vm11038_vm0, %v11037_v0 }
 0x728   : > { %8787 = vmatprep.subr.bf16.mxu0 %v11037_v0 }
 0x72e   : > { %8778 = vmatmul.mubr.msk.bf16.vlgmr.msra.gmra.mrb[20].mxu0 %vm1856_vm2, %v2230_v5  ;;  %v11929_v5 = vsel %vm1553_vm4, -1e+30, %v1561_v57 }
 0x72f   : > { %8803 = vmatprep.mubr.msk.bf16.mxu0 %vm11038_vm0, %v11037_v0 }
 0x77e   : > { %v1897_v7 = vpop.f32.mrb[8].mxu0 }
 0x77f   : > { %v1904_v9 = vmul.f32 0.17677669, %v1897_v7  ;;  %v8743_v10 = vpop.f32.mrb[9].mxu0 }
 0x780   : > { %v1900_v12 = vpop.f32.mrb[10].mxu0 }
 0x781   : > { %v1905_v13 = vmul.f32 0.17677669, %v1900_v12  ;;  %v8744_v14 = vpop.f32.mrb[11].mxu0  ;;  %v1906_v16 = vadd.f32 %v1904_v9, %v11882_v11 }
 0x783   : > { %v1908_v18 = vsel %vm1507_vm15, %v1906_v16, -inf  ;;  %v1907_v19 = vadd.f32 %v1905_v13, %v11887_v17 }
 0x784   : > { %1909 = vmax.xlane.f32.xlu0 %v1908_v18 }
 0x785   : > { %v1911_v20 = vsel %vm1507_vm15, %v1907_v19, -inf }
 0x786   : > { %1912 = vmax.xlane.f32.xlu1 %v1911_v20 }
 0x7f1   : > { %v2022_v22 = vpop.f32.mrb[12].mxu0 }
 0x7f2   : > { %v2029_v24 = vmul.f32 0.17677669, %v2022_v22  ;;  %v8755_v25 = vpop.f32.mrb[13].mxu0 }
 0x7f3   : > { %v2025_v27 = vpop.f32.mrb[14].mxu0 }
 0x7f4   : > { %v2030_v29 = vmul.f32 0.17677669, %v2025_v27  ;;  %v8756_v30 = vpop.f32.mrb[15].mxu0  ;;  %v2031_v31 = vadd.f32 %v2029_v24, %v11896_v26 }
 0x7f6   : > { %v2033_v33 = vsel %vm1507_vm15, %v2031_v31, -inf  ;;  %v2032_v34 = vadd.f32 %v2030_v29, %v11901_v32 }
 0x7f7   : > { %2034 = vmax.xlane.f32.xlu0 %v2033_v33 }
 0x7f8   : > { %v2036_v45 = vsel %vm1507_vm15, %v2032_v34, -inf }
 0x7f9   : > { %v2148_v36 = vpop.f32.mrb[16].mxu0 }
 0x7fa   : > { %v2155_v41 = vmul.f32 0.17677669, %v2148_v36  ;;  %v8767_v44 = vpop.f32.mrb[17].mxu0 }
 0x7fb   : > { %2037 = vmax.xlane.f32.xlu0 %v2036_v45  ;;  %v2151_v47 = vpop.f32.mrb[18].mxu0 }
 0x7fc   : > { %v2156_v48 = vmul.f32 0.17677669, %v2151_v47  ;;  %v8768_v49 = vpop.f32.mrb[19].mxu0  ;;  %v2157_v50 = vadd.f32 %v2155_v41, %v11910_v46 }
 0x7fe   : > { %v2159_v52 = vsel %vm1507_vm15, %v2157_v50, -inf  ;;  %v2158_v53 = vadd.f32 %v2156_v48, %v11915_v51 }
 0x7ff   : > { %2160 = vmax.xlane.f32.xlu0 %v2159_v52 }
 0x800   : > { %v2162_v55 = vsel %vm1507_vm15, %v2158_v53, -inf }
 0x801   : > { %2163 = vmax.xlane.f32.xlu1 %v2162_v55  ;;  %v2273_v56 = vpop.f32.mrb[20].mxu0 }
 0x802   : > { %v2280_v59 = vmul.f32 0.17677669, %v2273_v56  ;;  %v8779_v60 = vpop.f32.mrb[21].mxu0 }
 0x803   : > { %v2276_v63 = vpop.f32.mrb[22].mxu0 }
 0x804   : > { %v2281_v1 = vmul.f32 0.17677669, %v2276_v63  ;;  %v8780_v3 = vpop.f32.mrb[23].mxu0  ;;  %v2282_v4 = vadd.f32 %v2280_v59, %v11924_v61 }
 0x806   : > { %v2284_v6 = vsel %vm1507_vm15, %v2282_v4, -inf  ;;  %v11933_v7 = vadd.f32 %v2281_v1, %v11929_v5 }
 0x807   : > { %2285 = vmax.xlane.f32.xlu0 %v2284_v6 }
 0x808   : > { %v2287_v38 = vsel %vm1507_vm15, %v11933_v7, -inf }
 0x809   : > { %2288 = vmax.xlane.f32.xlu1 %v2287_v38 }
 0x811   : > { %v1910_v8 = vpop.xlane.xlu0 %1909 }
 0x812   : > { %v1914_v9 = vsub.f32 %v1906_v16, %v1910_v8 }
 0x813   : > { %v1913_v10 = vpop.xlane.xlu1 %1912 }
 0x814   : > { %v1916_v12 = vmul.f32 1.442695, %v1914_v9  ;;  %v1915_v13 = vsub.f32 %v1907_v19, %v1913_v10 }
 0x816   : > { %10001 = vpow2.f32 %v1916_v12  ;;  %v1918_v14 = vmul.f32 1.442695, %v1915_v13 }
 0x818   : > { %10003 = vpow2.f32 %v1918_v14 }
 0x820   : > { %v10002_v40 = vpop.eup %10001 }
 0x821   : > { %v1920_v18 = vsel %vm1507_vm15, %v10002_v40, 0.0 }
 0x822   : > { %v10004_v20 = vpop.eup %10003  ;;  %1921 = vadd.xlane.f32.xlu0 %v1920_v18 }
 0x823   : > { %v1923_v21 = vsel %vm1507_vm15, %v10004_v20, 0.0 }
 0x824   : > { %1924 = vadd.xlane.f32.xlu1 %v1923_v21 }
 0x884   : > { %v2035_v22 = vpop.xlane.xlu0 %2034 }
 0x885   : > { %v2039_v23 = vsub.f32 %v2031_v31, %v2035_v22 }
 0x887   : > { %v2041_v24 = vmul.f32 1.442695, %v2039_v23 }
 0x888   : > { %v2038_v25 = vpop.xlane.xlu0 %2037 }
 0x889   : > { %10005 = vpow2.f32 %v2041_v24  ;;  %v2040_v16 = vsub.f32 %v2032_v34, %v2038_v25 }
 0x88b   : > { %v2043_v27 = vmul.f32 1.442695, %v2040_v16 }
 0x88c   : > { %v2161_v29 = vpop.xlane.xlu0 %2160 }
 0x88d   : > { %10007 = vpow2.f32 %v2043_v27  ;;  %v2165_v19 = vsub.f32 %v2157_v50, %v2161_v29 }
 0x88e   : > { %v2164_v30 = vpop.xlane.xlu1 %2163 }
 0x88f   : > { %v2167_v33 = vmul.f32 1.442695, %v2165_v19  ;;  %v2166_v35 = vsub.f32 %v2158_v53, %v2164_v30 }
 0x891   : > { %10009 = vpow2.f32 %v2167_v33  ;;  %v2169_v36 = vmul.f32 1.442695, %v2166_v35 }
 0x893   : > { %v10006_v39 = vpop.eup %10005  ;;  %10011 = vpow2.f32 %v2169_v36 }
 0x894   : > { %v2286_v41 = vpop.xlane.xlu0 %2285  ;;  %v2045_v44 = vsel %vm1507_vm15, %v10006_v39, 0.0 }
 0x895   : > { %v2290_v45 = vsub.f32 %v2282_v4, %v2286_v41  ;;  %2046 = vadd.xlane.f32.xlu0 %v2045_v44 }
 0x896   : > { %v2289_v55 = vpop.xlane.xlu1 %2288 }
 0x897   : > { %v10008_v31 = vpop.eup %10007  ;;  %v2292_v47 = vmul.f32 1.442695, %v2290_v45  ;;  %v2291_v3 = vsub.f32 %v11933_v7, %v2289_v55  ;;  %v9725_v55 = vld [vmem:[%s12869_s19 + $0x10] sm:$0xff]  }
 0x898   : > { %v2048_v34 = vsel %vm1507_vm15, %v10008_v31, 0.0 }
 0x899   : > { %10013 = vpow2.f32 %v2292_v47  ;;  %2049 = vadd.xlane.f32.xlu1 %v2048_v34  ;;  %v2294_v6 = vmul.f32 1.442695, %v2291_v3  ;;  %v9728_v3 = vld [vmem:[%s12869_s19 + $0x28] sm:$0xff]  }
 0x89b   : > { %v10010_v48 = vpop.eup %10009 }
 0x89c   : > { %v2171_v49 = vsel %vm1507_vm15, %v10010_v48, 0.0 }
 0x89d   : > { %v10012_v50 = vpop.eup %10011  ;;  %2172 = vadd.xlane.f32.xlu0 %v2171_v49  ;;  %v9723_v49 = vld [vmem:[%s12869_s19] sm:$0xff]  }
 0x89e   : > { %v2174_v52 = vsel %vm1507_vm15, %v10012_v50, 0.0  ;;  %8788 = vmatpush3.bf16.msra.mxu0 %v9723_v49 }
 0x89f   : > { %2175 = vadd.xlane.f32.xlu1 %v2174_v52  ;;  %8789 = vmatprep.subr.bf16.mxu0 %v11037_v0 }
 0x8a3   : > { %v10014_v53 = vpop.eup %10013 }
 0x8a4   : > { %v2296_v54 = vsel %vm1507_vm15, %v10014_v53, 0.0 }
 0x8a5   : > { %2297 = vadd.xlane.f32.xlu0 %v2296_v54 }
 0x8af   : > { %v1922_v56 = vpop.xlane.xlu0 %1921 }
 0x8b0   : > { %10015 = vrcp.f32 %v1922_v56  ;;  %2182 = vrot.lane.b32.xlu1 %v11834_v37, %s11042_s13 }
 0x8b1   : > { %v1925_v57 = vpop.xlane.xlu1 %1924 }
 0x8b2   : > { %10017 = vrcp.f32 %v1925_v57 }
 0x8b3   : > { %10019 = vpow2.f32 %v2294_v6  ;;  %v9730_v6 = vld [vmem:[%s12869_s19 + $0x38] sm:$0xff]  }
 0x8ba   : > { %v10016_v59 = vpop.eup %10015 }
 0x8bb   : > { %2057 = vrot.lane.b32.xlu0 %v11834_v37, %s11041_s8  ;;  %v1928_v63 = vmul.f32 %v10016_v59, %v10002_v40 }
 0x8bc   : > { %v10018_v60 = vpop.eup %10017 }
 0x8bd   : > { %v1929_v1 = vmul.f32 %v10018_v60, %v10004_v20  ;;  %v10020_v38 = vpop.eup %10019 }
 0x8be   : > { %v2299_v8 = vsel %vm1507_vm15, %v10020_v38, 0.0 }
 0x8bf   : > { %v1930_v4 = vpack.c.bf16 %v1929_v1, %v1928_v63  ;;  %v9726_v63 = vld [vmem:[%s12869_s19 + $0x18] sm:$0xff]   ;;  %v9727_v1 = vld [vmem:[%s12869_s19 + $0x20] sm:$0xff]  }
 0x8c1   : > { %8748 = vmatmul.mubr.msk.bf16.vlgmr.msra.gmra.mrb[8].mxu1 %vm1507_vm15, %v1930_v4  ;;  %v9729_v4 = vld [vmem:[%s12869_s19 + $0x30] sm:$0xff]  }
 0x8c2   : > { %8759 = vmatprep.mubr.msk.bf16.mxu1 %vm11038_vm0, %v11037_v0 }
 0x8d4   : > { %2300 = vadd.xlane.f32.xlu1 %v2299_v8 }
 0x8e5   : > { %2307 = vrot.lane.b32.xlu1 %v11834_v37, %s11043_s15 }
 0x922   : > { %v2047_v9 = vpop.xlane.xlu0 %2046 }
 0x926   : > { %v2050_v10 = vpop.xlane.xlu1 %2049 }
 0x927   : > { %10021 = vrcp.f32 %v2050_v10 }
 0x928   : > { %10023 = vrcp.f32 %v2047_v9 }
 0x92a   : > { %v2173_v12 = vpop.xlane.xlu0 %2172 }
 0x92c   : > { %v2176_v7 = vpop.xlane.xlu1 %2175 }
 0x92d   : > { %10025 = vrcp.f32 %v2176_v7 }
 0x92e   : > { %10027 = vrcp.f32 %v2173_v12 }
 0x930   : > { %v2183_v37 = vpop.permute.xlu1 %2182 }
 0x931   : > { %v10022_v13 = vpop.eup %10021 }
 0x932   : > { %v2298_v14 = vpop.xlane.xlu0 %2297  ;;  %v10024_v40 = vpop.eup %10023  ;;  %v2054_v18 = vmul.f32 %v10022_v13, %v10008_v31 }
 0x933   : > { %v2053_v20 = vmul.f32 %v10024_v40, %v10006_v39  ;;  %10029 = vrcp.f32 %v2298_v14 }
 0x935   : > { %v2055_v22 = vpack.c.bf16 %v2054_v18, %v2053_v20 }
 0x936   : > { %v2058_v21 = vpop.permute.xlu0 %2057 }
 0x937   : > { %8758 = vmatpush3.bf16.msra.mxu1 %v2058_v21  ;;  %v10026_v23 = vpop.eup %10025 }
 0x938   : > { %8769 = vmatprep.subr.bf16.mxu1 %v11037_v0  ;;  %v10028_v24 = vpop.eup %10027  ;;  %v2180_v25 = vmul.f32 %v10026_v23, %v10012_v50 }
 0x939   : > { %v2179_v16 = vmul.f32 %v10028_v24, %v10010_v48 }
 0x93a   : > { %8760 = vmatmul.mubr.msk.bf16.vlgmr.msra.gmra.mrb[12].mxu1 %vm1507_vm15, %v2055_v22 }
 0x93b   : > { %8770 = vmatpush3.bf16.msra.mxu1 %v2183_v37  ;;  %8771 = vmatprep.mubr.msk.bf16.mxu1 %vm11038_vm0, %v11037_v0  ;;  %v2181_v27 = vpack.c.bf16 %v2180_v25, %v2179_v16 }
 0x93c   : > { %8781 = vmatprep.subr.bf16.mxu1 %v11037_v0 }
 0x93d   : > { %v10030_v30 = vpop.eup %10029 }
 0x93e   : > { %v2304_v35 = vmul.f32 %v10030_v30, %v10014_v53  ;;  %v9724_v53 = vld [vmem:[%s12869_s19 + $0x8] sm:$0xff]   ;;  %v8028_v30 = vld [vmem:[#allocation19] ss:$0 sm:$0xff] }
 0x93f   : > { %8790 = vmatpush3.bf16.msra.mxu0 %v9724_v53 }
 0x940   : > { %8791 = vmatprep.subr.bf16.mxu0 %v11037_v0 }
 0x942   : > { %8772 = vmatmul.mubr.msk.bf16.vlgmr.msra.gmra.mrb[16].mxu1 %vm1507_vm15, %v2181_v27 }
 0x943   : > { %8783 = vmatprep.mubr.msk.bf16.mxu1 %vm11038_vm0, %v11037_v0  ;;  %8792 = vmatpush3.bf16.msra.mxu0 %v9725_v55 }
 0x944   : > { %8793 = vmatprep.subr.bf16.mxu0 %v11037_v0 }
 0x947   : > { %8794 = vmatpush3.bf16.msra.mxu0 %v9726_v63 }
 0x948   : > { %8795 = vmatprep.subr.bf16.mxu0 %v11037_v0 }
 0x94b   : > { %8796 = vmatpush3.bf16.msra.mxu0 %v9727_v1  ;;  %v8037_v1 = vld [vmem:[#allocation20] ss:$0 sm:$0xff] }
 0x94c   : > { %8797 = vmatprep.subr.bf16.mxu0 %v11037_v0 }
 0x94f   : > { %8798 = vmatpush3.bf16.msra.mxu0 %v9728_v3 }
 0x950   : > { %8799 = vmatprep.subr.bf16.mxu0 %v11037_v0 }
 0x953   : > { %8800 = vmatpush3.bf16.msra.mxu0 %v9729_v4 }
 0x954   : > { %8801 = vmatprep.subr.bf16.mxu0 %v11037_v0 }
 0x957   : > { %8802 = vmatpush3.bf16.msra.mxu0 %v9730_v6 }
 0x958   : > { %8845 = vmatprep.subr.bf16.mxu0 %v11037_v0 }
 0x961   : > { %v2301_v29 = vpop.xlane.xlu1 %2300 }
 0x962   : > { %10031 = vrcp.f32 %v2301_v29 }
 0x965   : > { %v2308_v19 = vpop.permute.xlu1 %2307 }
 0x966   : > { %8782 = vmatpush3.bf16.msra.mxu1 %v2308_v19 }
 0x967   : > { %8807 = vmatprep.subr.bf16.mxu1 %v11037_v0 }
 0x96c   : > { %v10032_v33 = vpop.eup %10031 }
 0x96d   : > { %v2305_v36 = vmul.f32 %v10032_v33, %v10020_v38 }
 0x96f   : > { %v2306_v39 = vpack.c.bf16 %v2305_v36, %v2304_v35 }
 0x971   : > { %8784 = vmatmul.mubr.msk.bf16.vlgmr.msra.gmra.mrb[20].mxu1 %vm1507_vm15, %v2306_v39 }
 0x972   : > { %8809 = vmatprep.mubr.msk.bf16.mxu1 %vm11038_vm0, %v11037_v0 }
 0x994   : > { %v1969_v41 = vpop.f32.mrb[8].mxu1 }
 0x995   : > { %v8749_v44 = vpop.f32.mrb[9].mxu1 }
 0x996   : > { %v1972_v45 = vpop.f32.mrb[10].mxu1 }
 0x997   : > { %v8750_v31 = vpop.f32.mrb[11].mxu1 }
 0xa0d   : > { %v2097_v47 = vpop.f32.mrb[12].mxu1 }
 0xa0e   : > { %v8761_v34 = vpop.f32.mrb[13].mxu1 }
 0xa0f   : > { %v2100_v48 = vpop.f32.mrb[14].mxu1 }
 0xa10   : > { %v9642_v50 = vpack.i.bf16 %v2100_v48, %v2097_v47  ;;  %v8762_v52 = vpop.f32.mrb[15].mxu1 }
 0xa12   : > { %9643 = vrot.lane.b32.xlu1 %v9642_v50, %s11043_s15 }
 0xa15   : > { %v2222_v54 = vpop.f32.mrb[16].mxu1 }
 0xa16   : > { %v8773_v56 = vpop.f32.mrb[17].mxu1 }
 0xa17   : > { %v2225_v57 = vpop.f32.mrb[18].mxu1 }
 0xa18   : > { %v9647_v59 = vpack.i.bf16 %v2225_v57, %v2222_v54  ;;  %v8774_v60 = vpop.f32.mrb[19].mxu1 }
 0xa1a   : > { %9648 = vrot.lane.b32.xlu0 %v9647_v59, %s11042_s13 }
 0xa44   : > { %v2347_v38 = vpop.f32.mrb[20].mxu1 }
 0xa45   : > { %v8785_v8 = vpop.f32.mrb[21].mxu1 }
 0xa46   : > { %v2350_v9 = vpop.f32.mrb[22].mxu1 }
 0xa47   : > { %v9652_v10 = vpack.i.bf16 %v2350_v9, %v2347_v38  ;;  %v8786_v7 = vpop.f32.mrb[23].mxu1  ;;  %v8038_v38 = vld [vmem:[#allocation22] ss:$0 sm:$0xff] }
 0xa49   : > { %9653 = vrot.lane.b32.xlu1 %v9652_v10, %s11041_s8 }
 0xa84   : > { %v9644_v12 = vpop.permute.xlu1 %9643 }
 0xa85   : > { %v9646_v14 = vunpack.i.h.bf16 %v9644_v12  ;;  %v9645_v40 = vunpack.i.l.bf16 %v9644_v12  ;;  %v9731_v12 = vld [vmem:[#allocation5] sm:$0xff]  }
 0xa87   : > { %v2379_v22 = vsel %vm1856_vm2, %v1972_v45, %v9646_v14  ;;  %v2378_v23 = vsel %vm1856_vm2, %v1969_v41, %v9645_v40  ;;  %v9733_v14 = vld [vmem:[#allocation5 + $0x10] sm:$0xff]   ;;  %v9734_v40 = vld [vmem:[#allocation5 + $0x18] sm:$0xff]  }
 0xa8c   : > { %v9649_v13 = vpop.permute.xlu0 %9648 }
 0xa8d   : > { %v9651_v18 = vunpack.i.h.bf16 %v9649_v13  ;;  %v9650_v20 = vunpack.i.l.bf16 %v9649_v13  ;;  %v9732_v13 = vld [vmem:[#allocation5 + $0x8] sm:$0xff]  }
 0xa8f   : > { %v2380_v25 = vsel %vm1336_vm1, %v2378_v23, %v9650_v20  ;;  %v2381_v16 = vsel %vm1336_vm1, %v2379_v22, %v9651_v18  ;;  %v9735_v18 = vld [vmem:[#allocation5 + $0x20] sm:$0xff]   ;;  %v9736_v20 = vld [vmem:[#allocation5 + $0x28] sm:$0xff]   ;;  %v9738_v22 = vld [vmem:[#allocation5 + $0x38] sm:$0xff]  }
 0xa90   : > { %v9739_v23 = vld [vmem:[#allocation5 + $0x40] sm:$0xff]  }
 0xabb   : > { %v9654_v21 = vpop.permute.xlu1 %9653 }
 0xabc   : > { %v9656_v37 = vunpack.i.h.bf16 %v9654_v21  ;;  %v9655_v24 = vunpack.i.l.bf16 %v9654_v21  ;;  %v9737_v21 = vld [vmem:[#allocation5 + $0x30] sm:$0xff]  }
 0xabe   : > { %v2383_v27 = vsel %vm2382_vm5, %v2380_v25, %v9655_v24  ;;  %v2384_v29 = vsel %vm2382_vm5, %v2381_v16, %v9656_v37  ;;  %v12031_v25 = vld [vmem:[%s12870_s12] sm:$0xff] }
 0xabf   : > { %v2401_v19 = vpack.c.bf16 %v2384_v29, %v2383_v27  ;;  %v2723_v29 = vrot.slane %v12031_v25, %v11843_v42 }
 0xac1   : > { %8804 = vmatmul.mubr.bf16.vlgmr.msra.gmra.mrb[24].mxu0 %v2401_v19  ;;  %v2729_v19 = vrot.slane %v12031_v25, %v11846_v43 }
 0xac2   : > { %8861 = vmatprep.mubr.msk.bf16.mxu0 %vm11038_vm0, %v11037_v0 }
 0xb94   : > { %v2491_v33 = vpop.f32.mrb[24].mxu0 }
 0xb95   : > { %v2492_v35 = vadd.f32 %v8028_v30, %v2491_v33  ;;  %v8805_v36 = vpop.f32.mrb[25].mxu0 }
 0xb96   : > { %v2494_v39 = vpop.f32.mrb[26].mxu0 }
 0xb97   : > { %v2495_v41 = vadd.f32 %v8028_v30, %v2494_v39  ;;  %v8806_v44 = vpop.f32.mrb[27].mxu0  ;;  %v2498_v45 = vadd.f32 %v2492_v35, %v11788_v58 }
 0xb99   : > { %2502 = vadd.xlane.f32.xlu0 %v2498_v45  ;;  %v2499_v31 = vadd.f32 %v2495_v41, %v11798_v62 }
 0xb9b   : > { %2504 = vadd.xlane.f32.xlu1 %v2499_v31 }
 0xc26   : > { %v2503_v47 = vpop.xlane.xlu0 %2502 }
 0xc27   : > { %v2506_v34 = vmul.f32 0.0078125, %v2503_v47 }
 0xc28   : > { %v2505_v48 = vpop.xlane.xlu1 %2504 }
 0xc29   : > { %v2508_v49 = vsub.f32 %v2498_v45, %v2506_v34  ;;  %v2507_v50 = vmul.f32 0.0078125, %v2505_v48  ;;  %v2737_v34 = vrot.slane %v12031_v25, %v11831_v28 }
 0xc2b   : > { %v2509_v52 = vsub.f32 %v2499_v31, %v2507_v50  ;;  %v2510_v53 = vmul.f32 %v2508_v49, %v2508_v49 }
 0xc2d   : > { %2512 = vadd.xlane.f32.xlu0 %v2510_v53  ;;  %v2511_v54 = vmul.f32 %v2509_v52, %v2509_v52 }
 0xc31   : > { %2514 = vadd.xlane.f32.xlu0 %v2511_v54 }
 0xcba   : > { %v2513_v55 = vpop.xlane.xlu0 %2512 }
 0xcbb   : > { %v2516_v56 = vmul.f32 0.0078125, %v2513_v55 }
 0xcbd   : > { %v2518_v57 = vadd.f32 1e-05, %v2516_v56 }
 0xcbe   : > { %v2515_v59 = vpop.xlane.xlu0 %2514 }
 0xcbf   : > { %10033 = vrsqrt.f32 %v2518_v57  ;;  %v2517_v58 = vmul.f32 0.0078125, %v2515_v59 }
 0xcc1   : > { %v2519_v60 = vadd.f32 1e-05, %v2517_v58 }
 0xcc3   : > { %10035 = vrsqrt.f32 %v2519_v60 }
 0xcc9   : > { %v10034_v62 = vpop.eup %10033 }
 0xcca   : > { %v2522_v63 = vmul.f32 %v10034_v62, %v2508_v49 }
 0xccc   : > { %v2530_v6 = vmul.f32 %v8037_v1, %v2522_v63  ;;  %v12045_v63 = vsub.s32 4, %v11812_v2 }
 0xccd   : > { %v10036_v3 = vpop.eup %10035 }
 0xcce   : > { %v2523_v4 = vmul.f32 %v10036_v3, %v2509_v52  ;;  %v11996_v9 = vadd.f32 %v8038_v38, %v2530_v6  ;;  %v12040_v52 = vsub.s32 3, %v11812_v2 }
 0xcd0   : > { %v2531_v8 = vmul.f32 %v8037_v1, %v2523_v4  ;;  %v2745_v59 = vrot.slane %v12031_v25, %v12040_v52 }
 0xcd2   : > { %v11998_v10 = vadd.f32 %v8038_v38, %v2531_v8  ;;  %v2753_v8 = vrot.slane %v12031_v25, %v12045_v63 }
 0xcd4   : > { %v2540_v7 = vpack.c.bf16 %v11998_v10, %v11996_v9 }
 0xcd6   : > { %8808 = vmatpush3.bf16.msra.mxu1 %v2540_v7 }
 0xcd7   : > { %8865 = vmatprep.subr.bf16.mxu1 %v11037_v0 }
 0xcd9   : > { %8810 = vmatmul.mubr.msk.bf16.vlgmr.msra.gmra.mrb[24].mxu1 %vm1507_vm15, %v9731_v12 }
 0xcda   : > { %8813 = vmatprep.mubr.msk.bf16.mxu1 %vm11038_vm0, %v11037_v0 }
 0xce1   : > { %8814 = vmatmul.mubr.msk.bf16.gmra.mrb[28].mxu1 %vm1507_vm15, %v9732_v13 }
 0xce2   : > { %8817 = vmatprep.mubr.msk.bf16.mxu1 %vm11038_vm0, %v11037_v0 }
 0xce9   : > { %8818 = vmatmul.mubr.msk.bf16.gmra.mrb[32].mxu1 %vm1507_vm15, %v9733_v14  ;;  %v12050_v14 = vsub.s32 5, %v11812_v2 }
 0xcea   : > { %8821 = vmatprep.mubr.msk.bf16.mxu1 %vm11038_vm0, %v11037_v0 }
 0xcf1   : > { %8822 = vmatmul.mubr.msk.bf16.gmra.mrb[36].mxu1 %vm1507_vm15, %v9734_v40 }
 0xcf2   : > { %8825 = vmatprep.mubr.msk.bf16.mxu1 %vm11038_vm0, %v11037_v0 }
 0xcf9   : > { %8826 = vmatmul.mubr.msk.bf16.gmra.mrb[40].mxu1 %vm1507_vm15, %v9735_v18 }
 0xcfa   : > { %8829 = vmatprep.mubr.msk.bf16.mxu1 %vm11038_vm0, %v11037_v0 }
 0xd01   : > { %8830 = vmatmul.mubr.msk.bf16.gmra.mrb[44].mxu1 %vm1507_vm15, %v9736_v20 }
 0xd02   : > { %8833 = vmatprep.mubr.msk.bf16.mxu1 %vm11038_vm0, %v11037_v0 }
 0xd09   : > { %8834 = vmatmul.mubr.msk.bf16.gmra.mrb[48].mxu1 %vm1507_vm15, %v9737_v21 }
 0xd0a   : > { %8837 = vmatprep.mubr.msk.bf16.mxu1 %vm11038_vm0, %v11037_v0 }
 0xd11   : > { %8838 = vmatmul.mubr.msk.bf16.gmra.mrb[52].mxu1 %vm1507_vm15, %v9738_v22 }
 0xd12   : > { %8841 = vmatprep.mubr.msk.bf16.mxu1 %vm11038_vm0, %v11037_v0 }
 0xd19   : > { %8842 = vmatmul.mubr.msk.bf16.gmra.mrb[56].mxu1 %vm1507_vm15, %v9739_v23  ;;  %v2761_v23 = vrot.slane %v12031_v25, %v12050_v14 }
 0xd1a   : > { %8881 = vmatprep.mubr.msk.bf16.mxu1 %vm11038_vm0, %v11037_v0 }
 0xdac   : > { %v2647_v37 = vpop.f32.mrb[24].mxu1 }
 0xdad   : > { %v8811_v24 = vpop.f32.mrb[25].mxu1  ;;  %v2724_v33 = vmul.f32 %v2723_v29, %v2647_v37 }
 0xdae   : > { %v2650_v16 = vpop.f32.mrb[26].mxu1 }
 0xdaf   : > { %v8812_v27 = vpop.f32.mrb[27].mxu1  ;;  %v2725_v41 = vmul.f32 %v2723_v29, %v2650_v16 }
 0xdb0   : > { %v12055_v27 = vsub.s32 6, %v11812_v2 }
 0xdb4   : > { %v2655_v30 = vpop.f32.mrb[28].mxu1 }
 0xdb5   : > { %v2730_v35 = vmul.f32 %v2729_v19, %v2655_v30  ;;  %v8815_v36 = vpop.f32.mrb[29].mxu1 }
 0xdb6   : > { %v2658_v39 = vpop.f32.mrb[30].mxu1  ;;  %v2769_v36 = vrot.slane %v12031_v25, %v12055_v27 }
 0xdb7   : > { %v2732_v44 = vadd.f32 %v2730_v35, %v2724_v33  ;;  %v2731_v45 = vmul.f32 %v2729_v19, %v2658_v39  ;;  %v8816_v31 = vpop.f32.mrb[31].mxu1 }
 0xdb9   : > { %v2733_v47 = vadd.f32 %v2731_v45, %v2725_v41  ;;  %v12060_v45 = vsub.s32 7, %v11812_v2 }
 0xdbc   : > { %v2663_v48 = vpop.f32.mrb[32].mxu1 }
 0xdbd   : > { %v2738_v49 = vmul.f32 %v2737_v34, %v2663_v48  ;;  %v8819_v50 = vpop.f32.mrb[33].mxu1 }
 0xdbe   : > { %v2666_v53 = vpop.f32.mrb[34].mxu1  ;;  %v2777_v50 = vrot.slane %v12031_v25, %v12060_v45 }
 0xdbf   : > { %v2740_v54 = vadd.f32 %v2738_v49, %v2732_v44  ;;  %v2739_v55 = vmul.f32 %v2737_v34, %v2666_v53  ;;  %v8820_v56 = vpop.f32.mrb[35].mxu1 }
 0xdc1   : > { %v2741_v57 = vadd.f32 %v2739_v55, %v2733_v47 }
 0xdc4   : > { %v2671_v58 = vpop.f32.mrb[36].mxu1 }
 0xdc5   : > { %v2746_v60 = vmul.f32 %v2745_v59, %v2671_v58  ;;  %v8823_v62 = vpop.f32.mrb[37].mxu1 }
 0xdc6   : > { %v2674_v1 = vpop.f32.mrb[38].mxu1  ;;  %v8057_v62 = vld [vmem:[%s12870_s12 + $0x8] ss:$0 sm:$0xff] }
 0xdc7   : > { %v2748_v3 = vadd.f32 %v2746_v60, %v2740_v54  ;;  %v2747_v4 = vmul.f32 %v2745_v59, %v2674_v1  ;;  %v8824_v6 = vpop.f32.mrb[39].mxu1 }
 0xdc9   : > { %v2749_v38 = vadd.f32 %v2747_v4, %v2741_v57 }
 0xdcc   : > { %v2679_v7 = vpop.f32.mrb[40].mxu1 }
 0xdcd   : > { %v2754_v12 = vmul.f32 %v2753_v8, %v2679_v7  ;;  %v8827_v13 = vpop.f32.mrb[41].mxu1  ;;  %v8058_v7 = vld [vmem:[#allocation23] ss:$0 sm:$0xff] }
 0xdce   : > { %v2682_v40 = vpop.f32.mrb[42].mxu1 }
 0xdcf   : > { %v2756_v18 = vadd.f32 %v2754_v12, %v2748_v3  ;;  %v2755_v20 = vmul.f32 %v2753_v8, %v2682_v40  ;;  %v8828_v21 = vpop.f32.mrb[43].mxu1 }
 0xdd0   : > { %v9741_v21 = vld [vmem:[%s12871_s7 + $0x8] sm:$0xff]  }
 0xdd1   : > { %v2757_v22 = vadd.f32 %v2755_v20, %v2749_v38  ;;  %v9740_v20 = vld [vmem:[%s12871_s7] sm:$0xff]  }
 0xdd2   : > { %8846 = vmatpush3.bf16.msra.mxu0 %v9740_v20 }
 0xdd3   : > { %8847 = vmatprep.subr.bf16.mxu0 %v11037_v0 }
 0xdd4   : > { %v2687_v37 = vpop.f32.mrb[44].mxu1 }
 0xdd5   : > { %v2762_v24 = vmul.f32 %v2761_v23, %v2687_v37  ;;  %v8831_v16 = vpop.f32.mrb[45].mxu1 }
 0xdd6   : > { %v2690_v29 = vpop.f32.mrb[46].mxu1  ;;  %8848 = vmatpush3.bf16.msra.mxu0 %v9741_v21 }
 0xdd7   : > { %v2764_v19 = vadd.f32 %v2762_v24, %v2756_v18  ;;  %v2763_v30 = vmul.f32 %v2761_v23, %v2690_v29  ;;  %v8832_v33 = vpop.f32.mrb[47].mxu1  ;;  %8849 = vmatprep.subr.bf16.mxu0 %v11037_v0 }
 0xdd8   : > { %v9744_v33 = vld [vmem:[%s12871_s7 + $0x20] sm:$0xff]  }
 0xdd9   : > { %v2765_v35 = vadd.f32 %v2763_v30, %v2757_v22  ;;  %v9743_v30 = vld [vmem:[%s12871_s7 + $0x18] sm:$0xff]  }
 0xddc   : > { %v2695_v39 = vpop.f32.mrb[48].mxu1 }
 0xddd   : > { %v2770_v41 = vmul.f32 %v2769_v36, %v2695_v39  ;;  %v8835_v44 = vpop.f32.mrb[49].mxu1  ;;  %v9747_v39 = vld [vmem:[%s12871_s7 + $0x38] sm:$0xff]  }
 0xdde   : > { %v2698_v31 = vpop.f32.mrb[50].mxu1  ;;  %v9749_v44 = vld [vmem:[#allocation29 + $0x8] sm:$0xff]  }
 0xddf   : > { %v2772_v47 = vadd.f32 %v2770_v41, %v2764_v19  ;;  %v2771_v34 = vmul.f32 %v2769_v36, %v2698_v31  ;;  %v8836_v48 = vpop.f32.mrb[51].mxu1  ;;  %v9742_v19 = vld [vmem:[%s12871_s7 + $0x10] sm:$0xff]   ;;  %v9750_v31 = vld [vmem:[#allocation29 + $0x10] sm:$0xff]  }
 0xde0   : > { %8850 = vmatpush3.bf16.msra.mxu0 %v9742_v19  ;;  %v9746_v36 = vld [vmem:[%s12871_s7 + $0x30] sm:$0xff]  }
 0xde1   : > { %v2773_v49 = vadd.f32 %v2771_v34, %v2765_v35  ;;  %8851 = vmatprep.subr.bf16.mxu0 %v11037_v0  ;;  %v9745_v35 = vld [vmem:[%s12871_s7 + $0x28] sm:$0xff]   ;;  %v9753_v48 = vld [vmem:[#allocation29 + $0x28] sm:$0xff]  }
 0xde2   : > { %v9748_v41 = vld [vmem:[#allocation29] sm:$0xff]  }
 0xde3   : > { %8866 = vmatpush3.bf16.msra.mxu1 %v9748_v41  ;;  %v9752_v34 = vld [vmem:[#allocation29 + $0x20] sm:$0xff]  }
 0xde4   : > { %v2703_v53 = vpop.f32.mrb[52].mxu1  ;;  %8852 = vmatpush3.bf16.msra.mxu0 %v9743_v30  ;;  %8867 = vmatprep.subr.bf16.mxu1 %v11037_v0  ;;  %v9759_v41 = vld [vmem:[#allocation16 + $0xc8] ss:$12 sps:$4 sm:$0xff]  }
 0xde5   : > { %v2778_v54 = vmul.f32 %v2777_v50, %v2703_v53  ;;  %v8839_v55 = vpop.f32.mrb[53].mxu1  ;;  %8853 = vmatprep.subr.bf16.mxu0 %v11037_v0 }
 0xde6   : > { %v2706_v56 = vpop.f32.mrb[54].mxu1 }
 0xde7   : > { %v2780_v57 = vadd.f32 %v2778_v54, %v2772_v47  ;;  %v2779_v59 = vmul.f32 %v2777_v50, %v2706_v56  ;;  %v8840_v58 = vpop.f32.mrb[55].mxu1  ;;  %8868 = vmatpush3.bf16.msra.mxu1 %v9749_v44  ;;  %v9751_v47 = vld [vmem:[#allocation29 + $0x18] sm:$0xff]  }
 0xde8   : > { %8854 = vmatpush3.bf16.msra.mxu0 %v9744_v33  ;;  %8869 = vmatprep.subr.bf16.mxu1 %v11037_v0  ;;  %v8059_v58 = vld [vmem:[#allocation25] ss:$0 sm:$0xff]  ;;  %v9762_v44 = vld [vmem:[#allocation16 + $0xdc] ss:$12 sps:$4 sm:$0xff]  }
 0xde9   : > { %v2781_v60 = vadd.f32 %v2779_v59, %v2773_v49  ;;  %8855 = vmatprep.subr.bf16.mxu0 %v11037_v0  ;;  %v9754_v49 = vld [vmem:[#allocation29 + $0x30] sm:$0xff]  }
 0xdeb   : > { %8870 = vmatpush3.bf16.msra.mxu1 %v9750_v31  ;;  %v9763_v31 = vld [vmem:[#allocation16 + $0xe0] ss:$12 sps:$4 sm:$0xff]  }
 0xdec   : > { %v2711_v2 = vpop.f32.mrb[56].mxu1  ;;  %8856 = vmatpush3.bf16.msra.mxu0 %v9745_v35  ;;  %8871 = vmatprep.subr.bf16.mxu1 %v11037_v0 }
 0xded   : > { %v2786_v1 = vmul.f32 %v8057_v62, %v2711_v2  ;;  %v8843_v3 = vpop.f32.mrb[57].mxu1  ;;  %8857 = vmatprep.subr.bf16.mxu0 %v11037_v0 }
 0xdee   : > { %v2714_v4 = vpop.f32.mrb[58].mxu1  ;;  %v8060_v3 = vld [vmem:[#allocation26] ss:$0 sm:$0xff] }
 0xdef   : > { %v2788_v6 = vadd.f32 %v2786_v1, %v2780_v57  ;;  %v2787_v38 = vmul.f32 %v8057_v62, %v2714_v4  ;;  %v8844_v8 = vpop.f32.mrb[59].mxu1  ;;  %8872 = vmatpush3.bf16.msra.mxu1 %v9751_v47  ;;  %v9760_v47 = vld [vmem:[#allocation16 + $0xd8] ss:$12 sps:$4 sm:$0xff]  }
 0xdf0   : > { %8858 = vmatpush3.bf16.msra.mxu0 %v9746_v36  ;;  %8873 = vmatprep.subr.bf16.mxu1 %v11037_v0  ;;  %v9756_v36 = vld [vmem:[#allocation16 + $0xc0] ss:$12 sps:$4 sm:$0xff]  }
 0xdf1   : > { %v2789_v25 = vadd.f32 %v2787_v38, %v2781_v60  ;;  %v2790_v12 = vadd.f32 %v2788_v6, %v11996_v9  ;;  %8859 = vmatprep.subr.bf16.mxu0 %v11037_v0 }
 0xdf3   : > { %v2799_v13 = vadd.f32 %v8058_v7, %v2790_v12  ;;  %v2791_v40 = vadd.f32 %v2789_v25, %v11998_v10  ;;  %8874 = vmatpush3.bf16.msra.mxu1 %v9752_v34  ;;  %v8061_v25 = vld [vmem:[#allocation28] ss:$0 sm:$0xff] }
 0xdf4   : > { %8860 = vmatpush3.bf16.msra.mxu0 %v9747_v39  ;;  %8875 = vmatprep.subr.bf16.mxu1 %v11037_v0  ;;  %v9758_v39 = vld [vmem:[#allocation16 + $0xc4] ss:$12 sps:$4 sm:$0xff]  }
 0xdf5   : > { %2803 = vadd.xlane.f32.xlu0 %v2799_v13  ;;  %v2800_v18 = vadd.f32 %v8058_v7, %v2791_v40  ;;  %v9755_v7 = vld [vmem:[#allocation29 + $0x38] sm:$0xff]   ;;  %3291 = vmatprep.subr.bf16.mxu0 %v9758_v39 }
 0xdf7   : > { %2805 = vadd.xlane.f32.xlu1 %v2800_v18  ;;  %8876 = vmatpush3.bf16.msra.mxu1 %v9753_v48 }
 0xdf8   : > { %8877 = vmatprep.subr.bf16.mxu1 %v11037_v0 }
 0xdfb   : > { %8878 = vmatpush3.bf16.msra.mxu1 %v9754_v49 }
 0xdfc   : > { %8879 = vmatprep.subr.bf16.mxu1 %v11037_v0 }
 0xdff   : > { %8880 = vmatpush3.bf16.msra.mxu1 %v9755_v7  ;;  %v9780_v7 = vld [vmem:[#allocation16 + $0x150] ss:$12 sps:$4 sm:$0xff]  }
 0xe00   : > { %8885 = vmatprep.subr.bf16.mxu1 %v11037_v0 }
 0xe82   : > { %v2804_v22 = vpop.xlane.xlu0 %2803 }
 0xe83   : > { %v2807_v23 = vmul.f32 0.0078125, %v2804_v22 }
 0xe84   : > { %v2806_v9 = vpop.xlane.xlu1 %2805 }
 0xe85   : > { %v2809_v37 = vsub.f32 %v2799_v13, %v2807_v23  ;;  %v2808_v10 = vmul.f32 0.0078125, %v2806_v9 }
 0xe87   : > { %v2810_v24 = vsub.f32 %v2800_v18, %v2808_v10  ;;  %v2811_v16 = vmul.f32 %v2809_v37, %v2809_v37 }
 0xe89   : > { %2813 = vadd.xlane.f32.xlu0 %v2811_v16  ;;  %v2812_v29 = vmul.f32 %v2810_v24, %v2810_v24 }
 0xe8b   : > { %2815 = vadd.xlane.f32.xlu1 %v2812_v29 }
 0xf16   : > { %v2814_v50 = vpop.xlane.xlu0 %2813 }
 0xf17   : > { %v2817_v53 = vmul.f32 0.0078125, %v2814_v50 }
 0xf18   : > { %v2816_v54 = vpop.xlane.xlu1 %2815 }
 0xf19   : > { %v2819_v55 = vadd.f32 1e-05, %v2817_v53  ;;  %v2818_v56 = vmul.f32 0.0078125, %v2816_v54 }
 0xf1b   : > { %10037 = vrsqrt.f32 %v2819_v55  ;;  %v2820_v57 = vadd.f32 1e-05, %v2818_v56 }
 0xf1d   : > { %10039 = vrsqrt.f32 %v2820_v57  ;;  %v9766_v57 = vld [vmem:[#allocation16 + $0xf4] ss:$12 sps:$4 sm:$0xff]  }
 0xf25   : > { %v10038_v59 = vpop.eup %10037 }
 0xf26   : > { %v2823_v60 = vmul.f32 %v10038_v59, %v2809_v37  ;;  %v8070_v37 = vld [vmem:[#allocation31] ss:$0 sm:$0xff]  ;;  %v9764_v59 = vld [vmem:[#allocation16 + $0xf0] ss:$12 sps:$4 sm:$0xff]  }
 0xf27   : > { %v10040_v62 = vpop.eup %10039 }
 0xf28   : > { %v2824_v2 = vmul.f32 %v10040_v62, %v2810_v24  ;;  %v2831_v1 = vmul.f32 %v8059_v58, %v2823_v60  ;;  %v9770_v60 = vld [vmem:[#allocation16 + $0x10c] ss:$12 sps:$4 sm:$0xff]   ;;  %v9768_v62 = vld [vmem:[#allocation16 + $0x108] ss:$12 sps:$4 sm:$0xff]  }
 0xf2a   : > { %v2832_v4 = vmul.f32 %v8059_v58, %v2824_v2  ;;  %v2839_v6 = vadd.f32 %v8060_v3, %v2831_v1  ;;  %v9767_v58 = vld [vmem:[#allocation16 + $0xf8] ss:$12 sps:$4 sm:$0xff]   ;;  %v9771_v2 = vld [vmem:[#allocation16 + $0x110] ss:$12 sps:$4 sm:$0xff]  }
 0xf2b   : > { %v9774_v1 = vld [vmem:[#allocation16 + $0x124] ss:$12 sps:$4 sm:$0xff]  }
 0xf2c   : > { %v2840_v38 = vadd.f32 %v8060_v3, %v2832_v4  ;;  %v9772_v3 = vld [vmem:[#allocation16 + $0x120] ss:$12 sps:$4 sm:$0xff]   ;;  %v9775_v4 = vld [vmem:[#allocation16 + $0x128] ss:$12 sps:$4 sm:$0xff]  }
 0xf2e   : > { %v2857_v8 = vpack.c.bf16 %v2840_v38, %v2839_v6 }
 0xf30   : > { %8862 = vmatmul.mubr.bf16.vlgmr.msra.gmra.mrb[28].mxu0 %v2857_v8  ;;  %v9779_v8 = vld [vmem:[#allocation16 + $0x140] ss:$12 sps:$4 sm:$0xff]  }
 0xf31   : > { %3323 = vmatprep.mubr.bf16.mxu0 %v11040_v15  ;;  %3292 = vmatpush1.bf16.msra.mxu0 %v9756_v36 }
 0xf32   : > { %3293 = vmatprep.subr.bf16.mxu0 %v9762_v44  ;;  %v3146_v44 = vld [vmem:[#allocation17 + $0x3] sm:$0x7] }
 0xf35   : > { %3294 = vmatpush1.bf16.msra.mxu0 %v9760_v47  ;;  %v3159_v47 = vrot.slane %v3146_v44, %v11831_v28 }
 0xf36   : > { %3295 = vmatprep.subr.bf16.mxu0 %v9766_v57 }
 0xf39   : > { %3296 = vmatpush1.bf16.msra.mxu0 %v9764_v59 }
 0xf3a   : > { %3297 = vmatprep.subr.bf16.mxu0 %v9770_v60 }
 0xf3d   : > { %3298 = vmatpush1.bf16.msra.mxu0 %v9768_v62 }
 0xf3e   : > { %3299 = vmatprep.subr.bf16.mxu0 %v9774_v1 }
 0xf41   : > { %3300 = vmatpush1.bf16.msra.mxu0 %v9772_v3 }
0x1003   : > { %v2947_v12 = vpop.f32.mrb[28].mxu0 }
0x1004   : > { %v2948_v13 = vadd.f32 %v8061_v25, %v2947_v12  ;;  %v8863_v40 = vpop.f32.mrb[29].mxu0  ;;  %v9783_v12 = vld [vmem:[#allocation16 + $0x158] ss:$12 sps:$4 sm:$0xff]  }
0x1005   : > { %v2950_v18 = vpop.f32.mrb[30].mxu0  ;;  %v9784_v40 = vld [vmem:[#allocation16 + $0x168] ss:$12 sps:$4 sm:$0xff]  }
0x1006   : > { %v2951_v20 = vadd.f32 %v8061_v25, %v2950_v18  ;;  %v8864_v21 = vpop.f32.mrb[31].mxu0  ;;  %v2954_v22 = vmax.f32 %v2948_v13, 0.0  ;;  %v9782_v25 = vld [vmem:[#allocation16 + $0x154] ss:$12 sps:$4 sm:$0xff]   ;;  %v9786_v13 = vld [vmem:[#allocation16 + $0x16c] ss:$12 sps:$4 sm:$0xff]  }
0x1007   : > { %v9787_v18 = vld [vmem:[#allocation16 + $0x170] ss:$12 sps:$4 sm:$0xff]  }
0x1008   : > { %v2955_v23 = vmax.f32 %v2951_v20, 0.0 }
0x100a   : > { %v2972_v9 = vpack.c.bf16 %v2955_v23, %v2954_v22 }
0x100c   : > { %8882 = vmatmul.mubr.bf16.vlgmr.msra.gmra.mrb[60].mxu1 %v2972_v9 }
0x100d   : > { %8901 = vmatprep.mubr.msk.bf16.mxu1 %vm11038_vm0, %v11037_v0  ;;  %8886 = vmatpush3.bf16.msra.mxu1 %v9759_v41 }
0x100e   : > { %8887 = vmatprep.subr.bf16.mxu1 %v11037_v0 }
0x1011   : > { %8888 = vmatpush3.bf16.msra.mxu1 %v9763_v31  ;;  %v3151_v31 = vrot.slane %v3146_v44, %v11843_v42 }
0x1012   : > { %8889 = vmatprep.subr.bf16.mxu1 %v11037_v0 }
0x1015   : > { %8890 = vmatpush3.bf16.msra.mxu1 %v9767_v58 }
0x1016   : > { %8891 = vmatprep.subr.bf16.mxu1 %v11037_v0 }
0x1019   : > { %8892 = vmatpush3.bf16.msra.mxu1 %v9771_v2 }
0x101a   : > { %8893 = vmatprep.subr.bf16.mxu1 %v11037_v0 }
0x101d   : > { %8894 = vmatpush3.bf16.msra.mxu1 %v9775_v4 }
0x101e   : > { %8895 = vmatprep.subr.bf16.mxu1 %v11037_v0 }
0x1021   : > { %8896 = vmatpush3.bf16.msra.mxu1 %v9779_v8 }
0x1022   : > { %8897 = vmatprep.subr.bf16.mxu1 %v11037_v0 }
0x1025   : > { %8898 = vmatpush3.bf16.msra.mxu1 %v9783_v12 }
0x1026   : > { %8899 = vmatprep.subr.bf16.mxu1 %v11037_v0 }
0x1029   : > { %8900 = vmatpush3.bf16.msra.mxu1 %v9787_v18 }
0x102a   : > { %8923 = vmatprep.subr.bf16.mxu1 %v11037_v0 }
0x10df   : > { %v3062_v10 = vpop.f32.mrb[60].mxu1 }
0x10e0   : > { %v3063_v24 = vadd.f32 %v8070_v37, %v3062_v10  ;;  %v8883_v16 = vpop.f32.mrb[61].mxu1 }
0x10e1   : > { %v3065_v29 = vpop.f32.mrb[62].mxu1 }
0x10e2   : > { %v3066_v19 = vadd.f32 %v8070_v37, %v3065_v29  ;;  %v8884_v30 = vpop.f32.mrb[63].mxu1  ;;  %v3069_v33 = vadd.f32 %v3063_v24, %v2839_v6  ;;  %v9778_v6 = vld [vmem:[#allocation16 + $0x13c] ss:$12 sps:$4 sm:$0xff]  }
0x10e3   : > { %3301 = vmatprep.subr.bf16.mxu0 %v9778_v6  ;;  %v8079_v24 = vld [vmem:[#allocation32] ss:$0 sm:$0xff] }
0x10e4   : > { %3073 = vadd.xlane.f32.xlu0 %v3069_v33  ;;  %v3070_v35 = vadd.f32 %v3066_v19, %v2840_v38  ;;  %v9776_v38 = vld [vmem:[#allocation16 + $0x138] ss:$12 sps:$4 sm:$0xff]  }
0x10e5   : > { %3302 = vmatpush1.bf16.msra.mxu0 %v9776_v38 }
0x10e6   : > { %3075 = vadd.xlane.f32.xlu1 %v3070_v35  ;;  %3303 = vmatprep.subr.bf16.mxu0 %v9782_v25 }
0x10e9   : > { %3304 = vmatpush1.bf16.msra.mxu0 %v9780_v7 }
0x10ea   : > { %3305 = vmatprep.subr.bf16.mxu0 %v9786_v13 }
0x10ed   : > { %3306 = vmatpush1.bf16.msra.mxu0 %v9784_v40 }
0x10ee   : > { %8905 = vmatprep.subr.bf16.mxu0 %v11037_v0 }
0x1171   : > { %v3074_v34 = vpop.xlane.xlu0 %3073 }
0x1172   : > { %v3077_v48 = vmul.f32 0.0078125, %v3074_v34 }
0x1173   : > { %v3076_v49 = vpop.xlane.xlu1 %3075 }
0x1174   : > { %v3079_v50 = vsub.f32 %v3069_v33, %v3077_v48  ;;  %v3078_v53 = vmul.f32 0.0078125, %v3076_v49  ;;  %v8080_v33 = vld [vmem:[#allocation34] ss:$0 sm:$0xff]  ;;  %v3155_v49 = vrot.slane %v3146_v44, %v11846_v43 }
0x1176   : > { %v3080_v54 = vsub.f32 %v3070_v35, %v3078_v53  ;;  %v3081_v55 = vmul.f32 %v3079_v50, %v3079_v50 }
0x1178   : > { %3083 = vadd.xlane.f32.xlu0 %v3081_v55  ;;  %v3082_v56 = vmul.f32 %v3080_v54, %v3080_v54 }
0x117a   : > { %3085 = vadd.xlane.f32.xlu1 %v3082_v56 }
0x1205   : > { %v3084_v20 = vpop.xlane.xlu0 %3083 }
0x1206   : > { %v3087_v21 = vmul.f32 0.0078125, %v3084_v20 }
0x1207   : > { %v3086_v22 = vpop.xlane.xlu1 %3085 }
0x1208   : > { %v3089_v23 = vadd.f32 1e-05, %v3087_v21  ;;  %v3088_v9 = vmul.f32 0.0078125, %v3086_v22 }
0x120a   : > { %10041 = vrsqrt.f32 %v3089_v23  ;;  %v3090_v37 = vadd.f32 1e-05, %v3088_v9 }
0x120c   : > { %10043 = vrsqrt.f32 %v3090_v37 }
0x1214   : > { %v10042_v10 = vpop.eup %10041 }
0x1215   : > { %v3093_v16 = vmul.f32 %v10042_v10, %v3079_v50 }
0x1216   : > { %v10044_v29 = vpop.eup %10043 }
0x1217   : > { %v3094_v19 = vmul.f32 %v10044_v29, %v3080_v54  ;;  %v3101_v30 = vmul.f32 %v8079_v24, %v3093_v16 }
0x1219   : > { %v3102_v35 = vmul.f32 %v8079_v24, %v3094_v19  ;;  %v12102_v36 = vadd.f32 %v8080_v33, %v3101_v30 }
0x121b   : > { %v12104_v39 = vadd.f32 %v8080_v33, %v3102_v35 }
0x121d   : > { %v12108_v41 = vpack.c.bf16 %v12104_v39, %v12102_v36 }
0x121f   : > { %3324 = vmatmul.mubr.bf16.vlgmr.msra.gmra.mrb[32].mxu0 %v12108_v41  ;;  %8902 = vmatmul.mubr.bf16.vlgmr.msra.gmra.mrb[64].mxu1 %v12108_v41 }
0x1220   : > { %8907 = vmatprep.mubr.msk.bf16.mxu0 %vm11038_vm0, %v11037_v0  ;;  %8925 = vmatprep.mubr.msk.bf16.mxu1 %vm11038_vm0, %v11037_v0 }
0x12f2   : > { %v3325_v34 = vpop.f32.mrb[32].mxu0  ;;  %v3368_v48 = vpop.f32.mrb[64].mxu1 }
0x12f3   : > { %v3327_v50 = vpop.f32.mrb[33].mxu0  ;;  %v8903_v53 = vpop.f32.mrb[65].mxu1  ;;  %v3326_v56 = vadd.f32 %v3325_v34, %v3151_v31  ;;  %v3369_v57 = vadd.f32 %v3368_v48, %v3159_v47 }
0x12f4   : > { %v3329_v54 = vpop.f32.mrb[34].mxu0  ;;  %v3371_v55 = vpop.f32.mrb[66].mxu1  ;;  %v3328_v2 = vadd.f32 %v3327_v50, %v3155_v49 }
0x12f5   : > { %v3330_v59 = vadd.f32 %v3329_v54, %v3151_v31  ;;  %v3372_v58 = vadd.f32 %v3371_v55, %v3159_v47  ;;  %v3331_v60 = vpop.f32.mrb[35].mxu0  ;;  %v8904_v62 = vpop.f32.mrb[67].mxu1 }
0x12f6   : > { %v3332_v1 = vadd.f32 %v3331_v60, %v3155_v49 }
0x12f7   : > { %v3375_v3 = vpack.c.bf16 %v3330_v59, %v3326_v56  ;;  %v12119_v4 = vpack.c.bf16 %v3372_v58, %v3369_v57 }
0x12f8   : > { %v3376_v6 = vpack.c.bf16 %v3332_v1, %v3328_v2 }
0x12fa   : > { %v3381_v38 = vsel %vm1856_vm2, %v3376_v6, 0 }
0x12fb   : > { %8906 = vmatpush3.bf16.xpose.msra.mxu0 %v3381_v38 }
0x12fc   : > { %8911 = vmatprep.subr.bf16.mxu0 %v11037_v0 }
0x1302   : > { %8908 = vmatmul.mubr.msk.bf16.vlgmr.msra.gmra.mrb[36].mxu0 %vm1856_vm2, %v3375_v3 }
0x1303   : > { %8912 = vmatpush3.bf16.msra.mxu0 %v12119_v4  ;;  %8913 = vmatprep.mubr.msk.bf16.mxu0 %vm11038_vm0, %v11037_v0 }
0x1304   : > { %8917 = vmatprep.subr.bf16.mxu0 %v11037_v0 }
0x13d5   : > { %v3417_v8 = vpop.f32.mrb[36].mxu0 }
0x13d6   : > { %v3424_v7 = vmul.f32 0.17677669, %v3417_v8  ;;  %v8909_v25 = vpop.f32.mrb[37].mxu0 }
0x13d7   : > { %v3420_v12 = vpop.f32.mrb[38].mxu0 }
0x13d8   : > { %v3425_v13 = vmul.f32 0.17677669, %v3420_v12  ;;  %v8910_v40 = vpop.f32.mrb[39].mxu0  ;;  %v3426_v18 = vadd.f32 %v3424_v7, %v11882_v11 }
0x13da   : > { %v3428_v20 = vsel %vm1507_vm15, %v3426_v18, -inf  ;;  %v3427_v21 = vadd.f32 %v3425_v13, %v11887_v17 }
0x13db   : > { %3429 = vmax.xlane.f32.xlu0 %v3428_v20 }
0x13dc   : > { %v3431_v22 = vsel %vm1507_vm15, %v3427_v21, -inf }
0x13dd   : > { %3432 = vmax.xlane.f32.xlu1 %v3431_v22 }
0x1468   : > { %v3430_v23 = vpop.xlane.xlu0 %3429 }
0x1469   : > { %v3434_v9 = vsub.f32 %v3426_v18, %v3430_v23 }
0x146a   : > { %v3433_v37 = vpop.xlane.xlu1 %3432 }
0x146b   : > { %v3436_v10 = vmul.f32 1.442695, %v3434_v9  ;;  %v3435_v24 = vsub.f32 %v3427_v21, %v3433_v37 }
0x146d   : > { %10045 = vpow2.f32 %v3436_v10  ;;  %v3438_v16 = vmul.f32 1.442695, %v3435_v24 }
0x146f   : > { %10047 = vpow2.f32 %v3438_v16 }
0x1477   : > { %v10046_v29 = vpop.eup %10045 }
0x1478   : > { %v3440_v19 = vsel %vm1507_vm15, %v10046_v29, 0.0 }
0x1479   : > { %v10048_v30 = vpop.eup %10047  ;;  %3441 = vadd.xlane.f32.xlu0 %v3440_v19 }
0x147a   : > { %v3443_v33 = vsel %vm1507_vm15, %v10048_v30, 0.0 }
0x147b   : > { %3444 = vadd.xlane.f32.xlu1 %v3443_v33 }
0x148c   : > { %3497 = vrot.lane.b32.xlu1 %v3375_v3, %s11041_s8 }
0x148f   : > { %3500 = vrot.lane.b32.xlu0 %v3376_v6, %s11041_s8 }
0x1490   : > { %3626 = vrot.lane.b32.xlu1 %v3376_v6, %s11042_s13 }
0x1493   : > { %3751 = vrot.lane.b32.xlu0 %v3376_v6, %s11043_s15 }
0x1494   : > { %3624 = vrot.lane.b32.xlu1 %v3375_v3, %s11042_s13 }
0x1498   : > { %3749 = vrot.lane.b32.xlu1 %v3375_v3, %s11043_s15 }
0x1506   : > { %v3442_v35 = vpop.xlane.xlu0 %3441 }
0x1507   : > { %10049 = vrcp.f32 %v3442_v35 }
0x1508   : > { %v3445_v44 = vpop.xlane.xlu1 %3444 }
0x1509   : > { %10051 = vrcp.f32 %v3445_v44 }
0x150a   : > { %v3501_v49 = vpop.permute.xlu0 %3500 }
0x150b   : > { %v3506_v54 = vsel %vm1856_vm2, %v3501_v49, 0 }
0x150c   : > { %v3498_v53 = vpop.permute.xlu1 %3497 }
0x150e   : > { %v3752_v57 = vpop.permute.xlu0 %3751 }
0x150f   : > { %v3757_v58 = vsel %vm1856_vm2, %v3752_v57, 0 }
0x1510   : > { %v3627_v55 = vpop.permute.xlu1 %3626 }
0x1511   : > { %v10050_v31 = vpop.eup %10049  ;;  %v3632_v56 = vsel %vm1856_vm2, %v3627_v55, 0 }
0x1512   : > { %v3448_v34 = vmul.f32 %v10050_v31, %v10046_v29 }
0x1513   : > { %v10052_v47 = vpop.eup %10051 }
0x1514   : > { %v3449_v48 = vmul.f32 %v10052_v47, %v10048_v30  ;;  %v3625_v59 = vpop.permute.xlu1 %3624 }
0x1516   : > { %v3450_v50 = vpack.c.bf16 %v3449_v48, %v3448_v34 }
0x1518   : > { %8914 = vmatmul.mubr.msk.bf16.vlgmr.msra.gmra.mrb[40].mxu0 %vm1507_vm15, %v3450_v50  ;;  %v3750_v60 = vpop.permute.xlu1 %3749 }
0x1519   : > { %8918 = vmatpush3.bf16.xpose.msra.mxu0 %v3506_v54  ;;  %8919 = vmatprep.mubr.msk.bf16.mxu0 %vm11038_vm0, %v11037_v0 }
0x151a   : > { %8929 = vmatprep.subr.bf16.mxu0 %v11037_v0 }
0x1520   : > { %8920 = vmatmul.mubr.msk.bf16.vlgmr.msra.gmra.mrb[44].mxu0 %vm1856_vm2, %v3498_v53 }
0x1521   : > { %8930 = vmatpush3.bf16.xpose.msra.mxu0 %v3632_v56  ;;  %8931 = vmatprep.mubr.msk.bf16.mxu0 %vm11038_vm0, %v11037_v0 }
0x1522   : > { %8941 = vmatprep.subr.bf16.mxu0 %v11037_v0 }
0x1528   : > { %8932 = vmatmul.mubr.msk.bf16.vlgmr.msra.gmra.mrb[48].mxu0 %vm1856_vm2, %v3625_v59 }
0x1529   : > { %8942 = vmatpush3.bf16.xpose.msra.mxu0 %v3757_v58  ;;  %8943 = vmatprep.mubr.msk.bf16.mxu0 %vm11038_vm0, %v11037_v0 }
0x152a   : > { %8953 = vmatprep.subr.bf16.mxu0 %v11037_v0 }
0x1530   : > { %8944 = vmatmul.mubr.msk.bf16.vlgmr.msra.gmra.mrb[52].mxu0 %vm1856_vm2, %v3750_v60 }
0x1531   : > { %8969 = vmatprep.mubr.msk.bf16.mxu0 %vm11038_vm0, %v11037_v0 }
0x15eb   : > { %v12158_v62 = vpop.f32.mrb[40].mxu0 }
0x15ec   : > { %v8915_v2 = vpop.f32.mrb[41].mxu0 }
0x15ed   : > { %v12160_v1 = vpop.f32.mrb[42].mxu0 }
0x15ee   : > { %v8916_v3 = vpop.f32.mrb[43].mxu0 }
0x15f3   : > { %v3542_v6 = vpop.f32.mrb[44].mxu0 }
0x15f4   : > { %v3549_v38 = vmul.f32 0.17677669, %v3542_v6  ;;  %v8921_v8 = vpop.f32.mrb[45].mxu0 }
0x15f5   : > { %v3545_v7 = vpop.f32.mrb[46].mxu0 }
0x15f6   : > { %v3550_v25 = vmul.f32 0.17677669, %v3545_v7  ;;  %v8922_v12 = vpop.f32.mrb[47].mxu0  ;;  %v3551_v13 = vadd.f32 %v3549_v38, %v11896_v26 }
0x15f8   : > { %v3553_v40 = vsel %vm1507_vm15, %v3551_v13, -inf  ;;  %v3552_v18 = vadd.f32 %v3550_v25, %v11901_v32 }
0x15f9   : > { %3554 = vmax.xlane.f32.xlu0 %v3553_v40 }
0x15fa   : > { %v3556_v20 = vsel %vm1507_vm15, %v3552_v18, -inf }
0x15fb   : > { %3557 = vmax.xlane.f32.xlu1 %v3556_v20  ;;  %v3668_v21 = vpop.f32.mrb[48].mxu0 }
0x15fc   : > { %v3675_v22 = vmul.f32 0.17677669, %v3668_v21  ;;  %v8933_v23 = vpop.f32.mrb[49].mxu0 }
0x15fd   : > { %v3671_v9 = vpop.f32.mrb[50].mxu0 }
0x15fe   : > { %v3676_v37 = vmul.f32 0.17677669, %v3671_v9  ;;  %v8934_v10 = vpop.f32.mrb[51].mxu0  ;;  %v3677_v24 = vadd.f32 %v3675_v22, %v11910_v46 }
0x1600   : > { %v3679_v16 = vsel %vm1507_vm15, %v3677_v24, -inf  ;;  %v3678_v29 = vadd.f32 %v3676_v37, %v11915_v51 }
0x1601   : > { %3680 = vmax.xlane.f32.xlu0 %v3679_v16 }
0x1602   : > { %v3682_v35 = vsel %vm1507_vm15, %v3678_v29, -inf }
0x1603   : > { %v3793_v19 = vpop.f32.mrb[52].mxu0 }
0x1604   : > { %v3800_v30 = vmul.f32 0.17677669, %v3793_v19  ;;  %v8945_v33 = vpop.f32.mrb[53].mxu0 }
0x1605   : > { %3683 = vmax.xlane.f32.xlu0 %v3682_v35  ;;  %v3796_v44 = vpop.f32.mrb[54].mxu0 }
0x1606   : > { %v3801_v31 = vmul.f32 0.17677669, %v3796_v44  ;;  %v8946_v47 = vpop.f32.mrb[55].mxu0  ;;  %v3802_v34 = vadd.f32 %v3800_v30, %v11924_v61 }
0x1608   : > { %v3804_v48 = vsel %vm1507_vm15, %v3802_v34, -inf  ;;  %v3803_v49 = vadd.f32 %v3801_v31, %v11929_v5 }
0x1609   : > { %3805 = vmax.xlane.f32.xlu0 %v3804_v48 }
0x160a   : > { %v3807_v50 = vsel %vm1507_vm15, %v3803_v49, -inf }
0x160b   : > { %3808 = vmax.xlane.f32.xlu1 %v3807_v50 }
0x1686   : > { %v3555_v53 = vpop.xlane.xlu0 %3554 }
0x1687   : > { %v3559_v54 = vsub.f32 %v3551_v13, %v3555_v53 }
0x1688   : > { %v3558_v55 = vpop.xlane.xlu1 %3557 }
0x1689   : > { %v3561_v56 = vmul.f32 1.442695, %v3559_v54  ;;  %v3560_v57 = vsub.f32 %v3552_v18, %v3558_v55 }
0x168b   : > { %10053 = vpow2.f32 %v3561_v56  ;;  %v3563_v59 = vmul.f32 1.442695, %v3560_v57 }
0x168d   : > { %10055 = vpow2.f32 %v3563_v59 }
0x168e   : > { %v3681_v58 = vpop.xlane.xlu0 %3680 }
0x168f   : > { %v3685_v60 = vsub.f32 %v3677_v24, %v3681_v58 }
0x1691   : > { %v3687_v2 = vmul.f32 1.442695, %v3685_v60 }
0x1692   : > { %v3684_v3 = vpop.xlane.xlu0 %3683 }
0x1693   : > { %10057 = vpow2.f32 %v3687_v2  ;;  %v3686_v6 = vsub.f32 %v3678_v29, %v3684_v3 }
0x1695   : > { %v10054_v38 = vpop.eup %10053  ;;  %v3689_v8 = vmul.f32 1.442695, %v3686_v6 }
0x1696   : > { %v3806_v7 = vpop.xlane.xlu0 %3805  ;;  %v3565_v25 = vsel %vm1507_vm15, %v10054_v38, 0.0 }
0x1697   : > { %v10056_v12 = vpop.eup %10055  ;;  %10059 = vpow2.f32 %v3689_v8  ;;  %v3810_v13 = vsub.f32 %v3802_v34, %v3806_v7  ;;  %3566 = vadd.xlane.f32.xlu0 %v3565_v25 }
0x1698   : > { %v3568_v40 = vsel %vm1507_vm15, %v10056_v12, 0.0  ;;  %v3809_v10 = vpop.xlane.xlu1 %3808 }
0x1699   : > { %v3812_v18 = vmul.f32 1.442695, %v3810_v13  ;;  %3569 = vadd.xlane.f32.xlu1 %v3568_v40  ;;  %v3811_v24 = vsub.f32 %v3803_v49, %v3809_v10  ;;  %v9788_v13 = vld [vmem:[%s12869_s19 + $0x40] sm:$0xff]  }
0x169a   : > { %8954 = vmatpush3.bf16.msra.mxu0 %v9788_v13 }
0x169b   : > { %10061 = vpow2.f32 %v3812_v18  ;;  %v3814_v16 = vmul.f32 1.442695, %v3811_v24  ;;  %8955 = vmatprep.subr.bf16.mxu0 %v11037_v0  ;;  %v9791_v24 = vld [vmem:[%s12869_s19 + $0x58] sm:$0xff]  }
0x169d   : > { %v10058_v20 = vpop.eup %10057  ;;  %10063 = vpow2.f32 %v3814_v16  ;;  %v9792_v16 = vld [vmem:[%s12869_s19 + $0x60] sm:$0xff]  }
0x169e   : > { %v3691_v21 = vsel %vm1507_vm15, %v10058_v20, 0.0 }
0x169f   : > { %3692 = vadd.xlane.f32.xlu0 %v3691_v21 }
0x16a1   : > { %v10060_v22 = vpop.eup %10059 }
0x16a2   : > { %v3694_v23 = vsel %vm1507_vm15, %v10060_v22, 0.0 }
0x16a3   : > { %3695 = vadd.xlane.f32.xlu1 %v3694_v23 }
0x16a5   : > { %v10062_v9 = vpop.eup %10061 }
0x16a6   : > { %v3816_v37 = vsel %vm1507_vm15, %v10062_v9, 0.0 }
0x16a7   : > { %3817 = vadd.xlane.f32.xlu0 %v3816_v37  ;;  %v10064_v29 = vpop.eup %10063 }
0x16a8   : > { %v3819_v19 = vsel %vm1507_vm15, %v10064_v29, 0.0 }
0x16b4   : > { %3702 = vrot.lane.b32.xlu1 %v12119_v4, %s11042_s13 }
0x16bd   : > { %3577 = vrot.lane.b32.xlu0 %v12119_v4, %s11041_s8 }
0x16d8   : > { %3820 = vadd.xlane.f32.xlu1 %v3819_v19  ;;  %v9794_v19 = vld [vmem:[%s12869_s19 + $0x70] sm:$0xff]  }
0x16e9   : > { %3827 = vrot.lane.b32.xlu1 %v12119_v4, %s11043_s15 }
0x1724   : > { %v3567_v33 = vpop.xlane.xlu0 %3566 }
0x1726   : > { %v3570_v30 = vpop.xlane.xlu1 %3569 }
0x1727   : > { %10065 = vrcp.f32 %v3570_v30  ;;  %v9795_v30 = vld [vmem:[%s12869_s19 + $0x78] sm:$0xff]  }
0x1728   : > { %10067 = vrcp.f32 %v3567_v33 }
0x172c   : > { %v3693_v35 = vpop.xlane.xlu0 %3692 }
0x1730   : > { %v3696_v44 = vpop.xlane.xlu1 %3695 }
0x1731   : > { %10069 = vrcp.f32 %v3696_v44  ;;  %v10066_v31 = vpop.eup %10065 }
0x1732   : > { %10071 = vrcp.f32 %v3693_v35  ;;  %v10068_v34 = vpop.eup %10067  ;;  %v3574_v48 = vmul.f32 %v10066_v31, %v10056_v12 }
0x1733   : > { %v3573_v49 = vmul.f32 %v10068_v34, %v10054_v38 }
0x1734   : > { %v3818_v47 = vpop.xlane.xlu0 %3817  ;;  %v3703_v4 = vpop.permute.xlu1 %3702 }
0x1735   : > { %v3575_v53 = vpack.c.bf16 %v3574_v48, %v3573_v49  ;;  %10073 = vrcp.f32 %v3818_v47 }
0x1738   : > { %v3578_v50 = vpop.permute.xlu0 %3577 }
0x1739   : > { %8924 = vmatpush3.bf16.msra.mxu1 %v3578_v50 }
0x173a   : > { %8935 = vmatprep.subr.bf16.mxu1 %v11037_v0 }
0x173b   : > { %v10070_v54 = vpop.eup %10069 }
0x173c   : > { %8926 = vmatmul.mubr.msk.bf16.vlgmr.msra.gmra.mrb[68].mxu1 %vm1507_vm15, %v3575_v53  ;;  %v10072_v55 = vpop.eup %10071  ;;  %v3700_v56 = vmul.f32 %v10070_v54, %v10060_v22  ;;  %v9790_v22 = vld [vmem:[%s12869_s19 + $0x50] sm:$0xff]  }
0x173d   : > { %8936 = vmatpush3.bf16.msra.mxu1 %v3703_v4  ;;  %8937 = vmatprep.mubr.msk.bf16.mxu1 %vm11038_vm0, %v11037_v0  ;;  %v3699_v57 = vmul.f32 %v10072_v55, %v10058_v20  ;;  %v9789_v20 = vld [vmem:[%s12869_s19 + $0x48] sm:$0xff]  }
0x173e   : > { %8947 = vmatprep.subr.bf16.mxu1 %v11037_v0  ;;  %8956 = vmatpush3.bf16.msra.mxu0 %v9789_v20 }
0x173f   : > { %v3701_v59 = vpack.c.bf16 %v3700_v56, %v3699_v57  ;;  %v10074_v2 = vpop.eup %10073  ;;  %8957 = vmatprep.subr.bf16.mxu0 %v11037_v0 }
0x1740   : > { %v3824_v6 = vmul.f32 %v10074_v2, %v10062_v9 }
0x1742   : > { %8958 = vmatpush3.bf16.msra.mxu0 %v9790_v22 }
0x1743   : > { %8959 = vmatprep.subr.bf16.mxu0 %v11037_v0 }
0x1744   : > { %8938 = vmatmul.mubr.msk.bf16.vlgmr.msra.gmra.mrb[72].mxu1 %vm1507_vm15, %v3701_v59 }
0x1745   : > { %8949 = vmatprep.mubr.msk.bf16.mxu1 %vm11038_vm0, %v11037_v0 }
0x1746   : > { %8960 = vmatpush3.bf16.msra.mxu0 %v9791_v24 }
0x1747   : > { %8961 = vmatprep.subr.bf16.mxu0 %v11037_v0 }
0x174a   : > { %8962 = vmatpush3.bf16.msra.mxu0 %v9792_v16 }
0x174b   : > { %8963 = vmatprep.subr.bf16.mxu0 %v11037_v0 }
0x1765   : > { %v3821_v58 = vpop.xlane.xlu1 %3820 }
0x1766   : > { %10075 = vrcp.f32 %v3821_v58 }
0x1769   : > { %v3828_v60 = vpop.permute.xlu1 %3827 }
0x176a   : > { %8948 = vmatpush3.bf16.msra.mxu1 %v3828_v60 }
0x176b   : > { %8973 = vmatprep.subr.bf16.mxu1 %v11037_v0 }
0x1770   : > { %v10076_v3 = vpop.eup %10075 }
0x1771   : > { %v3825_v38 = vmul.f32 %v10076_v3, %v10064_v29  ;;  %v9793_v29 = vld [vmem:[%s12869_s19 + $0x68] sm:$0xff]  }
0x1772   : > { %8964 = vmatpush3.bf16.msra.mxu0 %v9793_v29 }
0x1773   : > { %v3826_v8 = vpack.c.bf16 %v3825_v38, %v3824_v6  ;;  %8965 = vmatprep.subr.bf16.mxu0 %v11037_v0  ;;  %v8129_v38 = vld [vmem:[#allocation19 + $0x1] ss:$0 sm:$0xff] }
0x1775   : > { %8950 = vmatmul.mubr.msk.bf16.vlgmr.msra.gmra.mrb[76].mxu1 %vm1507_vm15, %v3826_v8 }
0x1776   : > { %8975 = vmatprep.mubr.msk.bf16.mxu1 %vm11038_vm0, %v11037_v0  ;;  %8966 = vmatpush3.bf16.msra.mxu0 %v9794_v19 }
0x1777   : > { %8967 = vmatprep.subr.bf16.mxu0 %v11037_v0 }
0x177a   : > { %8968 = vmatpush3.bf16.msra.mxu0 %v9795_v30 }
0x177b   : > { %9011 = vmatprep.subr.bf16.mxu0 %v11037_v0 }
0x180f   : > { %v3617_v7 = vpop.f32.mrb[68].mxu1 }
0x1810   : > { %v8927_v25 = vpop.f32.mrb[69].mxu1 }
0x1811   : > { %v3620_v12 = vpop.f32.mrb[70].mxu1 }
0x1812   : > { %v9657_v40 = vpack.i.bf16 %v3620_v12, %v3617_v7  ;;  %v8928_v18 = vpop.f32.mrb[71].mxu1 }
0x1814   : > { %9658 = vrot.lane.b32.xlu1 %v9657_v40, %s11043_s15 }
0x1817   : > { %v3742_v21 = vpop.f32.mrb[72].mxu1 }
0x1818   : > { %v8939_v23 = vpop.f32.mrb[73].mxu1 }
0x1819   : > { %v3745_v9 = vpop.f32.mrb[74].mxu1 }
0x181a   : > { %v9662_v37 = vpack.i.bf16 %v3745_v9, %v3742_v21  ;;  %v8940_v10 = vpop.f32.mrb[75].mxu1 }
0x181c   : > { %9663 = vrot.lane.b32.xlu0 %v9662_v37, %s11042_s13 }
0x1848   : > { %v3867_v33 = vpop.f32.mrb[76].mxu1 }
0x1849   : > { %v8951_v35 = vpop.f32.mrb[77].mxu1 }
0x184a   : > { %v3870_v44 = vpop.f32.mrb[78].mxu1  ;;  %v8138_v35 = vld [vmem:[#allocation20 + $0x1] ss:$0 sm:$0xff] }
0x184b   : > { %v9667_v31 = vpack.i.bf16 %v3870_v44, %v3867_v33  ;;  %v8952_v47 = vpop.f32.mrb[79].mxu1 }
0x184d   : > { %9668 = vrot.lane.b32.xlu1 %v9667_v31, %s11041_s8 }
0x1886   : > { %v9659_v34 = vpop.permute.xlu1 %9658 }
0x1887   : > { %v9661_v49 = vunpack.i.h.bf16 %v9659_v34  ;;  %v9660_v50 = vunpack.i.l.bf16 %v9659_v34  ;;  %v8139_v34 = vld [vmem:[#allocation22 + $0x1] ss:$0 sm:$0xff] }
0x1889   : > { %v3899_v55 = vsel %vm1856_vm2, %v12160_v1, %v9661_v49  ;;  %v3898_v56 = vsel %vm1856_vm2, %v12158_v62, %v9660_v50 }
0x188e   : > { %v9664_v48 = vpop.permute.xlu0 %9663 }
0x188f   : > { %v9666_v53 = vunpack.i.h.bf16 %v9664_v48  ;;  %v9665_v54 = vunpack.i.l.bf16 %v9664_v48 }
0x1891   : > { %v3900_v58 = vsel %vm1336_vm1, %v3898_v56, %v9665_v54  ;;  %v3901_v60 = vsel %vm1336_vm1, %v3899_v55, %v9666_v53  ;;  %v10133_v54 = vld [vmem:[#allocation5] sm:$0xff]   ;;  %v10135_v55 = vld [vmem:[#allocation5 + $0x10] sm:$0xff]   ;;  %v10136_v56 = vld [vmem:[#allocation5 + $0x18] sm:$0xff]  }
0x18bf   : > { %v9669_v4 = vpop.permute.xlu1 %9668 }
0x18c0   : > { %v9671_v57 = vunpack.i.h.bf16 %v9669_v4  ;;  %v9670_v59 = vunpack.i.l.bf16 %v9669_v4  ;;  %v10134_v4 = vld [vmem:[#allocation5 + $0x8] sm:$0xff]  }
0x18c2   : > { %v3902_v2 = vsel %vm2382_vm5, %v3900_v58, %v9670_v59  ;;  %v3903_v3 = vsel %vm2382_vm5, %v3901_v60, %v9671_v57  ;;  %v10137_v57 = vld [vmem:[#allocation5 + $0x20] sm:$0xff]   ;;  %v10138_v59 = vld [vmem:[#allocation5 + $0x28] sm:$0xff]   ;;  %v10139_v58 = vld [vmem:[#allocation5 + $0x30] sm:$0xff]  }
0x18c3   : > { %v3921_v6 = vpack.c.bf16 %v3903_v3, %v3902_v2  ;;  %v10140_v60 = vld [vmem:[#allocation5 + $0x38] sm:$0xff]   ;;  %v10141_v2 = vld [vmem:[#allocation5 + $0x40] sm:$0xff]  }
0x18c5   : > { %8970 = vmatmul.mubr.bf16.vlgmr.msra.gmra.mrb[56].mxu0 %v3921_v6 }
0x18c6   : > { %9027 = vmatprep.mubr.msk.bf16.mxu0 %vm11038_vm0, %v11037_v0 }
0x1998   : > { %v4012_v1 = vpop.f32.mrb[56].mxu0 }
0x1999   : > { %v4013_v8 = vadd.f32 %v8129_v38, %v4012_v1  ;;  %v8971_v7 = vpop.f32.mrb[57].mxu0 }
0x199a   : > { %v4015_v62 = vpop.f32.mrb[58].mxu0 }
0x199b   : > { %v4016_v25 = vadd.f32 %v8129_v38, %v4015_v62  ;;  %v8972_v12 = vpop.f32.mrb[59].mxu0  ;;  %v4019_v13 = vadd.f32 %v4013_v8, %v12102_v36  ;;  %v8149_v38 = vld [vmem:[%s12870_s12 + $0x10] sm:$0xff] }
0x199c   : > { %v4175_v7 = vrot.slane %v8149_v38, %v11843_v42  ;;  %v4181_v62 = vrot.slane %v8149_v38, %v11846_v43 }
0x199d   : > { %4025 = vadd.xlane.f32.xlu0 %v4019_v13  ;;  %v4020_v40 = vadd.f32 %v4016_v25, %v12104_v39 }
0x199f   : > { %4027 = vadd.xlane.f32.xlu1 %v4020_v40 }
0x1a2a   : > { %v4026_v18 = vpop.xlane.xlu0 %4025 }
0x1a2b   : > { %v4029_v20 = vmul.f32 0.0078125, %v4026_v18 }
0x1a2c   : > { %v4028_v21 = vpop.xlane.xlu1 %4027 }
0x1a2d   : > { %v4031_v22 = vsub.f32 %v4019_v13, %v4029_v20  ;;  %v4030_v23 = vmul.f32 0.0078125, %v4028_v21 }
0x1a2f   : > { %v4032_v9 = vsub.f32 %v4020_v40, %v4030_v23  ;;  %v4033_v37 = vmul.f32 %v4031_v22, %v4031_v22 }
0x1a31   : > { %4035 = vadd.xlane.f32.xlu0 %v4033_v37  ;;  %v4034_v10 = vmul.f32 %v4032_v9, %v4032_v9  ;;  %v4189_v37 = vrot.slane %v8149_v38, %v11831_v28 }
0x1a35   : > { %4037 = vadd.xlane.f32.xlu0 %v4034_v10 }
0x1abe   : > { %v4036_v24 = vpop.xlane.xlu0 %4035 }
0x1abf   : > { %v4039_v16 = vmul.f32 0.0078125, %v4036_v24 }
0x1ac1   : > { %v4041_v29 = vadd.f32 1e-05, %v4039_v16 }
0x1ac2   : > { %v4038_v19 = vpop.xlane.xlu0 %4037 }
0x1ac3   : > { %10077 = vrsqrt.f32 %v4041_v29  ;;  %v4040_v36 = vmul.f32 0.0078125, %v4038_v19 }
0x1ac5   : > { %v4042_v30 = vadd.f32 1e-05, %v4040_v36 }
0x1ac7   : > { %10079 = vrsqrt.f32 %v4042_v30 }
0x1acd   : > { %v10078_v39 = vpop.eup %10077 }
0x1ace   : > { %v4045_v33 = vmul.f32 %v10078_v39, %v4031_v22 }
0x1ad0   : > { %v4053_v47 = vmul.f32 %v8138_v35, %v4045_v33  ;;  %v4197_v33 = vrot.slane %v8149_v38, %v12040_v52 }
0x1ad1   : > { %v10080_v44 = vpop.eup %10079 }
0x1ad2   : > { %v4046_v31 = vmul.f32 %v10080_v44, %v4032_v9  ;;  %v12229_v49 = vadd.f32 %v8139_v34, %v4053_v47 }
0x1ad4   : > { %v4054_v48 = vmul.f32 %v8138_v35, %v4046_v31 }
0x1ad6   : > { %v12231_v50 = vadd.f32 %v8139_v34, %v4054_v48 }
0x1ad8   : > { %v4063_v53 = vpack.c.bf16 %v12231_v50, %v12229_v49 }
0x1ada   : > { %8974 = vmatpush3.bf16.msra.mxu1 %v4063_v53 }
0x1adb   : > { %9031 = vmatprep.subr.bf16.mxu1 %v11037_v0 }
0x1add   : > { %8976 = vmatmul.mubr.msk.bf16.vlgmr.msra.gmra.mrb[80].mxu1 %vm1507_vm15, %v10133_v54 }
0x1ade   : > { %8979 = vmatprep.mubr.msk.bf16.mxu1 %vm11038_vm0, %v11037_v0 }
0x1ae5   : > { %8980 = vmatmul.mubr.msk.bf16.gmra.mrb[84].mxu1 %vm1507_vm15, %v10134_v4  ;;  %v4205_v4 = vrot.slane %v8149_v38, %v12045_v63 }
0x1ae6   : > { %8983 = vmatprep.mubr.msk.bf16.mxu1 %vm11038_vm0, %v11037_v0 }
0x1aed   : > { %8984 = vmatmul.mubr.msk.bf16.gmra.mrb[88].mxu1 %vm1507_vm15, %v10135_v55 }
0x1aee   : > { %8987 = vmatprep.mubr.msk.bf16.mxu1 %vm11038_vm0, %v11037_v0 }
0x1af5   : > { %8988 = vmatmul.mubr.msk.bf16.gmra.mrb[92].mxu1 %vm1507_vm15, %v10136_v56 }
0x1af6   : > { %8991 = vmatprep.mubr.msk.bf16.mxu1 %vm11038_vm0, %v11037_v0 }
0x1afd   : > { %8992 = vmatmul.mubr.msk.bf16.gmra.mrb[96].mxu1 %vm1507_vm15, %v10137_v57 }
0x1afe   : > { %8995 = vmatprep.mubr.msk.bf16.mxu1 %vm11038_vm0, %v11037_v0 }
0x1b05   : > { %8996 = vmatmul.mubr.msk.bf16.gmra.mrb[100].mxu1 %vm1507_vm15, %v10138_v59 }
0x1b06   : > { %8999 = vmatprep.mubr.msk.bf16.mxu1 %vm11038_vm0, %v11037_v0 }
0x1b0d   : > { %9000 = vmatmul.mubr.msk.bf16.gmra.mrb[104].mxu1 %vm1507_vm15, %v10139_v58 }
0x1b0e   : > { %9003 = vmatprep.mubr.msk.bf16.mxu1 %vm11038_vm0, %v11037_v0 }
0x1b15   : > { %9004 = vmatmul.mubr.msk.bf16.gmra.mrb[108].mxu1 %vm1507_vm15, %v10140_v60 }
0x1b16   : > { %9007 = vmatprep.mubr.msk.bf16.mxu1 %vm11038_vm0, %v11037_v0 }
0x1b1d   : > { %9008 = vmatmul.mubr.msk.bf16.gmra.mrb[112].mxu1 %vm1507_vm15, %v10141_v2 }
0x1b1e   : > { %9047 = vmatprep.mubr.msk.bf16.mxu1 %vm11038_vm0, %v11037_v0 }
0x1bb0   : > { %v4098_v3 = vpop.f32.mrb[80].mxu1 }
0x1bb1   : > { %v8977_v6 = vpop.f32.mrb[81].mxu1  ;;  %v4176_v12 = vmul.f32 %v4175_v7, %v4098_v3 }
0x1bb2   : > { %v4101_v1 = vpop.f32.mrb[82].mxu1  ;;  %v4213_v6 = vrot.slane %v8149_v38, %v12050_v14 }
0x1bb3   : > { %v8978_v8 = vpop.f32.mrb[83].mxu1  ;;  %v4177_v20 = vmul.f32 %v4175_v7, %v4101_v1 }
0x1bb8   : > { %v4106_v25 = vpop.f32.mrb[84].mxu1 }
0x1bb9   : > { %v4182_v13 = vmul.f32 %v4181_v62, %v4106_v25  ;;  %v8981_v40 = vpop.f32.mrb[85].mxu1 }
0x1bba   : > { %v4109_v18 = vpop.f32.mrb[86].mxu1 }
0x1bbb   : > { %v4184_v21 = vadd.f32 %v4182_v13, %v4176_v12  ;;  %v4183_v22 = vmul.f32 %v4181_v62, %v4109_v18  ;;  %v8982_v23 = vpop.f32.mrb[87].mxu1  ;;  %v4221_v18 = vrot.slane %v8149_v38, %v12055_v27 }
0x1bbd   : > { %v4185_v9 = vadd.f32 %v4183_v22, %v4177_v20 }
0x1bc0   : > { %v4114_v10 = vpop.f32.mrb[88].mxu1 }
0x1bc1   : > { %v4190_v24 = vmul.f32 %v4189_v37, %v4114_v10  ;;  %v8985_v16 = vpop.f32.mrb[89].mxu1 }
0x1bc2   : > { %v4117_v29 = vpop.f32.mrb[90].mxu1  ;;  %v4229_v16 = vrot.slane %v8149_v38, %v12060_v45 }
0x1bc3   : > { %v4192_v19 = vadd.f32 %v4190_v24, %v4184_v21  ;;  %v4191_v36 = vmul.f32 %v4189_v37, %v4117_v29  ;;  %v8986_v30 = vpop.f32.mrb[91].mxu1 }
0x1bc5   : > { %v4193_v39 = vadd.f32 %v4191_v36, %v4185_v9 }
0x1bc8   : > { %v4122_v35 = vpop.f32.mrb[92].mxu1 }
0x1bc9   : > { %v4198_v44 = vmul.f32 %v4197_v33, %v4122_v35  ;;  %v8989_v31 = vpop.f32.mrb[93].mxu1 }
0x1bca   : > { %v4125_v47 = vpop.f32.mrb[94].mxu1  ;;  %v8151_v31 = vld [vmem:[%s12870_s12 + $0x18] ss:$0 sm:$0xff] }
0x1bcb   : > { %v4200_v34 = vadd.f32 %v4198_v44, %v4192_v19  ;;  %v4199_v48 = vmul.f32 %v4197_v33, %v4125_v47  ;;  %v8990_v53 = vpop.f32.mrb[95].mxu1 }
0x1bcd   : > { %v4201_v54 = vadd.f32 %v4199_v48, %v4193_v39 }
0x1bd0   : > { %v4130_v55 = vpop.f32.mrb[96].mxu1 }
0x1bd1   : > { %v4206_v56 = vmul.f32 %v4205_v4, %v4130_v55  ;;  %v8993_v57 = vpop.f32.mrb[97].mxu1 }
0x1bd2   : > { %v4133_v59 = vpop.f32.mrb[98].mxu1 }
0x1bd3   : > { %v4208_v58 = vadd.f32 %v4206_v56, %v4200_v34  ;;  %v4207_v60 = vmul.f32 %v4205_v4, %v4133_v59  ;;  %v8994_v2 = vpop.f32.mrb[99].mxu1  ;;  %v8152_v56 = vld [vmem:[#allocation23 + $0x1] ss:$0 sm:$0xff] }
0x1bd4   : > { %v9796_v2 = vld [vmem:[%s12871_s7 + $0x40] sm:$0xff]  }
0x1bd5   : > { %v4209_v3 = vadd.f32 %v4207_v60, %v4201_v54  ;;  %9012 = vmatpush3.bf16.msra.mxu0 %v9796_v2 }
0x1bd6   : > { %9013 = vmatprep.subr.bf16.mxu0 %v11037_v0 }
0x1bd8   : > { %v4138_v1 = vpop.f32.mrb[100].mxu1 }
0x1bd9   : > { %v4214_v8 = vmul.f32 %v4213_v6, %v4138_v1  ;;  %v8997_v7 = vpop.f32.mrb[101].mxu1 }
0x1bda   : > { %v4141_v62 = vpop.f32.mrb[102].mxu1 }
0x1bdb   : > { %v4216_v25 = vadd.f32 %v4214_v8, %v4208_v58  ;;  %v4215_v12 = vmul.f32 %v4213_v6, %v4141_v62  ;;  %v8998_v13 = vpop.f32.mrb[103].mxu1 }
0x1bdc   : > { %v9799_v13 = vld [vmem:[%s12871_s7 + $0x58] sm:$0xff]  }
0x1bdd   : > { %v4217_v40 = vadd.f32 %v4215_v12, %v4209_v3  ;;  %v9797_v3 = vld [vmem:[%s12871_s7 + $0x48] sm:$0xff]   ;;  %v9798_v12 = vld [vmem:[%s12871_s7 + $0x50] sm:$0xff]  }
0x1bde   : > { %9014 = vmatpush3.bf16.msra.mxu0 %v9797_v3 }
0x1bdf   : > { %9015 = vmatprep.subr.bf16.mxu0 %v11037_v0 }
0x1be0   : > { %v4146_v20 = vpop.f32.mrb[104].mxu1 }
0x1be1   : > { %v4222_v21 = vmul.f32 %v4221_v18, %v4146_v20  ;;  %v9001_v22 = vpop.f32.mrb[105].mxu1  ;;  %v9802_v20 = vld [vmem:[%s12871_s7 + $0x70] sm:$0xff]  }
0x1be2   : > { %v4149_v23 = vpop.f32.mrb[106].mxu1  ;;  %9016 = vmatpush3.bf16.msra.mxu0 %v9798_v12  ;;  %v9804_v22 = vld [vmem:[#allocation29 + $0x40] sm:$0xff]  }
0x1be3   : > { %v4224_v9 = vadd.f32 %v4222_v21, %v4216_v25  ;;  %v4223_v37 = vmul.f32 %v4221_v18, %v4149_v23  ;;  %v9002_v10 = vpop.f32.mrb[107].mxu1  ;;  %9017 = vmatprep.subr.bf16.mxu0 %v11037_v0  ;;  %v9801_v18 = vld [vmem:[%s12871_s7 + $0x68] sm:$0xff]   ;;  %v9803_v21 = vld [vmem:[%s12871_s7 + $0x78] sm:$0xff]   ;;  %9032 = vmatpush3.bf16.msra.mxu1 %v9804_v22 }
0x1be4   : > { %v9805_v23 = vld [vmem:[#allocation29 + $0x48] sm:$0xff]   ;;  %9033 = vmatprep.subr.bf16.mxu1 %v11037_v0  ;;  %v9808_v10 = vld [vmem:[#allocation29 + $0x60] sm:$0xff]  }
0x1be5   : > { %v4225_v24 = vadd.f32 %v4223_v37, %v4217_v40  ;;  %v9800_v40 = vld [vmem:[%s12871_s7 + $0x60] sm:$0xff]   ;;  %v9814_v22 = vld [vmem:[#allocation16 + $0x184] ss:$12 sps:$4 sm:$0xff]  }
0x1be6   : > { %9018 = vmatpush3.bf16.msra.mxu0 %v9799_v13  ;;  %v9807_v37 = vld [vmem:[#allocation29 + $0x58] sm:$0xff]  }
0x1be7   : > { %9019 = vmatprep.subr.bf16.mxu0 %v11037_v0  ;;  %9034 = vmatpush3.bf16.msra.mxu1 %v9805_v23  ;;  %v9815_v23 = vld [vmem:[#allocation16 + $0x188] ss:$12 sps:$4 sm:$0xff]  }
0x1be8   : > { %v4154_v29 = vpop.f32.mrb[108].mxu1  ;;  %9035 = vmatprep.subr.bf16.mxu1 %v11037_v0 }
0x1be9   : > { %v4230_v19 = vmul.f32 %v4229_v16, %v4154_v29  ;;  %v9005_v36 = vpop.f32.mrb[109].mxu1 }
0x1bea   : > { %v4157_v30 = vpop.f32.mrb[110].mxu1  ;;  %9020 = vmatpush3.bf16.msra.mxu0 %v9800_v40 }
0x1beb   : > { %v4232_v39 = vadd.f32 %v4230_v19, %v4224_v9  ;;  %v4231_v33 = vmul.f32 %v4229_v16, %v4157_v30  ;;  %v9006_v35 = vpop.f32.mrb[111].mxu1  ;;  %9021 = vmatprep.subr.bf16.mxu0 %v11037_v0  ;;  %v9806_v9 = vld [vmem:[#allocation29 + $0x50] sm:$0xff]  }
0x1bec   : > { %9036 = vmatpush3.bf16.msra.mxu1 %v9806_v9  ;;  %v9810_v16 = vld [vmem:[#allocation29 + $0x70] sm:$0xff]  }
0x1bed   : > { %v4233_v44 = vadd.f32 %v4231_v33, %v4225_v24  ;;  %9037 = vmatprep.subr.bf16.mxu1 %v11037_v0  ;;  %v9809_v24 = vld [vmem:[#allocation29 + $0x68] sm:$0xff]   ;;  %v9818_v9 = vld [vmem:[#allocation16 + $0x19c] ss:$12 sps:$4 sm:$0xff]  }
0x1bee   : > { %9022 = vmatpush3.bf16.msra.mxu0 %v9801_v18 }
0x1bef   : > { %9023 = vmatprep.subr.bf16.mxu0 %v11037_v0 }
0x1bf0   : > { %v4162_v47 = vpop.f32.mrb[112].mxu1  ;;  %9038 = vmatpush3.bf16.msra.mxu1 %v9807_v37  ;;  %v9819_v37 = vld [vmem:[#allocation16 + $0x1a0] ss:$12 sps:$4 sm:$0xff]  }
0x1bf1   : > { %v4238_v34 = vmul.f32 %v8151_v31, %v4162_v47  ;;  %v9009_v48 = vpop.f32.mrb[113].mxu1  ;;  %9039 = vmatprep.subr.bf16.mxu1 %v11037_v0 }
0x1bf2   : > { %v4165_v53 = vpop.f32.mrb[114].mxu1  ;;  %9024 = vmatpush3.bf16.msra.mxu0 %v9802_v20 }
0x1bf3   : > { %v4240_v54 = vadd.f32 %v4238_v34, %v4232_v39  ;;  %v4239_v4 = vmul.f32 %v8151_v31, %v4165_v53  ;;  %v9010_v55 = vpop.f32.mrb[115].mxu1  ;;  %9025 = vmatprep.subr.bf16.mxu0 %v11037_v0  ;;  %v8154_v53 = vld [vmem:[#allocation26 + $0x1] ss:$0 sm:$0xff] }
0x1bf4   : > { %9040 = vmatpush3.bf16.msra.mxu1 %v9808_v10  ;;  %v9816_v10 = vld [vmem:[#allocation16 + $0x198] ss:$12 sps:$4 sm:$0xff]  }
0x1bf5   : > { %v4241_v38 = vadd.f32 %v4239_v4, %v4233_v44  ;;  %v4242_v57 = vadd.f32 %v4240_v54, %v12229_v49  ;;  %9041 = vmatprep.subr.bf16.mxu1 %v11037_v0  ;;  %v8153_v44 = vld [vmem:[#allocation25 + $0x1] ss:$0 sm:$0xff] }
0x1bf6   : > { %9026 = vmatpush3.bf16.msra.mxu0 %v9803_v21  ;;  %v9812_v21 = vld [vmem:[#allocation16 + $0x180] ss:$12 sps:$4 sm:$0xff]  }
0x1bf7   : > { %v4252_v59 = vadd.f32 %v8152_v56, %v4242_v57  ;;  %v4243_v58 = vadd.f32 %v4241_v38, %v12231_v50  ;;  %v9811_v38 = vld [vmem:[#allocation29 + $0x78] sm:$0xff]   ;;  %4752 = vmatprep.subr.bf16.mxu0 %v9814_v22 }
0x1bf8   : > { %9042 = vmatpush3.bf16.msra.mxu1 %v9809_v24  ;;  %v8171_v57 = vld [vmem:[#allocation28 + $0x1] ss:$0 sm:$0xff] }
0x1bf9   : > { %4258 = vadd.xlane.f32.xlu0 %v4252_v59  ;;  %v4253_v60 = vadd.f32 %v8152_v56, %v4243_v58  ;;  %9043 = vmatprep.subr.bf16.mxu1 %v11037_v0 }
0x1bfb   : > { %4260 = vadd.xlane.f32.xlu1 %v4253_v60 }
0x1bfc   : > { %9044 = vmatpush3.bf16.msra.mxu1 %v9810_v16 }
0x1bfd   : > { %9045 = vmatprep.subr.bf16.mxu1 %v11037_v0 }
0x1c00   : > { %9046 = vmatpush3.bf16.msra.mxu1 %v9811_v38  ;;  %v9835_v38 = vld [vmem:[#allocation16 + $0x200] ss:$12 sps:$4 sm:$0xff]  }
0x1c01   : > { %9051 = vmatprep.subr.bf16.mxu1 %v11037_v0 }
0x1c86   : > { %v4259_v6 = vpop.xlane.xlu0 %4258 }
0x1c87   : > { %v4262_v1 = vmul.f32 0.0078125, %v4259_v6 }
0x1c88   : > { %v4261_v49 = vpop.xlane.xlu1 %4260 }
0x1c89   : > { %v4264_v8 = vsub.f32 %v4252_v59, %v4262_v1  ;;  %v4263_v50 = vmul.f32 0.0078125, %v4261_v49 }
0x1c8b   : > { %v4265_v7 = vsub.f32 %v4253_v60, %v4263_v50  ;;  %v4266_v62 = vmul.f32 %v4264_v8, %v4264_v8  ;;  %v8180_v50 = vld [vmem:[#allocation31 + $0x1] ss:$0 sm:$0xff] }
0x1c8d   : > { %4268 = vadd.xlane.f32.xlu0 %v4266_v62  ;;  %v4267_v25 = vmul.f32 %v4265_v7, %v4265_v7 }
0x1c8f   : > { %4270 = vadd.xlane.f32.xlu1 %v4267_v25 }
0x1d1a   : > { %v4269_v29 = vpop.xlane.xlu0 %4268 }
0x1d1b   : > { %v4272_v19 = vmul.f32 0.0078125, %v4269_v29 }
0x1d1c   : > { %v4271_v36 = vpop.xlane.xlu1 %4270 }
0x1d1d   : > { %v4274_v30 = vadd.f32 1e-05, %v4272_v19  ;;  %v4273_v39 = vmul.f32 0.0078125, %v4271_v36 }
0x1d1f   : > { %10081 = vrsqrt.f32 %v4274_v30  ;;  %v4275_v33 = vadd.f32 1e-05, %v4273_v39 }
0x1d21   : > { %10083 = vrsqrt.f32 %v4275_v33 }
0x1d29   : > { %v10082_v35 = vpop.eup %10081 }
0x1d2a   : > { %v4278_v31 = vmul.f32 %v10082_v35, %v4264_v8  ;;  %v9822_v35 = vld [vmem:[#allocation16 + $0x1b4] ss:$12 sps:$4 sm:$0xff]  }
0x1d2b   : > { %v10084_v47 = vpop.eup %10083 }
0x1d2c   : > { %v4279_v34 = vmul.f32 %v10084_v47, %v4265_v7  ;;  %v4286_v48 = vmul.f32 %v8153_v44, %v4278_v31  ;;  %v9823_v31 = vld [vmem:[#allocation16 + $0x1b8] ss:$12 sps:$4 sm:$0xff]  }
0x1d2d   : > { %v9826_v47 = vld [vmem:[#allocation16 + $0x1cc] ss:$12 sps:$4 sm:$0xff]  }
0x1d2e   : > { %v4287_v54 = vmul.f32 %v8153_v44, %v4279_v34  ;;  %v4294_v4 = vadd.f32 %v8154_v53, %v4286_v48  ;;  %v9820_v44 = vld [vmem:[#allocation16 + $0x1b0] ss:$12 sps:$4 sm:$0xff]   ;;  %v9824_v34 = vld [vmem:[#allocation16 + $0x1c8] ss:$12 sps:$4 sm:$0xff]  }
0x1d2f   : > { %v9827_v48 = vld [vmem:[#allocation16 + $0x1d0] ss:$12 sps:$4 sm:$0xff]  }
0x1d30   : > { %v4295_v55 = vadd.f32 %v8154_v53, %v4287_v54  ;;  %v9830_v53 = vld [vmem:[#allocation16 + $0x1e4] ss:$12 sps:$4 sm:$0xff]   ;;  %v9828_v54 = vld [vmem:[#allocation16 + $0x1e0] ss:$12 sps:$4 sm:$0xff]  }
0x1d32   : > { %v4313_v56 = vpack.c.bf16 %v4295_v55, %v4294_v4 }
0x1d34   : > { %9028 = vmatmul.mubr.bf16.vlgmr.msra.gmra.mrb[60].mxu0 %v4313_v56  ;;  %v9832_v56 = vld [vmem:[#allocation16 + $0x1f8] ss:$12 sps:$4 sm:$0xff]  }
0x1d35   : > { %4784 = vmatprep.mubr.bf16.mxu0 %v11040_v15  ;;  %4753 = vmatpush1.bf16.msra.mxu0 %v9812_v21 }
0x1d36   : > { %4754 = vmatprep.subr.bf16.mxu0 %v9818_v9 }
0x1d39   : > { %4755 = vmatpush1.bf16.msra.mxu0 %v9816_v10 }
0x1d3a   : > { %4756 = vmatprep.subr.bf16.mxu0 %v9822_v35 }
0x1d3d   : > { %4757 = vmatpush1.bf16.msra.mxu0 %v9820_v44 }
0x1d3e   : > { %4758 = vmatprep.subr.bf16.mxu0 %v9826_v47 }
0x1d41   : > { %4759 = vmatpush1.bf16.msra.mxu0 %v9824_v34 }
0x1d42   : > { %4760 = vmatprep.subr.bf16.mxu0 %v9830_v53 }
0x1d45   : > { %4761 = vmatpush1.bf16.msra.mxu0 %v9828_v54 }
0x1e07   : > { %v4404_v59 = vpop.f32.mrb[60].mxu0 }
0x1e08   : > { %v4405_v58 = vadd.f32 %v8171_v57, %v4404_v59  ;;  %v9029_v60 = vpop.f32.mrb[61].mxu0  ;;  %v9838_v59 = vld [vmem:[#allocation16 + $0x214] ss:$12 sps:$4 sm:$0xff]  }
0x1e09   : > { %v4407_v2 = vpop.f32.mrb[62].mxu0  ;;  %v9842_v60 = vld [vmem:[#allocation16 + $0x22c] ss:$12 sps:$4 sm:$0xff]  }
0x1e0a   : > { %v4408_v3 = vadd.f32 %v8171_v57, %v4407_v2  ;;  %v9030_v6 = vpop.f32.mrb[63].mxu0  ;;  %v4411_v1 = vmax.f32 %v4405_v58, 0.0  ;;  %v9836_v57 = vld [vmem:[#allocation16 + $0x210] ss:$12 sps:$4 sm:$0xff]   ;;  %v9839_v58 = vld [vmem:[#allocation16 + $0x218] ss:$12 sps:$4 sm:$0xff]  }
0x1e0b   : > { %v9840_v2 = vld [vmem:[#allocation16 + $0x228] ss:$12 sps:$4 sm:$0xff]  }
0x1e0c   : > { %v4412_v49 = vmax.f32 %v4408_v3, 0.0  ;;  %v9843_v3 = vld [vmem:[#allocation16 + $0x230] ss:$12 sps:$4 sm:$0xff]  }
0x1e0e   : > { %v4430_v8 = vpack.c.bf16 %v4412_v49, %v4411_v1 }
0x1e10   : > { %9048 = vmatmul.mubr.bf16.vlgmr.msra.gmra.mrb[116].mxu1 %v4430_v8 }
0x1e11   : > { %9067 = vmatprep.mubr.msk.bf16.mxu1 %vm11038_vm0, %v11037_v0  ;;  %9052 = vmatpush3.bf16.msra.mxu1 %v9815_v23 }
0x1e12   : > { %9053 = vmatprep.subr.bf16.mxu1 %v11037_v0 }
0x1e15   : > { %9054 = vmatpush3.bf16.msra.mxu1 %v9819_v37  ;;  %v4607_v37 = vld [vmem:[#allocation17 + $0x6] sm:$0x7] }
0x1e16   : > { %9055 = vmatprep.subr.bf16.mxu1 %v11037_v0  ;;  %v4612_v10 = vrot.slane %v4607_v37, %v11843_v42 }
0x1e19   : > { %9056 = vmatpush3.bf16.msra.mxu1 %v9823_v31 }
0x1e1a   : > { %9057 = vmatprep.subr.bf16.mxu1 %v11037_v0 }
0x1e1d   : > { %9058 = vmatpush3.bf16.msra.mxu1 %v9827_v48 }
0x1e1e   : > { %9059 = vmatprep.subr.bf16.mxu1 %v11037_v0 }
0x1ee3   : > { %v4521_v7 = vpop.f32.mrb[116].mxu1 }
0x1ee4   : > { %v4522_v62 = vadd.f32 %v8180_v50, %v4521_v7  ;;  %v9049_v25 = vpop.f32.mrb[117].mxu1 }
0x1ee5   : > { %v4524_v12 = vpop.f32.mrb[118].mxu1  ;;  %v8189_v25 = vld [vmem:[#allocation32 + $0x1] ss:$0 sm:$0xff] }
0x1ee6   : > { %v4525_v13 = vadd.f32 %v8180_v50, %v4524_v12  ;;  %v9050_v40 = vpop.f32.mrb[119].mxu1  ;;  %v4528_v18 = vadd.f32 %v4522_v62, %v4294_v4  ;;  %v9831_v4 = vld [vmem:[#allocation16 + $0x1e8] ss:$12 sps:$4 sm:$0xff]  }
0x1ee7   : > { %9060 = vmatpush3.bf16.msra.mxu1 %v9831_v4 }
0x1ee8   : > { %4534 = vadd.xlane.f32.xlu0 %v4528_v18  ;;  %v4529_v20 = vadd.f32 %v4525_v13, %v4295_v55  ;;  %v9834_v55 = vld [vmem:[#allocation16 + $0x1fc] ss:$12 sps:$4 sm:$0xff]   ;;  %9061 = vmatprep.subr.bf16.mxu1 %v11037_v0 }
0x1ee9   : > { %4762 = vmatprep.subr.bf16.mxu0 %v9834_v55 }
0x1eea   : > { %4536 = vadd.xlane.f32.xlu1 %v4529_v20  ;;  %4763 = vmatpush1.bf16.msra.mxu0 %v9832_v56 }
0x1eeb   : > { %9062 = vmatpush3.bf16.msra.mxu1 %v9835_v38  ;;  %4764 = vmatprep.subr.bf16.mxu0 %v9838_v59 }
0x1eec   : > { %9063 = vmatprep.subr.bf16.mxu1 %v11037_v0 }
0x1eee   : > { %4765 = vmatpush1.bf16.msra.mxu0 %v9836_v57 }
0x1eef   : > { %9064 = vmatpush3.bf16.msra.mxu1 %v9839_v58  ;;  %4766 = vmatprep.subr.bf16.mxu0 %v9842_v60 }
0x1ef0   : > { %9065 = vmatprep.subr.bf16.mxu1 %v11037_v0 }
0x1ef2   : > { %4767 = vmatpush1.bf16.msra.mxu0 %v9840_v2 }
0x1ef3   : > { %9066 = vmatpush3.bf16.msra.mxu1 %v9843_v3  ;;  %9071 = vmatprep.subr.bf16.mxu0 %v11037_v0 }
0x1ef4   : > { %9089 = vmatprep.subr.bf16.mxu1 %v11037_v0 }
0x1f75   : > { %v4535_v24 = vpop.xlane.xlu0 %4534 }
0x1f76   : > { %v4538_v16 = vmul.f32 0.0078125, %v4535_v24  ;;  %v4620_v24 = vrot.slane %v4607_v37, %v11831_v28 }
0x1f77   : > { %v4537_v29 = vpop.xlane.xlu1 %4536 }
0x1f78   : > { %v4540_v19 = vsub.f32 %v4528_v18, %v4538_v16  ;;  %v4539_v36 = vmul.f32 0.0078125, %v4537_v29 }
0x1f7a   : > { %v4541_v30 = vsub.f32 %v4529_v20, %v4539_v36  ;;  %v4542_v39 = vmul.f32 %v4540_v19, %v4540_v19  ;;  %v8190_v20 = vld [vmem:[#allocation34 + $0x1] ss:$0 sm:$0xff] }
0x1f7c   : > { %4544 = vadd.xlane.f32.xlu0 %v4542_v39  ;;  %v4543_v33 = vmul.f32 %v4541_v30, %v4541_v30 }
0x1f7e   : > { %4546 = vadd.xlane.f32.xlu1 %v4543_v33 }
0x2009   : > { %v4545_v6 = vpop.xlane.xlu0 %4544 }
0x200a   : > { %v4548_v1 = vmul.f32 0.0078125, %v4545_v6 }
0x200b   : > { %v4547_v49 = vpop.xlane.xlu1 %4546 }
0x200c   : > { %v4550_v8 = vadd.f32 1e-05, %v4548_v1  ;;  %v4549_v50 = vmul.f32 0.0078125, %v4547_v49 }
0x200e   : > { %10085 = vrsqrt.f32 %v4550_v8  ;;  %v4551_v7 = vadd.f32 1e-05, %v4549_v50 }
0x2010   : > { %10087 = vrsqrt.f32 %v4551_v7 }
0x2018   : > { %v10086_v62 = vpop.eup %10085 }
0x2019   : > { %v4554_v12 = vmul.f32 %v10086_v62, %v4540_v19  ;;  %v4616_v19 = vrot.slane %v4607_v37, %v11846_v43 }
0x201a   : > { %v10088_v13 = vpop.eup %10087 }
0x201b   : > { %v4555_v40 = vmul.f32 %v10088_v13, %v4541_v30  ;;  %v4562_v18 = vmul.f32 %v8189_v25, %v4554_v12 }
0x201d   : > { %v4563_v21 = vmul.f32 %v8189_v25, %v4555_v40  ;;  %v12310_v22 = vadd.f32 %v8190_v20, %v4562_v18 }
0x201f   : > { %v12312_v23 = vadd.f32 %v8190_v20, %v4563_v21 }
0x2021   : > { %v12316_v9 = vpack.c.bf16 %v12312_v23, %v12310_v22 }
0x2023   : > { %4785 = vmatmul.mubr.bf16.vlgmr.msra.gmra.mrb[64].mxu0 %v12316_v9  ;;  %9068 = vmatmul.mubr.bf16.vlgmr.msra.gmra.mrb[120].mxu1 %v12316_v9 }
0x2024   : > { %9073 = vmatprep.mubr.msk.bf16.mxu0 %vm11038_vm0, %v11037_v0  ;;  %9091 = vmatprep.mubr.msk.bf16.mxu1 %vm11038_vm0, %v11037_v0 }
0x20f6   : > { %v4786_v16 = vpop.f32.mrb[64].mxu0  ;;  %v4829_v29 = vpop.f32.mrb[120].mxu1 }
0x20f7   : > { %v4788_v36 = vpop.f32.mrb[65].mxu0  ;;  %v9069_v30 = vpop.f32.mrb[121].mxu1  ;;  %v4787_v35 = vadd.f32 %v4786_v16, %v4612_v10  ;;  %v4830_v44 = vadd.f32 %v4829_v29, %v4620_v24 }
0x20f8   : > { %v4790_v39 = vpop.f32.mrb[66].mxu0  ;;  %v4832_v33 = vpop.f32.mrb[122].mxu1  ;;  %v4789_v53 = vadd.f32 %v4788_v36, %v4616_v19 }
0x20f9   : > { %v4791_v31 = vadd.f32 %v4790_v39, %v4612_v10  ;;  %v4833_v47 = vadd.f32 %v4832_v33, %v4620_v24  ;;  %v4792_v34 = vpop.f32.mrb[67].mxu0  ;;  %v9070_v48 = vpop.f32.mrb[123].mxu1 }
0x20fa   : > { %v4793_v54 = vadd.f32 %v4792_v34, %v4616_v19 }
0x20fb   : > { %v4836_v4 = vpack.c.bf16 %v4791_v31, %v4787_v35  ;;  %v12327_v55 = vpack.c.bf16 %v4833_v47, %v4830_v44 }
0x20fc   : > { %v4837_v56 = vpack.c.bf16 %v4793_v54, %v4789_v53 }
0x20fe   : > { %v4842_v38 = vsel %vm1856_vm2, %v4837_v56, 0 }
0x20ff   : > { %9072 = vmatpush3.bf16.xpose.msra.mxu0 %v4842_v38 }
0x2100   : > { %9077 = vmatprep.subr.bf16.mxu0 %v11037_v0 }
0x2106   : > { %9074 = vmatmul.mubr.msk.bf16.vlgmr.msra.gmra.mrb[68].mxu0 %vm1856_vm2, %v4836_v4 }
0x2107   : > { %9078 = vmatpush3.bf16.msra.mxu0 %v12327_v55  ;;  %9079 = vmatprep.mubr.msk.bf16.mxu0 %vm11038_vm0, %v11037_v0 }
0x2108   : > { %9083 = vmatprep.subr.bf16.mxu0 %v11037_v0 }
0x21d9   : > { %v4878_v57 = vpop.f32.mrb[68].mxu0 }
0x21da   : > { %v4885_v59 = vmul.f32 0.17677669, %v4878_v57  ;;  %v9075_v58 = vpop.f32.mrb[69].mxu0 }
0x21db   : > { %v4881_v60 = vpop.f32.mrb[70].mxu0 }
0x21dc   : > { %v4886_v2 = vmul.f32 0.17677669, %v4881_v60  ;;  %v9076_v3 = vpop.f32.mrb[71].mxu0  ;;  %v4887_v6 = vadd.f32 %v4885_v59, %v11882_v11 }
0x21de   : > { %v4889_v1 = vsel %vm1507_vm15, %v4887_v6, -inf  ;;  %v4888_v49 = vadd.f32 %v4886_v2, %v11887_v17 }
0x21df   : > { %4890 = vmax.xlane.f32.xlu0 %v4889_v1 }
0x21e0   : > { %v4892_v8 = vsel %vm1507_vm15, %v4888_v49, -inf }
0x21e1   : > { %4893 = vmax.xlane.f32.xlu1 %v4892_v8 }
0x226c   : > { %v4891_v50 = vpop.xlane.xlu0 %4890 }
0x226d   : > { %v4895_v7 = vsub.f32 %v4887_v6, %v4891_v50 }
0x226e   : > { %v4894_v62 = vpop.xlane.xlu1 %4893 }
0x226f   : > { %v4897_v25 = vmul.f32 1.442695, %v4895_v7  ;;  %v4896_v12 = vsub.f32 %v4888_v49, %v4894_v62 }
0x2271   : > { %10089 = vpow2.f32 %v4897_v25  ;;  %v4899_v13 = vmul.f32 1.442695, %v4896_v12 }
0x2273   : > { %10091 = vpow2.f32 %v4899_v13 }
0x227b   : > { %v10090_v40 = vpop.eup %10089 }
0x227c   : > { %v4901_v18 = vsel %vm1507_vm15, %v10090_v40, 0.0 }
0x227d   : > { %v10092_v11 = vpop.eup %10091  ;;  %4902 = vadd.xlane.f32.xlu0 %v4901_v18 }
0x227e   : > { %v4904_v20 = vsel %vm1507_vm15, %v10092_v11, 0.0 }
0x227f   : > { %4905 = vadd.xlane.f32.xlu1 %v4904_v20 }
0x2290   : > { %4958 = vrot.lane.b32.xlu1 %v4836_v4, %s11041_s8 }
0x2293   : > { %4961 = vrot.lane.b32.xlu0 %v4837_v56, %s11041_s8 }
0x2294   : > { %5087 = vrot.lane.b32.xlu1 %v4837_v56, %s11042_s13 }
0x2297   : > { %5212 = vrot.lane.b32.xlu0 %v4837_v56, %s11043_s15 }
0x2298   : > { %5085 = vrot.lane.b32.xlu1 %v4836_v4, %s11042_s13 }
0x229c   : > { %5210 = vrot.lane.b32.xlu1 %v4836_v4, %s11043_s15 }
0x230a   : > { %v4903_v17 = vpop.xlane.xlu0 %4902 }
0x230b   : > { %10093 = vrcp.f32 %v4903_v17 }
0x230c   : > { %v4906_v21 = vpop.xlane.xlu1 %4905 }
0x230d   : > { %10095 = vrcp.f32 %v4906_v21 }
0x230e   : > { %v4962_v29 = vpop.permute.xlu0 %4961 }
0x230f   : > { %v4967_v30 = vsel %vm1856_vm2, %v4962_v29, 0 }
0x2310   : > { %v4959_v36 = vpop.permute.xlu1 %4958 }
0x2312   : > { %v5213_v35 = vpop.permute.xlu0 %5212 }
0x2313   : > { %v5218_v31 = vsel %vm1856_vm2, %v5213_v35, 0 }
0x2314   : > { %v5088_v39 = vpop.permute.xlu1 %5087 }
0x2315   : > { %v10094_v37 = vpop.eup %10093  ;;  %v5093_v33 = vsel %vm1856_vm2, %v5088_v39, 0 }
0x2316   : > { %v4909_v24 = vmul.f32 %v10094_v37, %v10090_v40 }
0x2317   : > { %v10096_v10 = vpop.eup %10095 }
0x2318   : > { %v4910_v16 = vmul.f32 %v10096_v10, %v10092_v11  ;;  %v5086_v44 = vpop.permute.xlu1 %5085 }
0x231a   : > { %v4911_v19 = vpack.c.bf16 %v4910_v16, %v4909_v24 }
0x231c   : > { %9080 = vmatmul.mubr.msk.bf16.vlgmr.msra.gmra.mrb[72].mxu0 %vm1507_vm15, %v4911_v19  ;;  %v5211_v47 = vpop.permute.xlu1 %5210 }
0x231d   : > { %9084 = vmatpush3.bf16.xpose.msra.mxu0 %v4967_v30  ;;  %9085 = vmatprep.mubr.msk.bf16.mxu0 %vm11038_vm0, %v11037_v0 }
0x231e   : > { %9095 = vmatprep.subr.bf16.mxu0 %v11037_v0 }
0x2324   : > { %9086 = vmatmul.mubr.msk.bf16.vlgmr.msra.gmra.mrb[76].mxu0 %vm1856_vm2, %v4959_v36 }
0x2325   : > { %9096 = vmatpush3.bf16.xpose.msra.mxu0 %v5093_v33  ;;  %9097 = vmatprep.mubr.msk.bf16.mxu0 %vm11038_vm0, %v11037_v0 }
0x2326   : > { %9107 = vmatprep.subr.bf16.mxu0 %v11037_v0 }
0x232c   : > { %9098 = vmatmul.mubr.msk.bf16.vlgmr.msra.gmra.mrb[80].mxu0 %vm1856_vm2, %v5086_v44 }
0x232d   : > { %9108 = vmatpush3.bf16.xpose.msra.mxu0 %v5218_v31  ;;  %9109 = vmatprep.mubr.msk.bf16.mxu0 %vm11038_vm0, %v11037_v0 }
0x232e   : > { %9119 = vmatprep.subr.bf16.mxu0 %v11037_v0 }
0x2334   : > { %9110 = vmatmul.mubr.msk.bf16.vlgmr.msra.gmra.mrb[84].mxu0 %vm1856_vm2, %v5211_v47 }
0x2335   : > { %9135 = vmatprep.mubr.msk.bf16.mxu0 %vm11038_vm0, %v11037_v0 }
0x23ef   : > { %v12366_v34 = vpop.f32.mrb[72].mxu0 }
0x23f0   : > { %v9081_v48 = vpop.f32.mrb[73].mxu0 }
0x23f1   : > { %v12368_v53 = vpop.f32.mrb[74].mxu0 }
0x23f2   : > { %v9082_v54 = vpop.f32.mrb[75].mxu0 }
0x23f7   : > { %v5003_v4 = vpop.f32.mrb[76].mxu0 }
0x23f8   : > { %v5010_v56 = vmul.f32 0.17677669, %v5003_v4  ;;  %v9087_v38 = vpop.f32.mrb[77].mxu0 }
0x23f9   : > { %v5006_v57 = vpop.f32.mrb[78].mxu0 }
0x23fa   : > { %v5011_v59 = vmul.f32 0.17677669, %v5006_v57  ;;  %v9088_v58 = vpop.f32.mrb[79].mxu0  ;;  %v5012_v60 = vadd.f32 %v5010_v56, %v11896_v26 }
0x23fc   : > { %v5013_v2 = vadd.f32 %v5011_v59, %v11901_v32  ;;  %v5014_v3 = vsel %vm1507_vm15, %v5012_v60, -inf }
0x23fd   : > { %5015 = vmax.xlane.f32.xlu0 %v5014_v3 }
0x23fe   : > { %v5017_v6 = vsel %vm1507_vm15, %v5013_v2, -inf }
0x23ff   : > { %5018 = vmax.xlane.f32.xlu1 %v5017_v6  ;;  %v5129_v1 = vpop.f32.mrb[80].mxu0 }
0x2400   : > { %v5136_v49 = vmul.f32 0.17677669, %v5129_v1  ;;  %v9099_v8 = vpop.f32.mrb[81].mxu0 }
0x2401   : > { %v5132_v50 = vpop.f32.mrb[82].mxu0 }
0x2402   : > { %v5138_v7 = vadd.f32 %v5136_v49, %v11910_v46  ;;  %v5137_v62 = vmul.f32 0.17677669, %v5132_v50  ;;  %v9100_v25 = vpop.f32.mrb[83].mxu0 }
0x2404   : > { %v5139_v12 = vadd.f32 %v5137_v62, %v11915_v51  ;;  %v5140_v26 = vsel %vm1507_vm15, %v5138_v7, -inf }
0x2405   : > { %5141 = vmax.xlane.f32.xlu0 %v5140_v26 }
0x2406   : > { %v5143_v18 = vsel %vm1507_vm15, %v5139_v12, -inf }
0x2407   : > { %v5254_v32 = vpop.f32.mrb[84].mxu0 }
0x2408   : > { %v5261_v13 = vmul.f32 0.17677669, %v5254_v32  ;;  %v9111_v40 = vpop.f32.mrb[85].mxu0 }
0x2409   : > { %5144 = vmax.xlane.f32.xlu0 %v5143_v18  ;;  %v5257_v11 = vpop.f32.mrb[86].mxu0 }
0x240a   : > { %v5263_v20 = vadd.f32 %v5261_v13, %v11924_v61  ;;  %v5262_v17 = vmul.f32 0.17677669, %v5257_v11  ;;  %v9112_v21 = vpop.f32.mrb[87].mxu0 }
0x240c   : > { %v5264_v46 = vadd.f32 %v5262_v17, %v11929_v5  ;;  %v5265_v37 = vsel %vm1507_vm15, %v5263_v20, -inf }
0x240d   : > { %5266 = vmax.xlane.f32.xlu0 %v5265_v37 }
0x240e   : > { %v5268_v51 = vsel %vm1507_vm15, %v5264_v46, -inf }
0x240f   : > { %5269 = vmax.xlane.f32.xlu1 %v5268_v51 }
0x248a   : > { %v5016_v10 = vpop.xlane.xlu0 %5015 }
0x248b   : > { %v5020_v24 = vsub.f32 %v5012_v60, %v5016_v10 }
0x248c   : > { %v5019_v16 = vpop.xlane.xlu1 %5018 }
0x248d   : > { %v5022_v29 = vmul.f32 1.442695, %v5020_v24  ;;  %v5021_v19 = vsub.f32 %v5013_v2, %v5019_v16 }
0x248f   : > { %10097 = vpow2.f32 %v5022_v29  ;;  %v5024_v36 = vmul.f32 1.442695, %v5021_v19 }
0x2491   : > { %10099 = vpow2.f32 %v5024_v36 }
0x2492   : > { %v5142_v30 = vpop.xlane.xlu0 %5141 }
0x2493   : > { %v5146_v61 = vsub.f32 %v5138_v7, %v5142_v30 }
0x2495   : > { %v5148_v39 = vmul.f32 1.442695, %v5146_v61 }
0x2496   : > { %v5145_v33 = vpop.xlane.xlu0 %5144 }
0x2497   : > { %10101 = vpow2.f32 %v5148_v39  ;;  %v5147_v5 = vsub.f32 %v5139_v12, %v5145_v33  ;;  %v9844_v33 = vld [vmem:[%s12869_s19 + $0x80] sm:$0xff]  }
0x2498   : > { %9120 = vmatpush3.bf16.msra.mxu0 %v9844_v33 }
0x2499   : > { %v10098_v35 = vpop.eup %10097  ;;  %v5150_v44 = vmul.f32 1.442695, %v5147_v5  ;;  %9121 = vmatprep.subr.bf16.mxu0 %v11037_v0 }
0x249a   : > { %v5267_v31 = vpop.xlane.xlu0 %5266  ;;  %v5026_v47 = vsel %vm1507_vm15, %v10098_v35, 0.0 }
0x249b   : > { %v10100_v48 = vpop.eup %10099  ;;  %10103 = vpow2.f32 %v5150_v44  ;;  %v5271_v54 = vsub.f32 %v5263_v20, %v5267_v31  ;;  %5027 = vadd.xlane.f32.xlu0 %v5026_v47  ;;  %v9845_v44 = vld [vmem:[%s12869_s19 + $0x88] sm:$0xff]   ;;  %v9846_v47 = vld [vmem:[%s12869_s19 + $0x90] sm:$0xff]  }
0x249c   : > { %v5029_v4 = vsel %vm1507_vm15, %v10100_v48, 0.0  ;;  %v5270_v3 = vpop.xlane.xlu1 %5269  ;;  %9122 = vmatpush3.bf16.msra.mxu0 %v9845_v44 }
0x249d   : > { %v5273_v56 = vmul.f32 1.442695, %v5271_v54  ;;  %5030 = vadd.xlane.f32.xlu1 %v5029_v4  ;;  %v5272_v6 = vsub.f32 %v5264_v46, %v5270_v3  ;;  %9123 = vmatprep.subr.bf16.mxu0 %v11037_v0 }
0x249f   : > { %10105 = vpow2.f32 %v5273_v56  ;;  %v5275_v1 = vmul.f32 1.442695, %v5272_v6 }
0x24a0   : > { %9124 = vmatpush3.bf16.msra.mxu0 %v9846_v47 }
0x24a1   : > { %v10102_v38 = vpop.eup %10101  ;;  %10107 = vpow2.f32 %v5275_v1  ;;  %9125 = vmatprep.subr.bf16.mxu0 %v11037_v0 }
0x24a2   : > { %v5152_v57 = vsel %vm1507_vm15, %v10102_v38, 0.0 }
0x24a3   : > { %5153 = vadd.xlane.f32.xlu0 %v5152_v57  ;;  %v9848_v57 = vld [vmem:[%s12869_s19 + $0xa0] sm:$0xff]  }
0x24a5   : > { %v10104_v59 = vpop.eup %10103 }
0x24a6   : > { %v5155_v58 = vsel %vm1507_vm15, %v10104_v59, 0.0 }
0x24a7   : > { %5156 = vadd.xlane.f32.xlu1 %v5155_v58  ;;  %v9850_v58 = vld [vmem:[%s12869_s19 + $0xb0] sm:$0xff]  }
0x24a9   : > { %v10106_v60 = vpop.eup %10105 }
0x24aa   : > { %v5277_v2 = vsel %vm1507_vm15, %v10106_v60, 0.0 }
0x24ab   : > { %5278 = vadd.xlane.f32.xlu0 %v5277_v2  ;;  %v10108_v49 = vpop.eup %10107 }
0x24ac   : > { %v5280_v8 = vsel %vm1507_vm15, %v10108_v49, 0.0 }
0x24b8   : > { %5163 = vrot.lane.b32.xlu1 %v12327_v55, %s11042_s13 }
0x24c1   : > { %5038 = vrot.lane.b32.xlu0 %v12327_v55, %s11041_s8 }
0x24dc   : > { %5281 = vadd.xlane.f32.xlu1 %v5280_v8 }
0x24ed   : > { %5288 = vrot.lane.b32.xlu1 %v12327_v55, %s11043_s15 }
0x2528   : > { %v5028_v7 = vpop.xlane.xlu0 %5027 }
0x252a   : > { %v5031_v50 = vpop.xlane.xlu1 %5030 }
0x252b   : > { %10109 = vrcp.f32 %v5031_v50 }
0x252c   : > { %10111 = vrcp.f32 %v5028_v7 }
0x2530   : > { %v5154_v62 = vpop.xlane.xlu0 %5153 }
0x2534   : > { %v5157_v25 = vpop.xlane.xlu1 %5156 }
0x2535   : > { %10113 = vrcp.f32 %v5157_v25  ;;  %v10110_v12 = vpop.eup %10109 }
0x2536   : > { %10115 = vrcp.f32 %v5154_v62  ;;  %v10112_v32 = vpop.eup %10111  ;;  %v5035_v13 = vmul.f32 %v10110_v12, %v10100_v48 }
0x2537   : > { %v5034_v40 = vmul.f32 %v10112_v32, %v10098_v35 }
0x2538   : > { %v5279_v26 = vpop.xlane.xlu0 %5278  ;;  %v5164_v55 = vpop.permute.xlu1 %5163 }
0x2539   : > { %v5036_v11 = vpack.c.bf16 %v5035_v13, %v5034_v40  ;;  %10117 = vrcp.f32 %v5279_v26 }
0x253c   : > { %v5039_v18 = vpop.permute.xlu0 %5038 }
0x253d   : > { %9090 = vmatpush3.bf16.msra.mxu1 %v5039_v18 }
0x253e   : > { %9101 = vmatprep.subr.bf16.mxu1 %v11037_v0 }
0x253f   : > { %v10114_v20 = vpop.eup %10113 }
0x2540   : > { %9092 = vmatmul.mubr.msk.bf16.vlgmr.msra.gmra.mrb[124].mxu1 %vm1507_vm15, %v5036_v11  ;;  %v10116_v17 = vpop.eup %10115  ;;  %v5161_v21 = vmul.f32 %v10114_v20, %v10104_v59  ;;  %v9849_v59 = vld [vmem:[%s12869_s19 + $0xa8] sm:$0xff]  }
0x2541   : > { %9102 = vmatpush3.bf16.msra.mxu1 %v5164_v55  ;;  %9103 = vmatprep.mubr.msk.bf16.mxu1 %vm11038_vm0, %v11037_v0  ;;  %v5160_v46 = vmul.f32 %v10116_v17, %v10102_v38  ;;  %v9847_v38 = vld [vmem:[%s12869_s19 + $0x98] sm:$0xff]  }
0x2542   : > { %9113 = vmatprep.subr.bf16.mxu1 %v11037_v0  ;;  %9126 = vmatpush3.bf16.msra.mxu0 %v9847_v38 }
0x2543   : > { %v5162_v37 = vpack.c.bf16 %v5161_v21, %v5160_v46  ;;  %v10118_v24 = vpop.eup %10117  ;;  %9127 = vmatprep.subr.bf16.mxu0 %v11037_v0  ;;  %v9852_v21 = vld [vmem:[%s12871_s7 + $0x80] sm:$0xff]  }
0x2544   : > { %v5285_v29 = vmul.f32 %v10118_v24, %v10106_v60  ;;  %v9851_v60 = vld [vmem:[%s12869_s19 + $0xb8] sm:$0xff]   ;;  %v9858_v24 = vld [vmem:[%s12871_s7 + $0xb0] sm:$0xff]  }
0x2546   : > { %9128 = vmatpush3.bf16.msra.mxu0 %v9848_v57 }
0x2547   : > { %9129 = vmatprep.subr.bf16.mxu0 %v11037_v0 }
0x2548   : > { %9104 = vmatmul.mubr.msk.bf16.vlgmr.msra.gmra.mrb[128].mxu1 %vm1507_vm15, %v5162_v37  ;;  %v9855_v37 = vld [vmem:[%s12871_s7 + $0x98] sm:$0xff]  }
0x2549   : > { %9115 = vmatprep.mubr.msk.bf16.mxu1 %vm11038_vm0, %v11037_v0 }
0x254a   : > { %9130 = vmatpush3.bf16.msra.mxu0 %v9849_v59 }
0x254b   : > { %9131 = vmatprep.subr.bf16.mxu0 %v11037_v0 }
0x254e   : > { %9132 = vmatpush3.bf16.msra.mxu0 %v9850_v58 }
0x254f   : > { %9133 = vmatprep.subr.bf16.mxu0 %v11037_v0 }
0x2552   : > { %9134 = vmatpush3.bf16.msra.mxu0 %v9851_v60 }
0x2553   : > { %9177 = vmatprep.subr.bf16.mxu0 %v11037_v0 }
0x2569   : > { %v5282_v51 = vpop.xlane.xlu1 %5281 }
0x256a   : > { %10119 = vrcp.f32 %v5282_v51  ;;  %v9856_v51 = vld [vmem:[%s12871_s7 + $0xa0] sm:$0xff]  }
0x256d   : > { %v5289_v10 = vpop.permute.xlu1 %5288 }
0x256e   : > { %9114 = vmatpush3.bf16.msra.mxu1 %v5289_v10  ;;  %v9857_v10 = vld [vmem:[%s12871_s7 + $0xa8] sm:$0xff]  }
0x256f   : > { %9139 = vmatprep.subr.bf16.mxu1 %v11037_v0 }
0x2574   : > { %v10120_v16 = vpop.eup %10119 }
0x2575   : > { %v5286_v19 = vmul.f32 %v10120_v16, %v10108_v49  ;;  %v9859_v16 = vld [vmem:[%s12871_s7 + $0xb8] sm:$0xff]  }
0x2577   : > { %v5287_v36 = vpack.c.bf16 %v5286_v19, %v5285_v29  ;;  %v8239_v29 = vld [vmem:[#allocation19 + $0x2] ss:$0 sm:$0xff] }
0x2579   : > { %9116 = vmatmul.mubr.msk.bf16.vlgmr.msra.gmra.mrb[132].mxu1 %vm1507_vm15, %v5287_v36 }
0x257a   : > { %9141 = vmatprep.mubr.msk.bf16.mxu1 %vm11038_vm0, %v11037_v0 }
0x2613   : > { %v5078_v30 = vpop.f32.mrb[124].mxu1 }
0x2614   : > { %v9093_v61 = vpop.f32.mrb[125].mxu1 }
0x2615   : > { %v5081_v39 = vpop.f32.mrb[126].mxu1 }
0x2616   : > { %v9672_v5 = vpack.i.bf16 %v5081_v39, %v5078_v30  ;;  %v9094_v35 = vpop.f32.mrb[127].mxu1 }
0x2618   : > { %9673 = vrot.lane.b32.xlu1 %v9672_v5, %s11043_s15  ;;  %s12690_s15 = scalar_lea.hbm %s12872_s3, %s8435_s1 }
0x261b   : > { %v5203_v31 = vpop.f32.mrb[128].mxu1 }
0x261c   : > { %v9105_v48 = vpop.f32.mrb[129].mxu1 }
0x261d   : > { %v5206_v54 = vpop.f32.mrb[130].mxu1 }
0x261e   : > { %v9677_v4 = vpack.i.bf16 %v5206_v54, %v5203_v31  ;;  %v9106_v56 = vpop.f32.mrb[131].mxu1 }
0x2620   : > { %9678 = vrot.lane.b32.xlu0 %v9677_v4, %s11042_s13 }
0x264c   : > { %v5328_v2 = vpop.f32.mrb[132].mxu1 }
0x264d   : > { %v9117_v3 = vpop.f32.mrb[133].mxu1 }
0x264e   : > { %v5331_v6 = vpop.f32.mrb[134].mxu1  ;;  %v8248_v3 = vld [vmem:[#allocation20 + $0x2] ss:$0 sm:$0xff] }
0x264f   : > { %v9682_v1 = vpack.i.bf16 %v5331_v6, %v5328_v2  ;;  %v9118_v49 = vpop.f32.mrb[135].mxu1 }
0x2651   : > { %9683 = vrot.lane.b32.xlu1 %v9682_v1, %s11041_s8  ;;  %s1315_s8 = scalar_lea.vmem [#allocation41], %s7942_s30  ;;  %s10857_s30 = sshll.u32 %s11044_s2, 4  ;;  %s10858_s30 = int_to_ptr.vmem [resolvable:$false] %s10857_s30 }
0x2652   : > { %s7551_s13 = sshll.u32 %s1315_s8, 4  ;;  %s10859_s1 = scalar_lea.vmem %s10858_s30, 512  ;;  %s12692_s13 = int_to_ptr.vmem [resolvable:$true] %s7551_s13 }
0x2653   : > { %s10853_s9 = scalar_lea.vmem %s12692_s13, 256  ;;  %p10860_p2 = scmp.lt.s32.totalorder %s12692_s13, %s10858_s30 }
0x2654   : > { %p10854_p9 = scmp.ne.s32.totalorder %s12692_s13, %s10853_s9  ;;  %p10861_p8 = scmp.lt.s32.totalorder %s10859_s1, %s10853_s9 }
0x2656   : > { %p10855_p6 = pnand %p10854_p9, %p12873_p0  ;;  %p10862_p4 = por %p10861_p8, %p10860_p2 }
0x2658   : > { %p10856_p13 = pneg %p10855_p6 }
0x265a   : > { %p10863_p10 = pnand %p10862_p4, %p10856_p13 }
0x268a   : > { %v9674_v8 = vpop.permute.xlu1 %9673 }
0x268b   : > { %v9676_v7 = vunpack.i.h.bf16 %v9674_v8  ;;  %v9675_v62 = vunpack.i.l.bf16 %v9674_v8  ;;  %v8249_v8 = vld [vmem:[#allocation22 + $0x2] ss:$0 sm:$0xff] }
0x268d   : > { %v5360_v32 = vsel %vm1856_vm2, %v12368_v53, %v9676_v7  ;;  %v5359_v13 = vsel %vm1856_vm2, %v12366_v34, %v9675_v62  ;;  %v9853_v53 = vld [vmem:[%s12871_s7 + $0x88] sm:$0xff]   ;;  %v9854_v34 = vld [vmem:[%s12871_s7 + $0x90] sm:$0xff]   ;;  %s7533_s7 = scalar_lea.sflag [#allocation4], %s11693_s28 }
0x2692   : > { %v9679_v50 = vpop.permute.xlu0 %9678 }
0x2693   : > { %v9681_v25 = vunpack.i.h.bf16 %v9679_v50  ;;  %v9680_v12 = vunpack.i.l.bf16 %v9679_v50 }
0x2695   : > { %v5361_v11 = vsel %vm1336_vm1, %v5359_v13, %v9680_v12  ;;  %v5362_v20 = vsel %vm1336_vm1, %v5360_v32, %v9681_v25  ;;  %v10142_v12 = vld [vmem:[#allocation5] sm:$0xff]   ;;  %v10144_v32 = vld [vmem:[#allocation5 + $0x10] sm:$0xff]   ;;  %v10145_v13 = vld [vmem:[#allocation5 + $0x18] sm:$0xff]  }
0x26c3   : > { %v9684_v26 = vpop.permute.xlu1 %9683 }
0x26c4   : > { %v9686_v40 = vunpack.i.h.bf16 %v9684_v26  ;;  %v9685_v18 = vunpack.i.l.bf16 %v9684_v26  ;;  %v10143_v26 = vld [vmem:[#allocation5 + $0x8] sm:$0xff]  }
0x26c6   : > { %v5363_v55 = vsel %vm2382_vm5, %v5361_v11, %v9685_v18  ;;  %v5364_v17 = vsel %vm2382_vm5, %v5362_v20, %v9686_v40  ;;  %v10146_v40 = vld [vmem:[#allocation5 + $0x20] sm:$0xff]   ;;  %v10147_v18 = vld [vmem:[#allocation5 + $0x28] sm:$0xff]   ;;  %v10148_v11 = vld [vmem:[#allocation5 + $0x30] sm:$0xff]  }
0x26c7   : > { %v5382_v46 = vpack.c.bf16 %v5364_v17, %v5363_v55  ;;  %v10149_v20 = vld [vmem:[#allocation5 + $0x38] sm:$0xff]   ;;  %v10150_v55 = vld [vmem:[#allocation5 + $0x40] sm:$0xff]  }
0x26c9   : > { %9136 = vmatmul.mubr.bf16.vlgmr.msra.gmra.mrb[88].mxu0 %v5382_v46  ;;  %v8259_v46 = vld [vmem:[%s12870_s12 + $0x20] sm:$0xff] }
0x26ca   : > { %9178 = vmatpush3.bf16.msra.mxu0 %v9852_v21  ;;  %9193 = vmatprep.mubr.msk.bf16.mxu0 %vm11038_vm0, %v11037_v0 }
0x26cb   : > { %9179 = vmatprep.subr.bf16.mxu0 %v11037_v0 }
0x26ce   : > { %9180 = vmatpush3.bf16.msra.mxu0 %v9853_v53 }
0x26cf   : > { %9181 = vmatprep.subr.bf16.mxu0 %v11037_v0 }
0x26d2   : > { %9182 = vmatpush3.bf16.msra.mxu0 %v9854_v34 }
0x26d3   : > { %9183 = vmatprep.subr.bf16.mxu0 %v11037_v0 }
0x26d6   : > { %9184 = vmatpush3.bf16.msra.mxu0 %v9855_v37  ;;  %v5636_v37 = vrot.slane %v8259_v46, %v11843_v42 }
0x26d7   : > { %9185 = vmatprep.subr.bf16.mxu0 %v11037_v0 }
0x26da   : > { %9186 = vmatpush3.bf16.msra.mxu0 %v9856_v51  ;;  %v5642_v51 = vrot.slane %v8259_v46, %v11846_v43 }
0x26db   : > { %9187 = vmatprep.subr.bf16.mxu0 %v11037_v0 }
0x26de   : > { %9188 = vmatpush3.bf16.msra.mxu0 %v9857_v10 }
0x26df   : > { %9189 = vmatprep.subr.bf16.mxu0 %v11037_v0 }
0x26e2   : > { %9190 = vmatpush3.bf16.msra.mxu0 %v9858_v24 }
0x26e3   : > { %9191 = vmatprep.subr.bf16.mxu0 %v11037_v0 }
0x26e6   : > { %9192 = vmatpush3.bf16.msra.mxu0 %v9859_v16 }
0x26e7   : > { %6124 = vmatprep.subr.bf16.mxu0 %v12316_v9 }
0x279c   : > { %v5473_v19 = vpop.f32.mrb[88].mxu0 }
0x279d   : > { %v5474_v36 = vadd.f32 %v8239_v29, %v5473_v19  ;;  %v9137_v30 = vpop.f32.mrb[89].mxu0 }
0x279e   : > { %v5476_v61 = vpop.f32.mrb[90].mxu0 }
0x279f   : > { %v5480_v39 = vadd.f32 %v5474_v36, %v12310_v22  ;;  %v5477_v33 = vadd.f32 %v8239_v29, %v5476_v61  ;;  %v9138_v5 = vpop.f32.mrb[91].mxu0 }
0x27a0   : > { %v5650_v5 = vrot.slane %v8259_v46, %v11831_v28 }
0x27a1   : > { %v5481_v35 = vadd.f32 %v5477_v33, %v12312_v23  ;;  %5486 = vadd.xlane.f32.xlu0 %v5480_v39 }
0x27a3   : > { %5488 = vadd.xlane.f32.xlu1 %v5481_v35 }
0x282e   : > { %v5487_v44 = vpop.xlane.xlu0 %5486 }
0x282f   : > { %v5490_v31 = vmul.f32 0.0078125, %v5487_v44 }
0x2830   : > { %v5489_v47 = vpop.xlane.xlu1 %5488 }
0x2831   : > { %v5492_v48 = vsub.f32 %v5480_v39, %v5490_v31  ;;  %v5491_v54 = vmul.f32 0.0078125, %v5489_v47 }
0x2833   : > { %v5493_v4 = vsub.f32 %v5481_v35, %v5491_v54  ;;  %v5494_v9 = vmul.f32 %v5492_v48, %v5492_v48 }
0x2835   : > { %5496 = vadd.xlane.f32.xlu0 %v5494_v9  ;;  %v5495_v56 = vmul.f32 %v5493_v4, %v5493_v4 }
0x2839   : > { %5498 = vadd.xlane.f32.xlu0 %v5495_v56  ;;  %v5658_v56 = vrot.slane %v8259_v46, %v12040_v52 }
0x28c2   : > { %v5497_v38 = vpop.xlane.xlu0 %5496 }
0x28c3   : > { %v5500_v57 = vmul.f32 0.0078125, %v5497_v38 }
0x28c5   : > { %v5502_v59 = vadd.f32 1e-05, %v5500_v57 }
0x28c6   : > { %v5499_v22 = vpop.xlane.xlu0 %5498 }
0x28c7   : > { %10121 = vrsqrt.f32 %v5502_v59  ;;  %v5501_v58 = vmul.f32 0.0078125, %v5499_v22 }
0x28c9   : > { %v5503_v60 = vadd.f32 1e-05, %v5501_v58 }
0x28cb   : > { %10123 = vrsqrt.f32 %v5503_v60 }
0x28d1   : > { %v10122_v23 = vpop.eup %10121 }
0x28d2   : > { %v5506_v2 = vmul.f32 %v10122_v23, %v5492_v48 }
0x28d4   : > { %v5514_v49 = vmul.f32 %v8248_v3, %v5506_v2 }
0x28d5   : > { %v10124_v6 = vpop.eup %10123 }
0x28d6   : > { %v5507_v1 = vmul.f32 %v10124_v6, %v5493_v4  ;;  %v12453_v7 = vadd.f32 %v8249_v8, %v5514_v49 }
0x28d8   : > { %v5515_v50 = vmul.f32 %v8248_v3, %v5507_v1  ;;  %v5666_v3 = vrot.slane %v8259_v46, %v12045_v63 }
0x28da   : > { %v12455_v62 = vadd.f32 %v8249_v8, %v5515_v50 }
0x28dc   : > { %v5524_v25 = vpack.c.bf16 %v12455_v62, %v12453_v7 }
0x28de   : > { %9140 = vmatpush3.bf16.msra.mxu1 %v5524_v25 }
0x28df   : > { %9197 = vmatprep.subr.bf16.mxu1 %v11037_v0 }
0x28e1   : > { %9142 = vmatmul.mubr.msk.bf16.vlgmr.msra.gmra.mrb[136].mxu1 %vm1507_vm15, %v10142_v12 }
0x28e2   : > { %9145 = vmatprep.mubr.msk.bf16.mxu1 %vm11038_vm0, %v11037_v0 }
0x28e9   : > { %9146 = vmatmul.mubr.msk.bf16.gmra.mrb[140].mxu1 %vm1507_vm15, %v10143_v26 }
0x28ea   : > { %9149 = vmatprep.mubr.msk.bf16.mxu1 %vm11038_vm0, %v11037_v0 }
0x28f1   : > { %9150 = vmatmul.mubr.msk.bf16.gmra.mrb[144].mxu1 %vm1507_vm15, %v10144_v32  ;;  %v5674_v32 = vrot.slane %v8259_v46, %v12050_v14 }
0x28f2   : > { %9153 = vmatprep.mubr.msk.bf16.mxu1 %vm11038_vm0, %v11037_v0 }
0x28f9   : > { %9154 = vmatmul.mubr.msk.bf16.gmra.mrb[148].mxu1 %vm1507_vm15, %v10145_v13 }
0x28fa   : > { %9157 = vmatprep.mubr.msk.bf16.mxu1 %vm11038_vm0, %v11037_v0 }
0x2901   : > { %9158 = vmatmul.mubr.msk.bf16.gmra.mrb[152].mxu1 %vm1507_vm15, %v10146_v40 }
0x2902   : > { %9161 = vmatprep.mubr.msk.bf16.mxu1 %vm11038_vm0, %v11037_v0 }
0x2909   : > { %9162 = vmatmul.mubr.msk.bf16.gmra.mrb[156].mxu1 %vm1507_vm15, %v10147_v18 }
0x290a   : > { %9165 = vmatprep.mubr.msk.bf16.mxu1 %vm11038_vm0, %v11037_v0 }
0x2911   : > { %9166 = vmatmul.mubr.msk.bf16.gmra.mrb[160].mxu1 %vm1507_vm15, %v10148_v11 }
0x2912   : > { %9169 = vmatprep.mubr.msk.bf16.mxu1 %vm11038_vm0, %v11037_v0 }
0x2919   : > { %9170 = vmatmul.mubr.msk.bf16.gmra.mrb[164].mxu1 %vm1507_vm15, %v10149_v20 }
0x291a   : > { %9173 = vmatprep.mubr.msk.bf16.mxu1 %vm11038_vm0, %v11037_v0 }
0x2921   : > { %9174 = vmatmul.mubr.msk.bf16.gmra.mrb[168].mxu1 %vm1507_vm15, %v10150_v55 }
0x2922   : > { %9213 = vmatprep.mubr.msk.bf16.mxu1 %vm11038_vm0, %v11037_v0 }
0x29b4   : > { %v5559_v17 = vpop.f32.mrb[136].mxu1 }
0x29b5   : > { %v9143_v21 = vpop.f32.mrb[137].mxu1  ;;  %v5637_v24 = vmul.f32 %v5636_v37, %v5559_v17 }
0x29b6   : > { %v5562_v53 = vpop.f32.mrb[138].mxu1 }
0x29b7   : > { %v9144_v34 = vpop.f32.mrb[139].mxu1  ;;  %v5638_v36 = vmul.f32 %v5636_v37, %v5562_v53  ;;  %v5682_v53 = vrot.slane %v8259_v46, %v12055_v27 }
0x29bc   : > { %v5567_v10 = vpop.f32.mrb[140].mxu1 }
0x29bd   : > { %v5643_v16 = vmul.f32 %v5642_v51, %v5567_v10  ;;  %v9147_v29 = vpop.f32.mrb[141].mxu1 }
0x29be   : > { %v5570_v19 = vpop.f32.mrb[142].mxu1 }
0x29bf   : > { %v5645_v30 = vadd.f32 %v5643_v16, %v5637_v24  ;;  %v5644_v61 = vmul.f32 %v5642_v51, %v5570_v19  ;;  %v9148_v39 = vpop.f32.mrb[143].mxu1 }
0x29c1   : > { %v5646_v33 = vadd.f32 %v5644_v61, %v5638_v36  ;;  %v5690_v36 = vrot.slane %v8259_v46, %v12060_v45 }
0x29c4   : > { %v5575_v35 = vpop.f32.mrb[144].mxu1 }
0x29c5   : > { %v5651_v44 = vmul.f32 %v5650_v5, %v5575_v35  ;;  %v9151_v31 = vpop.f32.mrb[145].mxu1 }
0x29c6   : > { %v5578_v47 = vpop.f32.mrb[146].mxu1 }
0x29c7   : > { %v5653_v48 = vadd.f32 %v5651_v44, %v5645_v30  ;;  %v5652_v54 = vmul.f32 %v5650_v5, %v5578_v47  ;;  %v9152_v4 = vpop.f32.mrb[147].mxu1  ;;  %v8261_v47 = vld [vmem:[%s12870_s12 + $0x28] ss:$0 sm:$0xff] }
0x29c9   : > { %v5654_v9 = vadd.f32 %v5652_v54, %v5646_v33 }
0x29cc   : > { %v5583_v38 = vpop.f32.mrb[148].mxu1 }
0x29cd   : > { %v5659_v57 = vmul.f32 %v5658_v56, %v5583_v38  ;;  %v9155_v59 = vpop.f32.mrb[149].mxu1 }
0x29ce   : > { %v5586_v22 = vpop.f32.mrb[150].mxu1  ;;  %v8262_v59 = vld [vmem:[#allocation23 + $0x2] ss:$0 sm:$0xff] }
0x29cf   : > { %v5661_v58 = vadd.f32 %v5659_v57, %v5653_v48  ;;  %v5660_v60 = vmul.f32 %v5658_v56, %v5586_v22  ;;  %v9156_v23 = vpop.f32.mrb[151].mxu1 }
0x29d1   : > { %v5662_v2 = vadd.f32 %v5660_v60, %v5654_v9 }
0x29d4   : > { %v5591_v6 = vpop.f32.mrb[152].mxu1 }
0x29d5   : > { %v5667_v1 = vmul.f32 %v5666_v3, %v5591_v6  ;;  %v9159_v49 = vpop.f32.mrb[153].mxu1 }
0x29d6   : > { %v5594_v8 = vpop.f32.mrb[154].mxu1 }
0x29d7   : > { %v5669_v50 = vadd.f32 %v5667_v1, %v5661_v58  ;;  %v5668_v25 = vmul.f32 %v5666_v3, %v5594_v8  ;;  %v9160_v12 = vpop.f32.mrb[155].mxu1 }
0x29d8   : > { %v9860_v12 = vld [vmem:[#allocation29 + $0x80] sm:$0xff]  }
0x29d9   : > { %v5670_v26 = vadd.f32 %v5668_v25, %v5662_v2  ;;  %9198 = vmatpush3.bf16.msra.mxu1 %v9860_v12 }
0x29da   : > { %9199 = vmatprep.subr.bf16.mxu1 %v11037_v0 }
0x29dc   : > { %v5599_v13 = vpop.f32.mrb[156].mxu1 }
0x29dd   : > { %v5675_v40 = vmul.f32 %v5674_v32, %v5599_v13  ;;  %v9163_v18 = vpop.f32.mrb[157].mxu1  ;;  %v9865_v13 = vld [vmem:[#allocation29 + $0xa8] sm:$0xff]  }
0x29de   : > { %v5602_v11 = vpop.f32.mrb[158].mxu1 }
0x29df   : > { %v5677_v20 = vadd.f32 %v5675_v40, %v5669_v50  ;;  %v5676_v55 = vmul.f32 %v5674_v32, %v5602_v11  ;;  %v9164_v17 = vpop.f32.mrb[159].mxu1  ;;  %v9864_v32 = vld [vmem:[#allocation29 + $0xa0] sm:$0xff]   ;;  %v9866_v40 = vld [vmem:[#allocation29 + $0xb0] sm:$0xff]  }
0x29e1   : > { %v5678_v21 = vadd.f32 %v5676_v55, %v5670_v26  ;;  %v9863_v26 = vld [vmem:[#allocation29 + $0x98] sm:$0xff]  }
0x29e4   : > { %v5607_v34 = vpop.f32.mrb[160].mxu1 }
0x29e5   : > { %v5683_v37 = vmul.f32 %v5682_v53, %v5607_v34  ;;  %v9167_v51 = vpop.f32.mrb[161].mxu1  ;;  %v8263_v34 = vld [vmem:[#allocation25 + $0x2] ss:$0 sm:$0xff] }
0x29e6   : > { %v5610_v10 = vpop.f32.mrb[162].mxu1 }
0x29e7   : > { %v5685_v24 = vadd.f32 %v5683_v37, %v5677_v20  ;;  %v5684_v16 = vmul.f32 %v5682_v53, %v5610_v10  ;;  %v9168_v29 = vpop.f32.mrb[163].mxu1 }
0x29e9   : > { %v5686_v19 = vadd.f32 %v5684_v16, %v5678_v21  ;;  %v8264_v16 = vld [vmem:[#allocation26 + $0x2] ss:$0 sm:$0xff] }
0x29ec   : > { %v5615_v30 = vpop.f32.mrb[164].mxu1 }
0x29ed   : > { %v5691_v61 = vmul.f32 %v5690_v36, %v5615_v30  ;;  %v9171_v39 = vpop.f32.mrb[165].mxu1 }
0x29ee   : > { %v5618_v33 = vpop.f32.mrb[166].mxu1  ;;  %v8281_v39 = vld [vmem:[#allocation28 + $0x2] ss:$0 sm:$0xff] }
0x29ef   : > { %v5693_v5 = vadd.f32 %v5691_v61, %v5685_v24  ;;  %v5692_v35 = vmul.f32 %v5690_v36, %v5618_v33  ;;  %v9172_v44 = vpop.f32.mrb[167].mxu1  ;;  %v9867_v61 = vld [vmem:[#allocation29 + $0xb8] sm:$0xff]  }
0x29f1   : > { %v5694_v31 = vadd.f32 %v5692_v35, %v5686_v19 }
0x29f4   : > { %v5623_v48 = vpop.f32.mrb[168].mxu1 }
0x29f5   : > { %v5699_v54 = vmul.f32 %v8261_v47, %v5623_v48  ;;  %v9175_v4 = vpop.f32.mrb[169].mxu1 }
0x29f6   : > { %v5626_v9 = vpop.f32.mrb[170].mxu1 }
0x29f7   : > { %v5701_v56 = vadd.f32 %v5699_v54, %v5693_v5  ;;  %v5700_v38 = vmul.f32 %v8261_v47, %v5626_v9  ;;  %v9176_v57 = vpop.f32.mrb[171].mxu1 }
0x29f9   : > { %v5703_v22 = vadd.f32 %v5701_v56, %v12453_v7  ;;  %v5702_v46 = vadd.f32 %v5700_v38, %v5694_v31  ;;  %v9861_v7 = vld [vmem:[#allocation29 + $0x88] sm:$0xff]  }
0x29fa   : > { %9200 = vmatpush3.bf16.msra.mxu1 %v9861_v7 }
0x29fb   : > { %v5704_v58 = vadd.f32 %v5702_v46, %v12455_v62  ;;  %v5713_v60 = vadd.f32 %v8262_v59, %v5703_v22  ;;  %v9862_v62 = vld [vmem:[#allocation29 + $0x90] sm:$0xff]   ;;  %9201 = vmatprep.subr.bf16.mxu1 %v11037_v0 }
0x29fd   : > { %5719 = vadd.xlane.f32.xlu0 %v5713_v60  ;;  %v5714_v23 = vadd.f32 %v8262_v59, %v5704_v58 }
0x29fe   : > { %9202 = vmatpush3.bf16.msra.mxu1 %v9862_v62 }
0x29ff   : > { %5721 = vadd.xlane.f32.xlu1 %v5714_v23  ;;  %9203 = vmatprep.subr.bf16.mxu1 %v11037_v0 }
0x2a02   : > { %9204 = vmatpush3.bf16.msra.mxu1 %v9863_v26 }
0x2a03   : > { %9205 = vmatprep.subr.bf16.mxu1 %v11037_v0 }
0x2a06   : > { %9206 = vmatpush3.bf16.msra.mxu1 %v9864_v32 }
0x2a07   : > { %9207 = vmatprep.subr.bf16.mxu1 %v11037_v0 }
0x2a0a   : > { %9208 = vmatpush3.bf16.msra.mxu1 %v9865_v13 }
0x2a0b   : > { %9209 = vmatprep.subr.bf16.mxu1 %v11037_v0 }
0x2a0e   : > { %9210 = vmatpush3.bf16.msra.mxu1 %v9866_v40  ;;  %v12559_v40 = vld [vmem:[#allocation7 + $0x40] sm:$0xff]  }
0x2a0f   : > { %9211 = vmatprep.subr.bf16.mxu1 %v11037_v0 }
0x2a12   : > { %9212 = vmatpush3.bf16.msra.mxu1 %v9867_v61 }
0x2a13   : > { %9217 = vmatprep.subr.bf16.mxu1 %v11037_v0 }
0x2a8a   : > { %v5720_v2 = vpop.xlane.xlu0 %5719 }
0x2a8b   : > { %v5723_v3 = vmul.f32 0.0078125, %v5720_v2  ;;  %v12521_v2 = vld [vmem:[#allocation7 + $0x10] sm:$0xff]  }
0x2a8c   : > { %v5722_v6 = vpop.xlane.xlu1 %5721 }
0x2a8d   : > { %v5725_v1 = vsub.f32 %v5713_v60, %v5723_v3  ;;  %v5724_v49 = vmul.f32 0.0078125, %v5722_v6  ;;  %v12511_v60 = vld [vmem:[#allocation7] sm:$0xff]   ;;  %v12526_v3 = vld [vmem:[#allocation7 + $0x18] sm:$0xff]  }
0x2a8e   : > { %v12531_v6 = vld [vmem:[#allocation7 + $0x20] sm:$0xff]  }
0x2a8f   : > { %v5726_v8 = vsub.f32 %v5714_v23, %v5724_v49  ;;  %v5727_v50 = vmul.f32 %v5725_v1, %v5725_v1  ;;  %v12516_v23 = vld [vmem:[#allocation7 + $0x8] sm:$0xff]   ;;  %v12541_v49 = vld [vmem:[#allocation7 + $0x30] sm:$0xff]  }
0x2a91   : > { %5729 = vadd.xlane.f32.xlu0 %v5727_v50  ;;  %v5728_v25 = vmul.f32 %v5726_v8, %v5726_v8 }
0x2a93   : > { %5731 = vadd.xlane.f32.xlu1 %v5728_v25 }
0x2b1e   : > { %v5730_v18 = vpop.xlane.xlu0 %5729 }
0x2b1f   : > { %v5733_v11 = vmul.f32 0.0078125, %v5730_v18  ;;  %v9877_v18 = vld [vmem:[#allocation35] ss:$12 sps:$4 sm:$0xff]  }
0x2b20   : > { %v5732_v20 = vpop.xlane.xlu1 %5731 }
0x2b21   : > { %v5735_v55 = vadd.f32 1e-05, %v5733_v11  ;;  %v5734_v17 = vmul.f32 0.0078125, %v5732_v20  ;;  %v9879_v11 = vld [vmem:[#allocation35 + $0x4] ss:$12 sps:$4 sm:$0xff]  }
0x2b22   : > { %v9882_v20 = vld [vmem:[#allocation35 + $0x1c] ss:$12 sps:$4 sm:$0xff]  }
0x2b23   : > { %10125 = vrsqrt.f32 %v5735_v55  ;;  %v5736_v21 = vadd.f32 1e-05, %v5734_v17  ;;  %v9880_v55 = vld [vmem:[#allocation35 + $0x18] ss:$12 sps:$4 sm:$0xff]  }
0x2b25   : > { %10127 = vrsqrt.f32 %v5736_v21  ;;  %v12563_v21 = vld [vmem:[#allocation8] sm:$0xff] }
0x2b2d   : > { %v10126_v53 = vpop.eup %10125 }
0x2b2e   : > { %v5739_v37 = vmul.f32 %v10126_v53, %v5725_v1  ;;  %v12536_v1 = vld [vmem:[#allocation7 + $0x28] sm:$0xff]   ;;  %v12565_v53 = vld [vmem:[#allocation8 + $0x8] sm:$0xff] }
0x2b2f   : > { %v10128_v51 = vpop.eup %10127 }
0x2b30   : > { %v5740_v10 = vmul.f32 %v10128_v51, %v5726_v8  ;;  %v5747_v24 = vmul.f32 %v8263_v34, %v5739_v37  ;;  %v12546_v8 = vld [vmem:[#allocation7 + $0x38] sm:$0xff]   ;;  %v6361_v37 = vrot.slane %v12563_v21, %v11843_v42 }
0x2b32   : > { %v5748_v29 = vmul.f32 %v8263_v34, %v5740_v10  ;;  %v5755_v19 = vadd.f32 %v8264_v16, %v5747_v24  ;;  %v9885_v34 = vld [vmem:[#allocation35 + $0x34] ss:$12 sps:$4 sm:$0xff]   ;;  %v6365_v10 = vrot.slane %v12565_v53, %v11843_v42  ;;  %v6379_v24 = vrot.slane %v12563_v21, %v11846_v43 }
0x2b34   : > { %v5756_v36 = vadd.f32 %v8264_v16, %v5748_v29  ;;  %v6383_v29 = vrot.slane %v12565_v53, %v11846_v43 }
0x2b36   : > { %v5774_v30 = vpack.c.bf16 %v5756_v36, %v5755_v19 }
0x2b38   : > { %9194 = vmatmul.mubr.bf16.vlgmr.msra.gmra.mrb[92].mxu0 %v5774_v30  ;;  %v9883_v30 = vld [vmem:[#allocation35 + $0x30] ss:$12 sps:$4 sm:$0xff]  }
0x2b39   : > { %6125 = vmatpush1.bf16.msra.mxu0 %v12108_v41  ;;  %6156 = vmatprep.mubr.bf16.mxu0 %v11040_v15  ;;  %v8290_v41 = vld [vmem:[#allocation31 + $0x2] ss:$0 sm:$0xff] }
0x2b3a   : > { %7068 = vmatprep.subr.bf16.mxu0 %v9879_v11 }
0x2b40   : > { %8310 = vmatmul.mubr.msk.bf16.vlgmr.msra.gmra.mrb[96].mxu0 %vm1507_vm15, %v12511_v60 }
0x2b41   : > { %6166 = vmatprep.mubr.bf16.mxu0 %v11040_v15  ;;  %7069 = vmatpush1.bf16.msra.mxu0 %v9877_v18  ;;  %v6431_v18 = vrot.slane %v12565_v53, %v12040_v52 }
0x2b42   : > { %7070 = vmatprep.subr.bf16.mxu0 %v9882_v20 }
0x2b45   : > { %7071 = vmatpush1.bf16.msra.mxu0 %v9880_v55 }
0x2b46   : > { %7072 = vmatprep.subr.bf16.mxu0 %v9885_v34 }
0x2b48   : > { %8311 = vmatmul.mubr.msk.bf16.gmra.mrb[100].mxu0 %vm1507_vm15, %v12516_v23 }
0x2b49   : > { %6176 = vmatprep.mubr.bf16.mxu0 %v11040_v15  ;;  %7073 = vmatpush1.bf16.msra.mxu0 %v9883_v30 }
0x2b50   : > { %8312 = vmatmul.mubr.msk.bf16.gmra.mrb[104].mxu0 %vm1507_vm15, %v12521_v2 }
0x2b51   : > { %6186 = vmatprep.mubr.bf16.mxu0 %v11040_v15 }
0x2b58   : > { %8313 = vmatmul.mubr.msk.bf16.gmra.mrb[108].mxu0 %vm1507_vm15, %v12526_v3 }
0x2b59   : > { %6196 = vmatprep.mubr.bf16.mxu0 %v11040_v15 }
0x2b60   : > { %8314 = vmatmul.mubr.msk.bf16.gmra.mrb[112].mxu0 %vm1507_vm15, %v12531_v6 }
0x2b61   : > { %6206 = vmatprep.mubr.bf16.mxu0 %v11040_v15 }
0x2b68   : > { %8315 = vmatmul.mubr.msk.bf16.gmra.mrb[116].mxu0 %vm1507_vm15, %v12536_v1 }
0x2b69   : > { %6216 = vmatprep.mubr.bf16.mxu0 %v11040_v15 }
0x2b70   : > { %8316 = vmatmul.mubr.msk.bf16.gmra.mrb[120].mxu0 %vm1507_vm15, %v12541_v49 }
0x2b71   : > { %6226 = vmatprep.mubr.bf16.mxu0 %v11040_v15 }
0x2b78   : > { %8317 = vmatmul.mubr.msk.bf16.gmra.mrb[124].mxu0 %vm1507_vm15, %v12546_v8 }
0x2b79   : > { %6236 = vmatprep.mubr.bf16.mxu0 %v11040_v15 }
0x2b80   : > { %8318 = vmatmul.mubr.msk.bf16.gmra.mrb[128].mxu0 %vm1507_vm15, %v12559_v40 }
0x2c0b   : > { %v5865_v33 = vpop.f32.mrb[92].mxu0 }
0x2c0c   : > { %v5866_v5 = vadd.f32 %v8281_v39, %v5865_v33  ;;  %v9195_v35 = vpop.f32.mrb[93].mxu0  ;;  %v9888_v33 = vld [vmem:[#allocation35 + $0x4c] ss:$12 sps:$4 sm:$0xff]  }
0x2c0d   : > { %v5868_v44 = vpop.f32.mrb[94].mxu0  ;;  %7074 = vmatprep.subr.bf16.mxu0 %v9888_v33 }
0x2c0e   : > { %v5869_v31 = vadd.f32 %v8281_v39, %v5868_v44  ;;  %v9196_v47 = vpop.f32.mrb[95].mxu0  ;;  %v5872_v48 = vmax.f32 %v5866_v5, 0.0 }
0x2c10   : > { %v5873_v54 = vmax.f32 %v5869_v31, 0.0  ;;  %v6403_v31 = vrot.slane %v12563_v21, %v11831_v28 }
0x2c12   : > { %v5891_v4 = vpack.c.bf16 %v5873_v54, %v5872_v48 }
0x2c13   : > { %v6158_v17 = vpop.f32.mrb[96].mxu0 }
0x2c14   : > { %9214 = vmatmul.mubr.bf16.vlgmr.msra.gmra.mrb[172].mxu1 %v5891_v4  ;;  %v6160_v51 = vpop.f32.mrb[97].mxu0  ;;  %v6407_v4 = vrot.slane %v12565_v53, %v11831_v28 }
0x2c15   : > { %9219 = vmatprep.mubr.msk.bf16.mxu1 %vm11038_vm0, %v11037_v0  ;;  %v6162_v16 = vpop.f32.mrb[98].mxu0  ;;  %v6371_v61 = vmul.f32 %v6365_v10, %v6160_v51 }
0x2c16   : > { %v6373_v5 = vmul.f32 %v6361_v37, %v6162_v16 }
0x2ce7   : > { %v5982_v9 = vpop.f32.mrb[172].mxu1 }
0x2ce8   : > { %v5983_v56 = vadd.f32 %v8290_v41, %v5982_v9  ;;  %v9215_v38 = vpop.f32.mrb[173].mxu1 }
0x2ce9   : > { %v5985_v57 = vpop.f32.mrb[174].mxu1  ;;  %v9886_v38 = vld [vmem:[#allocation35 + $0x48] ss:$12 sps:$4 sm:$0xff]  }
0x2cea   : > { %v5989_v59 = vadd.f32 %v5983_v56, %v5755_v19  ;;  %v5986_v22 = vadd.f32 %v8290_v41, %v5985_v57  ;;  %v9216_v46 = vpop.f32.mrb[175].mxu1  ;;  %v6370_v19 = vmul.f32 %v6361_v37, %v6158_v17  ;;  %7075 = vmatpush1.bf16.msra.mxu0 %v9886_v38  ;;  %v9889_v17 = vld [vmem:[#allocation35 + $0x60] ss:$12 sps:$4 sm:$0xff]  }
0x2ceb   : > { %v9891_v46 = vld [vmem:[#allocation35 + $0x64] ss:$12 sps:$4 sm:$0xff]  }
0x2cec   : > { %v5990_v58 = vadd.f32 %v5986_v22, %v5756_v36  ;;  %5995 = vadd.xlane.f32.xlu0 %v5989_v59  ;;  %v6164_v36 = vpop.f32.mrb[99].mxu0  ;;  %7076 = vmatprep.subr.bf16.mxu0 %v9891_v46 }
0x2ced   : > { %v6168_v39 = vpop.f32.mrb[100].mxu0  ;;  %v6374_v47 = vmul.f32 %v6365_v10, %v6164_v36  ;;  %v9894_v10 = vld [vmem:[#allocation35 + $0x7c] ss:$12 sps:$4 sm:$0xff]  }
0x2cee   : > { %5997 = vadd.xlane.f32.xlu1 %v5990_v58  ;;  %v6388_v35 = vmul.f32 %v6379_v24, %v6168_v39  ;;  %v6170_v44 = vpop.f32.mrb[101].mxu0  ;;  %v6455_v39 = vrot.slane %v12565_v53, %v12045_v63  ;;  %7077 = vmatpush1.bf16.msra.mxu0 %v9889_v17 }
0x2cef   : > { %v6389_v48 = vmul.f32 %v6383_v29, %v6170_v44  ;;  %v6172_v54 = vpop.f32.mrb[102].mxu0  ;;  %v9892_v44 = vld [vmem:[#allocation35 + $0x78] ss:$12 sps:$4 sm:$0xff]   ;;  %7078 = vmatprep.subr.bf16.mxu0 %v9894_v10 }
0x2cf0   : > { %v6394_v41 = vadd.f32 %v6388_v35, %v6370_v19  ;;  %v6391_v9 = vmul.f32 %v6379_v24, %v6172_v54  ;;  %v6174_v56 = vpop.f32.mrb[103].mxu0  ;;  %v6451_v19 = vrot.slane %v12563_v21, %v12045_v63  ;;  %v9897_v54 = vld [vmem:[#allocation35 + $0x94] ss:$12 sps:$4 sm:$0xff]  }
0x2cf1   : > { %v6395_v57 = vadd.f32 %v6389_v48, %v6371_v61  ;;  %v6178_v22 = vpop.f32.mrb[104].mxu0 }
0x2cf2   : > { %7079 = vmatpush1.bf16.msra.mxu0 %v9892_v44  ;;  %v9903_v44 = vld [vmem:[#allocation35 + $0xc0] ss:$12 sps:$4 sm:$0xff]  }
0x2cf3   : > { %7080 = vmatprep.subr.bf16.mxu0 %v9897_v54 }
0x2d79   : > { %v5996_v50 = vpop.xlane.xlu0 %5995 }
0x2d7a   : > { %v5999_v25 = vmul.f32 0.0078125, %v5996_v50  ;;  %v6412_v50 = vmul.f32 %v6403_v31, %v6178_v22  ;;  %v6479_v22 = vrot.slane %v12565_v53, %v12050_v14 }
0x2d7b   : > { %v5998_v12 = vpop.xlane.xlu1 %5997 }
0x2d7c   : > { %v12551_v7 = vsub.f32 %v5989_v59, %v5999_v25  ;;  %v6000_v62 = vmul.f32 0.0078125, %v5998_v12  ;;  %v6392_v59 = vmul.f32 %v6383_v29, %v6174_v56  ;;  %v6180_v25 = vpop.f32.mrb[105].mxu0  ;;  %v6427_v12 = vrot.slane %v12563_v21, %v12040_v52 }
0x2d7d   : > { %v6418_v11 = vadd.f32 %v6412_v50, %v6394_v41  ;;  %v6475_v56 = vrot.slane %v12563_v21, %v12050_v14 }
0x2d7e   : > { %v12553_v26 = vsub.f32 %v5990_v58, %v6000_v62  ;;  %v6003_v32 = vmul.f32 %v12551_v7, %v12551_v7  ;;  %v6397_v58 = vadd.f32 %v6391_v9, %v6373_v5  ;;  %v6398_v62 = vadd.f32 %v6392_v59, %v6374_v47 }
0x2d80   : > { %6005 = vadd.xlane.f32.xlu0 %v6003_v32  ;;  %v6004_v13 = vmul.f32 %v12553_v26, %v12553_v26  ;;  %v6413_v32 = vmul.f32 %v6407_v4, %v6180_v25  ;;  %v9895_v25 = vld [vmem:[#allocation35 + $0x90] ss:$12 sps:$4 sm:$0xff]  }
0x2d81   : > { %7081 = vmatpush1.bf16.msra.mxu0 %v9895_v25  ;;  %v9915_v25 = vld [vmem:[#allocation35 + $0xf4] ss:$12 sps:$4 sm:$0xff]  }
0x2d82   : > { %6007 = vadd.xlane.f32.xlu1 %v6004_v13  ;;  %v6182_v13 = vpop.f32.mrb[106].mxu0  ;;  %v6419_v34 = vadd.f32 %v6413_v32, %v6395_v57 }
0x2d83   : > { %v6415_v20 = vmul.f32 %v6403_v31, %v6182_v13  ;;  %v6184_v55 = vpop.f32.mrb[107].mxu0  ;;  %v9900_v13 = vld [vmem:[#allocation35 + $0xac] ss:$12 sps:$4 sm:$0xff]  }
0x2d84   : > { %v6416_v37 = vmul.f32 %v6407_v4, %v6184_v55  ;;  %v6188_v51 = vpop.f32.mrb[108].mxu0  ;;  %7082 = vmatprep.subr.bf16.mxu0 %v9900_v13 }
0x2d85   : > { %v6421_v24 = vadd.f32 %v6415_v20, %v6397_v58  ;;  %v6436_v16 = vmul.f32 %v6427_v12, %v6188_v51  ;;  %v6190_v29 = vpop.f32.mrb[109].mxu0 }
0x2d86   : > { %v6422_v36 = vadd.f32 %v6416_v37, %v6398_v62  ;;  %v6437_v30 = vmul.f32 %v6431_v18, %v6190_v29  ;;  %v6192_v61 = vpop.f32.mrb[110].mxu0 }
0x2d87   : > { %v6442_v33 = vadd.f32 %v6436_v16, %v6418_v11  ;;  %v6439_v5 = vmul.f32 %v6427_v12, %v6192_v61  ;;  %v6194_v35 = vpop.f32.mrb[111].mxu0  ;;  %v9898_v16 = vld [vmem:[#allocation35 + $0xa8] ss:$12 sps:$4 sm:$0xff]  }
0x2d88   : > { %v6443_v31 = vadd.f32 %v6437_v30, %v6419_v34  ;;  %v6440_v47 = vmul.f32 %v6431_v18, %v6194_v35  ;;  %v6198_v48 = vpop.f32.mrb[112].mxu0  ;;  %v9905_v30 = vld [vmem:[#allocation35 + $0xc4] ss:$12 sps:$4 sm:$0xff]   ;;  %7083 = vmatpush1.bf16.msra.mxu0 %v9898_v16 }
0x2d89   : > { %v6445_v4 = vadd.f32 %v6439_v5, %v6421_v24  ;;  %v6460_v41 = vmul.f32 %v6451_v19, %v6198_v48  ;;  %v6200_v9 = vpop.f32.mrb[113].mxu0  ;;  %v6499_v24 = vrot.slane %v12563_v21, %v12055_v27  ;;  %7084 = vmatprep.subr.bf16.mxu0 %v9905_v30  ;;  %v9910_v48 = vld [vmem:[#allocation35 + $0xdc] ss:$12 sps:$4 sm:$0xff]   ;;  %v9923_v30 = vld [vmem:[#allocation35 + $0x120] ss:$12 sps:$4 sm:$0xff]  }
0x2d8a   : > { %v6446_v38 = vadd.f32 %v6440_v47, %v6422_v36  ;;  %v6461_v57 = vmul.f32 %v6455_v39, %v6200_v9  ;;  %v6202_v59 = vpop.f32.mrb[114].mxu0  ;;  %v6503_v36 = vrot.slane %v12565_v53, %v12055_v27 }
0x2d8b   : > { %v6466_v46 = vadd.f32 %v6460_v41, %v6442_v33  ;;  %v6463_v58 = vmul.f32 %v6451_v19, %v6202_v59  ;;  %v6204_v50 = vpop.f32.mrb[115].mxu0 }
0x2d8c   : > { %v6467_v12 = vadd.f32 %v6461_v57, %v6443_v31  ;;  %v6464_v62 = vmul.f32 %v6455_v39, %v6204_v50  ;;  %v6208_v32 = vpop.f32.mrb[116].mxu0  ;;  %v6523_v57 = vrot.slane %v12563_v21, %v12060_v45  ;;  %7085 = vmatpush1.bf16.msra.mxu0 %v9903_v44 }
0x2d8d   : > { %v6469_v18 = vadd.f32 %v6463_v58, %v6445_v4  ;;  %v6484_v11 = vmul.f32 %v6475_v56, %v6208_v32  ;;  %v6210_v20 = vpop.f32.mrb[117].mxu0  ;;  %v6527_v58 = vrot.slane %v12565_v53, %v12060_v45  ;;  %7086 = vmatprep.subr.bf16.mxu0 %v9910_v48 }
0x2d8e   : > { %v6470_v55 = vadd.f32 %v6464_v62, %v6446_v38  ;;  %v6485_v17 = vmul.f32 %v6479_v22, %v6210_v20  ;;  %v6212_v34 = vpop.f32.mrb[118].mxu0  ;;  %v9913_v20 = vld [vmem:[#allocation35 + $0xf0] ss:$12 sps:$4 sm:$0xff]  }
0x2d8f   : > { %v6490_v37 = vadd.f32 %v6484_v11, %v6466_v46  ;;  %v6487_v51 = vmul.f32 %v6475_v56, %v6212_v34  ;;  %v6214_v10 = vpop.f32.mrb[119].mxu0  ;;  %v9920_v34 = vld [vmem:[#allocation35 + $0x10c] ss:$12 sps:$4 sm:$0xff]  }
0x2d90   : > { %v6491_v29 = vadd.f32 %v6485_v17, %v6467_v12  ;;  %v6488_v19 = vmul.f32 %v6479_v22, %v6214_v10  ;;  %v6218_v33 = vpop.f32.mrb[120].mxu0  ;;  %v9908_v22 = vld [vmem:[#allocation35 + $0xd8] ss:$12 sps:$4 sm:$0xff]  }
0x2d91   : > { %v6493_v61 = vadd.f32 %v6487_v51, %v6469_v18  ;;  %v6508_v5 = vmul.f32 %v6499_v24, %v6218_v33  ;;  %v6220_v35 = vpop.f32.mrb[121].mxu0  ;;  %7087 = vmatpush1.bf16.msra.mxu0 %v9908_v22  ;;  %v8299_v33 = vld [vmem:[#allocation32 + $0x2] ss:$0 sm:$0xff]  ;;  %v9906_v22 = vld [vmem:[#allocation35 + $0xe0] ss:$12 sps:$4 sm:$0xff]  }
0x2d92   : > { %v6494_v39 = vadd.f32 %v6488_v19, %v6470_v55  ;;  %v6509_v31 = vmul.f32 %v6503_v36, %v6220_v35  ;;  %v6222_v47 = vpop.f32.mrb[122].mxu0  ;;  %7088 = vmatprep.subr.bf16.mxu0 %v9915_v25  ;;  %v9928_v35 = vld [vmem:[#allocation35 + $0x138] ss:$12 sps:$4 sm:$0xff]   ;;  %v9916_v25 = vld [vmem:[#allocation35 + $0x110] ss:$12 sps:$4 sm:$0xff]  }
0x2d93   : > { %v6514_v54 = vadd.f32 %v6508_v5, %v6490_v37  ;;  %v6511_v4 = vmul.f32 %v6499_v24, %v6222_v47  ;;  %v6224_v41 = vpop.f32.mrb[123].mxu0 }
0x2d94   : > { %v6515_v9 = vadd.f32 %v6509_v31, %v6491_v29  ;;  %v6512_v56 = vmul.f32 %v6503_v36, %v6224_v41  ;;  %v6228_v62 = vpop.f32.mrb[124].mxu0  ;;  %v9918_v29 = vld [vmem:[#allocation35 + $0x108] ss:$12 sps:$4 sm:$0xff]   ;;  %v9925_v36 = vld [vmem:[#allocation35 + $0x124] ss:$12 sps:$4 sm:$0xff]  }
0x2d95   : > { %v6517_v38 = vadd.f32 %v6511_v4, %v6493_v61  ;;  %v6532_v18 = vmul.f32 %v6523_v57, %v6228_v62  ;;  %v6230_v11 = vpop.f32.mrb[125].mxu0  ;;  %7089 = vmatpush1.bf16.msra.mxu0 %v9913_v20  ;;  %v9930_v61 = vld [vmem:[#allocation35 + $0x13c] ss:$12 sps:$4 sm:$0xff]   ;;  %v9935_v31 = vld [vmem:[#allocation35 + $0x154] ss:$12 sps:$4 sm:$0xff]  }
0x2d96   : > { %v6518_v46 = vadd.f32 %v6512_v56, %v6494_v39  ;;  %v6533_v55 = vmul.f32 %v6527_v58, %v6230_v11  ;;  %v6232_v21 = vpop.f32.mrb[126].mxu0  ;;  %7090 = vmatprep.subr.bf16.mxu0 %v9920_v34  ;;  %v9933_v41 = vld [vmem:[#allocation35 + $0x150] ss:$12 sps:$4 sm:$0xff]   ;;  %v9922_v62 = vld [vmem:[#allocation35 + $0x68] ss:$12 sps:$4 sm:$0xff]  }
0x2d97   : > { %v12599_v37 = vadd.f32 %v6532_v18, %v6514_v54  ;;  %v6535_v53 = vmul.f32 %v6523_v57, %v6232_v21  ;;  %v6234_v51 = vpop.f32.mrb[127].mxu0  ;;  %v8300_v54 = vld [vmem:[#allocation34 + $0x2] ss:$0 sm:$0xff]  ;;  %v9901_v57 = vld [vmem:[#allocation35 + $0xc8] ss:$12 sps:$4 sm:$0xff]  }
0x2d98   : > { %v12601_v10 = vadd.f32 %v6533_v55, %v6515_v9  ;;  %v6536_v24 = vmul.f32 %v6527_v58, %v6234_v51  ;;  %v9940_v9 = vld [vmem:[#allocation35 + $0x16c] ss:$12 sps:$4 sm:$0xff]   ;;  %v9936_v11 = vld [vmem:[#allocation35 + $0x170] ss:$12 sps:$4 sm:$0xff]  }
0x2d99   : > { %v12603_v16 = vadd.f32 %v6535_v53, %v6517_v38  ;;  %7091 = vmatpush1.bf16.msra.mxu0 %v9918_v29  ;;  %v9911_v58 = vld [vmem:[#allocation35 + $0xf8] ss:$12 sps:$4 sm:$0xff]   ;;  %v9937_v20 = vld [vmem:[#allocation35 + $0xb0] ss:$12 sps:$4 sm:$0xff]  }
0x2d9a   : > { %v12605_v19 = vadd.f32 %v6536_v24, %v6518_v46  ;;  %7092 = vmatprep.subr.bf16.mxu0 %v9925_v36  ;;  %v9907_v46 = vld [vmem:[#allocation35 + $0x20] ss:$12 sps:$4 sm:$0xff]   ;;  %v9932_v18 = vld [vmem:[#allocation35 + $0x98] ss:$12 sps:$4 sm:$0xff]  }
0x2d9d   : > { %7093 = vmatpush1.bf16.msra.mxu0 %v9923_v30 }
0x2d9e   : > { %7094 = vmatprep.subr.bf16.mxu0 %v9930_v61  ;;  %v9944_v61 = vld [vmem:[#allocation35 + $0x188] ss:$12 sps:$4 sm:$0xff]  }
0x2da1   : > { %7095 = vmatpush1.bf16.msra.mxu0 %v9928_v35  ;;  %v9955_v35 = vld [vmem:[#allocation35 + $0x1cc] ss:$12 sps:$4 sm:$0xff]  }
0x2da2   : > { %7096 = vmatprep.subr.bf16.mxu0 %v9935_v31  ;;  %v9959_v31 = vld [vmem:[#allocation35 + $0x1e4] ss:$12 sps:$4 sm:$0xff]  }
0x2da5   : > { %7097 = vmatpush1.bf16.msra.mxu0 %v9933_v41  ;;  %v9964_v41 = vld [vmem:[#allocation35 + $0x200] ss:$12 sps:$4 sm:$0xff]  }
0x2da6   : > { %7098 = vmatprep.subr.bf16.mxu0 %v9940_v9  ;;  %v9967_v9 = vld [vmem:[#allocation35 + $0x214] ss:$12 sps:$4 sm:$0xff]  }
0x2e0d   : > { %v6006_v59 = vpop.xlane.xlu0 %6005 }
0x2e0e   : > { %v6009_v50 = vmul.f32 0.0078125, %v6006_v59  ;;  %v9938_v59 = vld [vmem:[#allocation35 + $0x168] ss:$12 sps:$4 sm:$0xff]  }
0x2e0f   : > { %v6008_v12 = vpop.xlane.xlu1 %6007  ;;  %7099 = vmatpush1.bf16.msra.mxu0 %v9938_v59  ;;  %v9971_v59 = vld [vmem:[#allocation35 + $0x22c] ss:$12 sps:$4 sm:$0xff]  }
0x2e10   : > { %v6011_v32 = vadd.f32 1e-05, %v6009_v50  ;;  %v6010_v13 = vmul.f32 0.0078125, %v6008_v12  ;;  %v9912_v50 = vld [vmem:[#allocation35 + $0x38] ss:$12 sps:$4 sm:$0xff]  }
0x2e11   : > { %v9917_v12 = vld [vmem:[#allocation35 + $0x50] ss:$12 sps:$4 sm:$0xff]  }
0x2e12   : > { %10129 = vrsqrt.f32 %v6011_v32  ;;  %v6012_v17 = vadd.f32 1e-05, %v6010_v13  ;;  %v9926_v32 = vld [vmem:[#allocation35 + $0x140] ss:$12 sps:$4 sm:$0xff]  }
0x2e13   : > { %v9927_v13 = vld [vmem:[#allocation35 + $0x80] ss:$12 sps:$4 sm:$0xff]  }
0x2e14   : > { %10131 = vrsqrt.f32 %v6012_v17 }
0x2e1c   : > { %v10130_v39 = vpop.eup %10129 }
0x2e1d   : > { %v6015_v5 = vmul.f32 %v10130_v39, %v12551_v7  ;;  %v9951_v39 = vld [vmem:[#allocation35 + $0x1b4] ss:$12 sps:$4 sm:$0xff]  }
0x2e1e   : > { %v10132_v44 = vpop.eup %10131 }
0x2e1f   : > { %v6016_v47 = vmul.f32 %v10132_v44, %v12553_v26  ;;  %v6023_v48 = vmul.f32 %v8299_v33, %v6015_v5  ;;  %v9902_v26 = vld [vmem:[#allocation35 + $0x8] ss:$12 sps:$4 sm:$0xff]   ;;  %v9956_v44 = vld [vmem:[#allocation35 + $0x1d0] ss:$12 sps:$4 sm:$0xff]  }
0x2e20   : > { %v9953_v5 = vld [vmem:[#allocation35 + $0x1c8] ss:$12 sps:$4 sm:$0xff]  }
0x2e21   : > { %v6024_v4 = vmul.f32 %v8299_v33, %v6016_v47  ;;  %v12609_v56 = vadd.f32 %v8300_v54, %v6023_v48  ;;  %v9952_v33 = vld [vmem:[#allocation35 + $0x1b8] ss:$12 sps:$4 sm:$0xff]   ;;  %v9957_v47 = vld [vmem:[#allocation35 + $0x1e0] ss:$12 sps:$4 sm:$0xff]   ;;  %v9960_v48 = vld [vmem:[#allocation35 + $0x1e8] ss:$12 sps:$4 sm:$0xff]  }
0x2e23   : > { %v12611_v38 = vadd.f32 %v8300_v54, %v6024_v4  ;;  %v9961_v54 = vld [vmem:[#allocation35 + $0x1f8] ss:$12 sps:$4 sm:$0xff]   ;;  %v9963_v4 = vld [vmem:[#allocation35 + $0x1fc] ss:$12 sps:$4 sm:$0xff]  }
0x2e25   : > { %v6051_v7 = vpack.c.bf16 %v12611_v38, %v12609_v56 }
0x2e27   : > { %9218 = vmatpush3.bf16.msra.mxu1 %v6051_v7  ;;  %v9968_v7 = vld [vmem:[#allocation35 + $0x218] ss:$12 sps:$4 sm:$0xff]  }
0x2e28   : > { %8639 = vmatprep.subr.bf16.mxu1 %v9901_v57  ;;  %v9965_v57 = vld [vmem:[#allocation35 + $0x210] ss:$12 sps:$4 sm:$0xff]  }
0x2e2a   : > { %9220 = vmatmul.mubr.msk.bf16.vlgmr.msra.gmra.mrb[176].mxu1 %vm1507_vm15, %v12511_v60  ;;  %v9921_v60 = vld [vmem:[#allocation35 + $0x128] ss:$12 sps:$4 sm:$0xff]  }
0x2e2b   : > { %9223 = vmatprep.mubr.msk.bf16.mxu1 %vm11038_vm0, %v11037_v0  ;;  %8640 = vmatpush3.bf16.msra.mxu1 %v9902_v26  ;;  %v9969_v26 = vld [vmem:[#allocation35 + $0x228] ss:$12 sps:$4 sm:$0xff]  }
0x2e2c   : > { %8641 = vmatprep.subr.bf16.mxu1 %v9906_v22  ;;  %v9972_v22 = vld [vmem:[#allocation35 + $0x230] ss:$12 sps:$4 sm:$0xff]  }
0x2e2f   : > { %8642 = vmatpush3.bf16.msra.mxu1 %v9907_v46  ;;  %v9974_v46 = vld [vmem:[#allocation38 + $0x40] sm:$0xff]  }
0x2e30   : > { %8643 = vmatprep.subr.bf16.mxu1 %v9911_v58 }
0x2e32   : > { %9224 = vmatmul.mubr.msk.bf16.gmra.mrb[180].mxu1 %vm1507_vm15, %v12516_v23  ;;  %v9931_v23 = vld [vmem:[#allocation35 + $0x158] ss:$12 sps:$4 sm:$0xff]  }
0x2e33   : > { %9227 = vmatprep.mubr.msk.bf16.mxu1 %vm11038_vm0, %v11037_v0  ;;  %8644 = vmatpush3.bf16.msra.mxu1 %v9912_v50 }
0x2e34   : > { %8645 = vmatprep.subr.bf16.mxu1 %v9916_v25  ;;  %v6354_v25 = vld [vmem:[#allocation8 + $0x10] sm:$0xff] }
0x2e37   : > { %8646 = vmatpush3.bf16.msra.mxu1 %v9917_v12 }
0x2e38   : > { %8647 = vmatprep.subr.bf16.mxu1 %v9921_v60 }
0x2e3a   : > { %9228 = vmatmul.mubr.msk.bf16.gmra.mrb[184].mxu1 %vm1507_vm15, %v12521_v2  ;;  %v8328_v2 = vld [vmem:[#allocation8 + $0x18] ss:$0 sm:$0xff] }
0x2e3b   : > { %9231 = vmatprep.mubr.msk.bf16.mxu1 %vm11038_vm0, %v11037_v0  ;;  %8648 = vmatpush3.bf16.msra.mxu1 %v9922_v62  ;;  %v6369_v62 = vrot.slane %v6354_v25, %v11843_v42 }
0x2e3c   : > { %8649 = vmatprep.subr.bf16.mxu1 %v9926_v32  ;;  %v6387_v32 = vrot.slane %v6354_v25, %v11846_v43 }
0x2e3f   : > { %8650 = vmatpush3.bf16.msra.mxu1 %v9927_v13 }
0x2e40   : > { %8651 = vmatprep.subr.bf16.mxu1 %v9931_v23 }
0x2e42   : > { %9232 = vmatmul.mubr.msk.bf16.gmra.mrb[188].mxu1 %vm1507_vm15, %v12526_v3  ;;  %v8329_v3 = vld [vmem:[#allocation8 + $0x20] ss:$0 sm:$0xff] }
0x2e43   : > { %9235 = vmatprep.mubr.msk.bf16.mxu1 %vm11038_vm0, %v11037_v0  ;;  %8652 = vmatpush3.bf16.msra.mxu1 %v9932_v18 }
0x2e44   : > { %8653 = vmatprep.subr.bf16.mxu1 %v9936_v11 }
0x2e47   : > { %8654 = vmatpush3.bf16.msra.mxu1 %v9937_v20 }
0x2e48   : > { %9255 = vmatprep.subr.bf16.mxu1 %v11037_v0 }
0x2e4a   : > { %9236 = vmatmul.mubr.msk.bf16.gmra.mrb[192].mxu1 %vm1507_vm15, %v12531_v6  ;;  %v6238_v6 = vpop.f32.mrb[128].mxu0 }
0x2e4b   : > { %9239 = vmatprep.mubr.msk.bf16.mxu1 %vm11038_vm0, %v11037_v0  ;;  %v6556_v55 = vmul.f32 %v8328_v2, %v6238_v6 }
0x2e4d   : > { %v6562_v34 = vadd.f32 %v6556_v55, %v12599_v37  ;;  %v9943_v37 = vld [vmem:[#allocation35 + $0x184] ss:$12 sps:$4 sm:$0xff]  }
0x2e4e   : > { %7111 = vmatprep.subr.bf16.mxu0 %v9943_v37 }
0x2e52   : > { %9240 = vmatmul.mubr.msk.bf16.gmra.mrb[196].mxu1 %vm1507_vm15, %v12536_v1  ;;  %v6240_v1 = vpop.f32.mrb[129].mxu0 }
0x2e53   : > { %9243 = vmatprep.mubr.msk.bf16.mxu1 %vm11038_vm0, %v11037_v0  ;;  %v6557_v21 = vmul.f32 %v8329_v3, %v6240_v1  ;;  %v6242_v17 = vpop.f32.mrb[130].mxu0 }
0x2e54   : > { %v6559_v53 = vmul.f32 %v8328_v2, %v6242_v17 }
0x2e55   : > { %v6563_v51 = vadd.f32 %v6557_v21, %v12601_v10  ;;  %v9941_v10 = vld [vmem:[#allocation35 + $0x180] ss:$12 sps:$4 sm:$0xff]   ;;  %v6411_v21 = vrot.slane %v6354_v25, %v11831_v28 }
0x2e5a   : > { %9244 = vmatmul.mubr.msk.bf16.gmra.mrb[200].mxu1 %vm1507_vm15, %v12541_v49  ;;  %v6244_v49 = vpop.f32.mrb[131].mxu0 }
0x2e5b   : > { %9247 = vmatprep.mubr.msk.bf16.mxu1 %vm11038_vm0, %v11037_v0  ;;  %v6560_v24 = vmul.f32 %v8329_v3, %v6244_v49 }
0x2e5d   : > { %v6566_v29 = vadd.f32 %v6560_v24, %v12605_v19  ;;  %v9948_v19 = vld [vmem:[#allocation35 + $0x1a0] ss:$12 sps:$4 sm:$0xff]  }
0x2e5f   : > { %v6665_v30 = vpack.c.bf16 %v6566_v29, %v6563_v51 }
0x2e61   : > { %7100 = vmatprep.mubr.bf16.mxu0 %v6665_v30 }
0x2e62   : > { %9248 = vmatmul.mubr.msk.bf16.gmra.mrb[204].mxu1 %vm1507_vm15, %v12546_v8  ;;  %v6565_v8 = vadd.f32 %v6559_v53, %v12603_v16  ;;  %v9947_v16 = vld [vmem:[#allocation35 + $0x19c] ss:$12 sps:$4 sm:$0xff]  }
0x2e63   : > { %9251 = vmatprep.mubr.msk.bf16.mxu1 %vm11038_vm0, %v11037_v0 }
0x2e64   : > { %v6664_v36 = vpack.c.bf16 %v6565_v8, %v6562_v34 }
0x2e66   : > { %7101 = vmatmul.mubr.bf16.vlgmr.msra.gmra.mrb[132].mxu0 %v6664_v36 }
0x2e67   : > { %7143 = vmatprep.mubr.bf16.mxu0 %v11040_v15  ;;  %7112 = vmatpush1.bf16.msra.mxu0 %v9941_v10  ;;  %v9949_v15 = vld [vmem:[#allocation35 + $0x1b0] ss:$12 sps:$4 sm:$0xff]  }
0x2e68   : > { %7113 = vmatprep.subr.bf16.mxu0 %v9947_v16 }
0x2e6a   : > { %9252 = vmatmul.mubr.msk.bf16.gmra.mrb[208].mxu1 %vm1507_vm15, %v12559_v40  ;;  %v9945_v40 = vld [vmem:[#allocation35 + $0x198] ss:$12 sps:$4 sm:$0xff]  }
0x2e6b   : > { %7186 = vmatprep.mubr.bf16.mxu1 %v6665_v30  ;;  %7114 = vmatpush1.bf16.msra.mxu0 %v9945_v40 }
0x2e6c   : > { %7115 = vmatprep.subr.bf16.mxu0 %v9951_v39 }
0x2e6f   : > { %7116 = vmatpush1.bf16.msra.mxu0 %v9949_v15  ;;  %v6459_v15 = vrot.slane %v6354_v25, %v12045_v63  ;;  %v6507_v63 = vrot.slane %v6354_v25, %v12055_v27 }
0x2e70   : > { %7117 = vmatprep.subr.bf16.mxu0 %v9955_v35 }
0x2e72   : > { %7187 = vmatmul.mubr.bf16.vlgmr.msra.gmra.mrb[212].mxu1 %v6664_v36  ;;  %v6435_v36 = vrot.slane %v6354_v25, %v12040_v52  ;;  %v6483_v52 = vrot.slane %v6354_v25, %v12050_v14  ;;  %v6531_v14 = vrot.slane %v6354_v25, %v12060_v45  ;;  %v9977_v25 = vld [vmem:[#allocation38 + $0x48] sm:$0xff]  }
0x2e73   : > { %9271 = vmatprep.mubr.msk.bf16.mxu1 %vm11038_vm0, %v11037_v0  ;;  %9256 = vmatpush3.bf16.msra.mxu1 %v9944_v61 }
0x2e74   : > { %9257 = vmatprep.subr.bf16.mxu1 %v11037_v0  ;;  %7118 = vmatpush1.bf16.msra.mxu0 %v9953_v5 }
0x2e75   : > { %7119 = vmatprep.subr.bf16.mxu0 %v9959_v31 }
0x2e77   : > { %9258 = vmatpush3.bf16.msra.mxu1 %v9948_v19 }
0x2e78   : > { %9259 = vmatprep.subr.bf16.mxu1 %v11037_v0  ;;  %7120 = vmatpush1.bf16.msra.mxu0 %v9957_v47 }
0x2e79   : > { %7121 = vmatprep.subr.bf16.mxu0 %v9963_v4 }
0x2e7b   : > { %9260 = vmatpush3.bf16.msra.mxu1 %v9952_v33 }
0x2e7c   : > { %9261 = vmatprep.subr.bf16.mxu1 %v11037_v0  ;;  %7122 = vmatpush1.bf16.msra.mxu0 %v9961_v54 }
0x2e7d   : > { %7123 = vmatprep.subr.bf16.mxu0 %v9967_v9 }
0x2e7f   : > { %9262 = vmatpush3.bf16.msra.mxu1 %v9956_v44 }
0x2e80   : > { %9263 = vmatprep.subr.bf16.mxu1 %v11037_v0  ;;  %7124 = vmatpush1.bf16.msra.mxu0 %v9965_v57 }
0x2e81   : > { %7125 = vmatprep.subr.bf16.mxu0 %v9971_v59 }
0x2e83   : > { %9264 = vmatpush3.bf16.msra.mxu1 %v9960_v48 }
0x2e84   : > { %9265 = vmatprep.subr.bf16.mxu1 %v11037_v0  ;;  %7126 = vmatpush1.bf16.msra.mxu0 %v9969_v26 }
0x2e85   : > { %8670 = vmatprep.subr.bf16.mxu0 %v9974_v46 }
0x2e87   : > { %9266 = vmatpush3.bf16.msra.mxu1 %v9964_v41 }
0x2e88   : > { %9267 = vmatprep.subr.bf16.mxu1 %v11037_v0 }
0x2e8b   : > { %9268 = vmatpush3.bf16.msra.mxu1 %v9968_v7 }
0x2e8c   : > { %9269 = vmatprep.subr.bf16.mxu1 %v11037_v0 }
0x2e8f   : > { %9270 = vmatpush3.bf16.msra.mxu1 %v9972_v22 }
0x2e90   : > { %9275 = vmatprep.subr.bf16.mxu1 %v11037_v0 }
0x2efd   : > { %v6281_v58 = vpop.f32.mrb[176].mxu1 }
0x2efe   : > { %v9221_v50 = vpop.f32.mrb[177].mxu1  ;;  %v6372_v23 = vmul.f32 %v6369_v62, %v6281_v58 }
0x2eff   : > { %v6284_v12 = vpop.f32.mrb[178].mxu1 }
0x2f00   : > { %v9222_v60 = vpop.f32.mrb[179].mxu1  ;;  %v6375_v2 = vmul.f32 %v6369_v62, %v6284_v12 }
0x2f05   : > { %v6289_v13 = vpop.f32.mrb[180].mxu1 }
0x2f06   : > { %v6390_v18 = vmul.f32 %v6387_v32, %v6289_v13  ;;  %v9225_v11 = vpop.f32.mrb[181].mxu1 }
0x2f07   : > { %v6292_v20 = vpop.f32.mrb[182].mxu1 }
0x2f08   : > { %v6396_v3 = vadd.f32 %v6390_v18, %v6372_v23  ;;  %v6393_v6 = vmul.f32 %v6387_v32, %v6292_v20  ;;  %v9226_v55 = vpop.f32.mrb[183].mxu1 }
0x2f0a   : > { %v6399_v1 = vadd.f32 %v6393_v6, %v6375_v2 }
0x2f0d   : > { %v6297_v17 = vpop.f32.mrb[184].mxu1 }
0x2f0e   : > { %v6414_v34 = vmul.f32 %v6411_v21, %v6297_v17  ;;  %v9229_v53 = vpop.f32.mrb[185].mxu1 }
0x2f0f   : > { %v6300_v49 = vpop.f32.mrb[186].mxu1 }
0x2f10   : > { %v6420_v51 = vadd.f32 %v6414_v34, %v6396_v3  ;;  %v6417_v24 = vmul.f32 %v6411_v21, %v6300_v49  ;;  %v9230_v8 = vpop.f32.mrb[187].mxu1 }
0x2f11   : > { %v9973_v8 = vld [vmem:[#allocation38 + $0x80] sm:$0xff]  }
0x2f12   : > { %v6423_v29 = vadd.f32 %v6417_v24, %v6399_v1  ;;  %v8330_v1 = vld [vmem:[#allocation8 + $0x28] ss:$0 sm:$0xff] }
0x2f15   : > { %v6305_v30 = vpop.f32.mrb[188].mxu1 }
0x2f16   : > { %v6438_v37 = vmul.f32 %v6435_v36, %v6305_v30  ;;  %v9233_v10 = vpop.f32.mrb[189].mxu1 }
0x2f17   : > { %v6308_v61 = vpop.f32.mrb[190].mxu1 }
0x2f18   : > { %v6444_v40 = vadd.f32 %v6438_v37, %v6420_v51  ;;  %v6441_v16 = vmul.f32 %v6435_v36, %v6308_v61  ;;  %v9234_v19 = vpop.f32.mrb[191].mxu1  ;;  %v9976_v61 = vld [vmem:[#allocation38 + $0x88] sm:$0xff]  }
0x2f19   : > { %v9980_v19 = vld [vmem:[#allocation38 + $0x50] sm:$0xff]  }
0x2f1a   : > { %v6447_v39 = vadd.f32 %v6441_v16, %v6423_v29  ;;  %v9975_v29 = vld [vmem:[#allocation38] sm:$0xff]  }
0x2f1d   : > { %v6313_v33 = vpop.f32.mrb[192].mxu1 }
0x2f1e   : > { %v6462_v5 = vmul.f32 %v6459_v15, %v6313_v33  ;;  %v9237_v35 = vpop.f32.mrb[193].mxu1  ;;  %v9981_v33 = vld [vmem:[#allocation38 + $0x10] sm:$0xff]  }
0x2f1f   : > { %v6316_v44 = vpop.f32.mrb[194].mxu1  ;;  %v9982_v35 = vld [vmem:[#allocation38 + $0x98] sm:$0xff]  }
0x2f20   : > { %v6468_v31 = vadd.f32 %v6462_v5, %v6444_v40  ;;  %v6465_v47 = vmul.f32 %v6459_v15, %v6316_v44  ;;  %v9238_v48 = vpop.f32.mrb[195].mxu1  ;;  %v9978_v40 = vld [vmem:[#allocation38 + $0x8] sm:$0xff]   ;;  %v9979_v15 = vld [vmem:[#allocation38 + $0x90] sm:$0xff]   ;;  %v9983_v5 = vld [vmem:[#allocation38 + $0x58] sm:$0xff]  }
0x2f21   : > { %v9984_v44 = vld [vmem:[#allocation38 + $0x18] sm:$0xff]   ;;  %v9987_v48 = vld [vmem:[#allocation38 + $0x20] sm:$0xff]  }
0x2f22   : > { %v6471_v54 = vadd.f32 %v6465_v47, %v6447_v39  ;;  %v9985_v47 = vld [vmem:[#allocation38 + $0xa0] sm:$0xff]  }
0x2f25   : > { %v6321_v4 = vpop.f32.mrb[196].mxu1 }
0x2f26   : > { %v6486_v41 = vmul.f32 %v6483_v52, %v6321_v4  ;;  %v9241_v9 = vpop.f32.mrb[197].mxu1  ;;  %v9990_v4 = vld [vmem:[#allocation38 + $0x28] sm:$0xff]  }
0x2f27   : > { %v6324_v57 = vpop.f32.mrb[198].mxu1  ;;  %v9992_v9 = vld [vmem:[#allocation38 + $0x70] sm:$0xff]  }
0x2f28   : > { %v6492_v7 = vadd.f32 %v6486_v41, %v6468_v31  ;;  %v6489_v59 = vmul.f32 %v6483_v52, %v6324_v57  ;;  %v9242_v26 = vpop.f32.mrb[199].mxu1  ;;  %v9986_v31 = vld [vmem:[#allocation38 + $0x60] sm:$0xff]   ;;  %v9988_v52 = vld [vmem:[#allocation38 + $0xa8] sm:$0xff]   ;;  %v9991_v41 = vld [vmem:[#allocation38 + $0xb0] sm:$0xff]  }
0x2f29   : > { %v9993_v57 = vld [vmem:[#allocation38 + $0x30] sm:$0xff]   ;;  %v9996_v26 = vld [vmem:[#allocation38 + $0x38] sm:$0xff]  }
0x2f2a   : > { %v6495_v22 = vadd.f32 %v6489_v59, %v6471_v54  ;;  %v9989_v54 = vld [vmem:[#allocation38 + $0x68] sm:$0xff]   ;;  %v9995_v59 = vld [vmem:[#allocation38 + $0x78] sm:$0xff]  }
0x2f2d   : > { %v6329_v46 = vpop.f32.mrb[200].mxu1 }
0x2f2e   : > { %v6510_v58 = vmul.f32 %v6507_v63, %v6329_v46  ;;  %v9245_v50 = vpop.f32.mrb[201].mxu1 }
0x2f2f   : > { %v6332_v12 = vpop.f32.mrb[202].mxu1 }
0x2f30   : > { %v6516_v60 = vadd.f32 %v6510_v58, %v6492_v7  ;;  %v6513_v62 = vmul.f32 %v6507_v63, %v6332_v12  ;;  %v9246_v32 = vpop.f32.mrb[203].mxu1  ;;  %v9994_v7 = vld [vmem:[#allocation38 + $0xb8] sm:$0xff]  }
0x2f32   : > { %v6519_v13 = vadd.f32 %v6513_v62, %v6495_v22  ;;  %v6667_v22 = vld [vmem:[#allocation37] sm:$0x7] }
0x2f33   : > { %v6680_v63 = vrot.slane %v6667_v22, %v11831_v28  ;;  %v6672_v46 = vrot.slane %v6667_v22, %v11843_v42  ;;  %v6676_v58 = vrot.slane %v6667_v22, %v11846_v43 }
0x2f35   : > { %v6337_v23 = vpop.f32.mrb[204].mxu1 }
0x2f36   : > { %v6534_v18 = vmul.f32 %v6531_v14, %v6337_v23  ;;  %v9249_v11 = vpop.f32.mrb[205].mxu1 }
0x2f37   : > { %v6340_v20 = vpop.f32.mrb[206].mxu1 }
0x2f38   : > { %v6540_v2 = vadd.f32 %v6534_v18, %v6516_v60  ;;  %v6537_v3 = vmul.f32 %v6531_v14, %v6340_v20  ;;  %v9250_v6 = vpop.f32.mrb[207].mxu1 }
0x2f3a   : > { %v6543_v55 = vadd.f32 %v6537_v3, %v6519_v13 }
0x2f3d   : > { %v6345_v27 = vpop.f32.mrb[208].mxu1 }
0x2f3e   : > { %v6558_v21 = vmul.f32 %v8330_v1, %v6345_v27  ;;  %v9253_v17 = vpop.f32.mrb[209].mxu1 }
0x2f3f   : > { %v6348_v34 = vpop.f32.mrb[210].mxu1 }
0x2f40   : > { %v6564_v53 = vadd.f32 %v6558_v21, %v6540_v2  ;;  %v6561_v49 = vmul.f32 %v8330_v1, %v6348_v34  ;;  %v9254_v51 = vpop.f32.mrb[211].mxu1 }
0x2f42   : > { %v6567_v24 = vadd.f32 %v6561_v49, %v6543_v55 }
0x2f44   : > { %v6666_v45 = vpack.c.bf16 %v6567_v24, %v6564_v53 }
0x2f45   : > { %v8655_v36 = vpop.f32.mrb[212].mxu1 }
0x2f46   : > { %7144 = vmatmul.mubr.bf16.vlgmr.msra.gmra.mrb[132].mxu0 %v6666_v45  ;;  %9272 = vmatmul.mubr.bf16.vlgmr.msra.gmra.mrb[216].mxu1 %v6666_v45  ;;  %v8656_v30 = vpop.f32.mrb[213].mxu1 }
0x2f47   : > { %v8657_v37 = vadd.f32 %v8656_v30, %v8655_v36  ;;  %v8658_v10 = vpop.f32.mrb[214].mxu1  ;;  %9276 = vmatpush3.bf16.msra.mxu1 %v9973_v8  ;;  %8671 = vmatpush3.bf16.msra.mxu0 %v9975_v29  ;;  %v8403_v29 = vld [vmem:[#allocation40] ss:$0 sm:$0xff] }
0x2f48   : > { %v8659_v16 = vpop.f32.mrb[215].mxu1  ;;  %9277 = vmatprep.subr.bf16.mxu1 %v11037_v0  ;;  %8672 = vmatprep.subr.bf16.mxu0 %v9977_v25 }
0x2f49   : > { %v8660_v39 = vadd.f32 %v8659_v16, %v8658_v10  ;;  %9291 = vmatprep.mubr.msk.bf16.mxu1 %vm11038_vm0, %v11037_v0  ;;  %v7189_v50 = vadd.f32 %v8657_v37, %v6680_v63 }
0x2f4b   : > { %9278 = vmatpush3.bf16.msra.mxu1 %v9976_v61  ;;  %8673 = vmatpush3.bf16.msra.mxu0 %v9978_v40  ;;  %v7192_v14 = vadd.f32 %v8660_v39, %v6680_v63 }
0x2f4c   : > { %9279 = vmatprep.subr.bf16.mxu1 %v11037_v0  ;;  %8674 = vmatprep.subr.bf16.mxu0 %v9980_v19 }
0x2f4f   : > { %9280 = vmatpush3.bf16.msra.mxu1 %v9979_v15  ;;  %8675 = vmatpush3.bf16.msra.mxu0 %v9981_v33 }
0x2f50   : > { %9281 = vmatprep.subr.bf16.mxu1 %v11037_v0  ;;  %8676 = vmatprep.subr.bf16.mxu0 %v9983_v5 }
0x2f53   : > { %9282 = vmatpush3.bf16.msra.mxu1 %v9982_v35  ;;  %8677 = vmatpush3.bf16.msra.mxu0 %v9984_v44 }
0x2f54   : > { %9283 = vmatprep.subr.bf16.mxu1 %v11037_v0  ;;  %8678 = vmatprep.subr.bf16.mxu0 %v9986_v31 }
0x2f57   : > { %9284 = vmatpush3.bf16.msra.mxu1 %v9985_v47  ;;  %8679 = vmatpush3.bf16.msra.mxu0 %v9987_v48 }
0x2f58   : > { %9285 = vmatprep.subr.bf16.mxu1 %v11037_v0  ;;  %8680 = vmatprep.subr.bf16.mxu0 %v9989_v54 }
0x2f5b   : > { %9286 = vmatpush3.bf16.msra.mxu1 %v9988_v52  ;;  %8681 = vmatpush3.bf16.msra.mxu0 %v9990_v4 }
0x2f5c   : > { %9287 = vmatprep.subr.bf16.mxu1 %v11037_v0  ;;  %8682 = vmatprep.subr.bf16.mxu0 %v9992_v9 }
0x2f5f   : > { %9288 = vmatpush3.bf16.msra.mxu1 %v9991_v41  ;;  %8683 = vmatpush3.bf16.msra.mxu0 %v9993_v57 }
0x2f60   : > { %9289 = vmatprep.subr.bf16.mxu1 %v11037_v0  ;;  %8684 = vmatprep.subr.bf16.mxu0 %v9995_v59 }
0x2f63   : > { %9290 = vmatpush3.bf16.msra.mxu1 %v9994_v7  ;;  %8685 = vmatpush3.bf16.msra.mxu0 %v9996_v26 }
0x3019   : > { %v7145_v12 = vpop.f32.mrb[132].mxu0  ;;  %v7229_v60 = vpop.f32.mrb[216].mxu1 }
0x301a   : > { %v9295_v62 = vadd.f32 %v7145_v12, %v6672_v46  ;;  %v7230_v32 = vadd.f32 %v7229_v60, %v7189_v50  ;;  %v7147_v0 = vpop.f32.mrb[133].mxu0  ;;  %v9273_v13 = vpop.f32.mrb[217].mxu1 }
0x301b   : > { %v9296_v23 = vadd.f32 %v7147_v0, %v6676_v58  ;;  %v7149_v18 = vpop.f32.mrb[134].mxu0  ;;  %v7232_v11 = vpop.f32.mrb[218].mxu1 }
0x301c   : > { %v9297_v20 = vadd.f32 %v7149_v18, %v6672_v46  ;;  %v7233_v2 = vadd.f32 %v7232_v11, %v7192_v14  ;;  %v7151_v3 = vpop.f32.mrb[135].mxu0  ;;  %v9274_v6 = vpop.f32.mrb[219].mxu1  ;;  %v7236_v55 = vmax.f32 %v9295_v62, 0.0  ;;  %v7238_v42 = vmax.f32 %v7230_v32, 0.0 }
0x301d   : > { %v9298_v28 = vadd.f32 %v7151_v3, %v6676_v58  ;;  %v7237_v27 = vmax.f32 %v9296_v23, 0.0 }
0x301e   : > { %v7239_v1 = vmax.f32 %v9297_v20, 0.0  ;;  %v7241_v43 = vmax.f32 %v7233_v2, 0.0 }
0x301f   : > { %v7240_v21 = vmax.f32 %v9298_v28, 0.0 }
0x3020   : > { %v7290_v17 = vpack.c.bf16 %v7239_v1, %v7236_v55  ;;  %v7292_v34 = vpack.c.bf16 %v7241_v43, %v7238_v42 }
0x3021   : > { %v7291_v53 = vpack.c.bf16 %v7240_v21, %v7237_v27 }
0x3022   : > { %9292 = vmatmul.mubr.bf16.vlgmr.msra.gmra.mrb[220].mxu1 %v7292_v34 }
0x3023   : > { %7476 = vmatprep.mubr.bf16.mxu0 %v7291_v53 }
0x3024   : > { %7477 = vmatmul.mubr.bf16.vlgmr.msra.gmra.mrb[136].mxu0 %v7290_v17 }
0x30f5   : > { %v7519_v49 = vpop.f32.mrb[220].mxu1 }
0x30f6   : > { %v9293_v51 = vpop.f32.mrb[221].mxu1 }
0x30f7   : > { %v8686_v24 = vpop.f32.mrb[136].mxu0  ;;  %v7522_v8 = vpop.f32.mrb[222].mxu1 }
0x30f8   : > { %v8687_v45 = vpop.f32.mrb[137].mxu0  ;;  %v9294_v25 = vpop.f32.mrb[223].mxu1 }
0x30f9   : > { %v8688_v36 = vadd.f32 %v8687_v45, %v8686_v24  ;;  %v8689_v30 = vpop.f32.mrb[138].mxu0 }
0x30fa   : > { %v8690_v37 = vpop.f32.mrb[139].mxu0 }
0x30fb   : > { %v7479_v10 = vadd.f32 %v8688_v36, %v8403_v29  ;;  %v8691_v61 = vadd.f32 %v8690_v37, %v8689_v30 }
0x30fd   : > { %v7520_v40 = vadd.f32 %v7519_v49, %v7479_v10  ;;  %v7482_v16 = vadd.f32 %v8691_v61, %v8403_v29 }
0x30ff   : > { %v7526_v19 = vmul.f32 0.2, %v7520_v40  ;;  %v7523_v39 = vadd.f32 %v7522_v8, %v7482_v16 }
0x3101   : > { %v7528_v15 = vadd.f32 %v7526_v19, %v12609_v56  ;;  %v7527_v33 = vmul.f32 0.2, %v7523_v39 }
0x3103   : > { %7530 = vst [vmem:[%s1315_s8] sm:$0xff] %v7528_v15  ;;  %v7529_v5 = vadd.f32 %v7527_v33, %v12611_v38 }
0x3105   : > { %7531 = vst [vmem:[%s1315_s8 + $0x8] sm:$0xff] %v7529_v5 }
0x3106   : > { %10866 = shalt.err (!%p10863_p10)
}
0x3107   : > { %s10867_s8 = scalar_lea.hbm %s12690_s15, 256  ;;  %s10871_s2 = scalar_lea.hbm %s12872_s3, 512 }
0x3108   : > { %p10868_p3 = scmp.ne.s32.totalorder %s12690_s15, %s10867_s8  ;;  %p10872_p5 = scmp.lt.u32.totalorder %s12690_s15, %s12872_s3 }
0x3109   : > { %p10873_p7 = scmp.lt.u32.totalorder %s10871_s2, %s10867_s8  ;;  %p10875_p9 = scmp.lt.u32.totalorder %s10867_s8, %s12690_s15 }
0x310a   : > { %p10869_p11 = pnand %p10868_p3, %p12873_p0 }
0x310b   : > { %p10874_p1 = por %p10873_p7, %p10872_p5 }
0x310c   : > { %p10870_p12 = pneg %p10869_p11 }
0x310d   : > { %p10876_p6 = por %p10875_p9, %p10874_p1 }
0x310f   : > { %p10877_p13 = pnand %p10876_p6, %p10870_p12 }
0x3111   : > { %10880 = shalt.err (!%p10877_p13)
}
0x3112   : > { %s11045_s9 = smov 128   ;;  %s11046_s30 = smov 8  }
0x3113   : > { %9401 = dma.vmem_to_hbm [thread:$0]  (%p12873_p0), %s12692_s13, 256, %s12690_s15, %s7533_s7, %s11045_s9, %s11045_s9, %s11046_s30  }
0x3114 PF: > { %s7569_s1 = sand.u32 1, %s10955_s22   ;;  %p12874_p2 = scmp.ne.s32.totalorder %s12834_s5, 0 }
0x3115   : > { %p12875_p8 = scmp.ge.s32.totalorder %s10967_s26, 2  ;;  %s7570_s8 = scalar_lea.sflag [#allocation4], %s7569_s1 }
0x3117   : > { %p9481_p4 = pnand %p12875_p8, %p12874_p2 }
0x3119   : > { %10950 = dma.done.wait (!%p9481_p4), %s7570_s8, 256  }
0x311a   : > { %10952 = vsyncadd (!%p9481_p4), %s7570_s8, 4294967040  ;;  %p89_p10 = scmp.ge.s32.totalorder %s11620_s6, 4   ;;  %s12876_s22 = smov %s10959_s0 }
0x311b   : > { %s12877_s0 = smov %s10963_s23  ;;  %s12878_s23 = smov %s11631_s16 }
0x311c   : > { %s12879_s26 = smov %s11620_s6  ;;  %91 = sbr.rel (!%p89_p10) target bundleno = 82 (0x52), region = 356 }
0x3123   :  { %7583 = vsyncpa [#allocation3], 1 }
0x3124   :  { %7585 = vsyncpa [#allocation3 + $0x1], 1 }
0x3125   :  { %7586 = vsyncpa [#allocation6], 1 }
0x3126   :  { %7587 = vsyncpa [#allocation9], 1 }
0x3127   :  { %7588 = vsyncpa [#allocation12], 1 }
0x3128   :  { %7589 = vsyncpa [#allocation15], 1 }
0x3129   :  { %7590 = vsyncpa [#allocation18], 1 }
0x312a   :  { %7591 = vsyncpa [#allocation21], 1 }
0x312b   :  { %7592 = vsyncpa [#allocation24], 1 }
0x312c   :  { %7593 = vsyncpa [#allocation27], 1 }
0x312d   :  { %7594 = vsyncpa [#allocation30], 1 }
0x312e   :  { %7595 = vsyncpa [#allocation33], 1 }
0x312f   :  { %7596 = vsyncpa [#allocation36], 1 }
0x3130   :  { %7597 = vsyncpa [#allocation39], 1 }
0x3131   :  { %7598 = vsyncpa [#allocation4], 1 }
0x3132   :  { %7600 = vsyncpa [#allocation4 + $0x1], 1 }

</bundles_post_ra>
